<compile_context>
chip_gen: v7x
topology: tpu7x:2x2x1
jax: 0.10.0
libtpu: 0.0.40
codegen_flags: <defaults>
</compile_context>

<pallas_src>
import functools
import numpy as np
import jax
import jax.numpy as jnp
from jax.experimental import pallas as pl
from jax.experimental.pallas import tpu as pltpu

# ---------------- model / algorithm sizes (the "args" dict of the module) -------------
PHYS = 2        # physical dimension (spin-1/2)
D = 2           # iPEPS bond dimension          (args["D"])
D2 = D * D      # double-layer bond dimension
CHI = 8         # CTM environment dimension     (args["chi"])
NITER = 5       # CTM iterations                (args["Niter"])
KDIM = CHI * D2          # enlarged-corner dimension (32)
PQM = PHYS * PHYS * D2   # (p, q, m) composite index (16)
LANES = PQM * CHI        # lane width of the half-ring environments (128)


def _vmem():
    return pl.BlockSpec(memory_space=pltpu.MemorySpace.VMEM)


def _smem():
    return pl.BlockSpec(memory_space=pltpu.MemorySpace.SMEM)


# =============================== Pallas kernels =======================================
def _prep_kernel(a_ref, af_ref, aa_ref):
    """A / ||A|| and the physical-index contraction aa = Af^T Af, fused in one launch."""
    a = a_ref[...]
    af = a * jax.lax.rsqrt(jnp.sum(a * a))
    af_ref[...] = af
    aa_ref[...] = jnp.dot(af.T, af, preferred_element_type=jnp.float32)


def prep(A2):
    return pl.pallas_call(
        _prep_kernel,
        out_shape=(jax.ShapeDtypeStruct((PHYS, D ** 4), jnp.float32),
                   jax.ShapeDtypeStruct((D ** 4, D ** 4), jnp.float32)),
        in_specs=[_vmem()],
        out_specs=(_vmem(), _vmem()),
    )(A2.astype(jnp.float32))


def _build_m_kernel(c_ref, tt_ref, ak1_ref, e1_ref, m_ref):
    """Enlarged corner  M[(i g),(j h)] = sum_{a,b,c,e} C[a,b] T[a,c,i] T[b,e,j] a[c,e,g,h].

    For each (c,e):  K_ce = Tt[c]^T C Tt[e]  (all 8x8 MXU matmuls), and the contribution
    to M is kron(K_ce, J4) * kron(J8, a[c,e]).  kron(K, J4) = E1 K E1^T with the constant
    E1[(i g), i'] = delta_{i i'}; kron(J8, a[c,e]) (= ak1_ref) is precomputed on the host
    because `a` is loop-invariant.  Symmetrization 0.5*(M + M^T) happens in-kernel.
    """
    C = c_ref[...]
    E1 = e1_ref[...]
    G = [jnp.dot(C, tt_ref[e], preferred_element_type=jnp.float32) for e in range(D2)]
    Macc = jnp.zeros((KDIM, KDIM), jnp.float32)
    for c in range(D2):
        TcT = tt_ref[c].T
        for e in range(D2):
            K = jnp.dot(TcT, G[e], preferred_element_type=jnp.float32)           # (chi, chi)
            Kx = jnp.dot(jnp.dot(E1, K, preferred_element_type=jnp.float32), E1.T,
                         preferred_element_type=jnp.float32)                     # (32, 32)
            Macc = Macc + Kx * ak1_ref[c * D2 + e]
    m_ref[...] = 0.5 * (Macc + Macc.T)


def build_m(C, Tt, Akron1, E1):
    return pl.pallas_call(
        _build_m_kernel,
        out_shape=jax.ShapeDtypeStruct((KDIM, KDIM), jnp.float32),
        in_specs=[_vmem(), _vmem(), _vmem(), _vmem()],
        out_specs=_vmem(),
    )(C, Tt, Akron1, E1)


def _renorm_kernel(m_ref, u_ref, ugt_ref, pall_ref, tt_ref, ak2_ref,
                   cn_ref, ttn_ref, tmn_ref):
    """Post-eigh renormalization, fused:  C' = U^T M U and
    T'[a,x,b] = sum U[(i g),a] T[i,c,j] a[c,g,x,h] U[(j h),b],
    both symmetrized and max-|.|-normalized in-kernel.
    ak2_ref[(c g)] = kron(a[c,g,:,:]^T, I_chi) is host-precomputed (loop-invariant),
    so every contraction is a 2-D matmul.  Outputs T' in both layouts used downstream:
    Tt' = (d2, chi, chi) and Tm' = (chi, d2*chi)  -- no relayout glue between iterations.
    """
    U = u_ref[...]
    M = m_ref[...]
    Pall = pall_ref[...]

    # renormalized corner
    Cn = jnp.dot(jnp.dot(U.T, M, preferred_element_type=jnp.float32), U,
                 preferred_element_type=jnp.float32)
    Cn = 0.5 * (Cn + Cn.T)
    cn_ref[...] = Cn / jnp.maximum(jnp.max(jnp.abs(Cn)), 1e-30)

    # renormalized edge, accumulated in the lane-dense layout (alpha, (x beta))
    Tm = jnp.zeros((CHI, D2 * CHI), jnp.float32)
    for c in range(D2):
        Tc = tt_ref[c]
        for g in range(D2):
            Q = jnp.dot(ugt_ref[g].T, Tc, preferred_element_type=jnp.float32)    # (chi, chi)
            R = jnp.dot(Q, Pall, preferred_element_type=jnp.float32)             # (chi, d2*chi)
            Tm = Tm + jnp.dot(R, ak2_ref[c * D2 + g], preferred_element_type=jnp.float32)

    # symmetrize each x-slice in its two chi legs, then normalize by the global max |.|
    slices = []
    mx = jnp.float32(1e-30)
    for x in range(D2):
        s = Tm[:, x * CHI:(x + 1) * CHI]
        s = 0.5 * (s + s.T)
        slices.append(s)
        mx = jnp.maximum(mx, jnp.max(jnp.abs(s)))
    inv = 1.0 / mx
    for x in range(D2):
        s = slices[x] * inv
        ttn_ref[x] = s
        tmn_ref[:, x * CHI:(x + 1) * CHI] = s


def renorm(M, U, Ugt, Pall, Tt, Akron2):
    return pl.pallas_call(
        _renorm_kernel,
        out_shape=(jax.ShapeDtypeStruct((CHI, CHI), jnp.float32),
                   jax.ShapeDtypeStruct((D2, CHI, CHI), jnp.float32),
                   jax.ShapeDtypeStruct((CHI, D2 * CHI), jnp.float32)),
        in_specs=[_vmem()] * 6,
        out_specs=(_vmem(), _vmem(), _vmem()),
    )(M, U, Ugt, Pall, Tt, Akron2)


def _energy_kernel(c_ref, tt_ref, tm_ref, bkl_ref, bkr_ref, h_ref, o_ref):
    """Whole nearest-neighbour ring in one launch (half-ring contraction ordering).

    W_{u,l,dn} = Tt[u] C Tt[l] C Tt[dn]  is the (chi, chi) left-half chain; the open
    physical / bond legs of the double-layer b tensors are contracted in via the
    host-precomputed kron(b-slice, I_chi) matrices, producing the two half-ring
    environments HL/HR as single lane-dense (chi, 128) tiles.  rho, Tr(rho H) and
    Tr(rho) are reduced in the epilogue (H read as SMEM scalars)."""
    C = c_ref[...]
    CTcat = jnp.dot(C, tm_ref[...], preferred_element_type=jnp.float32)          # (chi, d2*chi)
    CT = [jnp.dot(C, tt_ref[l], preferred_element_type=jnp.float32) for l in range(D2)]

    hl = jnp.zeros((CHI, LANES), jnp.float32)
    hr = jnp.zeros((CHI, LANES), jnp.float32)
    for u in range(D2):
        Tu = tt_ref[u]
        for l in range(D2):
            Dul = jnp.dot(Tu, CT[l], preferred_element_type=jnp.float32)         # (chi, chi)
            WD = jnp.dot(Dul, CTcat, preferred_element_type=jnp.float32)         # (chi, d2*chi)
            hl = hl + jnp.dot(WD, bkl_ref[u * D2 + l], preferred_element_type=jnp.float32)
            hr = hr + jnp.dot(WD, bkr_ref[u * D2 + l], preferred_element_type=jnp.float32)

    # rho[p1,q1,p2,q2] = sum_{gamma,theta,m} HL[gamma,theta,p1,q1,m] HR[gamma,theta,p2,q2,m]
    blk = D2 * CHI
    num = jnp.float32(0.0)
    den = jnp.float32(0.0)
    for p1 in range(PHYS):
        for q1 in range(PHYS):
            hlb = hl[:, (p1 * PHYS + q1) * blk:(p1 * PHYS + q1 + 1) * blk]
            for p2 in range(PHYS):
                for q2 in range(PHYS):
                    hrb = hr[:, (p2 * PHYS + q2) * blk:(p2 * PHYS + q2 + 1) * blk]
                    rv = jnp.sum(hlb * hrb)
                    num = num + rv * h_ref[p1 * PHYS + p2, q1 * PHYS + q2]
                    if p1 == q1 and p2 == q2:
                        den = den + rv
    o_ref[...] = (num / den) * jnp.ones((1, 1), jnp.float32)


def energy(C, Tt, Tm, BkronL, BkronR, H):
    out = pl.pallas_call(
        _energy_kernel,
        out_shape=jax.ShapeDtypeStruct((1, 1), jnp.float32),
        in_specs=[_vmem(), _vmem(), _vmem(), _vmem(), _vmem(), _smem()],
        out_specs=_vmem(),
    )(C, Tt, Tm, BkronL, BkronR, H)
    return out[0, 0]


# =============================== iPEPS forward =========================================
@functools.partial(jax.jit, static_argnames=("niter",))
def ipeps_forward(params, map_idx, H, C0, T0, niter=NITER):
    # 1. map unique parameters back onto the symmetric rank-5 tensor, normalize, build aa
    A = params[map_idx]                                    # (2, D, D, D, D)
    Af, aa = prep(A.reshape(PHYS, D ** 4))
    # TODO(synk): torch.isnan(params).any() -> raise has no in-graph equivalent; skipped.

    # ---- loop-invariant double-layer tensors & Kronecker relayouts (built ONCE) ----
    a4 = aa.reshape(D, D, D, D, D, D, D, D).transpose(0, 4, 1, 5, 2, 6, 3, 7) \
           .reshape(D2, D2, D2, D2)                        # (Up, Left, Down, Right)
    A5 = Af.reshape(PHYS, D, D, D, D)
    b6 = (A5[:, None, :, None, :, None, :, None, :, None] *
          A5[None, :, None, :, None, :, None, :, None, :]).reshape(
              PHYS, PHYS, D2, D2, D2, D2)                  # (p, q, Up, Left, Down, Right)

    I8 = jnp.eye(CHI, dtype=jnp.float32)
    E1 = jnp.repeat(I8, D2, axis=0)                        # (32, 8): kron(K, J4) helper
    # build-M:  kron(J8, a[c,e])
    Akron1 = (jnp.ones((1, 1, CHI, 1, CHI, 1), jnp.float32) *
              a4[:, :, None, :, None, :]).reshape(D2 * D2, KDIM, KDIM)
    # renorm :  kron(a[c,g,:,:]^T, I8)
    Akron2 = (a4.transpose(0, 1, 3, 2)[:, :, :, None, :, None] *
              I8[None, None, None, :, None, :]).reshape(D2 * D2, KDIM, KDIM)
    # energy :  kron(b-slice, I8) for the left (right leg open) and right (left leg open) site
    BL = b6.transpose(2, 3, 4, 0, 1, 5).reshape(D2, D2, D2, PQM)   # [U, L, Dn, (p q m=R)]
    BR = b6.transpose(2, 5, 4, 0, 1, 3).reshape(D2, D2, D2, PQM)   # [U, R, Dn, (p q m=L)]
    BkronL = (BL[:, :, :, None, :, None] *
              I8[None, None, None, :, None, :]).reshape(D2 * D2, KDIM, LANES)
    BkronR = (BR[:, :, :, None, :, None] *
              I8[None, None, None, :, None, :]).reshape(D2 * D2, KDIM, LANES)

    # ---- CTM environment kept in the two layouts the fused kernels consume ----
    C = C0.astype(jnp.float32)
    Tt = T0.transpose(1, 0, 2).astype(jnp.float32)         # (d2, chi, chi)
    Tm = T0.reshape(CHI, D2 * CHI).astype(jnp.float32)     # (chi, d2*chi)

    # 2. CTM algorithm (alg.exe(N)) -- 2 pallas launches + 1 eigh per iteration
    for _ in range(niter):
        M = build_m(C, Tt, Akron1, E1)
        # TODO(synk): truncated eigendecomposition (CTM projector) has no Pallas
        # equivalent -- jnp.linalg.eigh + top-chi selection done in plain JAX.
        w, v = jnp.linalg.eigh(M)
        idx = jnp.argsort(-jnp.abs(w))[:CHI]
        U = v[:, idx]                                      # (chi*d2, chi), rows = (chi, d2)
        Ugt = U.reshape(CHI, D2, CHI).transpose(1, 0, 2)   # [g, i, alpha]
        Pall = U.reshape(CHI, D2 * CHI)                    # [j, (h beta)]
        C, Tt, Tm = renorm(M, U, Ugt, Pall, Tt, Akron2)

    # 3. nearest-neighbour energy expectation value (Heisenberg: no J2 term)
    loss = energy(C, Tt, Tm, BkronL, BkronR, H)
    return loss, C, Tm.reshape(CHI, D2, CHI)


# ================================= setup ("__init__") =================================
def a_random_symmetric(key, d):
    """Random rank-5 tensor, symmetrized over the D4 group acting on the virtual legs."""
    A = jax.random.normal(key, (PHYS, d, d, d, d), dtype=jnp.float32)
    perms = [(0, 1, 2, 3, 4), (0, 2, 3, 4, 1), (0, 3, 4, 1, 2), (0, 4, 1, 2, 3),
             (0, 4, 3, 2, 1), (0, 3, 2, 1, 4), (0, 2, 1, 4, 3), (0, 1, 4, 3, 2)]
    A = sum(jnp.transpose(A, p) for p in perms) / len(perms)
    return A / jnp.linalg.norm(A)


def heisenberg_hamiltonian():
    sx = np.array([[0.0, 1.0], [1.0, 0.0]])
    sy = np.array([[0.0, -1j], [1j, 0.0]])
    sz = np.array([[1.0, 0.0], [0.0, -1.0]])
    H = 0.25 * (np.kron(sx, sx) + np.kron(sy, sy).real + np.kron(sz, sz))
    return jnp.asarray(H, dtype=jnp.float32)


if __name__ == "__main__":
    key = jax.random.PRNGKey(0)
    kA, kC, kT = jax.random.split(key, 3)

    # _setup_random(): random symmetric A, params = unique values, map = inverse indices
    A0 = a_random_symmetric(kA, D)
    A0_np = np.asarray(A0)
    params_np, inv = np.unique(A0_np, return_inverse=True)   # torch.unique(return_inverse=True)
    map_idx = jnp.asarray(np.reshape(inv, A0_np.shape), dtype=jnp.int32)
    params = jnp.asarray(params_np, dtype=jnp.float32)
    H = heisenberg_hamiltonian()

    # CtmAlg initial environment (forward called with C=None, T=None): random symmetric
    C0 = jax.random.normal(kC, (CHI, CHI), dtype=jnp.float32)
    C0 = 0.5 * (C0 + C0.T)
    C0 = C0 / jnp.max(jnp.abs(C0))
    T0 = jax.random.normal(kT, (CHI, D2, CHI), dtype=jnp.float32)
    T0 = 0.5 * (T0 + T0.transpose(2, 1, 0))
    T0 = T0 / jnp.max(jnp.abs(T0))

    loss, C, T = ipeps_forward(params, map_idx, H, C0, T0, niter=NITER)
    jax.block_until_ready((loss, C, T))

    assert np.isfinite(float(loss)), "non-finite energy"
    assert C.shape == (CHI, CHI) and T.shape == (CHI, D2, CHI)
    print("KERNEL_OK")
</pallas_src>

<mosaic_0001>
module attributes {stable_mosaic.version = 11 : i64} {
  func.func @_prep_kernel(%arg0: memref<2x16xf32, #tpu.memory_space<vmem>>, %arg1: memref<2x16xf32, #tpu.memory_space<vmem>>, %arg2: memref<16x16xf32, #tpu.memory_space<vmem>>) attributes {dimension_semantics = [], scalar_prefetch = 0 : i64, scratch_operands = 0 : i64, tpu.core_type = #tpu.core_type<tc>} {
    %c0 = arith.constant 0 : index
    %c0_0 = arith.constant 0 : index
    %0 = vector.load %arg0[%c0, %c0_0] : memref<2x16xf32, #tpu.memory_space<vmem>>, vector<2x16xf32>
    %1 = arith.mulf %0, %0 : vector<2x16xf32>
    %2 = vector.shape_cast %1 : vector<2x16xf32> to vector<1x2x16xf32>
    %cst = arith.constant dense<0.000000e+00> : vector<1xf32>
    %3 = vector.multi_reduction <add>, %2, %cst [1, 2] : vector<1x2x16xf32> to vector<1xf32>
    %4 = vector.shape_cast %3 : vector<1xf32> to vector<1x1x1xf32>
    %5 = vector.extract %4[0, 0, 0] : f32 from vector<1x1x1xf32>
    %6 = math.rsqrt %5 : f32
    %7 = vector.broadcast %6 : f32 to vector<2x16xf32>
    %8 = arith.mulf %0, %7 : vector<2x16xf32>
    %c0_1 = arith.constant 0 : index
    %c0_2 = arith.constant 0 : index
    %9 = vector.load %arg1[%c0_1, %c0_2] : memref<2x16xf32, #tpu.memory_space<vmem>>, vector<2x16xf32>
    tpu.vector_store %arg1[%c0_1, %c0_2], %8 {strides = array<i32>} : memref<2x16xf32, #tpu.memory_space<vmem>>, vector<2x16xf32>,
    %10 = tpu.transpose %8, [1, 0] : vector<2x16xf32> -> vector<16x2xf32>
    %cst_3 = arith.constant dense<0.000000e+00> : vector<16x16xf32>
    %11 = tpu.matmul %10, %8, %cst_3 {dimension_numbers = #tpu.dot_dimension_numbers<[1], [0], [0], [1], [0, 0, 1, 1], [], []>} : vector<16x2xf32>, vector<2x16xf32>, vector<16x16xf32> -> vector<16x16xf32>
    %c0_4 = arith.constant 0 : index
    %c0_5 = arith.constant 0 : index
    %12 = vector.load %arg2[%c0_4, %c0_5] : memref<16x16xf32, #tpu.memory_space<vmem>>, vector<16x16xf32>
    tpu.vector_store %arg2[%c0_4, %c0_5], %11 {strides = array<i32>} : memref<16x16xf32, #tpu.memory_space<vmem>>, vector<16x16xf32>,
    return
  }
}

module attributes {stable_mosaic.version = 11 : i64} {
  func.func @_build_m_kernel(%arg0: memref<8x8xf32, #tpu.memory_space<vmem>>, %arg1: memref<4x8x8xf32, #tpu.memory_space<vmem>>, %arg2: memref<16x32x32xf32, #tpu.memory_space<vmem>>, %arg3: memref<32x8xf32, #tpu.memory_space<vmem>>, %arg4: memref<32x32xf32, #tpu.memory_space<vmem>>) attributes {dimension_semantics = [], scalar_prefetch = 0 : i64, scratch_operands = 0 : i64, tpu.core_type = #tpu.core_type<tc>} {
    %c0 = arith.constant 0 : index
    %c0_0 = arith.constant 0 : index
    %0 = vector.load %arg0[%c0, %c0_0] : memref<8x8xf32, #tpu.memory_space<vmem>>, vector<8x8xf32>
    %c0_1 = arith.constant 0 : index
    %c0_2 = arith.constant 0 : index
    %1 = vector.load %arg3[%c0_1, %c0_2] : memref<32x8xf32, #tpu.memory_space<vmem>>, vector<32x8xf32>
    %c0_3 = arith.constant 0 : index
    %c0_4 = arith.constant 0 : index
    %c0_5 = arith.constant 0 : index
    %2 = vector.load %arg1[%c0_3, %c0_4, %c0_5] : memref<4x8x8xf32, #tpu.memory_space<vmem>>, vector<1x8x8xf32>
    %3 = vector.shape_cast %2 : vector<1x8x8xf32> to vector<8x8xf32>
    %cst = arith.constant dense<0.000000e+00> : vector<8x8xf32>
    %4 = tpu.matmul %0, %3, %cst {dimension_numbers = #tpu.dot_dimension_numbers<[1], [0], [0], [1], [0, 0, 1, 1], [], []>} : vector<8x8xf32>, vector<8x8xf32>, vector<8x8xf32> -> vector<8x8xf32>
    %c1 = arith.constant 1 : index
    %c0_6 = arith.constant 0 : index
    %c0_7 = arith.constant 0 : index
    %5 = vector.load %arg1[%c1, %c0_6, %c0_7] : memref<4x8x8xf32, #tpu.memory_space<vmem>>, vector<1x8x8xf32>
    %6 = vector.shape_cast %5 : vector<1x8x8xf32> to vector<8x8xf32>
    %cst_8 = arith.constant dense<0.000000e+00> : vector<8x8xf32>
    %7 = tpu.matmul %0, %6, %cst_8 {dimension_numbers = #tpu.dot_dimension_numbers<[1], [0], [0], [1], [0, 0, 1, 1], [], []>} : vector<8x8xf32>, vector<8x8xf32>, vector<8x8xf32> -> vector<8x8xf32>
    %c2 = arith.constant 2 : index
    %c0_9 = arith.constant 0 : index
    %c0_10 = arith.constant 0 : index
    %8 = vector.load %arg1[%c2, %c0_9, %c0_10] : memref<4x8x8xf32, #tpu.memory_space<vmem>>, vector<1x8x8xf32>
    %9 = vector.shape_cast %8 : vector<1x8x8xf32> to vector<8x8xf32>
    %cst_11 = arith.constant dense<0.000000e+00> : vector<8x8xf32>
    %10 = tpu.matmul %0, %9, %cst_11 {dimension_numbers = #tpu.dot_dimension_numbers<[1], [0], [0], [1], [0, 0, 1, 1], [], []>} : vector<8x8xf32>, vector<8x8xf32>, vector<8x8xf32> -> vector<8x8xf32>
    %c3 = arith.constant 3 : index
    %c0_12 = arith.constant 0 : index
    %c0_13 = arith.constant 0 : index
    %11 = vector.load %arg1[%c3, %c0_12, %c0_13] : memref<4x8x8xf32, #tpu.memory_space<vmem>>, vector<1x8x8xf32>
    %12 = vector.shape_cast %11 : vector<1x8x8xf32> to vector<8x8xf32>
    %cst_14 = arith.constant dense<0.000000e+00> : vector<8x8xf32>
    %13 = tpu.matmul %0, %12, %cst_14 {dimension_numbers = #tpu.dot_dimension_numbers<[1], [0], [0], [1], [0, 0, 1, 1], [], []>} : vector<8x8xf32>, vector<8x8xf32>, vector<8x8xf32> -> vector<8x8xf32>
    %cst_15 = arith.constant 0.000000e+00 : f32
    %14 = vector.broadcast %cst_15 : f32 to vector<32x32xf32>
    %c0_16 = arith.constant 0 : index
    %c0_17 = arith.constant 0 : index
    %c0_18 = arith.constant 0 : index
    %15 = vector.load %arg1[%c0_16, %c0_17, %c0_18] : memref<4x8x8xf32, #tpu.memory_space<vmem>>, vector<1x8x8xf32>
    %16 = vector.shape_cast %15 : vector<1x8x8xf32> to vector<8x8xf32>
    %17 = tpu.transpose %16, [1, 0] : vector<8x8xf32> -> vector<8x8xf32>
    %cst_19 = arith.constant dense<0.000000e+00> : vector<8x8xf32>
    %18 = tpu.matmul %17, %4, %cst_19 {dimension_numbers = #tpu.dot_dimension_numbers<[1], [0], [0], [1], [0, 0, 1, 1], [], []>} : vector<8x8xf32>, vector<8x8xf32>, vector<8x8xf32> -> vector<8x8xf32>
    %cst_20 = arith.constant dense<0.000000e+00> : vector<32x8xf32>
    %19 = tpu.matmul %1, %18, %cst_20 {dimension_numbers = #tpu.dot_dimension_numbers<[1], [0], [0], [1], [0, 0, 1, 1], [], []>} : vector<32x8xf32>, vector<8x8xf32>, vector<32x8xf32> -> vector<32x8xf32>
    %20 = tpu.transpose %1, [1, 0] : vector<32x8xf32> -> vector<8x32xf32>
    %cst_21 = arith.constant dense<0.000000e+00> : vector<32x32xf32>
    %21 = tpu.matmul %19, %20, %cst_21 {dimension_numbers = #tpu.dot_dimension_numbers<[1], [0], [0], [1], [0, 0, 1, 1], [], []>} : vector<32x8xf32>, vector<8x32xf32>, vector<32x32xf32> -> vector<32x32xf32>
    %c0_22 = arith.constant 0 : index
    %c0_23 = arith.constant 0 : index
    %c0_24 = arith.constant 0 : index
    %22 = vector.load %arg2[%c0_22, %c0_23, %c0_24] : memref<16x32x32xf32, #tpu.memory_space<vmem>>, vector<1x32x32xf32>
    %23 = vector.shape_cast %22 : vector<1x32x32xf32> to vector<32x32xf32>
    %24 = arith.mulf %21, %23 : vector<32x32xf32>
    %25 = arith.addf %14, %24 : vector<32x32xf32>
    %cst_25 = arith.constant dense<0.000000e+00> : vector<8x8xf32>
    %26 = tpu.matmul %17, %7, %cst_25 {dimension_numbers = #tpu.dot_dimension_numbers<[1], [0], [0], [1], [0, 0, 1, 1], [], []>} : vector<8x8xf32>, vector<8x8xf32>, vector<8x8xf32> -> vector<8x8xf32>
    %cst_26 = arith.constant dense<0.000000e+00> : vector<32x8xf32>
    %27 = tpu.matmul %1, %26, %cst_26 {dimension_numbers = #tpu.dot_dimension_numbers<[1], [0], [0], [1], [0, 0, 1, 1], [], []>} : vector<32x8xf32>, vector<8x8xf32>, vector<32x8xf32> -> vector<32x8xf32>
    %28 = tpu.transpose %1, [1, 0] : vector<32x8xf32> -> vector<8x32xf32>
    %cst_27 = arith.constant dense<0.000000e+00> : vector<32x32xf32>
    %29 = tpu.matmul %27, %28, %cst_27 {dimension_numbers = #tpu.dot_dimension_numbers<[1], [0], [0], [1], [0, 0, 1, 1], [], []>} : vector<32x8xf32>, vector<8x32xf32>, vector<32x32xf32> -> vector<32x32xf32>
    %c1_28 = arith.constant 1 : index
    %c0_29 = arith.constant 0 : index
    %c0_30 = arith.constant 0 : index
    %30 = vector.load %arg2[%c1_28, %c0_29, %c0_30] : memref<16x32x32xf32, #tpu.memory_space<vmem>>, vector<1x32x32xf32>
    %31 = vector.shape_cast %30 : vector<1x32x32xf32> to vector<32x32xf32>
    %32 = arith.mulf %29, %31 : vector<32x32xf32>
    %33 = arith.addf %25, %32 : vector<32x32xf32>
    %cst_31 = arith.constant dense<0.000000e+00> : vector<8x8xf32>
    %34 = tpu.matmul %17, %10, %cst_31 {dimension_numbers = #tpu.dot_dimension_numbers<[1], [0], [0], [1], [0, 0, 1, 1], [], []>} : vector<8x8xf32>, vector<8x8xf32>, vector<8x8xf32> -> vector<8x8xf32>
    %cst_32 = arith.constant dense<0.000000e+00> : vector<32x8xf32>
    %35 = tpu.matmul %1, %34, %cst_32 {dimension_numbers = #tpu.dot_dimension_numbers<[1], [0], [0], [1], [0, 0, 1, 1], [], []>} : vector<32x8xf32>, vector<8x8xf32>, vector<32x8xf32> -> vector<32x8xf32>
    %36 = tpu.transpose %1, [1, 0] : vector<32x8xf32> -> vector<8x32xf32>
    %cst_33 = arith.constant dense<0.000000e+00> : vector<32x32xf32>
    %37 = tpu.matmul %35, %36, %cst_33 {dimension_numbers = #tpu.dot_dimension_numbers<[1], [0], [0], [1], [0, 0, 1, 1], [], []>} : vector<32x8xf32>, vector<8x32xf32>, vector<32x32xf32> -> vector<32x32xf32>
    %c2_34 = arith.constant 2 : index
    %c0_35 = arith.constant 0 : index
    %c0_36 = arith.constant 0 : index
    %38 = vector.load %arg2[%c2_34, %c0_35, %c0_36] : memref<16x32x32xf32, #tpu.memory_space<vmem>>, vector<1x32x32xf32>
    %39 = vector.shape_cast %38 : vector<1x32x32xf32> to vector<32x32xf32>
    %40 = arith.mulf %37, %39 : vector<32x32xf32>
    %41 = arith.addf %33, %40 : vector<32x32xf32>
    %cst_37 = arith.constant dense<0.000000e+00> : vector<8x8xf32>
    %42 = tpu.matmul %17, %13, %cst_37 {dimension_numbers = #tpu.dot_dimension_numbers<[1], [0], [0], [1], [0, 0, 1, 1], [], []>} : vector<8x8xf32>, vector<8x8xf32>, vector<8x8xf32> -> vector<8x8xf32>
    %cst_38 = arith.constant dense<0.000000e+00> : vector<32x8xf32>
    %43 = tpu.matmul %1, %42, %cst_38 {dimension_numbers = #tpu.dot_dimension_numbers<[1], [0], [0], [1], [0, 0, 1, 1], [], []>} : vector<32x8xf32>, vector<8x8xf32>, vector<32x8xf32> -> vector<32x8xf32>
    %44 = tpu.transpose %1, [1, 0] : vector<32x8xf32> -> vector<8x32xf32>
    %cst_39 = arith.constant dense<0.000000e+00> : vector<32x32xf32>
    %45 = tpu.matmul %43, %44, %cst_39 {dimension_numbers = #tpu.dot_dimension_numbers<[1], [0], [0], [1], [0, 0, 1, 1], [], []>} : vector<32x8xf32>, vector<8x32xf32>, vector<32x32xf32> -> vector<32x32xf32>
    %c3_40 = arith.constant 3 : index
    %c0_41 = arith.constant 0 : index
    %c0_42 = arith.constant 0 : index
    %46 = vector.load %arg2[%c3_40, %c0_41, %c0_42] : memref<16x32x32xf32, #tpu.memory_space<vmem>>, vector<1x32x32xf32>
    %47 = vector.shape_cast %46 : vector<1x32x32xf32> to vector<32x32xf32>
    %48 = arith.mulf %45, %47 : vector<32x32xf32>
    %49 = arith.addf %41, %48 : vector<32x32xf32>
    %c1_43 = arith.constant 1 : index
    %c0_44 = arith.constant 0 : index
    %c0_45 = arith.constant 0 : index
    %50 = vector.load %arg1[%c1_43, %c0_44, %c0_45] : memref<4x8x8xf32, #tpu.memory_space<vmem>>, vector<1x8x8xf32>
    %51 = vector.shape_cast %50 : vector<1x8x8xf32> to vector<8x8xf32>
    %52 = tpu.transpose %51, [1, 0] : vector<8x8xf32> -> vector<8x8xf32>
    %cst_46 = arith.constant dense<0.000000e+00> : vector<8x8xf32>
    %53 = tpu.matmul %52, %4, %cst_46 {dimension_numbers = #tpu.dot_dimension_numbers<[1], [0], [0], [1], [0, 0, 1, 1], [], []>} : vector<8x8xf32>, vector<8x8xf32>, vector<8x8xf32> -> vector<8x8xf32>
    %cst_47 = arith.constant dense<0.000000e+00> : vector<32x8xf32>
    %54 = tpu.matmul %1, %53, %cst_47 {dimension_numbers = #tpu.dot_dimension_numbers<[1], [0], [0], [1], [0, 0, 1, 1], [], []>} : vector<32x8xf32>, vector<8x8xf32>, vector<32x8xf32> -> vector<32x8xf32>
    %55 = tpu.transpose %1, [1, 0] : vector<32x8xf32> -> vector<8x32xf32>
    %cst_48 = arith.constant dense<0.000000e+00> : vector<32x32xf32>
    %56 = tpu.matmul %54, %55, %cst_48 {dimension_numbers = #tpu.dot_dimension_numbers<[1], [0], [0], [1], [0, 0, 1, 1], [], []>} : vector<32x8xf32>, vector<8x32xf32>, vector<32x32xf32> -> vector<32x32xf32>
    %c4 = arith.constant 4 : index
    %c0_49 = arith.constant 0 : index
    %c0_50 = arith.constant 0 : index
    %57 = vector.load %arg2[%c4, %c0_49, %c0_50] : memref<16x32x32xf32, #tpu.memory_space<vmem>>, vector<1x32x32xf32>
    %58 = vector.shape_cast %57 : vector<1x32x32xf32> to vector<32x32xf32>
    %59 = arith.mulf %56, %58 : vector<32x32xf32>
    %60 = arith.addf %49, %59 : vector<32x32xf32>
    %cst_51 = arith.constant dense<0.000000e+00> : vector<8x8xf32>
    %61 = tpu.matmul %52, %7, %cst_51 {dimension_numbers = #tpu.dot_dimension_numbers<[1], [0], [0], [1], [0, 0, 1, 1], [], []>} : vector<8x8xf32>, vector<8x8xf32>, vector<8x8xf32> -> vector<8x8xf32>
    %cst_52 = arith.constant dense<0.000000e+00> : vector<32x8xf32>
    %62 = tpu.matmul %1, %61, %cst_52 {dimension_numbers = #tpu.dot_dimension_numbers<[1], [0], [0], [1], [0, 0, 1, 1], [], []>} : vector<32x8xf32>, vector<8x8xf32>, vector<32x8xf32> -> vector<32x8xf32>
    %63 = tpu.transpose %1, [1, 0] : vector<32x8xf32> -> vector<8x32xf32>
    %cst_53 = arith.constant dense<0.000000e+00> : vector<32x32xf32>
    %64 = tpu.matmul %62, %63, %cst_53 {dimension_numbers = #tpu.dot_dimension_numbers<[1], [0], [0], [1], [0, 0, 1, 1], [], []>} : vector<32x8xf32>, vector<8x32xf32>, vector<32x32xf32> -> vector<32x32xf32>
    %c5 = arith.constant 5 : index
    %c0_54 = arith.constant 0 : index
    %c0_55 = arith.constant 0 : index
    %65 = vector.load %arg2[%c5, %c0_54, %c0_55] : memref<16x32x32xf32, #tpu.memory_space<vmem>>, vector<1x32x32xf32>
    %66 = vector.shape_cast %65 : vector<1x32x32xf32> to vector<32x32xf32>
    %67 = arith.mulf %64, %66 : vector<32x32xf32>
    %68 = arith.addf %60, %67 : vector<32x32xf32>
    %cst_56 = arith.constant dense<0.000000e+00> : vector<8x8xf32>
    %69 = tpu.matmul %52, %10, %cst_56 {dimension_numbers = #tpu.dot_dimension_numbers<[1], [0], [0], [1], [0, 0, 1, 1], [], []>} : vector<8x8xf32>, vector<8x8xf32>, vector<8x8xf32> -> vector<8x8xf32>
    %cst_57 = arith.constant dense<0.000000e+00> : vector<32x8xf32>
    %70 = tpu.matmul %1, %69, %cst_57 {dimension_numbers = #tpu.dot_dimension_numbers<[1], [0], [0], [1], [0, 0, 1, 1], [], []>} : vector<32x8xf32>, vector<8x8xf32>, vector<32x8xf32> -> vector<32x8xf32>
    %71 = tpu.transpose %1, [1, 0] : vector<32x8xf32> -> vector<8x32xf32>
    %cst_58 = arith.constant dense<0.000000e+00> : vector<32x32xf32>
    %72 = tpu.matmul %70, %71, %cst_58 {dimension_numbers = #tpu.dot_dimension_numbers<[1], [0], [0], [1], [0, 0, 1, 1], [], []>} : vector<32x8xf32>, vector<8x32xf32>, vector<32x32xf32> -> vector<32x32xf32>
    %c6 = arith.constant 6 : index
    %c0_59 = arith.constant 0 : index
    %c0_60 = arith.constant 0 : index
    %73 = vector.load %arg2[%c6, %c0_59, %c0_60] : memref<16x32x32xf32, #tpu.memory_space<vmem>>, vector<1x32x32xf32>
    %74 = vector.shape_cast %73 : vector<1x32x32xf32> to vector<32x32xf32>
    %75 = arith.mulf %72, %74 : vector<32x32xf32>
    %76 = arith.addf %68, %75 : vector<32x32xf32>
    %cst_61 = arith.constant dense<0.000000e+00> : vector<8x8xf32>
    %77 = tpu.matmul %52, %13, %cst_61 {dimension_numbers = #tpu.dot_dimension_numbers<[1], [0], [0], [1], [0, 0, 1, 1], [], []>} : vector<8x8xf32>, vector<8x8xf32>, vector<8x8xf32> -> vector<8x8xf32>
    %cst_62 = arith.constant dense<0.000000e+00> : vector<32x8xf32>
    %78 = tpu.matmul %1, %77, %cst_62 {dimension_numbers = #tpu.dot_dimension_numbers<[1], [0], [0], [1], [0, 0, 1, 1], [], []>} : vector<32x8xf32>, vector<8x8xf32>, vector<32x8xf32> -> vector<32x8xf32>
    %79 = tpu.transpose %1, [1, 0] : vector<32x8xf32> -> vector<8x32xf32>
    %cst_63 = arith.constant dense<0.000000e+00> : vector<32x32xf32>
    %80 = tpu.matmul %78, %79, %cst_63 {dimension_numbers = #tpu.dot_dimension_numbers<[1], [0], [0], [1], [0, 0, 1, 1], [], []>} : vector<32x8xf32>, vector<8x32xf32>, vector<32x32xf32> -> vector<32x32xf32>
    %c7 = arith.constant 7 : index
    %c0_64 = arith.constant 0 : index
    %c0_65 = arith.constant 0 : index
    %81 = vector.load %arg2[%c7, %c0_64, %c0_65] : memref<16x32x32xf32, #tpu.memory_space<vmem>>, vector<1x32x32xf32>
    %82 = vector.shape_cast %81 : vector<1x32x32xf32> to vector<32x32xf32>
    %83 = arith.mulf %80, %82 : vector<32x32xf32>
    %84 = arith.addf %76, %83 : vector<32x32xf32>
    %c2_66 = arith.constant 2 : index
    %c0_67 = arith.constant 0 : index
    %c0_68 = arith.constant 0 : index
    %85 = vector.load %arg1[%c2_66, %c0_67, %c0_68] : memref<4x8x8xf32, #tpu.memory_space<vmem>>, vector<1x8x8xf32>
    %86 = vector.shape_cast %85 : vector<1x8x8xf32> to vector<8x8xf32>
    %87 = tpu.transpose %86, [1, 0] : vector<8x8xf32> -> vector<8x8xf32>
    %cst_69 = arith.constant dense<0.000000e+00> : vector<8x8xf32>
    %88 = tpu.matmul %87, %4, %cst_69 {dimension_numbers = #tpu.dot_dimension_numbers<[1], [0], [0], [1], [0, 0, 1, 1], [], []>} : vector<8x8xf32>, vector<8x8xf32>, vector<8x8xf32> -> vector<8x8xf32>
    %cst_70 = arith.constant dense<0.000000e+00> : vector<32x8xf32>
    %89 = tpu.matmul %1, %88, %cst_70 {dimension_numbers = #tpu.dot_dimension_numbers<[1], [0], [0], [1], [0, 0, 1, 1], [], []>} : vector<32x8xf32>, vector<8x8xf32>, vector<32x8xf32> -> vector<32x8xf32>
    %90 = tpu.transpose %1, [1, 0] : vector<32x8xf32> -> vector<8x32xf32>
    %cst_71 = arith.constant dense<0.000000e+00> : vector<32x32xf32>
    %91 = tpu.matmul %89, %90, %cst_71 {dimension_numbers = #tpu.dot_dimension_numbers<[1], [0], [0], [1], [0, 0, 1, 1], [], []>} : vector<32x8xf32>, vector<8x32xf32>, vector<32x32xf32> -> vector<32x32xf32>
    %c8 = arith.constant 8 : index
    %c0_72 = arith.constant 0 : index
    %c0_73 = arith.constant 0 : index
    %92 = vector.load %arg2[%c8, %c0_72, %c0_73] : memref<16x32x32xf32, #tpu.memory_space<vmem>>, vector<1x32x32xf32>
    %93 = vector.shape_cast %92 : vector<1x32x32xf32> to vector<32x32xf32>
    %94 = arith.mulf %91, %93 : vector<32x32xf32>
    %95 = arith.addf %84, %94 : vector<32x32xf32>
    %cst_74 = arith.constant dense<0.000000e+00> : vector<8x8xf32>
    %96 = tpu.matmul %87, %7, %cst_74 {dimension_numbers = #tpu.dot_dimension_numbers<[1], [0], [0], [1], [0, 0, 1, 1], [], []>} : vector<8x8xf32>, vector<8x8xf32>, vector<8x8xf32> -> vector<8x8xf32>
    %cst_75 = arith.constant dense<0.000000e+00> : vector<32x8xf32>
    %97 = tpu.matmul %1, %96, %cst_75 {dimension_numbers = #tpu.dot_dimension_numbers<[1], [0], [0], [1], [0, 0, 1, 1], [], []>} : vector<32x8xf32>, vector<8x8xf32>, vector<32x8xf32> -> vector<32x8xf32>
    %98 = tpu.transpose %1, [1, 0] : vector<32x8xf32> -> vector<8x32xf32>
    %cst_76 = arith.constant dense<0.000000e+00> : vector<32x32xf32>
    %99 = tpu.matmul %97, %98, %cst_76 {dimension_numbers = #tpu.dot_dimension_numbers<[1], [0], [0], [1], [0, 0, 1, 1], [], []>} : vector<32x8xf32>, vector<8x32xf32>, vector<32x32xf32> -> vector<32x32xf32>
    %c9 = arith.constant 9 : index
    %c0_77 = arith.constant 0 : index
    %c0_78 = arith.constant 0 : index
    %100 = vector.load %arg2[%c9, %c0_77, %c0_78] : memref<16x32x32xf32, #tpu.memory_space<vmem>>, vector<1x32x32xf32>
    %101 = vector.shape_cast %100 : vector<1x32x32xf32> to vector<32x32xf32>
    %102 = arith.mulf %99, %101 : vector<32x32xf32>
    %103 = arith.addf %95, %102 : vector<32x32xf32>
    %cst_79 = arith.constant dense<0.000000e+00> : vector<8x8xf32>
    %104 = tpu.matmul %87, %10, %cst_79 {dimension_numbers = #tpu.dot_dimension_numbers<[1], [0], [0], [1], [0, 0, 1, 1], [], []>} : vector<8x8xf32>, vector<8x8xf32>, vector<8x8xf32> -> vector<8x8xf32>
    %cst_80 = arith.constant dense<0.000000e+00> : vector<32x8xf32>
    %105 = tpu.matmul %1, %104, %cst_80 {dimension_numbers = #tpu.dot_dimension_numbers<[1], [0], [0], [1], [0, 0, 1, 1], [], []>} : vector<32x8xf32>, vector<8x8xf32>, vector<32x8xf32> -> vector<32x8xf32>
    %106 = tpu.transpose %1, [1, 0] : vector<32x8xf32> -> vector<8x32xf32>
    %cst_81 = arith.constant dense<0.000000e+00> : vector<32x32xf32>
    %107 = tpu.matmul %105, %106, %cst_81 {dimension_numbers = #tpu.dot_dimension_numbers<[1], [0], [0], [1], [0, 0, 1, 1], [], []>} : vector<32x8xf32>, vector<8x32xf32>, vector<32x32xf32> -> vector<32x32xf32>
    %c10 = arith.constant 10 : index
    %c0_82 = arith.constant 0 : index
    %c0_83 = arith.constant 0 : index
    %108 = vector.load %arg2[%c10, %c0_82, %c0_83] : memref<16x32x32xf32, #tpu.memory_space<vmem>>, vector<1x32x32xf32>
    %109 = vector.shape_cast %108 : vector<1x32x32xf32> to vector<32x32xf32>
    %110 = arith.mulf %107, %109 : vector<32x32xf32>
    %111 = arith.addf %103, %110 : vector<32x32xf32>
    %cst_84 = arith.constant dense<0.000000e+00> : vector<8x8xf32>
    %112 = tpu.matmul %87, %13, %cst_84 {dimension_numbers = #tpu.dot_dimension_numbers<[1], [0], [0], [1], [0, 0, 1, 1], [], []>} : vector<8x8xf32>, vector<8x8xf32>, vector<8x8xf32> -> vector<8x8xf32>
    %cst_85 = arith.constant dense<0.000000e+00> : vector<32x8xf32>
    %113 = tpu.matmul %1, %112, %cst_85 {dimension_numbers = #tpu.dot_dimension_numbers<[1], [0], [0], [1], [0, 0, 1, 1], [], []>} : vector<32x8xf32>, vector<8x8xf32>, vector<32x8xf32> -> vector<32x8xf32>
    %114 = tpu.transpose %1, [1, 0] : vector<32x8xf32> -> vector<8x32xf32>
    %cst_86 = arith.constant dense<0.000000e+00> : vector<32x32xf32>
    %115 = tpu.matmul %113, %114, %cst_86 {dimension_numbers = #tpu.dot_dimension_numbers<[1], [0], [0], [1], [0, 0, 1, 1], [], []>} : vector<32x8xf32>, vector<8x32xf32>, vector<32x32xf32> -> vector<32x32xf32>
    %c11 = arith.constant 11 : index
    %c0_87 = arith.constant 0 : index
    %c0_88 = arith.constant 0 : index
    %116 = vector.load %arg2[%c11, %c0_87, %c0_88] : memref<16x32x32xf32, #tpu.memory_space<vmem>>, vector<1x32x32xf32>
    %117 = vector.shape_cast %116 : vector<1x32x32xf32> to vector<32x32xf32>
    %118 = arith.mulf %115, %117 : vector<32x32xf32>
    %119 = arith.addf %111, %118 : vector<32x32xf32>
    %c3_89 = arith.constant 3 : index
    %c0_90 = arith.constant 0 : index
    %c0_91 = arith.constant 0 : index
    %120 = vector.load %arg1[%c3_89, %c0_90, %c0_91] : memref<4x8x8xf32, #tpu.memory_space<vmem>>, vector<1x8x8xf32>
    %121 = vector.shape_cast %120 : vector<1x8x8xf32> to vector<8x8xf32>
    %122 = tpu.transpose %121, [1, 0] : vector<8x8xf32> -> vector<8x8xf32>
    %cst_92 = arith.constant dense<0.000000e+00> : vector<8x8xf32>
    %123 = tpu.matmul %122, %4, %cst_92 {dimension_numbers = #tpu.dot_dimension_numbers<[1], [0], [0], [1], [0, 0, 1, 1], [], []>} : vector<8x8xf32>, vector<8x8xf32>, vector<8x8xf32> -> vector<8x8xf32>
    %cst_93 = arith.constant dense<0.000000e+00> : vector<32x8xf32>
    %124 = tpu.matmul %1, %123, %cst_93 {dimension_numbers = #tpu.dot_dimension_numbers<[1], [0], [0], [1], [0, 0, 1, 1], [], []>} : vector<32x8xf32>, vector<8x8xf32>, vector<32x8xf32> -> vector<32x8xf32>
    %125 = tpu.transpose %1, [1, 0] : vector<32x8xf32> -> vector<8x32xf32>
    %cst_94 = arith.constant dense<0.000000e+00> : vector<32x32xf32>
    %126 = tpu.matmul %124, %125, %cst_94 {dimension_numbers = #tpu.dot_dimension_numbers<[1], [0], [0], [1], [0, 0, 1, 1], [], []>} : vector<32x8xf32>, vector<8x32xf32>, vector<32x32xf32> -> vector<32x32xf32>
    %c12 = arith.constant 12 : index
    %c0_95 = arith.constant 0 : index
    %c0_96 = arith.constant 0 : index
    %127 = vector.load %arg2[%c12, %c0_95, %c0_96] : memref<16x32x32xf32, #tpu.memory_space<vmem>>, vector<1x32x32xf32>
    %128 = vector.shape_cast %127 : vector<1x32x32xf32> to vector<32x32xf32>
    %129 = arith.mulf %126, %128 : vector<32x32xf32>
    %130 = arith.addf %119, %129 : vector<32x32xf32>
    %cst_97 = arith.constant dense<0.000000e+00> : vector<8x8xf32>
    %131 = tpu.matmul %122, %7, %cst_97 {dimension_numbers = #tpu.dot_dimension_numbers<[1], [0], [0], [1], [0, 0, 1, 1], [], []>} : vector<8x8xf32>, vector<8x8xf32>, vector<8x8xf32> -> vector<8x8xf32>
    %cst_98 = arith.constant dense<0.000000e+00> : vector<32x8xf32>
    %132 = tpu.matmul %1, %131, %cst_98 {dimension_numbers = #tpu.dot_dimension_numbers<[1], [0], [0], [1], [0, 0, 1, 1], [], []>} : vector<32x8xf32>, vector<8x8xf32>, vector<32x8xf32> -> vector<32x8xf32>
    %133 = tpu.transpose %1, [1, 0] : vector<32x8xf32> -> vector<8x32xf32>
    %cst_99 = arith.constant dense<0.000000e+00> : vector<32x32xf32>
    %134 = tpu.matmul %132, %133, %cst_99 {dimension_numbers = #tpu.dot_dimension_numbers<[1], [0], [0], [1], [0, 0, 1, 1], [], []>} : vector<32x8xf32>, vector<8x32xf32>, vector<32x32xf32> -> vector<32x32xf32>
    %c13 = arith.constant 13 : index
    %c0_100 = arith.constant 0 : index
    %c0_101 = arith.constant 0 : index
    %135 = vector.load %arg2[%c13, %c0_100, %c0_101] : memref<16x32x32xf32, #tpu.memory_space<vmem>>, vector<1x32x32xf32>
    %136 = vector.shape_cast %135 : vector<1x32x32xf32> to vector<32x32xf32>
    %137 = arith.mulf %134, %136 : vector<32x32xf32>
    %138 = arith.addf %130, %137 : vector<32x32xf32>
    %cst_102 = arith.constant dense<0.000000e+00> : vector<8x8xf32>
    %139 = tpu.matmul %122, %10, %cst_102 {dimension_numbers = #tpu.dot_dimension_numbers<[1], [0], [0], [1], [0, 0, 1, 1], [], []>} : vector<8x8xf32>, vector<8x8xf32>, vector<8x8xf32> -> vector<8x8xf32>
    %cst_103 = arith.constant dense<0.000000e+00> : vector<32x8xf32>
    %140 = tpu.matmul %1, %139, %cst_103 {dimension_numbers = #tpu.dot_dimension_numbers<[1], [0], [0], [1], [0, 0, 1, 1], [], []>} : vector<32x8xf32>, vector<8x8xf32>, vector<32x8xf32> -> vector<32x8xf32>
    %141 = tpu.transpose %1, [1, 0] : vector<32x8xf32> -> vector<8x32xf32>
    %cst_104 = arith.constant dense<0.000000e+00> : vector<32x32xf32>
    %142 = tpu.matmul %140, %141, %cst_104 {dimension_numbers = #tpu.dot_dimension_numbers<[1], [0], [0], [1], [0, 0, 1, 1], [], []>} : vector<32x8xf32>, vector<8x32xf32>, vector<32x32xf32> -> vector<32x32xf32>
    %c14 = arith.constant 14 : index
    %c0_105 = arith.constant 0 : index
    %c0_106 = arith.constant 0 : index
    %143 = vector.load %arg2[%c14, %c0_105, %c0_106] : memref<16x32x32xf32, #tpu.memory_space<vmem>>, vector<1x32x32xf32>
    %144 = vector.shape_cast %143 : vector<1x32x32xf32> to vector<32x32xf32>
    %145 = arith.mulf %142, %144 : vector<32x32xf32>
    %146 = arith.addf %138, %145 : vector<32x32xf32>
    %cst_107 = arith.constant dense<0.000000e+00> : vector<8x8xf32>
    %147 = tpu.matmul %122, %13, %cst_107 {dimension_numbers = #tpu.dot_dimension_numbers<[1], [0], [0], [1], [0, 0, 1, 1], [], []>} : vector<8x8xf32>, vector<8x8xf32>, vector<8x8xf32> -> vector<8x8xf32>
    %cst_108 = arith.constant dense<0.000000e+00> : vector<32x8xf32>
    %148 = tpu.matmul %1, %147, %cst_108 {dimension_numbers = #tpu.dot_dimension_numbers<[1], [0], [0], [1], [0, 0, 1, 1], [], []>} : vector<32x8xf32>, vector<8x8xf32>, vector<32x8xf32> -> vector<32x8xf32>
    %149 = tpu.transpose %1, [1, 0] : vector<32x8xf32> -> vector<8x32xf32>
    %cst_109 = arith.constant dense<0.000000e+00> : vector<32x32xf32>
    %150 = tpu.matmul %148, %149, %cst_109 {dimension_numbers = #tpu.dot_dimension_numbers<[1], [0], [0], [1], [0, 0, 1, 1], [], []>} : vector<32x8xf32>, vector<8x32xf32>, vector<32x32xf32> -> vector<32x32xf32>
    %c15 = arith.constant 15 : index
    %c0_110 = arith.constant 0 : index
    %c0_111 = arith.constant 0 : index
    %151 = vector.load %arg2[%c15, %c0_110, %c0_111] : memref<16x32x32xf32, #tpu.memory_space<vmem>>, vector<1x32x32xf32>
    %152 = vector.shape_cast %151 : vector<1x32x32xf32> to vector<32x32xf32>
    %153 = arith.mulf %150, %152 : vector<32x32xf32>
    %154 = arith.addf %146, %153 : vector<32x32xf32>
    %155 = tpu.transpose %154, [1, 0] : vector<32x32xf32> -> vector<32x32xf32>
    %156 = arith.addf %154, %155 : vector<32x32xf32>
    %cst_112 = arith.constant 5.000000e-01 : f32
    %157 = vector.broadcast %cst_112 : f32 to vector<32x32xf32>
    %158 = arith.mulf %157, %156 : vector<32x32xf32>
    %c0_113 = arith.constant 0 : index
    %c0_114 = arith.constant 0 : index
    %159 = vector.load %arg4[%c0_113, %c0_114] : memref<32x32xf32, #tpu.memory_space<vmem>>, vector<32x32xf32>
    tpu.vector_store %arg4[%c0_113, %c0_114], %158 {strides = array<i32>} : memref<32x32xf32, #tpu.memory_space<vmem>>, vector<32x32xf32>,
    return
  }
}

module attributes {stable_mosaic.version = 11 : i64} {
  func.func @_renorm_kernel(%arg0: memref<32x32xf32, #tpu.memory_space<vmem>>, %arg1: memref<32x8xf32, #tpu.memory_space<vmem>>, %arg2: memref<4x8x8xf32, #tpu.memory_space<vmem>>, %arg3: memref<8x32xf32, #tpu.memory_space<vmem>>, %arg4: memref<4x8x8xf32, #tpu.memory_space<vmem>>, %arg5: memref<16x32x32xf32, #tpu.memory_space<vmem>>, %arg6: memref<8x8xf32, #tpu.memory_space<vmem>>, %arg7: memref<4x8x8xf32, #tpu.memory_space<vmem>>, %arg8: memref<8x32xf32, #tpu.memory_space<vmem>>) attributes {dimension_semantics = [], scalar_prefetch = 0 : i64, scratch_operands = 0 : i64, tpu.core_type = #tpu.core_type<tc>} {
    %c0 = arith.constant 0 : index
    %c0_0 = arith.constant 0 : index
    %0 = vector.load %arg1[%c0, %c0_0] : memref<32x8xf32, #tpu.memory_space<vmem>>, vector<32x8xf32>
    %c0_1 = arith.constant 0 : index
    %c0_2 = arith.constant 0 : index
    %1 = vector.load %arg0[%c0_1, %c0_2] : memref<32x32xf32, #tpu.memory_space<vmem>>, vector<32x32xf32>
    %c0_3 = arith.constant 0 : index
    %c0_4 = arith.constant 0 : index
    %2 = vector.load %arg3[%c0_3, %c0_4] : memref<8x32xf32, #tpu.memory_space<vmem>>, vector<8x32xf32>
    %3 = tpu.transpose %0, [1, 0] : vector<32x8xf32> -> vector<8x32xf32>
    %cst = arith.constant dense<0.000000e+00> : vector<8x32xf32>
    %4 = tpu.matmul %3, %1, %cst {dimension_numbers = #tpu.dot_dimension_numbers<[1], [0], [0], [1], [0, 0, 1, 1], [], []>} : vector<8x32xf32>, vector<32x32xf32>, vector<8x32xf32> -> vector<8x32xf32>
    %cst_5 = arith.constant dense<0.000000e+00> : vector<8x8xf32>
    %5 = tpu.matmul %4, %0, %cst_5 {dimension_numbers = #tpu.dot_dimension_numbers<[1], [0], [0], [1], [0, 0, 1, 1], [], []>} : vector<8x32xf32>, vector<32x8xf32>, vector<8x8xf32> -> vector<8x8xf32>
    %6 = tpu.transpose %5, [1, 0] : vector<8x8xf32> -> vector<8x8xf32>
    %7 = arith.addf %5, %6 : vector<8x8xf32>
    %cst_6 = arith.constant 5.000000e-01 : f32
    %8 = vector.broadcast %cst_6 : f32 to vector<8x8xf32>
    %9 = arith.mulf %8, %7 : vector<8x8xf32>
    %10 = math.absf %9 : vector<8x8xf32>
    %11 = vector.shape_cast %10 : vector<8x8xf32> to vector<1x8x8xf32>
    %cst_7 = arith.constant dense<0xFF800000> : vector<1xf32>
    %12 = vector.multi_reduction <maximumf>, %11, %cst_7 [1, 2] : vector<1x8x8xf32> to vector<1xf32>
    %13 = vector.shape_cast %12 : vector<1xf32> to vector<1x1x1xf32>
    %14 = vector.extract %13[0, 0, 0] : f32 from vector<1x1x1xf32>
    %cst_8 = arith.constant 1.000000e-30 : f32
    %15 = arith.maximumf %14, %cst_8 : f32
    %16 = vector.broadcast %15 : f32 to vector<8x8xf32>
    %17 = arith.divf %9, %16 : vector<8x8xf32>
    %c0_9 = arith.constant 0 : index
    %c0_10 = arith.constant 0 : index
    %18 = vector.load %arg6[%c0_9, %c0_10] : memref<8x8xf32, #tpu.memory_space<vmem>>, vector<8x8xf32>
    tpu.vector_store %arg6[%c0_9, %c0_10], %17 {strides = array<i32>} : memref<8x8xf32, #tpu.memory_space<vmem>>, vector<8x8xf32>,
    %cst_11 = arith.constant 0.000000e+00 : f32
    %19 = vector.broadcast %cst_11 : f32 to vector<8x32xf32>
    %c0_12 = arith.constant 0 : index
    %c0_13 = arith.constant 0 : index
    %c0_14 = arith.constant 0 : index
    %20 = vector.load %arg4[%c0_12, %c0_13, %c0_14] : memref<4x8x8xf32, #tpu.memory_space<vmem>>, vector<1x8x8xf32>
    %21 = vector.shape_cast %20 : vector<1x8x8xf32> to vector<8x8xf32>
    %c0_15 = arith.constant 0 : index
    %c0_16 = arith.constant 0 : index
    %c0_17 = arith.constant 0 : index
    %22 = vector.load %arg2[%c0_15, %c0_16, %c0_17] : memref<4x8x8xf32, #tpu.memory_space<vmem>>, vector<1x8x8xf32>
    %23 = vector.shape_cast %22 : vector<1x8x8xf32> to vector<8x8xf32>
    %24 = tpu.transpose %23, [1, 0] : vector<8x8xf32> -> vector<8x8xf32>
    %cst_18 = arith.constant dense<0.000000e+00> : vector<8x8xf32>
    %25 = tpu.matmul %24, %21, %cst_18 {dimension_numbers = #tpu.dot_dimension_numbers<[1], [0], [0], [1], [0, 0, 1, 1], [], []>} : vector<8x8xf32>, vector<8x8xf32>, vector<8x8xf32> -> vector<8x8xf32>
    %cst_19 = arith.constant dense<0.000000e+00> : vector<8x32xf32>
    %26 = tpu.matmul %25, %2, %cst_19 {dimension_numbers = #tpu.dot_dimension_numbers<[1], [0], [0], [1], [0, 0, 1, 1], [], []>} : vector<8x8xf32>, vector<8x32xf32>, vector<8x32xf32> -> vector<8x32xf32>
    %c0_20 = arith.constant 0 : index
    %c0_21 = arith.constant 0 : index
    %c0_22 = arith.constant 0 : index
    %27 = vector.load %arg5[%c0_20, %c0_21, %c0_22] : memref<16x32x32xf32, #tpu.memory_space<vmem>>, vector<1x32x32xf32>
    %28 = vector.shape_cast %27 : vector<1x32x32xf32> to vector<32x32xf32>
    %cst_23 = arith.constant dense<0.000000e+00> : vector<8x32xf32>
    %29 = tpu.matmul %26, %28, %cst_23 {dimension_numbers = #tpu.dot_dimension_numbers<[1], [0], [0], [1], [0, 0, 1, 1], [], []>} : vector<8x32xf32>, vector<32x32xf32>, vector<8x32xf32> -> vector<8x32xf32>
    %30 = arith.addf %19, %29 : vector<8x32xf32>
    %c1 = arith.constant 1 : index
    %c0_24 = arith.constant 0 : index
    %c0_25 = arith.constant 0 : index
    %31 = vector.load %arg2[%c1, %c0_24, %c0_25] : memref<4x8x8xf32, #tpu.memory_space<vmem>>, vector<1x8x8xf32>
    %32 = vector.shape_cast %31 : vector<1x8x8xf32> to vector<8x8xf32>
    %33 = tpu.transpose %32, [1, 0] : vector<8x8xf32> -> vector<8x8xf32>
    %cst_26 = arith.constant dense<0.000000e+00> : vector<8x8xf32>
    %34 = tpu.matmul %33, %21, %cst_26 {dimension_numbers = #tpu.dot_dimension_numbers<[1], [0], [0], [1], [0, 0, 1, 1], [], []>} : vector<8x8xf32>, vector<8x8xf32>, vector<8x8xf32> -> vector<8x8xf32>
    %cst_27 = arith.constant dense<0.000000e+00> : vector<8x32xf32>
    %35 = tpu.matmul %34, %2, %cst_27 {dimension_numbers = #tpu.dot_dimension_numbers<[1], [0], [0], [1], [0, 0, 1, 1], [], []>} : vector<8x8xf32>, vector<8x32xf32>, vector<8x32xf32> -> vector<8x32xf32>
    %c1_28 = arith.constant 1 : index
    %c0_29 = arith.constant 0 : index
    %c0_30 = arith.constant 0 : index
    %36 = vector.load %arg5[%c1_28, %c0_29, %c0_30] : memref<16x32x32xf32, #tpu.memory_space<vmem>>, vector<1x32x32xf32>
    %37 = vector.shape_cast %36 : vector<1x32x32xf32> to vector<32x32xf32>
    %cst_31 = arith.constant dense<0.000000e+00> : vector<8x32xf32>
    %38 = tpu.matmul %35, %37, %cst_31 {dimension_numbers = #tpu.dot_dimension_numbers<[1], [0], [0], [1], [0, 0, 1, 1], [], []>} : vector<8x32xf32>, vector<32x32xf32>, vector<8x32xf32> -> vector<8x32xf32>
    %39 = arith.addf %30, %38 : vector<8x32xf32>
    %c2 = arith.constant 2 : index
    %c0_32 = arith.constant 0 : index
    %c0_33 = arith.constant 0 : index
    %40 = vector.load %arg2[%c2, %c0_32, %c0_33] : memref<4x8x8xf32, #tpu.memory_space<vmem>>, vector<1x8x8xf32>
    %41 = vector.shape_cast %40 : vector<1x8x8xf32> to vector<8x8xf32>
    %42 = tpu.transpose %41, [1, 0] : vector<8x8xf32> -> vector<8x8xf32>
    %cst_34 = arith.constant dense<0.000000e+00> : vector<8x8xf32>
    %43 = tpu.matmul %42, %21, %cst_34 {dimension_numbers = #tpu.dot_dimension_numbers<[1], [0], [0], [1], [0, 0, 1, 1], [], []>} : vector<8x8xf32>, vector<8x8xf32>, vector<8x8xf32> -> vector<8x8xf32>
    %cst_35 = arith.constant dense<0.000000e+00> : vector<8x32xf32>
    %44 = tpu.matmul %43, %2, %cst_35 {dimension_numbers = #tpu.dot_dimension_numbers<[1], [0], [0], [1], [0, 0, 1, 1], [], []>} : vector<8x8xf32>, vector<8x32xf32>, vector<8x32xf32> -> vector<8x32xf32>
    %c2_36 = arith.constant 2 : index
    %c0_37 = arith.constant 0 : index
    %c0_38 = arith.constant 0 : index
    %45 = vector.load %arg5[%c2_36, %c0_37, %c0_38] : memref<16x32x32xf32, #tpu.memory_space<vmem>>, vector<1x32x32xf32>
    %46 = vector.shape_cast %45 : vector<1x32x32xf32> to vector<32x32xf32>
    %cst_39 = arith.constant dense<0.000000e+00> : vector<8x32xf32>
    %47 = tpu.matmul %44, %46, %cst_39 {dimension_numbers = #tpu.dot_dimension_numbers<[1], [0], [0], [1], [0, 0, 1, 1], [], []>} : vector<8x32xf32>, vector<32x32xf32>, vector<8x32xf32> -> vector<8x32xf32>
    %48 = arith.addf %39, %47 : vector<8x32xf32>
    %c3 = arith.constant 3 : index
    %c0_40 = arith.constant 0 : index
    %c0_41 = arith.constant 0 : index
    %49 = vector.load %arg2[%c3, %c0_40, %c0_41] : memref<4x8x8xf32, #tpu.memory_space<vmem>>, vector<1x8x8xf32>
    %50 = vector.shape_cast %49 : vector<1x8x8xf32> to vector<8x8xf32>
    %51 = tpu.transpose %50, [1, 0] : vector<8x8xf32> -> vector<8x8xf32>
    %cst_42 = arith.constant dense<0.000000e+00> : vector<8x8xf32>
    %52 = tpu.matmul %51, %21, %cst_42 {dimension_numbers = #tpu.dot_dimension_numbers<[1], [0], [0], [1], [0, 0, 1, 1], [], []>} : vector<8x8xf32>, vector<8x8xf32>, vector<8x8xf32> -> vector<8x8xf32>
    %cst_43 = arith.constant dense<0.000000e+00> : vector<8x32xf32>
    %53 = tpu.matmul %52, %2, %cst_43 {dimension_numbers = #tpu.dot_dimension_numbers<[1], [0], [0], [1], [0, 0, 1, 1], [], []>} : vector<8x8xf32>, vector<8x32xf32>, vector<8x32xf32> -> vector<8x32xf32>
    %c3_44 = arith.constant 3 : index
    %c0_45 = arith.constant 0 : index
    %c0_46 = arith.constant 0 : index
    %54 = vector.load %arg5[%c3_44, %c0_45, %c0_46] : memref<16x32x32xf32, #tpu.memory_space<vmem>>, vector<1x32x32xf32>
    %55 = vector.shape_cast %54 : vector<1x32x32xf32> to vector<32x32xf32>
    %cst_47 = arith.constant dense<0.000000e+00> : vector<8x32xf32>
    %56 = tpu.matmul %53, %55, %cst_47 {dimension_numbers = #tpu.dot_dimension_numbers<[1], [0], [0], [1], [0, 0, 1, 1], [], []>} : vector<8x32xf32>, vector<32x32xf32>, vector<8x32xf32> -> vector<8x32xf32>
    %57 = arith.addf %48, %56 : vector<8x32xf32>
    %c1_48 = arith.constant 1 : index
    %c0_49 = arith.constant 0 : index
    %c0_50 = arith.constant 0 : index
    %58 = vector.load %arg4[%c1_48, %c0_49, %c0_50] : memref<4x8x8xf32, #tpu.memory_space<vmem>>, vector<1x8x8xf32>
    %59 = vector.shape_cast %58 : vector<1x8x8xf32> to vector<8x8xf32>
    %c0_51 = arith.constant 0 : index
    %c0_52 = arith.constant 0 : index
    %c0_53 = arith.constant 0 : index
    %60 = vector.load %arg2[%c0_51, %c0_52, %c0_53] : memref<4x8x8xf32, #tpu.memory_space<vmem>>, vector<1x8x8xf32>
    %61 = vector.shape_cast %60 : vector<1x8x8xf32> to vector<8x8xf32>
    %62 = tpu.transpose %61, [1, 0] : vector<8x8xf32> -> vector<8x8xf32>
    %cst_54 = arith.constant dense<0.000000e+00> : vector<8x8xf32>
    %63 = tpu.matmul %62, %59, %cst_54 {dimension_numbers = #tpu.dot_dimension_numbers<[1], [0], [0], [1], [0, 0, 1, 1], [], []>} : vector<8x8xf32>, vector<8x8xf32>, vector<8x8xf32> -> vector<8x8xf32>
    %cst_55 = arith.constant dense<0.000000e+00> : vector<8x32xf32>
    %64 = tpu.matmul %63, %2, %cst_55 {dimension_numbers = #tpu.dot_dimension_numbers<[1], [0], [0], [1], [0, 0, 1, 1], [], []>} : vector<8x8xf32>, vector<8x32xf32>, vector<8x32xf32> -> vector<8x32xf32>
    %c4 = arith.constant 4 : index
    %c0_56 = arith.constant 0 : index
    %c0_57 = arith.constant 0 : index
    %65 = vector.load %arg5[%c4, %c0_56, %c0_57] : memref<16x32x32xf32, #tpu.memory_space<vmem>>, vector<1x32x32xf32>
    %66 = vector.shape_cast %65 : vector<1x32x32xf32> to vector<32x32xf32>
    %cst_58 = arith.constant dense<0.000000e+00> : vector<8x32xf32>
    %67 = tpu.matmul %64, %66, %cst_58 {dimension_numbers = #tpu.dot_dimension_numbers<[1], [0], [0], [1], [0, 0, 1, 1], [], []>} : vector<8x32xf32>, vector<32x32xf32>, vector<8x32xf32> -> vector<8x32xf32>
    %68 = arith.addf %57, %67 : vector<8x32xf32>
    %c1_59 = arith.constant 1 : index
    %c0_60 = arith.constant 0 : index
    %c0_61 = arith.constant 0 : index
    %69 = vector.load %arg2[%c1_59, %c0_60, %c0_61] : memref<4x8x8xf32, #tpu.memory_space<vmem>>, vector<1x8x8xf32>
    %70 = vector.shape_cast %69 : vector<1x8x8xf32> to vector<8x8xf32>
    %71 = tpu.transpose %70, [1, 0] : vector<8x8xf32> -> vector<8x8xf32>
    %cst_62 = arith.constant dense<0.000000e+00> : vector<8x8xf32>
    %72 = tpu.matmul %71, %59, %cst_62 {dimension_numbers = #tpu.dot_dimension_numbers<[1], [0], [0], [1], [0, 0, 1, 1], [], []>} : vector<8x8xf32>, vector<8x8xf32>, vector<8x8xf32> -> vector<8x8xf32>
    %cst_63 = arith.constant dense<0.000000e+00> : vector<8x32xf32>
    %73 = tpu.matmul %72, %2, %cst_63 {dimension_numbers = #tpu.dot_dimension_numbers<[1], [0], [0], [1], [0, 0, 1, 1], [], []>} : vector<8x8xf32>, vector<8x32xf32>, vector<8x32xf32> -> vector<8x32xf32>
    %c5 = arith.constant 5 : index
    %c0_64 = arith.constant 0 : index
    %c0_65 = arith.constant 0 : index
    %74 = vector.load %arg5[%c5, %c0_64, %c0_65] : memref<16x32x32xf32, #tpu.memory_space<vmem>>, vector<1x32x32xf32>
    %75 = vector.shape_cast %74 : vector<1x32x32xf32> to vector<32x32xf32>
    %cst_66 = arith.constant dense<0.000000e+00> : vector<8x32xf32>
    %76 = tpu.matmul %73, %75, %cst_66 {dimension_numbers = #tpu.dot_dimension_numbers<[1], [0], [0], [1], [0, 0, 1, 1], [], []>} : vector<8x32xf32>, vector<32x32xf32>, vector<8x32xf32> -> vector<8x32xf32>
    %77 = arith.addf %68, %76 : vector<8x32xf32>
    %c2_67 = arith.constant 2 : index
    %c0_68 = arith.constant 0 : index
    %c0_69 = arith.constant 0 : index
    %78 = vector.load %arg2[%c2_67, %c0_68, %c0_69] : memref<4x8x8xf32, #tpu.memory_space<vmem>>, vector<1x8x8xf32>
    %79 = vector.shape_cast %78 : vector<1x8x8xf32> to vector<8x8xf32>
    %80 = tpu.transpose %79, [1, 0] : vector<8x8xf32> -> vector<8x8xf32>
    %cst_70 = arith.constant dense<0.000000e+00> : vector<8x8xf32>
    %81 = tpu.matmul %80, %59, %cst_70 {dimension_numbers = #tpu.dot_dimension_numbers<[1], [0], [0], [1], [0, 0, 1, 1], [], []>} : vector<8x8xf32>, vector<8x8xf32>, vector<8x8xf32> -> vector<8x8xf32>
    %cst_71 = arith.constant dense<0.000000e+00> : vector<8x32xf32>
    %82 = tpu.matmul %81, %2, %cst_71 {dimension_numbers = #tpu.dot_dimension_numbers<[1], [0], [0], [1], [0, 0, 1, 1], [], []>} : vector<8x8xf32>, vector<8x32xf32>, vector<8x32xf32> -> vector<8x32xf32>
    %c6 = arith.constant 6 : index
    %c0_72 = arith.constant 0 : index
    %c0_73 = arith.constant 0 : index
    %83 = vector.load %arg5[%c6, %c0_72, %c0_73] : memref<16x32x32xf32, #tpu.memory_space<vmem>>, vector<1x32x32xf32>
    %84 = vector.shape_cast %83 : vector<1x32x32xf32> to vector<32x32xf32>
    %cst_74 = arith.constant dense<0.000000e+00> : vector<8x32xf32>
    %85 = tpu.matmul %82, %84, %cst_74 {dimension_numbers = #tpu.dot_dimension_numbers<[1], [0], [0], [1], [0, 0, 1, 1], [], []>} : vector<8x32xf32>, vector<32x32xf32>, vector<8x32xf32> -> vector<8x32xf32>
    %86 = arith.addf %77, %85 : vector<8x32xf32>
    %c3_75 = arith.constant 3 : index
    %c0_76 = arith.constant 0 : index
    %c0_77 = arith.constant 0 : index
    %87 = vector.load %arg2[%c3_75, %c0_76, %c0_77] : memref<4x8x8xf32, #tpu.memory_space<vmem>>, vector<1x8x8xf32>
    %88 = vector.shape_cast %87 : vector<1x8x8xf32> to vector<8x8xf32>
    %89 = tpu.transpose %88, [1, 0] : vector<8x8xf32> -> vector<8x8xf32>
    %cst_78 = arith.constant dense<0.000000e+00> : vector<8x8xf32>
    %90 = tpu.matmul %89, %59, %cst_78 {dimension_numbers = #tpu.dot_dimension_numbers<[1], [0], [0], [1], [0, 0, 1, 1], [], []>} : vector<8x8xf32>, vector<8x8xf32>, vector<8x8xf32> -> vector<8x8xf32>
    %cst_79 = arith.constant dense<0.000000e+00> : vector<8x32xf32>
    %91 = tpu.matmul %90, %2, %cst_79 {dimension_numbers = #tpu.dot_dimension_numbers<[1], [0], [0], [1], [0, 0, 1, 1], [], []>} : vector<8x8xf32>, vector<8x32xf32>, vector<8x32xf32> -> vector<8x32xf32>
    %c7 = arith.constant 7 : index
    %c0_80 = arith.constant 0 : index
    %c0_81 = arith.constant 0 : index
    %92 = vector.load %arg5[%c7, %c0_80, %c0_81] : memref<16x32x32xf32, #tpu.memory_space<vmem>>, vector<1x32x32xf32>
    %93 = vector.shape_cast %92 : vector<1x32x32xf32> to vector<32x32xf32>
    %cst_82 = arith.constant dense<0.000000e+00> : vector<8x32xf32>
    %94 = tpu.matmul %91, %93, %cst_82 {dimension_numbers = #tpu.dot_dimension_numbers<[1], [0], [0], [1], [0, 0, 1, 1], [], []>} : vector<8x32xf32>, vector<32x32xf32>, vector<8x32xf32> -> vector<8x32xf32>
    %95 = arith.addf %86, %94 : vector<8x32xf32>
    %c2_83 = arith.constant 2 : index
    %c0_84 = arith.constant 0 : index
    %c0_85 = arith.constant 0 : index
    %96 = vector.load %arg4[%c2_83, %c0_84, %c0_85] : memref<4x8x8xf32, #tpu.memory_space<vmem>>, vector<1x8x8xf32>
    %97 = vector.shape_cast %96 : vector<1x8x8xf32> to vector<8x8xf32>
    %c0_86 = arith.constant 0 : index
    %c0_87 = arith.constant 0 : index
    %c0_88 = arith.constant 0 : index
    %98 = vector.load %arg2[%c0_86, %c0_87, %c0_88] : memref<4x8x8xf32, #tpu.memory_space<vmem>>, vector<1x8x8xf32>
    %99 = vector.shape_cast %98 : vector<1x8x8xf32> to vector<8x8xf32>
    %100 = tpu.transpose %99, [1, 0] : vector<8x8xf32> -> vector<8x8xf32>
    %cst_89 = arith.constant dense<0.000000e+00> : vector<8x8xf32>
    %101 = tpu.matmul %100, %97, %cst_89 {dimension_numbers = #tpu.dot_dimension_numbers<[1], [0], [0], [1], [0, 0, 1, 1], [], []>} : vector<8x8xf32>, vector<8x8xf32>, vector<8x8xf32> -> vector<8x8xf32>
    %cst_90 = arith.constant dense<0.000000e+00> : vector<8x32xf32>
    %102 = tpu.matmul %101, %2, %cst_90 {dimension_numbers = #tpu.dot_dimension_numbers<[1], [0], [0], [1], [0, 0, 1, 1], [], []>} : vector<8x8xf32>, vector<8x32xf32>, vector<8x32xf32> -> vector<8x32xf32>
    %c8 = arith.constant 8 : index
    %c0_91 = arith.constant 0 : index
    %c0_92 = arith.constant 0 : index
    %103 = vector.load %arg5[%c8, %c0_91, %c0_92] : memref<16x32x32xf32, #tpu.memory_space<vmem>>, vector<1x32x32xf32>
    %104 = vector.shape_cast %103 : vector<1x32x32xf32> to vector<32x32xf32>
    %cst_93 = arith.constant dense<0.000000e+00> : vector<8x32xf32>
    %105 = tpu.matmul %102, %104, %cst_93 {dimension_numbers = #tpu.dot_dimension_numbers<[1], [0], [0], [1], [0, 0, 1, 1], [], []>} : vector<8x32xf32>, vector<32x32xf32>, vector<8x32xf32> -> vector<8x32xf32>
    %106 = arith.addf %95, %105 : vector<8x32xf32>
    %c1_94 = arith.constant 1 : index
    %c0_95 = arith.constant 0 : index
    %c0_96 = arith.constant 0 : index
    %107 = vector.load %arg2[%c1_94, %c0_95, %c0_96] : memref<4x8x8xf32, #tpu.memory_space<vmem>>, vector<1x8x8xf32>
    %108 = vector.shape_cast %107 : vector<1x8x8xf32> to vector<8x8xf32>
    %109 = tpu.transpose %108, [1, 0] : vector<8x8xf32> -> vector<8x8xf32>
    %cst_97 = arith.constant dense<0.000000e+00> : vector<8x8xf32>
    %110 = tpu.matmul %109, %97, %cst_97 {dimension_numbers = #tpu.dot_dimension_numbers<[1], [0], [0], [1], [0, 0, 1, 1], [], []>} : vector<8x8xf32>, vector<8x8xf32>, vector<8x8xf32> -> vector<8x8xf32>
    %cst_98 = arith.constant dense<0.000000e+00> : vector<8x32xf32>
    %111 = tpu.matmul %110, %2, %cst_98 {dimension_numbers = #tpu.dot_dimension_numbers<[1], [0], [0], [1], [0, 0, 1, 1], [], []>} : vector<8x8xf32>, vector<8x32xf32>, vector<8x32xf32> -> vector<8x32xf32>
    %c9 = arith.constant 9 : index
    %c0_99 = arith.constant 0 : index
    %c0_100 = arith.constant 0 : index
    %112 = vector.load %arg5[%c9, %c0_99, %c0_100] : memref<16x32x32xf32, #tpu.memory_space<vmem>>, vector<1x32x32xf32>
    %113 = vector.shape_cast %112 : vector<1x32x32xf32> to vector<32x32xf32>
    %cst_101 = arith.constant dense<0.000000e+00> : vector<8x32xf32>
    %114 = tpu.matmul %111, %113, %cst_101 {dimension_numbers = #tpu.dot_dimension_numbers<[1], [0], [0], [1], [0, 0, 1, 1], [], []>} : vector<8x32xf32>, vector<32x32xf32>, vector<8x32xf32> -> vector<8x32xf32>
    %115 = arith.addf %106, %114 : vector<8x32xf32>
    %c2_102 = arith.constant 2 : index
    %c0_103 = arith.constant 0 : index
    %c0_104 = arith.constant 0 : index
    %116 = vector.load %arg2[%c2_102, %c0_103, %c0_104] : memref<4x8x8xf32, #tpu.memory_space<vmem>>, vector<1x8x8xf32>
    %117 = vector.shape_cast %116 : vector<1x8x8xf32> to vector<8x8xf32>
    %118 = tpu.transpose %117, [1, 0] : vector<8x8xf32> -> vector<8x8xf32>
    %cst_105 = arith.constant dense<0.000000e+00> : vector<8x8xf32>
    %119 = tpu.matmul %118, %97, %cst_105 {dimension_numbers = #tpu.dot_dimension_numbers<[1], [0], [0], [1], [0, 0, 1, 1], [], []>} : vector<8x8xf32>, vector<8x8xf32>, vector<8x8xf32> -> vector<8x8xf32>
    %cst_106 = arith.constant dense<0.000000e+00> : vector<8x32xf32>
    %120 = tpu.matmul %119, %2, %cst_106 {dimension_numbers = #tpu.dot_dimension_numbers<[1], [0], [0], [1], [0, 0, 1, 1], [], []>} : vector<8x8xf32>, vector<8x32xf32>, vector<8x32xf32> -> vector<8x32xf32>
    %c10 = arith.constant 10 : index
    %c0_107 = arith.constant 0 : index
    %c0_108 = arith.constant 0 : index
    %121 = vector.load %arg5[%c10, %c0_107, %c0_108] : memref<16x32x32xf32, #tpu.memory_space<vmem>>, vector<1x32x32xf32>
    %122 = vector.shape_cast %121 : vector<1x32x32xf32> to vector<32x32xf32>
    %cst_109 = arith.constant dense<0.000000e+00> : vector<8x32xf32>
    %123 = tpu.matmul %120, %122, %cst_109 {dimension_numbers = #tpu.dot_dimension_numbers<[1], [0], [0], [1], [0, 0, 1, 1], [], []>} : vector<8x32xf32>, vector<32x32xf32>, vector<8x32xf32> -> vector<8x32xf32>
    %124 = arith.addf %115, %123 : vector<8x32xf32>
    %c3_110 = arith.constant 3 : index
    %c0_111 = arith.constant 0 : index
    %c0_112 = arith.constant 0 : index
    %125 = vector.load %arg2[%c3_110, %c0_111, %c0_112] : memref<4x8x8xf32, #tpu.memory_space<vmem>>, vector<1x8x8xf32>
    %126 = vector.shape_cast %125 : vector<1x8x8xf32> to vector<8x8xf32>
    %127 = tpu.transpose %126, [1, 0] : vector<8x8xf32> -> vector<8x8xf32>
    %cst_113 = arith.constant dense<0.000000e+00> : vector<8x8xf32>
    %128 = tpu.matmul %127, %97, %cst_113 {dimension_numbers = #tpu.dot_dimension_numbers<[1], [0], [0], [1], [0, 0, 1, 1], [], []>} : vector<8x8xf32>, vector<8x8xf32>, vector<8x8xf32> -> vector<8x8xf32>
    %cst_114 = arith.constant dense<0.000000e+00> : vector<8x32xf32>
    %129 = tpu.matmul %128, %2, %cst_114 {dimension_numbers = #tpu.dot_dimension_numbers<[1], [0], [0], [1], [0, 0, 1, 1], [], []>} : vector<8x8xf32>, vector<8x32xf32>, vector<8x32xf32> -> vector<8x32xf32>
    %c11 = arith.constant 11 : index
    %c0_115 = arith.constant 0 : index
    %c0_116 = arith.constant 0 : index
    %130 = vector.load %arg5[%c11, %c0_115, %c0_116] : memref<16x32x32xf32, #tpu.memory_space<vmem>>, vector<1x32x32xf32>
    %131 = vector.shape_cast %130 : vector<1x32x32xf32> to vector<32x32xf32>
    %cst_117 = arith.constant dense<0.000000e+00> : vector<8x32xf32>
    %132 = tpu.matmul %129, %131, %cst_117 {dimension_numbers = #tpu.dot_dimension_numbers<[1], [0], [0], [1], [0, 0, 1, 1], [], []>} : vector<8x32xf32>, vector<32x32xf32>, vector<8x32xf32> -> vector<8x32xf32>
    %133 = arith.addf %124, %132 : vector<8x32xf32>
    %c3_118 = arith.constant 3 : index
    %c0_119 = arith.constant 0 : index
    %c0_120 = arith.constant 0 : index
    %134 = vector.load %arg4[%c3_118, %c0_119, %c0_120] : memref<4x8x8xf32, #tpu.memory_space<vmem>>, vector<1x8x8xf32>
    %135 = vector.shape_cast %134 : vector<1x8x8xf32> to vector<8x8xf32>
    %c0_121 = arith.constant 0 : index
    %c0_122 = arith.constant 0 : index
    %c0_123 = arith.constant 0 : index
    %136 = vector.load %arg2[%c0_121, %c0_122, %c0_123] : memref<4x8x8xf32, #tpu.memory_space<vmem>>, vector<1x8x8xf32>
    %137 = vector.shape_cast %136 : vector<1x8x8xf32> to vector<8x8xf32>
    %138 = tpu.transpose %137, [1, 0] : vector<8x8xf32> -> vector<8x8xf32>
    %cst_124 = arith.constant dense<0.000000e+00> : vector<8x8xf32>
    %139 = tpu.matmul %138, %135, %cst_124 {dimension_numbers = #tpu.dot_dimension_numbers<[1], [0], [0], [1], [0, 0, 1, 1], [], []>} : vector<8x8xf32>, vector<8x8xf32>, vector<8x8xf32> -> vector<8x8xf32>
    %cst_125 = arith.constant dense<0.000000e+00> : vector<8x32xf32>
    %140 = tpu.matmul %139, %2, %cst_125 {dimension_numbers = #tpu.dot_dimension_numbers<[1], [0], [0], [1], [0, 0, 1, 1], [], []>} : vector<8x8xf32>, vector<8x32xf32>, vector<8x32xf32> -> vector<8x32xf32>
    %c12 = arith.constant 12 : index
    %c0_126 = arith.constant 0 : index
    %c0_127 = arith.constant 0 : index
    %141 = vector.load %arg5[%c12, %c0_126, %c0_127] : memref<16x32x32xf32, #tpu.memory_space<vmem>>, vector<1x32x32xf32>
    %142 = vector.shape_cast %141 : vector<1x32x32xf32> to vector<32x32xf32>
    %cst_128 = arith.constant dense<0.000000e+00> : vector<8x32xf32>
    %143 = tpu.matmul %140, %142, %cst_128 {dimension_numbers = #tpu.dot_dimension_numbers<[1], [0], [0], [1], [0, 0, 1, 1], [], []>} : vector<8x32xf32>, vector<32x32xf32>, vector<8x32xf32> -> vector<8x32xf32>
    %144 = arith.addf %133, %143 : vector<8x32xf32>
    %c1_129 = arith.constant 1 : index
    %c0_130 = arith.constant 0 : index
    %c0_131 = arith.constant 0 : index
    %145 = vector.load %arg2[%c1_129, %c0_130, %c0_131] : memref<4x8x8xf32, #tpu.memory_space<vmem>>, vector<1x8x8xf32>
    %146 = vector.shape_cast %145 : vector<1x8x8xf32> to vector<8x8xf32>
    %147 = tpu.transpose %146, [1, 0] : vector<8x8xf32> -> vector<8x8xf32>
    %cst_132 = arith.constant dense<0.000000e+00> : vector<8x8xf32>
    %148 = tpu.matmul %147, %135, %cst_132 {dimension_numbers = #tpu.dot_dimension_numbers<[1], [0], [0], [1], [0, 0, 1, 1], [], []>} : vector<8x8xf32>, vector<8x8xf32>, vector<8x8xf32> -> vector<8x8xf32>
    %cst_133 = arith.constant dense<0.000000e+00> : vector<8x32xf32>
    %149 = tpu.matmul %148, %2, %cst_133 {dimension_numbers = #tpu.dot_dimension_numbers<[1], [0], [0], [1], [0, 0, 1, 1], [], []>} : vector<8x8xf32>, vector<8x32xf32>, vector<8x32xf32> -> vector<8x32xf32>
    %c13 = arith.constant 13 : index
    %c0_134 = arith.constant 0 : index
    %c0_135 = arith.constant 0 : index
    %150 = vector.load %arg5[%c13, %c0_134, %c0_135] : memref<16x32x32xf32, #tpu.memory_space<vmem>>, vector<1x32x32xf32>
    %151 = vector.shape_cast %150 : vector<1x32x32xf32> to vector<32x32xf32>
    %cst_136 = arith.constant dense<0.000000e+00> : vector<8x32xf32>
    %152 = tpu.matmul %149, %151, %cst_136 {dimension_numbers = #tpu.dot_dimension_numbers<[1], [0], [0], [1], [0, 0, 1, 1], [], []>} : vector<8x32xf32>, vector<32x32xf32>, vector<8x32xf32> -> vector<8x32xf32>
    %153 = arith.addf %144, %152 : vector<8x32xf32>
    %c2_137 = arith.constant 2 : index
    %c0_138 = arith.constant 0 : index
    %c0_139 = arith.constant 0 : index
    %154 = vector.load %arg2[%c2_137, %c0_138, %c0_139] : memref<4x8x8xf32, #tpu.memory_space<vmem>>, vector<1x8x8xf32>
    %155 = vector.shape_cast %154 : vector<1x8x8xf32> to vector<8x8xf32>
    %156 = tpu.transpose %155, [1, 0] : vector<8x8xf32> -> vector<8x8xf32>
    %cst_140 = arith.constant dense<0.000000e+00> : vector<8x8xf32>
    %157 = tpu.matmul %156, %135, %cst_140 {dimension_numbers = #tpu.dot_dimension_numbers<[1], [0], [0], [1], [0, 0, 1, 1], [], []>} : vector<8x8xf32>, vector<8x8xf32>, vector<8x8xf32> -> vector<8x8xf32>
    %cst_141 = arith.constant dense<0.000000e+00> : vector<8x32xf32>
    %158 = tpu.matmul %157, %2, %cst_141 {dimension_numbers = #tpu.dot_dimension_numbers<[1], [0], [0], [1], [0, 0, 1, 1], [], []>} : vector<8x8xf32>, vector<8x32xf32>, vector<8x32xf32> -> vector<8x32xf32>
    %c14 = arith.constant 14 : index
    %c0_142 = arith.constant 0 : index
    %c0_143 = arith.constant 0 : index
    %159 = vector.load %arg5[%c14, %c0_142, %c0_143] : memref<16x32x32xf32, #tpu.memory_space<vmem>>, vector<1x32x32xf32>
    %160 = vector.shape_cast %159 : vector<1x32x32xf32> to vector<32x32xf32>
    %cst_144 = arith.constant dense<0.000000e+00> : vector<8x32xf32>
    %161 = tpu.matmul %158, %160, %cst_144 {dimension_numbers = #tpu.dot_dimension_numbers<[1], [0], [0], [1], [0, 0, 1, 1], [], []>} : vector<8x32xf32>, vector<32x32xf32>, vector<8x32xf32> -> vector<8x32xf32>
    %162 = arith.addf %153, %161 : vector<8x32xf32>
    %c3_145 = arith.constant 3 : index
    %c0_146 = arith.constant 0 : index
    %c0_147 = arith.constant 0 : index
    %163 = vector.load %arg2[%c3_145, %c0_146, %c0_147] : memref<4x8x8xf32, #tpu.memory_space<vmem>>, vector<1x8x8xf32>
    %164 = vector.shape_cast %163 : vector<1x8x8xf32> to vector<8x8xf32>
    %165 = tpu.transpose %164, [1, 0] : vector<8x8xf32> -> vector<8x8xf32>
    %cst_148 = arith.constant dense<0.000000e+00> : vector<8x8xf32>
    %166 = tpu.matmul %165, %135, %cst_148 {dimension_numbers = #tpu.dot_dimension_numbers<[1], [0], [0], [1], [0, 0, 1, 1], [], []>} : vector<8x8xf32>, vector<8x8xf32>, vector<8x8xf32> -> vector<8x8xf32>
    %cst_149 = arith.constant dense<0.000000e+00> : vector<8x32xf32>
    %167 = tpu.matmul %166, %2, %cst_149 {dimension_numbers = #tpu.dot_dimension_numbers<[1], [0], [0], [1], [0, 0, 1, 1], [], []>} : vector<8x8xf32>, vector<8x32xf32>, vector<8x32xf32> -> vector<8x32xf32>
    %c15 = arith.constant 15 : index
    %c0_150 = arith.constant 0 : index
    %c0_151 = arith.constant 0 : index
    %168 = vector.load %arg5[%c15, %c0_150, %c0_151] : memref<16x32x32xf32, #tpu.memory_space<vmem>>, vector<1x32x32xf32>
    %169 = vector.shape_cast %168 : vector<1x32x32xf32> to vector<32x32xf32>
    %cst_152 = arith.constant dense<0.000000e+00> : vector<8x32xf32>
    %170 = tpu.matmul %167, %169, %cst_152 {dimension_numbers = #tpu.dot_dimension_numbers<[1], [0], [0], [1], [0, 0, 1, 1], [], []>} : vector<8x32xf32>, vector<32x32xf32>, vector<8x32xf32> -> vector<8x32xf32>
    %171 = arith.addf %162, %170 : vector<8x32xf32>
    %172 = vector.extract_strided_slice %171 {offsets = [0, 0], sizes = [8, 8], strides = [1, 1]} : vector<8x32xf32> to vector<8x8xf32>
    %173 = tpu.transpose %172, [1, 0] : vector<8x8xf32> -> vector<8x8xf32>
    %174 = arith.addf %172, %173 : vector<8x8xf32>
    %cst_153 = arith.constant 5.000000e-01 : f32
    %175 = vector.broadcast %cst_153 : f32 to vector<8x8xf32>
    %176 = arith.mulf %175, %174 : vector<8x8xf32>
    %177 = math.absf %176 : vector<8x8xf32>
    %178 = vector.shape_cast %177 : vector<8x8xf32> to vector<1x8x8xf32>
    %cst_154 = arith.constant dense<0xFF800000> : vector<1xf32>
    %179 = vector.multi_reduction <maximumf>, %178, %cst_154 [1, 2] : vector<1x8x8xf32> to vector<1xf32>
    %180 = vector.shape_cast %179 : vector<1xf32> to vector<1x1x1xf32>
    %181 = vector.extract %180[0, 0, 0] : f32 from vector<1x1x1xf32>
    %cst_155 = arith.constant 1.000000e-30 : f32
    %182 = arith.maximumf %cst_155, %181 : f32
    %183 = vector.extract_strided_slice %171 {offsets = [0, 8], sizes = [8, 8], strides = [1, 1]} : vector<8x32xf32> to vector<8x8xf32>
    %184 = tpu.transpose %183, [1, 0] : vector<8x8xf32> -> vector<8x8xf32>
    %185 = arith.addf %183, %184 : vector<8x8xf32>
    %cst_156 = arith.constant 5.000000e-01 : f32
    %186 = vector.broadcast %cst_156 : f32 to vector<8x8xf32>
    %187 = arith.mulf %186, %185 : vector<8x8xf32>
    %188 = math.absf %187 : vector<8x8xf32>
    %189 = vector.shape_cast %188 : vector<8x8xf32> to vector<1x8x8xf32>
    %cst_157 = arith.constant dense<0xFF800000> : vector<1xf32>
    %190 = vector.multi_reduction <maximumf>, %189, %cst_157 [1, 2] : vector<1x8x8xf32> to vector<1xf32>
    %191 = vector.shape_cast %190 : vector<1xf32> to vector<1x1x1xf32>
    %192 = vector.extract %191[0, 0, 0] : f32 from vector<1x1x1xf32>
    %193 = arith.maximumf %182, %192 : f32
    %194 = vector.extract_strided_slice %171 {offsets = [0, 16], sizes = [8, 8], strides = [1, 1]} : vector<8x32xf32> to vector<8x8xf32>
    %195 = tpu.transpose %194, [1, 0] : vector<8x8xf32> -> vector<8x8xf32>
    %196 = arith.addf %194, %195 : vector<8x8xf32>
    %cst_158 = arith.constant 5.000000e-01 : f32
    %197 = vector.broadcast %cst_158 : f32 to vector<8x8xf32>
    %198 = arith.mulf %197, %196 : vector<8x8xf32>
    %199 = math.absf %198 : vector<8x8xf32>
    %200 = vector.shape_cast %199 : vector<8x8xf32> to vector<1x8x8xf32>
    %cst_159 = arith.constant dense<0xFF800000> : vector<1xf32>
    %201 = vector.multi_reduction <maximumf>, %200, %cst_159 [1, 2] : vector<1x8x8xf32> to vector<1xf32>
    %202 = vector.shape_cast %201 : vector<1xf32> to vector<1x1x1xf32>
    %203 = vector.extract %202[0, 0, 0] : f32 from vector<1x1x1xf32>
    %204 = arith.maximumf %193, %203 : f32
    %205 = vector.extract_strided_slice %171 {offsets = [0, 24], sizes = [8, 8], strides = [1, 1]} : vector<8x32xf32> to vector<8x8xf32>
    %206 = tpu.transpose %205, [1, 0] : vector<8x8xf32> -> vector<8x8xf32>
    %207 = arith.addf %205, %206 : vector<8x8xf32>
    %cst_160 = arith.constant 5.000000e-01 : f32
    %208 = vector.broadcast %cst_160 : f32 to vector<8x8xf32>
    %209 = arith.mulf %208, %207 : vector<8x8xf32>
    %210 = math.absf %209 : vector<8x8xf32>
    %211 = vector.shape_cast %210 : vector<8x8xf32> to vector<1x8x8xf32>
    %cst_161 = arith.constant dense<0xFF800000> : vector<1xf32>
    %212 = vector.multi_reduction <maximumf>, %211, %cst_161 [1, 2] : vector<1x8x8xf32> to vector<1xf32>
    %213 = vector.shape_cast %212 : vector<1xf32> to vector<1x1x1xf32>
    %214 = vector.extract %213[0, 0, 0] : f32 from vector<1x1x1xf32>
    %215 = arith.maximumf %204, %214 : f32
    %cst_162 = arith.constant 1.000000e+00 : f32
    %216 = arith.divf %cst_162, %215 : f32
    %217 = vector.broadcast %216 : f32 to vector<8x8xf32>
    %218 = arith.mulf %176, %217 : vector<8x8xf32>
    %c0_163 = arith.constant 0 : index
    %c0_164 = arith.constant 0 : index
    %c0_165 = arith.constant 0 : index
    %219 = vector.load %arg7[%c0_163, %c0_164, %c0_165] : memref<4x8x8xf32, #tpu.memory_space<vmem>>, vector<1x8x8xf32>
    %220 = vector.shape_cast %219 : vector<1x8x8xf32> to vector<8x8xf32>
    %221 = vector.shape_cast %218 : vector<8x8xf32> to vector<1x8x8xf32>
    tpu.vector_store %arg7[%c0_163, %c0_164, %c0_165], %221 {strides = array<i32>} : memref<4x8x8xf32, #tpu.memory_space<vmem>>, vector<1x8x8xf32>,
    %c0_166 = arith.constant 0 : index
    %c0_167 = arith.constant 0 : index
    %222 = vector.load %arg8[%c0_166, %c0_167] : memref<8x32xf32, #tpu.memory_space<vmem>>, vector<8x8xf32>
    tpu.vector_store %arg8[%c0_166, %c0_167], %218 {strides = array<i32>} : memref<8x32xf32, #tpu.memory_space<vmem>>, vector<8x8xf32>,
    %223 = vector.broadcast %216 : f32 to vector<8x8xf32>
    %224 = arith.mulf %187, %223 : vector<8x8xf32>
    %c1_168 = arith.constant 1 : index
    %c0_169 = arith.constant 0 : index
    %c0_170 = arith.constant 0 : index
    %225 = vector.load %arg7[%c1_168, %c0_169, %c0_170] : memref<4x8x8xf32, #tpu.memory_space<vmem>>, vector<1x8x8xf32>
    %226 = vector.shape_cast %225 : vector<1x8x8xf32> to vector<8x8xf32>
    %227 = vector.shape_cast %224 : vector<8x8xf32> to vector<1x8x8xf32>
    tpu.vector_store %arg7[%c1_168, %c0_169, %c0_170], %227 {strides = array<i32>} : memref<4x8x8xf32, #tpu.memory_space<vmem>>, vector<1x8x8xf32>,
    %c0_171 = arith.constant 0 : index
    %c8_172 = arith.constant 8 : index
    %228 = vector.load %arg8[%c0_171, %c8_172] : memref<8x32xf32, #tpu.memory_space<vmem>>, vector<8x8xf32>
    tpu.vector_store %arg8[%c0_171, %c8_172], %224 {strides = array<i32>} : memref<8x32xf32, #tpu.memory_space<vmem>>, vector<8x8xf32>,
    %229 = vector.broadcast %216 : f32 to vector<8x8xf32>
    %230 = arith.mulf %198, %229 : vector<8x8xf32>
    %c2_173 = arith.constant 2 : index
    %c0_174 = arith.constant 0 : index
    %c0_175 = arith.constant 0 : index
    %231 = vector.load %arg7[%c2_173, %c0_174, %c0_175] : memref<4x8x8xf32, #tpu.memory_space<vmem>>, vector<1x8x8xf32>
    %232 = vector.shape_cast %231 : vector<1x8x8xf32> to vector<8x8xf32>
    %233 = vector.shape_cast %230 : vector<8x8xf32> to vector<1x8x8xf32>
    tpu.vector_store %arg7[%c2_173, %c0_174, %c0_175], %233 {strides = array<i32>} : memref<4x8x8xf32, #tpu.memory_space<vmem>>, vector<1x8x8xf32>,
    %c0_176 = arith.constant 0 : index
    %c16 = arith.constant 16 : index
    %234 = vector.load %arg8[%c0_176, %c16] : memref<8x32xf32, #tpu.memory_space<vmem>>, vector<8x8xf32>
    tpu.vector_store %arg8[%c0_176, %c16], %230 {strides = array<i32>} : memref<8x32xf32, #tpu.memory_space<vmem>>, vector<8x8xf32>,
    %235 = vector.broadcast %216 : f32 to vector<8x8xf32>
    %236 = arith.mulf %209, %235 : vector<8x8xf32>
    %c3_177 = arith.constant 3 : index
    %c0_178 = arith.constant 0 : index
    %c0_179 = arith.constant 0 : index
    %237 = vector.load %arg7[%c3_177, %c0_178, %c0_179] : memref<4x8x8xf32, #tpu.memory_space<vmem>>, vector<1x8x8xf32>
    %238 = vector.shape_cast %237 : vector<1x8x8xf32> to vector<8x8xf32>
    %239 = vector.shape_cast %236 : vector<8x8xf32> to vector<1x8x8xf32>
    tpu.vector_store %arg7[%c3_177, %c0_178, %c0_179], %239 {strides = array<i32>} : memref<4x8x8xf32, #tpu.memory_space<vmem>>, vector<1x8x8xf32>,
    %c0_180 = arith.constant 0 : index
    %c24 = arith.constant 24 : index
    %240 = vector.load %arg8[%c0_180, %c24] : memref<8x32xf32, #tpu.memory_space<vmem>>, vector<8x8xf32>
    tpu.vector_store %arg8[%c0_180, %c24], %236 {strides = array<i32>} : memref<8x32xf32, #tpu.memory_space<vmem>>, vector<8x8xf32>,
    return
  }
}

module attributes {stable_mosaic.version = 11 : i64} {
  func.func @_renorm_kernel(%arg0: memref<32x32xf32, #tpu.memory_space<vmem>>, %arg1: memref<32x8xf32, #tpu.memory_space<vmem>>, %arg2: memref<4x8x8xf32, #tpu.memory_space<vmem>>, %arg3: memref<8x32xf32, #tpu.memory_space<vmem>>, %arg4: memref<4x8x8xf32, #tpu.memory_space<vmem>>, %arg5: memref<16x32x32xf32, #tpu.memory_space<vmem>>, %arg6: memref<8x8xf32, #tpu.memory_space<vmem>>, %arg7: memref<4x8x8xf32, #tpu.memory_space<vmem>>, %arg8: memref<8x32xf32, #tpu.memory_space<vmem>>) attributes {dimension_semantics = [], scalar_prefetch = 0 : i64, scratch_operands = 0 : i64, tpu.core_type = #tpu.core_type<tc>} {
    %c0 = arith.constant 0 : index
    %c0_0 = arith.constant 0 : index
    %0 = vector.load %arg1[%c0, %c0_0] : memref<32x8xf32, #tpu.memory_space<vmem>>, vector<32x8xf32>
    %c0_1 = arith.constant 0 : index
    %c0_2 = arith.constant 0 : index
    %1 = vector.load %arg0[%c0_1, %c0_2] : memref<32x32xf32, #tpu.memory_space<vmem>>, vector<32x32xf32>
    %c0_3 = arith.constant 0 : index
    %c0_4 = arith.constant 0 : index
    %2 = vector.load %arg3[%c0_3, %c0_4] : memref<8x32xf32, #tpu.memory_space<vmem>>, vector<8x32xf32>
    %3 = tpu.transpose %0, [1, 0] : vector<32x8xf32> -> vector<8x32xf32>
    %cst = arith.constant dense<0.000000e+00> : vector<8x32xf32>
    %4 = tpu.matmul %3, %1, %cst {dimension_numbers = #tpu.dot_dimension_numbers<[1], [0], [0], [1], [0, 0, 1, 1], [], []>} : vector<8x32xf32>, vector<32x32xf32>, vector<8x32xf32> -> vector<8x32xf32>
    %cst_5 = arith.constant dense<0.000000e+00> : vector<8x8xf32>
    %5 = tpu.matmul %4, %0, %cst_5 {dimension_numbers = #tpu.dot_dimension_numbers<[1], [0], [0], [1], [0, 0, 1, 1], [], []>} : vector<8x32xf32>, vector<32x8xf32>, vector<8x8xf32> -> vector<8x8xf32>
    %6 = tpu.transpose %5, [1, 0] : vector<8x8xf32> -> vector<8x8xf32>
    %7 = arith.addf %5, %6 : vector<8x8xf32>
    %cst_6 = arith.constant 5.000000e-01 : f32
    %8 = vector.broadcast %cst_6 : f32 to vector<8x8xf32>
    %9 = arith.mulf %8, %7 : vector<8x8xf32>
    %10 = math.absf %9 : vector<8x8xf32>
    %11 = vector.shape_cast %10 : vector<8x8xf32> to vector<1x8x8xf32>
    %cst_7 = arith.constant dense<0xFF800000> : vector<1xf32>
    %12 = vector.multi_reduction <maximumf>, %11, %cst_7 [1, 2] : vector<1x8x8xf32> to vector<1xf32>
    %13 = vector.shape_cast %12 : vector<1xf32> to vector<1x1x1xf32>
    %14 = vector.extract %13[0, 0, 0] : f32 from vector<1x1x1xf32>
    %cst_8 = arith.constant 1.000000e-30 : f32
    %15 = arith.maximumf %14, %cst_8 : f32
    %16 = vector.broadcast %15 : f32 to vector<8x8xf32>
    %17 = arith.divf %9, %16 : vector<8x8xf32>
    %c0_9 = arith.constant 0 : index
    %c0_10 = arith.constant 0 : index
    %18 = vector.load %arg6[%c0_9, %c0_10] : memref<8x8xf32, #tpu.memory_space<vmem>>, vector<8x8xf32>
    tpu.vector_store %arg6[%c0_9, %c0_10], %17 {strides = array<i32>} : memref<8x8xf32, #tpu.memory_space<vmem>>, vector<8x8xf32>,
    %cst_11 = arith.constant 0.000000e+00 : f32
    %19 = vector.broadcast %cst_11 : f32 to vector<8x32xf32>
    %c0_12 = arith.constant 0 : index
    %c0_13 = arith.constant 0 : index
    %c0_14 = arith.constant 0 : index
    %20 = vector.load %arg4[%c0_12, %c0_13, %c0_14] : memref<4x8x8xf32, #tpu.memory_space<vmem>>, vector<1x8x8xf32>
    %21 = vector.shape_cast %20 : vector<1x8x8xf32> to vector<8x8xf32>
    %c0_15 = arith.constant 0 : index
    %c0_16 = arith.constant 0 : index
    %c0_17 = arith.constant 0 : index
    %22 = vector.load %arg2[%c0_15, %c0_16, %c0_17] : memref<4x8x8xf32, #tpu.memory_space<vmem>>, vector<1x8x8xf32>
    %23 = vector.shape_cast %22 : vector<1x8x8xf32> to vector<8x8xf32>
    %24 = tpu.transpose %23, [1, 0] : vector<8x8xf32> -> vector<8x8xf32>
    %cst_18 = arith.constant dense<0.000000e+00> : vector<8x8xf32>
    %25 = tpu.matmul %24, %21, %cst_18 {dimension_numbers = #tpu.dot_dimension_numbers<[1], [0], [0], [1], [0, 0, 1, 1], [], []>} : vector<8x8xf32>, vector<8x8xf32>, vector<8x8xf32> -> vector<8x8xf32>
    %cst_19 = arith.constant dense<0.000000e+00> : vector<8x32xf32>
    %26 = tpu.matmul %25, %2, %cst_19 {dimension_numbers = #tpu.dot_dimension_numbers<[1], [0], [0], [1], [0, 0, 1, 1], [], []>} : vector<8x8xf32>, vector<8x32xf32>, vector<8x32xf32> -> vector<8x32xf32>
    %c0_20 = arith.constant 0 : index
    %c0_21 = arith.constant 0 : index
    %c0_22 = arith.constant 0 : index
    %27 = vector.load %arg5[%c0_20, %c0_21, %c0_22] : memref<16x32x32xf32, #tpu.memory_space<vmem>>, vector<1x32x32xf32>
    %28 = vector.shape_cast %27 : vector<1x32x32xf32> to vector<32x32xf32>
    %cst_23 = arith.constant dense<0.000000e+00> : vector<8x32xf32>
    %29 = tpu.matmul %26, %28, %cst_23 {dimension_numbers = #tpu.dot_dimension_numbers<[1], [0], [0], [1], [0, 0, 1, 1], [], []>} : vector<8x32xf32>, vector<32x32xf32>, vector<8x32xf32> -> vector<8x32xf32>
    %30 = arith.addf %19, %29 : vector<8x32xf32>
    %c1 = arith.constant 1 : index
    %c0_24 = arith.constant 0 : index
    %c0_25 = arith.constant 0 : index
    %31 = vector.load %arg2[%c1, %c0_24, %c0_25] : memref<4x8x8xf32, #tpu.memory_space<vmem>>, vector<1x8x8xf32>
    %32 = vector.shape_cast %31 : vector<1x8x8xf32> to vector<8x8xf32>
    %33 = tpu.transpose %32, [1, 0] : vector<8x8xf32> -> vector<8x8xf32>
    %cst_26 = arith.constant dense<0.000000e+00> : vector<8x8xf32>
    %34 = tpu.matmul %33, %21, %cst_26 {dimension_numbers = #tpu.dot_dimension_numbers<[1], [0], [0], [1], [0, 0, 1, 1], [], []>} : vector<8x8xf32>, vector<8x8xf32>, vector<8x8xf32> -> vector<8x8xf32>
    %cst_27 = arith.constant dense<0.000000e+00> : vector<8x32xf32>
    %35 = tpu.matmul %34, %2, %cst_27 {dimension_numbers = #tpu.dot_dimension_numbers<[1], [0], [0], [1], [0, 0, 1, 1], [], []>} : vector<8x8xf32>, vector<8x32xf32>, vector<8x32xf32> -> vector<8x32xf32>
    %c1_28 = arith.constant 1 : index
    %c0_29 = arith.constant 0 : index
    %c0_30 = arith.constant 0 : index
    %36 = vector.load %arg5[%c1_28, %c0_29, %c0_30] : memref<16x32x32xf32, #tpu.memory_space<vmem>>, vector<1x32x32xf32>
    %37 = vector.shape_cast %36 : vector<1x32x32xf32> to vector<32x32xf32>
    %cst_31 = arith.constant dense<0.000000e+00> : vector<8x32xf32>
    %38 = tpu.matmul %35, %37, %cst_31 {dimension_numbers = #tpu.dot_dimension_numbers<[1], [0], [0], [1], [0, 0, 1, 1], [], []>} : vector<8x32xf32>, vector<32x32xf32>, vector<8x32xf32> -> vector<8x32xf32>
    %39 = arith.addf %30, %38 : vector<8x32xf32>
    %c2 = arith.constant 2 : index
    %c0_32 = arith.constant 0 : index
    %c0_33 = arith.constant 0 : index
    %40 = vector.load %arg2[%c2, %c0_32, %c0_33] : memref<4x8x8xf32, #tpu.memory_space<vmem>>, vector<1x8x8xf32>
    %41 = vector.shape_cast %40 : vector<1x8x8xf32> to vector<8x8xf32>
    %42 = tpu.transpose %41, [1, 0] : vector<8x8xf32> -> vector<8x8xf32>
    %cst_34 = arith.constant dense<0.000000e+00> : vector<8x8xf32>
    %43 = tpu.matmul %42, %21, %cst_34 {dimension_numbers = #tpu.dot_dimension_numbers<[1], [0], [0], [1], [0, 0, 1, 1], [], []>} : vector<8x8xf32>, vector<8x8xf32>, vector<8x8xf32> -> vector<8x8xf32>
    %cst_35 = arith.constant dense<0.000000e+00> : vector<8x32xf32>
    %44 = tpu.matmul %43, %2, %cst_35 {dimension_numbers = #tpu.dot_dimension_numbers<[1], [0], [0], [1], [0, 0, 1, 1], [], []>} : vector<8x8xf32>, vector<8x32xf32>, vector<8x32xf32> -> vector<8x32xf32>
    %c2_36 = arith.constant 2 : index
    %c0_37 = arith.constant 0 : index
    %c0_38 = arith.constant 0 : index
    %45 = vector.load %arg5[%c2_36, %c0_37, %c0_38] : memref<16x32x32xf32, #tpu.memory_space<vmem>>, vector<1x32x32xf32>
    %46 = vector.shape_cast %45 : vector<1x32x32xf32> to vector<32x32xf32>
    %cst_39 = arith.constant dense<0.000000e+00> : vector<8x32xf32>
    %47 = tpu.matmul %44, %46, %cst_39 {dimension_numbers = #tpu.dot_dimension_numbers<[1], [0], [0], [1], [0, 0, 1, 1], [], []>} : vector<8x32xf32>, vector<32x32xf32>, vector<8x32xf32> -> vector<8x32xf32>
    %48 = arith.addf %39, %47 : vector<8x32xf32>
    %c3 = arith.constant 3 : index
    %c0_40 = arith.constant 0 : index
    %c0_41 = arith.constant 0 : index
    %49 = vector.load %arg2[%c3, %c0_40, %c0_41] : memref<4x8x8xf32, #tpu.memory_space<vmem>>, vector<1x8x8xf32>
    %50 = vector.shape_cast %49 : vector<1x8x8xf32> to vector<8x8xf32>
    %51 = tpu.transpose %50, [1, 0] : vector<8x8xf32> -> vector<8x8xf32>
    %cst_42 = arith.constant dense<0.000000e+00> : vector<8x8xf32>
    %52 = tpu.matmul %51, %21, %cst_42 {dimension_numbers = #tpu.dot_dimension_numbers<[1], [0], [0], [1], [0, 0, 1, 1], [], []>} : vector<8x8xf32>, vector<8x8xf32>, vector<8x8xf32> -> vector<8x8xf32>
    %cst_43 = arith.constant dense<0.000000e+00> : vector<8x32xf32>
    %53 = tpu.matmul %52, %2, %cst_43 {dimension_numbers = #tpu.dot_dimension_numbers<[1], [0], [0], [1], [0, 0, 1, 1], [], []>} : vector<8x8xf32>, vector<8x32xf32>, vector<8x32xf32> -> vector<8x32xf32>
    %c3_44 = arith.constant 3 : index
    %c0_45 = arith.constant 0 : index
    %c0_46 = arith.constant 0 : index
    %54 = vector.load %arg5[%c3_44, %c0_45, %c0_46] : memref<16x32x32xf32, #tpu.memory_space<vmem>>, vector<1x32x32xf32>
    %55 = vector.shape_cast %54 : vector<1x32x32xf32> to vector<32x32xf32>
    %cst_47 = arith.constant dense<0.000000e+00> : vector<8x32xf32>
    %56 = tpu.matmul %53, %55, %cst_47 {dimension_numbers = #tpu.dot_dimension_numbers<[1], [0], [0], [1], [0, 0, 1, 1], [], []>} : vector<8x32xf32>, vector<32x32xf32>, vector<8x32xf32> -> vector<8x32xf32>
    %57 = arith.addf %48, %56 : vector<8x32xf32>
    %c1_48 = arith.constant 1 : index
    %c0_49 = arith.constant 0 : index
    %c0_50 = arith.constant 0 : index
    %58 = vector.load %arg4[%c1_48, %c0_49, %c0_50] : memref<4x8x8xf32, #tpu.memory_space<vmem>>, vector<1x8x8xf32>
    %59 = vector.shape_cast %58 : vector<1x8x8xf32> to vector<8x8xf32>
    %c0_51 = arith.constant 0 : index
    %c0_52 = arith.constant 0 : index
    %c0_53 = arith.constant 0 : index
    %60 = vector.load %arg2[%c0_51, %c0_52, %c0_53] : memref<4x8x8xf32, #tpu.memory_space<vmem>>, vector<1x8x8xf32>
    %61 = vector.shape_cast %60 : vector<1x8x8xf32> to vector<8x8xf32>
    %62 = tpu.transpose %61, [1, 0] : vector<8x8xf32> -> vector<8x8xf32>
    %cst_54 = arith.constant dense<0.000000e+00> : vector<8x8xf32>
    %63 = tpu.matmul %62, %59, %cst_54 {dimension_numbers = #tpu.dot_dimension_numbers<[1], [0], [0], [1], [0, 0, 1, 1], [], []>} : vector<8x8xf32>, vector<8x8xf32>, vector<8x8xf32> -> vector<8x8xf32>
    %cst_55 = arith.constant dense<0.000000e+00> : vector<8x32xf32>
    %64 = tpu.matmul %63, %2, %cst_55 {dimension_numbers = #tpu.dot_dimension_numbers<[1], [0], [0], [1], [0, 0, 1, 1], [], []>} : vector<8x8xf32>, vector<8x32xf32>, vector<8x32xf32> -> vector<8x32xf32>
    %c4 = arith.constant 4 : index
    %c0_56 = arith.constant 0 : index
    %c0_57 = arith.constant 0 : index
    %65 = vector.load %arg5[%c4, %c0_56, %c0_57] : memref<16x32x32xf32, #tpu.memory_space<vmem>>, vector<1x32x32xf32>
    %66 = vector.shape_cast %65 : vector<1x32x32xf32> to vector<32x32xf32>
    %cst_58 = arith.constant dense<0.000000e+00> : vector<8x32xf32>
    %67 = tpu.matmul %64, %66, %cst_58 {dimension_numbers = #tpu.dot_dimension_numbers<[1], [0], [0], [1], [0, 0, 1, 1], [], []>} : vector<8x32xf32>, vector<32x32xf32>, vector<8x32xf32> -> vector<8x32xf32>
    %68 = arith.addf %57, %67 : vector<8x32xf32>
    %c1_59 = arith.constant 1 : index
    %c0_60 = arith.constant 0 : index
    %c0_61 = arith.constant 0 : index
    %69 = vector.load %arg2[%c1_59, %c0_60, %c0_61] : memref<4x8x8xf32, #tpu.memory_space<vmem>>, vector<1x8x8xf32>
    %70 = vector.shape_cast %69 : vector<1x8x8xf32> to vector<8x8xf32>
    %71 = tpu.transpose %70, [1, 0] : vector<8x8xf32> -> vector<8x8xf32>
    %cst_62 = arith.constant dense<0.000000e+00> : vector<8x8xf32>
    %72 = tpu.matmul %71, %59, %cst_62 {dimension_numbers = #tpu.dot_dimension_numbers<[1], [0], [0], [1], [0, 0, 1, 1], [], []>} : vector<8x8xf32>, vector<8x8xf32>, vector<8x8xf32> -> vector<8x8xf32>
    %cst_63 = arith.constant dense<0.000000e+00> : vector<8x32xf32>
    %73 = tpu.matmul %72, %2, %cst_63 {dimension_numbers = #tpu.dot_dimension_numbers<[1], [0], [0], [1], [0, 0, 1, 1], [], []>} : vector<8x8xf32>, vector<8x32xf32>, vector<8x32xf32> -> vector<8x32xf32>
    %c5 = arith.constant 5 : index
    %c0_64 = arith.constant 0 : index
    %c0_65 = arith.constant 0 : index
    %74 = vector.load %arg5[%c5, %c0_64, %c0_65] : memref<16x32x32xf32, #tpu.memory_space<vmem>>, vector<1x32x32xf32>
    %75 = vector.shape_cast %74 : vector<1x32x32xf32> to vector<32x32xf32>
    %cst_66 = arith.constant dense<0.000000e+00> : vector<8x32xf32>
    %76 = tpu.matmul %73, %75, %cst_66 {dimension_numbers = #tpu.dot_dimension_numbers<[1], [0], [0], [1], [0, 0, 1, 1], [], []>} : vector<8x32xf32>, vector<32x32xf32>, vector<8x32xf32> -> vector<8x32xf32>
    %77 = arith.addf %68, %76 : vector<8x32xf32>
    %c2_67 = arith.constant 2 : index
    %c0_68 = arith.constant 0 : index
    %c0_69 = arith.constant 0 : index
    %78 = vector.load %arg2[%c2_67, %c0_68, %c0_69] : memref<4x8x8xf32, #tpu.memory_space<vmem>>, vector<1x8x8xf32>
    %79 = vector.shape_cast %78 : vector<1x8x8xf32> to vector<8x8xf32>
    %80 = tpu.transpose %79, [1, 0] : vector<8x8xf32> -> vector<8x8xf32>
    %cst_70 = arith.constant dense<0.000000e+00> : vector<8x8xf32>
    %81 = tpu.matmul %80, %59, %cst_70 {dimension_numbers = #tpu.dot_dimension_numbers<[1], [0], [0], [1], [0, 0, 1, 1], [], []>} : vector<8x8xf32>, vector<8x8xf32>, vector<8x8xf32> -> vector<8x8xf32>
    %cst_71 = arith.constant dense<0.000000e+00> : vector<8x32xf32>
    %82 = tpu.matmul %81, %2, %cst_71 {dimension_numbers = #tpu.dot_dimension_numbers<[1], [0], [0], [1], [0, 0, 1, 1], [], []>} : vector<8x8xf32>, vector<8x32xf32>, vector<8x32xf32> -> vector<8x32xf32>
    %c6 = arith.constant 6 : index
    %c0_72 = arith.constant 0 : index
    %c0_73 = arith.constant 0 : index
    %83 = vector.load %arg5[%c6, %c0_72, %c0_73] : memref<16x32x32xf32, #tpu.memory_space<vmem>>, vector<1x32x32xf32>
    %84 = vector.shape_cast %83 : vector<1x32x32xf32> to vector<32x32xf32>
    %cst_74 = arith.constant dense<0.000000e+00> : vector<8x32xf32>
    %85 = tpu.matmul %82, %84, %cst_74 {dimension_numbers = #tpu.dot_dimension_numbers<[1], [0], [0], [1], [0, 0, 1, 1], [], []>} : vector<8x32xf32>, vector<32x32xf32>, vector<8x32xf32> -> vector<8x32xf32>
    %86 = arith.addf %77, %85 : vector<8x32xf32>
    %c3_75 = arith.constant 3 : index
    %c0_76 = arith.constant 0 : index
    %c0_77 = arith.constant 0 : index
    %87 = vector.load %arg2[%c3_75, %c0_76, %c0_77] : memref<4x8x8xf32, #tpu.memory_space<vmem>>, vector<1x8x8xf32>
    %88 = vector.shape_cast %87 : vector<1x8x8xf32> to vector<8x8xf32>
    %89 = tpu.transpose %88, [1, 0] : vector<8x8xf32> -> vector<8x8xf32>
    %cst_78 = arith.constant dense<0.000000e+00> : vector<8x8xf32>
    %90 = tpu.matmul %89, %59, %cst_78 {dimension_numbers = #tpu.dot_dimension_numbers<[1], [0], [0], [1], [0, 0, 1, 1], [], []>} : vector<8x8xf32>, vector<8x8xf32>, vector<8x8xf32> -> vector<8x8xf32>
    %cst_79 = arith.constant dense<0.000000e+00> : vector<8x32xf32>
    %91 = tpu.matmul %90, %2, %cst_79 {dimension_numbers = #tpu.dot_dimension_numbers<[1], [0], [0], [1], [0, 0, 1, 1], [], []>} : vector<8x8xf32>, vector<8x32xf32>, vector<8x32xf32> -> vector<8x32xf32>
    %c7 = arith.constant 7 : index
    %c0_80 = arith.constant 0 : index
    %c0_81 = arith.constant 0 : index
    %92 = vector.load %arg5[%c7, %c0_80, %c0_81] : memref<16x32x32xf32, #tpu.memory_space<vmem>>, vector<1x32x32xf32>
    %93 = vector.shape_cast %92 : vector<1x32x32xf32> to vector<32x32xf32>
    %cst_82 = arith.constant dense<0.000000e+00> : vector<8x32xf32>
    %94 = tpu.matmul %91, %93, %cst_82 {dimension_numbers = #tpu.dot_dimension_numbers<[1], [0], [0], [1], [0, 0, 1, 1], [], []>} : vector<8x32xf32>, vector<32x32xf32>, vector<8x32xf32> -> vector<8x32xf32>
    %95 = arith.addf %86, %94 : vector<8x32xf32>
    %c2_83 = arith.constant 2 : index
    %c0_84 = arith.constant 0 : index
    %c0_85 = arith.constant 0 : index
    %96 = vector.load %arg4[%c2_83, %c0_84, %c0_85] : memref<4x8x8xf32, #tpu.memory_space<vmem>>, vector<1x8x8xf32>
    %97 = vector.shape_cast %96 : vector<1x8x8xf32> to vector<8x8xf32>
    %c0_86 = arith.constant 0 : index
    %c0_87 = arith.constant 0 : index
    %c0_88 = arith.constant 0 : index
    %98 = vector.load %arg2[%c0_86, %c0_87, %c0_88] : memref<4x8x8xf32, #tpu.memory_space<vmem>>, vector<1x8x8xf32>
    %99 = vector.shape_cast %98 : vector<1x8x8xf32> to vector<8x8xf32>
    %100 = tpu.transpose %99, [1, 0] : vector<8x8xf32> -> vector<8x8xf32>
    %cst_89 = arith.constant dense<0.000000e+00> : vector<8x8xf32>
    %101 = tpu.matmul %100, %97, %cst_89 {dimension_numbers = #tpu.dot_dimension_numbers<[1], [0], [0], [1], [0, 0, 1, 1], [], []>} : vector<8x8xf32>, vector<8x8xf32>, vector<8x8xf32> -> vector<8x8xf32>
    %cst_90 = arith.constant dense<0.000000e+00> : vector<8x32xf32>
    %102 = tpu.matmul %101, %2, %cst_90 {dimension_numbers = #tpu.dot_dimension_numbers<[1], [0], [0], [1], [0, 0, 1, 1], [], []>} : vector<8x8xf32>, vector<8x32xf32>, vector<8x32xf32> -> vector<8x32xf32>
    %c8 = arith.constant 8 : index
    %c0_91 = arith.constant 0 : index
    %c0_92 = arith.constant 0 : index
    %103 = vector.load %arg5[%c8, %c0_91, %c0_92] : memref<16x32x32xf32, #tpu.memory_space<vmem>>, vector<1x32x32xf32>
    %104 = vector.shape_cast %103 : vector<1x32x32xf32> to vector<32x32xf32>
    %cst_93 = arith.constant dense<0.000000e+00> : vector<8x32xf32>
    %105 = tpu.matmul %102, %104, %cst_93 {dimension_numbers = #tpu.dot_dimension_numbers<[1], [0], [0], [1], [0, 0, 1, 1], [], []>} : vector<8x32xf32>, vector<32x32xf32>, vector<8x32xf32> -> vector<8x32xf32>
    %106 = arith.addf %95, %105 : vector<8x32xf32>
    %c1_94 = arith.constant 1 : index
    %c0_95 = arith.constant 0 : index
    %c0_96 = arith.constant 0 : index
    %107 = vector.load %arg2[%c1_94, %c0_95, %c0_96] : memref<4x8x8xf32, #tpu.memory_space<vmem>>, vector<1x8x8xf32>
    %108 = vector.shape_cast %107 : vector<1x8x8xf32> to vector<8x8xf32>
    %109 = tpu.transpose %108, [1, 0] : vector<8x8xf32> -> vector<8x8xf32>
    %cst_97 = arith.constant dense<0.000000e+00> : vector<8x8xf32>
    %110 = tpu.matmul %109, %97, %cst_97 {dimension_numbers = #tpu.dot_dimension_numbers<[1], [0], [0], [1], [0, 0, 1, 1], [], []>} : vector<8x8xf32>, vector<8x8xf32>, vector<8x8xf32> -> vector<8x8xf32>
    %cst_98 = arith.constant dense<0.000000e+00> : vector<8x32xf32>
    %111 = tpu.matmul %110, %2, %cst_98 {dimension_numbers = #tpu.dot_dimension_numbers<[1], [0], [0], [1], [0, 0, 1, 1], [], []>} : vector<8x8xf32>, vector<8x32xf32>, vector<8x32xf32> -> vector<8x32xf32>
    %c9 = arith.constant 9 : index
    %c0_99 = arith.constant 0 : index
    %c0_100 = arith.constant 0 : index
    %112 = vector.load %arg5[%c9, %c0_99, %c0_100] : memref<16x32x32xf32, #tpu.memory_space<vmem>>, vector<1x32x32xf32>
    %113 = vector.shape_cast %112 : vector<1x32x32xf32> to vector<32x32xf32>
    %cst_101 = arith.constant dense<0.000000e+00> : vector<8x32xf32>
    %114 = tpu.matmul %111, %113, %cst_101 {dimension_numbers = #tpu.dot_dimension_numbers<[1], [0], [0], [1], [0, 0, 1, 1], [], []>} : vector<8x32xf32>, vector<32x32xf32>, vector<8x32xf32> -> vector<8x32xf32>
    %115 = arith.addf %106, %114 : vector<8x32xf32>
    %c2_102 = arith.constant 2 : index
    %c0_103 = arith.constant 0 : index
    %c0_104 = arith.constant 0 : index
    %116 = vector.load %arg2[%c2_102, %c0_103, %c0_104] : memref<4x8x8xf32, #tpu.memory_space<vmem>>, vector<1x8x8xf32>
    %117 = vector.shape_cast %116 : vector<1x8x8xf32> to vector<8x8xf32>
    %118 = tpu.transpose %117, [1, 0] : vector<8x8xf32> -> vector<8x8xf32>
    %cst_105 = arith.constant dense<0.000000e+00> : vector<8x8xf32>
    %119 = tpu.matmul %118, %97, %cst_105 {dimension_numbers = #tpu.dot_dimension_numbers<[1], [0], [0], [1], [0, 0, 1, 1], [], []>} : vector<8x8xf32>, vector<8x8xf32>, vector<8x8xf32> -> vector<8x8xf32>
    %cst_106 = arith.constant dense<0.000000e+00> : vector<8x32xf32>
    %120 = tpu.matmul %119, %2, %cst_106 {dimension_numbers = #tpu.dot_dimension_numbers<[1], [0], [0], [1], [0, 0, 1, 1], [], []>} : vector<8x8xf32>, vector<8x32xf32>, vector<8x32xf32> -> vector<8x32xf32>
    %c10 = arith.constant 10 : index
    %c0_107 = arith.constant 0 : index
    %c0_108 = arith.constant 0 : index
    %121 = vector.load %arg5[%c10, %c0_107, %c0_108] : memref<16x32x32xf32, #tpu.memory_space<vmem>>, vector<1x32x32xf32>
    %122 = vector.shape_cast %121 : vector<1x32x32xf32> to vector<32x32xf32>
    %cst_109 = arith.constant dense<0.000000e+00> : vector<8x32xf32>
    %123 = tpu.matmul %120, %122, %cst_109 {dimension_numbers = #tpu.dot_dimension_numbers<[1], [0], [0], [1], [0, 0, 1, 1], [], []>} : vector<8x32xf32>, vector<32x32xf32>, vector<8x32xf32> -> vector<8x32xf32>
    %124 = arith.addf %115, %123 : vector<8x32xf32>
    %c3_110 = arith.constant 3 : index
    %c0_111 = arith.constant 0 : index
    %c0_112 = arith.constant 0 : index
    %125 = vector.load %arg2[%c3_110, %c0_111, %c0_112] : memref<4x8x8xf32, #tpu.memory_space<vmem>>, vector<1x8x8xf32>
    %126 = vector.shape_cast %125 : vector<1x8x8xf32> to vector<8x8xf32>
    %127 = tpu.transpose %126, [1, 0] : vector<8x8xf32> -> vector<8x8xf32>
    %cst_113 = arith.constant dense<0.000000e+00> : vector<8x8xf32>
    %128 = tpu.matmul %127, %97, %cst_113 {dimension_numbers = #tpu.dot_dimension_numbers<[1], [0], [0], [1], [0, 0, 1, 1], [], []>} : vector<8x8xf32>, vector<8x8xf32>, vector<8x8xf32> -> vector<8x8xf32>
    %cst_114 = arith.constant dense<0.000000e+00> : vector<8x32xf32>
    %129 = tpu.matmul %128, %2, %cst_114 {dimension_numbers = #tpu.dot_dimension_numbers<[1], [0], [0], [1], [0, 0, 1, 1], [], []>} : vector<8x8xf32>, vector<8x32xf32>, vector<8x32xf32> -> vector<8x32xf32>
    %c11 = arith.constant 11 : index
    %c0_115 = arith.constant 0 : index
    %c0_116 = arith.constant 0 : index
    %130 = vector.load %arg5[%c11, %c0_115, %c0_116] : memref<16x32x32xf32, #tpu.memory_space<vmem>>, vector<1x32x32xf32>
    %131 = vector.shape_cast %130 : vector<1x32x32xf32> to vector<32x32xf32>
    %cst_117 = arith.constant dense<0.000000e+00> : vector<8x32xf32>
    %132 = tpu.matmul %129, %131, %cst_117 {dimension_numbers = #tpu.dot_dimension_numbers<[1], [0], [0], [1], [0, 0, 1, 1], [], []>} : vector<8x32xf32>, vector<32x32xf32>, vector<8x32xf32> -> vector<8x32xf32>
    %133 = arith.addf %124, %132 : vector<8x32xf32>
    %c3_118 = arith.constant 3 : index
    %c0_119 = arith.constant 0 : index
    %c0_120 = arith.constant 0 : index
    %134 = vector.load %arg4[%c3_118, %c0_119, %c0_120] : memref<4x8x8xf32, #tpu.memory_space<vmem>>, vector<1x8x8xf32>
    %135 = vector.shape_cast %134 : vector<1x8x8xf32> to vector<8x8xf32>
    %c0_121 = arith.constant 0 : index
    %c0_122 = arith.constant 0 : index
    %c0_123 = arith.constant 0 : index
    %136 = vector.load %arg2[%c0_121, %c0_122, %c0_123] : memref<4x8x8xf32, #tpu.memory_space<vmem>>, vector<1x8x8xf32>
    %137 = vector.shape_cast %136 : vector<1x8x8xf32> to vector<8x8xf32>
    %138 = tpu.transpose %137, [1, 0] : vector<8x8xf32> -> vector<8x8xf32>
    %cst_124 = arith.constant dense<0.000000e+00> : vector<8x8xf32>
    %139 = tpu.matmul %138, %135, %cst_124 {dimension_numbers = #tpu.dot_dimension_numbers<[1], [0], [0], [1], [0, 0, 1, 1], [], []>} : vector<8x8xf32>, vector<8x8xf32>, vector<8x8xf32> -> vector<8x8xf32>
    %cst_125 = arith.constant dense<0.000000e+00> : vector<8x32xf32>
    %140 = tpu.matmul %139, %2, %cst_125 {dimension_numbers = #tpu.dot_dimension_numbers<[1], [0], [0], [1], [0, 0, 1, 1], [], []>} : vector<8x8xf32>, vector<8x32xf32>, vector<8x32xf32> -> vector<8x32xf32>
    %c12 = arith.constant 12 : index
    %c0_126 = arith.constant 0 : index
    %c0_127 = arith.constant 0 : index
    %141 = vector.load %arg5[%c12, %c0_126, %c0_127] : memref<16x32x32xf32, #tpu.memory_space<vmem>>, vector<1x32x32xf32>
    %142 = vector.shape_cast %141 : vector<1x32x32xf32> to vector<32x32xf32>
    %cst_128 = arith.constant dense<0.000000e+00> : vector<8x32xf32>
    %143 = tpu.matmul %140, %142, %cst_128 {dimension_numbers = #tpu.dot_dimension_numbers<[1], [0], [0], [1], [0, 0, 1, 1], [], []>} : vector<8x32xf32>, vector<32x32xf32>, vector<8x32xf32> -> vector<8x32xf32>
    %144 = arith.addf %133, %143 : vector<8x32xf32>
    %c1_129 = arith.constant 1 : index
    %c0_130 = arith.constant 0 : index
    %c0_131 = arith.constant 0 : index
    %145 = vector.load %arg2[%c1_129, %c0_130, %c0_131] : memref<4x8x8xf32, #tpu.memory_space<vmem>>, vector<1x8x8xf32>
    %146 = vector.shape_cast %145 : vector<1x8x8xf32> to vector<8x8xf32>
    %147 = tpu.transpose %146, [1, 0] : vector<8x8xf32> -> vector<8x8xf32>
    %cst_132 = arith.constant dense<0.000000e+00> : vector<8x8xf32>
    %148 = tpu.matmul %147, %135, %cst_132 {dimension_numbers = #tpu.dot_dimension_numbers<[1], [0], [0], [1], [0, 0, 1, 1], [], []>} : vector<8x8xf32>, vector<8x8xf32>, vector<8x8xf32> -> vector<8x8xf32>
    %cst_133 = arith.constant dense<0.000000e+00> : vector<8x32xf32>
    %149 = tpu.matmul %148, %2, %cst_133 {dimension_numbers = #tpu.dot_dimension_numbers<[1], [0], [0], [1], [0, 0, 1, 1], [], []>} : vector<8x8xf32>, vector<8x32xf32>, vector<8x32xf32> -> vector<8x32xf32>
    %c13 = arith.constant 13 : index
    %c0_134 = arith.constant 0 : index
    %c0_135 = arith.constant 0 : index
    %150 = vector.load %arg5[%c13, %c0_134, %c0_135] : memref<16x32x32xf32, #tpu.memory_space<vmem>>, vector<1x32x32xf32>
    %151 = vector.shape_cast %150 : vector<1x32x32xf32> to vector<32x32xf32>
    %cst_136 = arith.constant dense<0.000000e+00> : vector<8x32xf32>
    %152 = tpu.matmul %149, %151, %cst_136 {dimension_numbers = #tpu.dot_dimension_numbers<[1], [0], [0], [1], [0, 0, 1, 1], [], []>} : vector<8x32xf32>, vector<32x32xf32>, vector<8x32xf32> -> vector<8x32xf32>
    %153 = arith.addf %144, %152 : vector<8x32xf32>
    %c2_137 = arith.constant 2 : index
    %c0_138 = arith.constant 0 : index
    %c0_139 = arith.constant 0 : index
    %154 = vector.load %arg2[%c2_137, %c0_138, %c0_139] : memref<4x8x8xf32, #tpu.memory_space<vmem>>, vector<1x8x8xf32>
    %155 = vector.shape_cast %154 : vector<1x8x8xf32> to vector<8x8xf32>
    %156 = tpu.transpose %155, [1, 0] : vector<8x8xf32> -> vector<8x8xf32>
    %cst_140 = arith.constant dense<0.000000e+00> : vector<8x8xf32>
    %157 = tpu.matmul %156, %135, %cst_140 {dimension_numbers = #tpu.dot_dimension_numbers<[1], [0], [0], [1], [0, 0, 1, 1], [], []>} : vector<8x8xf32>, vector<8x8xf32>, vector<8x8xf32> -> vector<8x8xf32>
    %cst_141 = arith.constant dense<0.000000e+00> : vector<8x32xf32>
    %158 = tpu.matmul %157, %2, %cst_141 {dimension_numbers = #tpu.dot_dimension_numbers<[1], [0], [0], [1], [0, 0, 1, 1], [], []>} : vector<8x8xf32>, vector<8x32xf32>, vector<8x32xf32> -> vector<8x32xf32>
    %c14 = arith.constant 14 : index
    %c0_142 = arith.constant 0 : index
    %c0_143 = arith.constant 0 : index
    %159 = vector.load %arg5[%c14, %c0_142, %c0_143] : memref<16x32x32xf32, #tpu.memory_space<vmem>>, vector<1x32x32xf32>
    %160 = vector.shape_cast %159 : vector<1x32x32xf32> to vector<32x32xf32>
    %cst_144 = arith.constant dense<0.000000e+00> : vector<8x32xf32>
    %161 = tpu.matmul %158, %160, %cst_144 {dimension_numbers = #tpu.dot_dimension_numbers<[1], [0], [0], [1], [0, 0, 1, 1], [], []>} : vector<8x32xf32>, vector<32x32xf32>, vector<8x32xf32> -> vector<8x32xf32>
    %162 = arith.addf %153, %161 : vector<8x32xf32>
    %c3_145 = arith.constant 3 : index
    %c0_146 = arith.constant 0 : index
    %c0_147 = arith.constant 0 : index
    %163 = vector.load %arg2[%c3_145, %c0_146, %c0_147] : memref<4x8x8xf32, #tpu.memory_space<vmem>>, vector<1x8x8xf32>
    %164 = vector.shape_cast %163 : vector<1x8x8xf32> to vector<8x8xf32>
    %165 = tpu.transpose %164, [1, 0] : vector<8x8xf32> -> vector<8x8xf32>
    %cst_148 = arith.constant dense<0.000000e+00> : vector<8x8xf32>
    %166 = tpu.matmul %165, %135, %cst_148 {dimension_numbers = #tpu.dot_dimension_numbers<[1], [0], [0], [1], [0, 0, 1, 1], [], []>} : vector<8x8xf32>, vector<8x8xf32>, vector<8x8xf32> -> vector<8x8xf32>
    %cst_149 = arith.constant dense<0.000000e+00> : vector<8x32xf32>
    %167 = tpu.matmul %166, %2, %cst_149 {dimension_numbers = #tpu.dot_dimension_numbers<[1], [0], [0], [1], [0, 0, 1, 1], [], []>} : vector<8x8xf32>, vector<8x32xf32>, vector<8x32xf32> -> vector<8x32xf32>
    %c15 = arith.constant 15 : index
    %c0_150 = arith.constant 0 : index
    %c0_151 = arith.constant 0 : index
    %168 = vector.load %arg5[%c15, %c0_150, %c0_151] : memref<16x32x32xf32, #tpu.memory_space<vmem>>, vector<1x32x32xf32>
    %169 = vector.shape_cast %168 : vector<1x32x32xf32> to vector<32x32xf32>
    %cst_152 = arith.constant dense<0.000000e+00> : vector<8x32xf32>
    %170 = tpu.matmul %167, %169, %cst_152 {dimension_numbers = #tpu.dot_dimension_numbers<[1], [0], [0], [1], [0, 0, 1, 1], [], []>} : vector<8x32xf32>, vector<32x32xf32>, vector<8x32xf32> -> vector<8x32xf32>
    %171 = arith.addf %162, %170 : vector<8x32xf32>
    %172 = vector.extract_strided_slice %171 {offsets = [0, 0], sizes = [8, 8], strides = [1, 1]} : vector<8x32xf32> to vector<8x8xf32>
    %173 = tpu.transpose %172, [1, 0] : vector<8x8xf32> -> vector<8x8xf32>
    %174 = arith.addf %172, %173 : vector<8x8xf32>
    %cst_153 = arith.constant 5.000000e-01 : f32
    %175 = vector.broadcast %cst_153 : f32 to vector<8x8xf32>
    %176 = arith.mulf %175, %174 : vector<8x8xf32>
    %177 = math.absf %176 : vector<8x8xf32>
    %178 = vector.shape_cast %177 : vector<8x8xf32> to vector<1x8x8xf32>
    %cst_154 = arith.constant dense<0xFF800000> : vector<1xf32>
    %179 = vector.multi_reduction <maximumf>, %178, %cst_154 [1, 2] : vector<1x8x8xf32> to vector<1xf32>
    %180 = vector.shape_cast %179 : vector<1xf32> to vector<1x1x1xf32>
    %181 = vector.extract %180[0, 0, 0] : f32 from vector<1x1x1xf32>
    %cst_155 = arith.constant 1.000000e-30 : f32
    %182 = arith.maximumf %cst_155, %181 : f32
    %183 = vector.extract_strided_slice %171 {offsets = [0, 8], sizes = [8, 8], strides = [1, 1]} : vector<8x32xf32> to vector<8x8xf32>
    %184 = tpu.transpose %183, [1, 0] : vector<8x8xf32> -> vector<8x8xf32>
    %185 = arith.addf %183, %184 : vector<8x8xf32>
    %cst_156 = arith.constant 5.000000e-01 : f32
    %186 = vector.broadcast %cst_156 : f32 to vector<8x8xf32>
    %187 = arith.mulf %186, %185 : vector<8x8xf32>
    %188 = math.absf %187 : vector<8x8xf32>
    %189 = vector.shape_cast %188 : vector<8x8xf32> to vector<1x8x8xf32>
    %cst_157 = arith.constant dense<0xFF800000> : vector<1xf32>
    %190 = vector.multi_reduction <maximumf>, %189, %cst_157 [1, 2] : vector<1x8x8xf32> to vector<1xf32>
    %191 = vector.shape_cast %190 : vector<1xf32> to vector<1x1x1xf32>
    %192 = vector.extract %191[0, 0, 0] : f32 from vector<1x1x1xf32>
    %193 = arith.maximumf %182, %192 : f32
    %194 = vector.extract_strided_slice %171 {offsets = [0, 16], sizes = [8, 8], strides = [1, 1]} : vector<8x32xf32> to vector<8x8xf32>
    %195 = tpu.transpose %194, [1, 0] : vector<8x8xf32> -> vector<8x8xf32>
    %196 = arith.addf %194, %195 : vector<8x8xf32>
    %cst_158 = arith.constant 5.000000e-01 : f32
    %197 = vector.broadcast %cst_158 : f32 to vector<8x8xf32>
    %198 = arith.mulf %197, %196 : vector<8x8xf32>
    %199 = math.absf %198 : vector<8x8xf32>
    %200 = vector.shape_cast %199 : vector<8x8xf32> to vector<1x8x8xf32>
    %cst_159 = arith.constant dense<0xFF800000> : vector<1xf32>
    %201 = vector.multi_reduction <maximumf>, %200, %cst_159 [1, 2] : vector<1x8x8xf32> to vector<1xf32>
    %202 = vector.shape_cast %201 : vector<1xf32> to vector<1x1x1xf32>
    %203 = vector.extract %202[0, 0, 0] : f32 from vector<1x1x1xf32>
    %204 = arith.maximumf %193, %203 : f32
    %205 = vector.extract_strided_slice %171 {offsets = [0, 24], sizes = [8, 8], strides = [1, 1]} : vector<8x32xf32> to vector<8x8xf32>
    %206 = tpu.transpose %205, [1, 0] : vector<8x8xf32> -> vector<8x8xf32>
    %207 = arith.addf %205, %206 : vector<8x8xf32>
    %cst_160 = arith.constant 5.000000e-01 : f32
    %208 = vector.broadcast %cst_160 : f32 to vector<8x8xf32>
    %209 = arith.mulf %208, %207 : vector<8x8xf32>
    %210 = math.absf %209 : vector<8x8xf32>
    %211 = vector.shape_cast %210 : vector<8x8xf32> to vector<1x8x8xf32>
    %cst_161 = arith.constant dense<0xFF800000> : vector<1xf32>
    %212 = vector.multi_reduction <maximumf>, %211, %cst_161 [1, 2] : vector<1x8x8xf32> to vector<1xf32>
    %213 = vector.shape_cast %212 : vector<1xf32> to vector<1x1x1xf32>
    %214 = vector.extract %213[0, 0, 0] : f32 from vector<1x1x1xf32>
    %215 = arith.maximumf %204, %214 : f32
    %cst_162 = arith.constant 1.000000e+00 : f32
    %216 = arith.divf %cst_162, %215 : f32
    %217 = vector.broadcast %216 : f32 to vector<8x8xf32>
    %218 = arith.mulf %176, %217 : vector<8x8xf32>
    %c0_163 = arith.constant 0 : index
    %c0_164 = arith.constant 0 : index
    %c0_165 = arith.constant 0 : index
    %219 = vector.load %arg7[%c0_163, %c0_164, %c0_165] : memref<4x8x8xf32, #tpu.memory_space<vmem>>, vector<1x8x8xf32>
    %220 = vector.shape_cast %219 : vector<1x8x8xf32> to vector<8x8xf32>
    %221 = vector.shape_cast %218 : vector<8x8xf32> to vector<1x8x8xf32>
    tpu.vector_store %arg7[%c0_163, %c0_164, %c0_165], %221 {strides = array<i32>} : memref<4x8x8xf32, #tpu.memory_space<vmem>>, vector<1x8x8xf32>,
    %c0_166 = arith.constant 0 : index
    %c0_167 = arith.constant 0 : index
    %222 = vector.load %arg8[%c0_166, %c0_167] : memref<8x32xf32, #tpu.memory_space<vmem>>, vector<8x8xf32>
    tpu.vector_store %arg8[%c0_166, %c0_167], %218 {strides = array<i32>} : memref<8x32xf32, #tpu.memory_space<vmem>>, vector<8x8xf32>,
    %223 = vector.broadcast %216 : f32 to vector<8x8xf32>
    %224 = arith.mulf %187, %223 : vector<8x8xf32>
    %c1_168 = arith.constant 1 : index
    %c0_169 = arith.constant 0 : index
    %c0_170 = arith.constant 0 : index
    %225 = vector.load %arg7[%c1_168, %c0_169, %c0_170] : memref<4x8x8xf32, #tpu.memory_space<vmem>>, vector<1x8x8xf32>
    %226 = vector.shape_cast %225 : vector<1x8x8xf32> to vector<8x8xf32>
    %227 = vector.shape_cast %224 : vector<8x8xf32> to vector<1x8x8xf32>
    tpu.vector_store %arg7[%c1_168, %c0_169, %c0_170], %227 {strides = array<i32>} : memref<4x8x8xf32, #tpu.memory_space<vmem>>, vector<1x8x8xf32>,
    %c0_171 = arith.constant 0 : index
    %c8_172 = arith.constant 8 : index
    %228 = vector.load %arg8[%c0_171, %c8_172] : memref<8x32xf32, #tpu.memory_space<vmem>>, vector<8x8xf32>
    tpu.vector_store %arg8[%c0_171, %c8_172], %224 {strides = array<i32>} : memref<8x32xf32, #tpu.memory_space<vmem>>, vector<8x8xf32>,
    %229 = vector.broadcast %216 : f32 to vector<8x8xf32>
    %230 = arith.mulf %198, %229 : vector<8x8xf32>
    %c2_173 = arith.constant 2 : index
    %c0_174 = arith.constant 0 : index
    %c0_175 = arith.constant 0 : index
    %231 = vector.load %arg7[%c2_173, %c0_174, %c0_175] : memref<4x8x8xf32, #tpu.memory_space<vmem>>, vector<1x8x8xf32>
    %232 = vector.shape_cast %231 : vector<1x8x8xf32> to vector<8x8xf32>
    %233 = vector.shape_cast %230 : vector<8x8xf32> to vector<1x8x8xf32>
    tpu.vector_store %arg7[%c2_173, %c0_174, %c0_175], %233 {strides = array<i32>} : memref<4x8x8xf32, #tpu.memory_space<vmem>>, vector<1x8x8xf32>,
    %c0_176 = arith.constant 0 : index
    %c16 = arith.constant 16 : index
    %234 = vector.load %arg8[%c0_176, %c16] : memref<8x32xf32, #tpu.memory_space<vmem>>, vector<8x8xf32>
    tpu.vector_store %arg8[%c0_176, %c16], %230 {strides = array<i32>} : memref<8x32xf32, #tpu.memory_space<vmem>>, vector<8x8xf32>,
    %235 = vector.broadcast %216 : f32 to vector<8x8xf32>
    %236 = arith.mulf %209, %235 : vector<8x8xf32>
    %c3_177 = arith.constant 3 : index
    %c0_178 = arith.constant 0 : index
    %c0_179 = arith.constant 0 : index
    %237 = vector.load %arg7[%c3_177, %c0_178, %c0_179] : memref<4x8x8xf32, #tpu.memory_space<vmem>>, vector<1x8x8xf32>
    %238 = vector.shape_cast %237 : vector<1x8x8xf32> to vector<8x8xf32>
    %239 = vector.shape_cast %236 : vector<8x8xf32> to vector<1x8x8xf32>
    tpu.vector_store %arg7[%c3_177, %c0_178, %c0_179], %239 {strides = array<i32>} : memref<4x8x8xf32, #tpu.memory_space<vmem>>, vector<1x8x8xf32>,
    %c0_180 = arith.constant 0 : index
    %c24 = arith.constant 24 : index
    %240 = vector.load %arg8[%c0_180, %c24] : memref<8x32xf32, #tpu.memory_space<vmem>>, vector<8x8xf32>
    tpu.vector_store %arg8[%c0_180, %c24], %236 {strides = array<i32>} : memref<8x32xf32, #tpu.memory_space<vmem>>, vector<8x8xf32>,
    return
  }
}

module attributes {stable_mosaic.version = 11 : i64} {
  func.func @_energy_kernel(%arg0: memref<8x8xf32, #tpu.memory_space<vmem>>, %arg1: memref<4x8x8xf32, #tpu.memory_space<vmem>>, %arg2: memref<8x32xf32, #tpu.memory_space<vmem>>, %arg3: memref<16x32x128xf32, #tpu.memory_space<vmem>>, %arg4: memref<16x32x128xf32, #tpu.memory_space<vmem>>, %arg5: memref<4x4xf32, #tpu.memory_space<smem>>, %arg6: memref<1x1xf32, #tpu.memory_space<vmem>>) attributes {dimension_semantics = [], scalar_prefetch = 0 : i64, scratch_operands = 0 : i64, tpu.core_type = #tpu.core_type<tc>} {
    %c0 = arith.constant 0 : index
    %c0_0 = arith.constant 0 : index
    %0 = vector.load %arg0[%c0, %c0_0] : memref<8x8xf32, #tpu.memory_space<vmem>>, vector<8x8xf32>
    %c0_1 = arith.constant 0 : index
    %c0_2 = arith.constant 0 : index
    %1 = vector.load %arg2[%c0_1, %c0_2] : memref<8x32xf32, #tpu.memory_space<vmem>>, vector<8x32xf32>
    %cst = arith.constant dense<0.000000e+00> : vector<8x32xf32>
    %2 = tpu.matmul %0, %1, %cst {dimension_numbers = #tpu.dot_dimension_numbers<[1], [0], [0], [1], [0, 0, 1, 1], [], []>} : vector<8x8xf32>, vector<8x32xf32>, vector<8x32xf32> -> vector<8x32xf32>
    %c0_3 = arith.constant 0 : index
    %c0_4 = arith.constant 0 : index
    %c0_5 = arith.constant 0 : index
    %3 = vector.load %arg1[%c0_3, %c0_4, %c0_5] : memref<4x8x8xf32, #tpu.memory_space<vmem>>, vector<1x8x8xf32>
    %4 = vector.shape_cast %3 : vector<1x8x8xf32> to vector<8x8xf32>
    %cst_6 = arith.constant dense<0.000000e+00> : vector<8x8xf32>
    %5 = tpu.matmul %0, %4, %cst_6 {dimension_numbers = #tpu.dot_dimension_numbers<[1], [0], [0], [1], [0, 0, 1, 1], [], []>} : vector<8x8xf32>, vector<8x8xf32>, vector<8x8xf32> -> vector<8x8xf32>
    %c1 = arith.constant 1 : index
    %c0_7 = arith.constant 0 : index
    %c0_8 = arith.constant 0 : index
    %6 = vector.load %arg1[%c1, %c0_7, %c0_8] : memref<4x8x8xf32, #tpu.memory_space<vmem>>, vector<1x8x8xf32>
    %7 = vector.shape_cast %6 : vector<1x8x8xf32> to vector<8x8xf32>
    %cst_9 = arith.constant dense<0.000000e+00> : vector<8x8xf32>
    %8 = tpu.matmul %0, %7, %cst_9 {dimension_numbers = #tpu.dot_dimension_numbers<[1], [0], [0], [1], [0, 0, 1, 1], [], []>} : vector<8x8xf32>, vector<8x8xf32>, vector<8x8xf32> -> vector<8x8xf32>
    %c2 = arith.constant 2 : index
    %c0_10 = arith.constant 0 : index
    %c0_11 = arith.constant 0 : index
    %9 = vector.load %arg1[%c2, %c0_10, %c0_11] : memref<4x8x8xf32, #tpu.memory_space<vmem>>, vector<1x8x8xf32>
    %10 = vector.shape_cast %9 : vector<1x8x8xf32> to vector<8x8xf32>
    %cst_12 = arith.constant dense<0.000000e+00> : vector<8x8xf32>
    %11 = tpu.matmul %0, %10, %cst_12 {dimension_numbers = #tpu.dot_dimension_numbers<[1], [0], [0], [1], [0, 0, 1, 1], [], []>} : vector<8x8xf32>, vector<8x8xf32>, vector<8x8xf32> -> vector<8x8xf32>
    %c3 = arith.constant 3 : index
    %c0_13 = arith.constant 0 : index
    %c0_14 = arith.constant 0 : index
    %12 = vector.load %arg1[%c3, %c0_13, %c0_14] : memref<4x8x8xf32, #tpu.memory_space<vmem>>, vector<1x8x8xf32>
    %13 = vector.shape_cast %12 : vector<1x8x8xf32> to vector<8x8xf32>
    %cst_15 = arith.constant dense<0.000000e+00> : vector<8x8xf32>
    %14 = tpu.matmul %0, %13, %cst_15 {dimension_numbers = #tpu.dot_dimension_numbers<[1], [0], [0], [1], [0, 0, 1, 1], [], []>} : vector<8x8xf32>, vector<8x8xf32>, vector<8x8xf32> -> vector<8x8xf32>
    %cst_16 = arith.constant 0.000000e+00 : f32
    %15 = vector.broadcast %cst_16 : f32 to vector<8x128xf32>
    %cst_17 = arith.constant 0.000000e+00 : f32
    %16 = vector.broadcast %cst_17 : f32 to vector<8x128xf32>
    %c0_18 = arith.constant 0 : index
    %c0_19 = arith.constant 0 : index
    %c0_20 = arith.constant 0 : index
    %17 = vector.load %arg1[%c0_18, %c0_19, %c0_20] : memref<4x8x8xf32, #tpu.memory_space<vmem>>, vector<1x8x8xf32>
    %18 = vector.shape_cast %17 : vector<1x8x8xf32> to vector<8x8xf32>
    %cst_21 = arith.constant dense<0.000000e+00> : vector<8x8xf32>
    %19 = tpu.matmul %18, %5, %cst_21 {dimension_numbers = #tpu.dot_dimension_numbers<[1], [0], [0], [1], [0, 0, 1, 1], [], []>} : vector<8x8xf32>, vector<8x8xf32>, vector<8x8xf32> -> vector<8x8xf32>
    %cst_22 = arith.constant dense<0.000000e+00> : vector<8x32xf32>
    %20 = tpu.matmul %19, %2, %cst_22 {dimension_numbers = #tpu.dot_dimension_numbers<[1], [0], [0], [1], [0, 0, 1, 1], [], []>} : vector<8x8xf32>, vector<8x32xf32>, vector<8x32xf32> -> vector<8x32xf32>
    %c0_23 = arith.constant 0 : index
    %c0_24 = arith.constant 0 : index
    %c0_25 = arith.constant 0 : index
    %21 = vector.load %arg3[%c0_23, %c0_24, %c0_25] : memref<16x32x128xf32, #tpu.memory_space<vmem>>, vector<1x32x128xf32>
    %22 = vector.shape_cast %21 : vector<1x32x128xf32> to vector<32x128xf32>
    %cst_26 = arith.constant dense<0.000000e+00> : vector<8x128xf32>
    %23 = tpu.matmul %20, %22, %cst_26 {dimension_numbers = #tpu.dot_dimension_numbers<[1], [0], [0], [1], [0, 0, 1, 1], [], []>} : vector<8x32xf32>, vector<32x128xf32>, vector<8x128xf32> -> vector<8x128xf32>
    %24 = arith.addf %15, %23 : vector<8x128xf32>
    %c0_27 = arith.constant 0 : index
    %c0_28 = arith.constant 0 : index
    %c0_29 = arith.constant 0 : index
    %25 = vector.load %arg4[%c0_27, %c0_28, %c0_29] : memref<16x32x128xf32, #tpu.memory_space<vmem>>, vector<1x32x128xf32>
    %26 = vector.shape_cast %25 : vector<1x32x128xf32> to vector<32x128xf32>
    %cst_30 = arith.constant dense<0.000000e+00> : vector<8x128xf32>
    %27 = tpu.matmul %20, %26, %cst_30 {dimension_numbers = #tpu.dot_dimension_numbers<[1], [0], [0], [1], [0, 0, 1, 1], [], []>} : vector<8x32xf32>, vector<32x128xf32>, vector<8x128xf32> -> vector<8x128xf32>
    %28 = arith.addf %16, %27 : vector<8x128xf32>
    %cst_31 = arith.constant dense<0.000000e+00> : vector<8x8xf32>
    %29 = tpu.matmul %18, %8, %cst_31 {dimension_numbers = #tpu.dot_dimension_numbers<[1], [0], [0], [1], [0, 0, 1, 1], [], []>} : vector<8x8xf32>, vector<8x8xf32>, vector<8x8xf32> -> vector<8x8xf32>
    %cst_32 = arith.constant dense<0.000000e+00> : vector<8x32xf32>
    %30 = tpu.matmul %29, %2, %cst_32 {dimension_numbers = #tpu.dot_dimension_numbers<[1], [0], [0], [1], [0, 0, 1, 1], [], []>} : vector<8x8xf32>, vector<8x32xf32>, vector<8x32xf32> -> vector<8x32xf32>
    %c1_33 = arith.constant 1 : index
    %c0_34 = arith.constant 0 : index
    %c0_35 = arith.constant 0 : index
    %31 = vector.load %arg3[%c1_33, %c0_34, %c0_35] : memref<16x32x128xf32, #tpu.memory_space<vmem>>, vector<1x32x128xf32>
    %32 = vector.shape_cast %31 : vector<1x32x128xf32> to vector<32x128xf32>
    %cst_36 = arith.constant dense<0.000000e+00> : vector<8x128xf32>
    %33 = tpu.matmul %30, %32, %cst_36 {dimension_numbers = #tpu.dot_dimension_numbers<[1], [0], [0], [1], [0, 0, 1, 1], [], []>} : vector<8x32xf32>, vector<32x128xf32>, vector<8x128xf32> -> vector<8x128xf32>
    %34 = arith.addf %24, %33 : vector<8x128xf32>
    %c1_37 = arith.constant 1 : index
    %c0_38 = arith.constant 0 : index
    %c0_39 = arith.constant 0 : index
    %35 = vector.load %arg4[%c1_37, %c0_38, %c0_39] : memref<16x32x128xf32, #tpu.memory_space<vmem>>, vector<1x32x128xf32>
    %36 = vector.shape_cast %35 : vector<1x32x128xf32> to vector<32x128xf32>
    %cst_40 = arith.constant dense<0.000000e+00> : vector<8x128xf32>
    %37 = tpu.matmul %30, %36, %cst_40 {dimension_numbers = #tpu.dot_dimension_numbers<[1], [0], [0], [1], [0, 0, 1, 1], [], []>} : vector<8x32xf32>, vector<32x128xf32>, vector<8x128xf32> -> vector<8x128xf32>
    %38 = arith.addf %28, %37 : vector<8x128xf32>
    %cst_41 = arith.constant dense<0.000000e+00> : vector<8x8xf32>
    %39 = tpu.matmul %18, %11, %cst_41 {dimension_numbers = #tpu.dot_dimension_numbers<[1], [0], [0], [1], [0, 0, 1, 1], [], []>} : vector<8x8xf32>, vector<8x8xf32>, vector<8x8xf32> -> vector<8x8xf32>
    %cst_42 = arith.constant dense<0.000000e+00> : vector<8x32xf32>
    %40 = tpu.matmul %39, %2, %cst_42 {dimension_numbers = #tpu.dot_dimension_numbers<[1], [0], [0], [1], [0, 0, 1, 1], [], []>} : vector<8x8xf32>, vector<8x32xf32>, vector<8x32xf32> -> vector<8x32xf32>
    %c2_43 = arith.constant 2 : index
    %c0_44 = arith.constant 0 : index
    %c0_45 = arith.constant 0 : index
    %41 = vector.load %arg3[%c2_43, %c0_44, %c0_45] : memref<16x32x128xf32, #tpu.memory_space<vmem>>, vector<1x32x128xf32>
    %42 = vector.shape_cast %41 : vector<1x32x128xf32> to vector<32x128xf32>
    %cst_46 = arith.constant dense<0.000000e+00> : vector<8x128xf32>
    %43 = tpu.matmul %40, %42, %cst_46 {dimension_numbers = #tpu.dot_dimension_numbers<[1], [0], [0], [1], [0, 0, 1, 1], [], []>} : vector<8x32xf32>, vector<32x128xf32>, vector<8x128xf32> -> vector<8x128xf32>
    %44 = arith.addf %34, %43 : vector<8x128xf32>
    %c2_47 = arith.constant 2 : index
    %c0_48 = arith.constant 0 : index
    %c0_49 = arith.constant 0 : index
    %45 = vector.load %arg4[%c2_47, %c0_48, %c0_49] : memref<16x32x128xf32, #tpu.memory_space<vmem>>, vector<1x32x128xf32>
    %46 = vector.shape_cast %45 : vector<1x32x128xf32> to vector<32x128xf32>
    %cst_50 = arith.constant dense<0.000000e+00> : vector<8x128xf32>
    %47 = tpu.matmul %40, %46, %cst_50 {dimension_numbers = #tpu.dot_dimension_numbers<[1], [0], [0], [1], [0, 0, 1, 1], [], []>} : vector<8x32xf32>, vector<32x128xf32>, vector<8x128xf32> -> vector<8x128xf32>
    %48 = arith.addf %38, %47 : vector<8x128xf32>
    %cst_51 = arith.constant dense<0.000000e+00> : vector<8x8xf32>
    %49 = tpu.matmul %18, %14, %cst_51 {dimension_numbers = #tpu.dot_dimension_numbers<[1], [0], [0], [1], [0, 0, 1, 1], [], []>} : vector<8x8xf32>, vector<8x8xf32>, vector<8x8xf32> -> vector<8x8xf32>
    %cst_52 = arith.constant dense<0.000000e+00> : vector<8x32xf32>
    %50 = tpu.matmul %49, %2, %cst_52 {dimension_numbers = #tpu.dot_dimension_numbers<[1], [0], [0], [1], [0, 0, 1, 1], [], []>} : vector<8x8xf32>, vector<8x32xf32>, vector<8x32xf32> -> vector<8x32xf32>
    %c3_53 = arith.constant 3 : index
    %c0_54 = arith.constant 0 : index
    %c0_55 = arith.constant 0 : index
    %51 = vector.load %arg3[%c3_53, %c0_54, %c0_55] : memref<16x32x128xf32, #tpu.memory_space<vmem>>, vector<1x32x128xf32>
    %52 = vector.shape_cast %51 : vector<1x32x128xf32> to vector<32x128xf32>
    %cst_56 = arith.constant dense<0.000000e+00> : vector<8x128xf32>
    %53 = tpu.matmul %50, %52, %cst_56 {dimension_numbers = #tpu.dot_dimension_numbers<[1], [0], [0], [1], [0, 0, 1, 1], [], []>} : vector<8x32xf32>, vector<32x128xf32>, vector<8x128xf32> -> vector<8x128xf32>
    %54 = arith.addf %44, %53 : vector<8x128xf32>
    %c3_57 = arith.constant 3 : index
    %c0_58 = arith.constant 0 : index
    %c0_59 = arith.constant 0 : index
    %55 = vector.load %arg4[%c3_57, %c0_58, %c0_59] : memref<16x32x128xf32, #tpu.memory_space<vmem>>, vector<1x32x128xf32>
    %56 = vector.shape_cast %55 : vector<1x32x128xf32> to vector<32x128xf32>
    %cst_60 = arith.constant dense<0.000000e+00> : vector<8x128xf32>
    %57 = tpu.matmul %50, %56, %cst_60 {dimension_numbers = #tpu.dot_dimension_numbers<[1], [0], [0], [1], [0, 0, 1, 1], [], []>} : vector<8x32xf32>, vector<32x128xf32>, vector<8x128xf32> -> vector<8x128xf32>
    %58 = arith.addf %48, %57 : vector<8x128xf32>
    %c1_61 = arith.constant 1 : index
    %c0_62 = arith.constant 0 : index
    %c0_63 = arith.constant 0 : index
    %59 = vector.load %arg1[%c1_61, %c0_62, %c0_63] : memref<4x8x8xf32, #tpu.memory_space<vmem>>, vector<1x8x8xf32>
    %60 = vector.shape_cast %59 : vector<1x8x8xf32> to vector<8x8xf32>
    %cst_64 = arith.constant dense<0.000000e+00> : vector<8x8xf32>
    %61 = tpu.matmul %60, %5, %cst_64 {dimension_numbers = #tpu.dot_dimension_numbers<[1], [0], [0], [1], [0, 0, 1, 1], [], []>} : vector<8x8xf32>, vector<8x8xf32>, vector<8x8xf32> -> vector<8x8xf32>
    %cst_65 = arith.constant dense<0.000000e+00> : vector<8x32xf32>
    %62 = tpu.matmul %61, %2, %cst_65 {dimension_numbers = #tpu.dot_dimension_numbers<[1], [0], [0], [1], [0, 0, 1, 1], [], []>} : vector<8x8xf32>, vector<8x32xf32>, vector<8x32xf32> -> vector<8x32xf32>
    %c4 = arith.constant 4 : index
    %c0_66 = arith.constant 0 : index
    %c0_67 = arith.constant 0 : index
    %63 = vector.load %arg3[%c4, %c0_66, %c0_67] : memref<16x32x128xf32, #tpu.memory_space<vmem>>, vector<1x32x128xf32>
    %64 = vector.shape_cast %63 : vector<1x32x128xf32> to vector<32x128xf32>
    %cst_68 = arith.constant dense<0.000000e+00> : vector<8x128xf32>
    %65 = tpu.matmul %62, %64, %cst_68 {dimension_numbers = #tpu.dot_dimension_numbers<[1], [0], [0], [1], [0, 0, 1, 1], [], []>} : vector<8x32xf32>, vector<32x128xf32>, vector<8x128xf32> -> vector<8x128xf32>
    %66 = arith.addf %54, %65 : vector<8x128xf32>
    %c4_69 = arith.constant 4 : index
    %c0_70 = arith.constant 0 : index
    %c0_71 = arith.constant 0 : index
    %67 = vector.load %arg4[%c4_69, %c0_70, %c0_71] : memref<16x32x128xf32, #tpu.memory_space<vmem>>, vector<1x32x128xf32>
    %68 = vector.shape_cast %67 : vector<1x32x128xf32> to vector<32x128xf32>
    %cst_72 = arith.constant dense<0.000000e+00> : vector<8x128xf32>
    %69 = tpu.matmul %62, %68, %cst_72 {dimension_numbers = #tpu.dot_dimension_numbers<[1], [0], [0], [1], [0, 0, 1, 1], [], []>} : vector<8x32xf32>, vector<32x128xf32>, vector<8x128xf32> -> vector<8x128xf32>
    %70 = arith.addf %58, %69 : vector<8x128xf32>
    %cst_73 = arith.constant dense<0.000000e+00> : vector<8x8xf32>
    %71 = tpu.matmul %60, %8, %cst_73 {dimension_numbers = #tpu.dot_dimension_numbers<[1], [0], [0], [1], [0, 0, 1, 1], [], []>} : vector<8x8xf32>, vector<8x8xf32>, vector<8x8xf32> -> vector<8x8xf32>
    %cst_74 = arith.constant dense<0.000000e+00> : vector<8x32xf32>
    %72 = tpu.matmul %71, %2, %cst_74 {dimension_numbers = #tpu.dot_dimension_numbers<[1], [0], [0], [1], [0, 0, 1, 1], [], []>} : vector<8x8xf32>, vector<8x32xf32>, vector<8x32xf32> -> vector<8x32xf32>
    %c5 = arith.constant 5 : index
    %c0_75 = arith.constant 0 : index
    %c0_76 = arith.constant 0 : index
    %73 = vector.load %arg3[%c5, %c0_75, %c0_76] : memref<16x32x128xf32, #tpu.memory_space<vmem>>, vector<1x32x128xf32>
    %74 = vector.shape_cast %73 : vector<1x32x128xf32> to vector<32x128xf32>
    %cst_77 = arith.constant dense<0.000000e+00> : vector<8x128xf32>
    %75 = tpu.matmul %72, %74, %cst_77 {dimension_numbers = #tpu.dot_dimension_numbers<[1], [0], [0], [1], [0, 0, 1, 1], [], []>} : vector<8x32xf32>, vector<32x128xf32>, vector<8x128xf32> -> vector<8x128xf32>
    %76 = arith.addf %66, %75 : vector<8x128xf32>
    %c5_78 = arith.constant 5 : index
    %c0_79 = arith.constant 0 : index
    %c0_80 = arith.constant 0 : index
    %77 = vector.load %arg4[%c5_78, %c0_79, %c0_80] : memref<16x32x128xf32, #tpu.memory_space<vmem>>, vector<1x32x128xf32>
    %78 = vector.shape_cast %77 : vector<1x32x128xf32> to vector<32x128xf32>
    %cst_81 = arith.constant dense<0.000000e+00> : vector<8x128xf32>
    %79 = tpu.matmul %72, %78, %cst_81 {dimension_numbers = #tpu.dot_dimension_numbers<[1], [0], [0], [1], [0, 0, 1, 1], [], []>} : vector<8x32xf32>, vector<32x128xf32>, vector<8x128xf32> -> vector<8x128xf32>
    %80 = arith.addf %70, %79 : vector<8x128xf32>
    %cst_82 = arith.constant dense<0.000000e+00> : vector<8x8xf32>
    %81 = tpu.matmul %60, %11, %cst_82 {dimension_numbers = #tpu.dot_dimension_numbers<[1], [0], [0], [1], [0, 0, 1, 1], [], []>} : vector<8x8xf32>, vector<8x8xf32>, vector<8x8xf32> -> vector<8x8xf32>
    %cst_83 = arith.constant dense<0.000000e+00> : vector<8x32xf32>
    %82 = tpu.matmul %81, %2, %cst_83 {dimension_numbers = #tpu.dot_dimension_numbers<[1], [0], [0], [1], [0, 0, 1, 1], [], []>} : vector<8x8xf32>, vector<8x32xf32>, vector<8x32xf32> -> vector<8x32xf32>
    %c6 = arith.constant 6 : index
    %c0_84 = arith.constant 0 : index
    %c0_85 = arith.constant 0 : index
    %83 = vector.load %arg3[%c6, %c0_84, %c0_85] : memref<16x32x128xf32, #tpu.memory_space<vmem>>, vector<1x32x128xf32>
    %84 = vector.shape_cast %83 : vector<1x32x128xf32> to vector<32x128xf32>
    %cst_86 = arith.constant dense<0.000000e+00> : vector<8x128xf32>
    %85 = tpu.matmul %82, %84, %cst_86 {dimension_numbers = #tpu.dot_dimension_numbers<[1], [0], [0], [1], [0, 0, 1, 1], [], []>} : vector<8x32xf32>, vector<32x128xf32>, vector<8x128xf32> -> vector<8x128xf32>
    %86 = arith.addf %76, %85 : vector<8x128xf32>
    %c6_87 = arith.constant 6 : index
    %c0_88 = arith.constant 0 : index
    %c0_89 = arith.constant 0 : index
    %87 = vector.load %arg4[%c6_87, %c0_88, %c0_89] : memref<16x32x128xf32, #tpu.memory_space<vmem>>, vector<1x32x128xf32>
    %88 = vector.shape_cast %87 : vector<1x32x128xf32> to vector<32x128xf32>
    %cst_90 = arith.constant dense<0.000000e+00> : vector<8x128xf32>
    %89 = tpu.matmul %82, %88, %cst_90 {dimension_numbers = #tpu.dot_dimension_numbers<[1], [0], [0], [1], [0, 0, 1, 1], [], []>} : vector<8x32xf32>, vector<32x128xf32>, vector<8x128xf32> -> vector<8x128xf32>
    %90 = arith.addf %80, %89 : vector<8x128xf32>
    %cst_91 = arith.constant dense<0.000000e+00> : vector<8x8xf32>
    %91 = tpu.matmul %60, %14, %cst_91 {dimension_numbers = #tpu.dot_dimension_numbers<[1], [0], [0], [1], [0, 0, 1, 1], [], []>} : vector<8x8xf32>, vector<8x8xf32>, vector<8x8xf32> -> vector<8x8xf32>
    %cst_92 = arith.constant dense<0.000000e+00> : vector<8x32xf32>
    %92 = tpu.matmul %91, %2, %cst_92 {dimension_numbers = #tpu.dot_dimension_numbers<[1], [0], [0], [1], [0, 0, 1, 1], [], []>} : vector<8x8xf32>, vector<8x32xf32>, vector<8x32xf32> -> vector<8x32xf32>
    %c7 = arith.constant 7 : index
    %c0_93 = arith.constant 0 : index
    %c0_94 = arith.constant 0 : index
    %93 = vector.load %arg3[%c7, %c0_93, %c0_94] : memref<16x32x128xf32, #tpu.memory_space<vmem>>, vector<1x32x128xf32>
    %94 = vector.shape_cast %93 : vector<1x32x128xf32> to vector<32x128xf32>
    %cst_95 = arith.constant dense<0.000000e+00> : vector<8x128xf32>
    %95 = tpu.matmul %92, %94, %cst_95 {dimension_numbers = #tpu.dot_dimension_numbers<[1], [0], [0], [1], [0, 0, 1, 1], [], []>} : vector<8x32xf32>, vector<32x128xf32>, vector<8x128xf32> -> vector<8x128xf32>
    %96 = arith.addf %86, %95 : vector<8x128xf32>
    %c7_96 = arith.constant 7 : index
    %c0_97 = arith.constant 0 : index
    %c0_98 = arith.constant 0 : index
    %97 = vector.load %arg4[%c7_96, %c0_97, %c0_98] : memref<16x32x128xf32, #tpu.memory_space<vmem>>, vector<1x32x128xf32>
    %98 = vector.shape_cast %97 : vector<1x32x128xf32> to vector<32x128xf32>
    %cst_99 = arith.constant dense<0.000000e+00> : vector<8x128xf32>
    %99 = tpu.matmul %92, %98, %cst_99 {dimension_numbers = #tpu.dot_dimension_numbers<[1], [0], [0], [1], [0, 0, 1, 1], [], []>} : vector<8x32xf32>, vector<32x128xf32>, vector<8x128xf32> -> vector<8x128xf32>
    %100 = arith.addf %90, %99 : vector<8x128xf32>
    %c2_100 = arith.constant 2 : index
    %c0_101 = arith.constant 0 : index
    %c0_102 = arith.constant 0 : index
    %101 = vector.load %arg1[%c2_100, %c0_101, %c0_102] : memref<4x8x8xf32, #tpu.memory_space<vmem>>, vector<1x8x8xf32>
    %102 = vector.shape_cast %101 : vector<1x8x8xf32> to vector<8x8xf32>
    %cst_103 = arith.constant dense<0.000000e+00> : vector<8x8xf32>
    %103 = tpu.matmul %102, %5, %cst_103 {dimension_numbers = #tpu.dot_dimension_numbers<[1], [0], [0], [1], [0, 0, 1, 1], [], []>} : vector<8x8xf32>, vector<8x8xf32>, vector<8x8xf32> -> vector<8x8xf32>
    %cst_104 = arith.constant dense<0.000000e+00> : vector<8x32xf32>
    %104 = tpu.matmul %103, %2, %cst_104 {dimension_numbers = #tpu.dot_dimension_numbers<[1], [0], [0], [1], [0, 0, 1, 1], [], []>} : vector<8x8xf32>, vector<8x32xf32>, vector<8x32xf32> -> vector<8x32xf32>
    %c8 = arith.constant 8 : index
    %c0_105 = arith.constant 0 : index
    %c0_106 = arith.constant 0 : index
    %105 = vector.load %arg3[%c8, %c0_105, %c0_106] : memref<16x32x128xf32, #tpu.memory_space<vmem>>, vector<1x32x128xf32>
    %106 = vector.shape_cast %105 : vector<1x32x128xf32> to vector<32x128xf32>
    %cst_107 = arith.constant dense<0.000000e+00> : vector<8x128xf32>
    %107 = tpu.matmul %104, %106, %cst_107 {dimension_numbers = #tpu.dot_dimension_numbers<[1], [0], [0], [1], [0, 0, 1, 1], [], []>} : vector<8x32xf32>, vector<32x128xf32>, vector<8x128xf32> -> vector<8x128xf32>
    %108 = arith.addf %96, %107 : vector<8x128xf32>
    %c8_108 = arith.constant 8 : index
    %c0_109 = arith.constant 0 : index
    %c0_110 = arith.constant 0 : index
    %109 = vector.load %arg4[%c8_108, %c0_109, %c0_110] : memref<16x32x128xf32, #tpu.memory_space<vmem>>, vector<1x32x128xf32>
    %110 = vector.shape_cast %109 : vector<1x32x128xf32> to vector<32x128xf32>
    %cst_111 = arith.constant dense<0.000000e+00> : vector<8x128xf32>
    %111 = tpu.matmul %104, %110, %cst_111 {dimension_numbers = #tpu.dot_dimension_numbers<[1], [0], [0], [1], [0, 0, 1, 1], [], []>} : vector<8x32xf32>, vector<32x128xf32>, vector<8x128xf32> -> vector<8x128xf32>
    %112 = arith.addf %100, %111 : vector<8x128xf32>
    %cst_112 = arith.constant dense<0.000000e+00> : vector<8x8xf32>
    %113 = tpu.matmul %102, %8, %cst_112 {dimension_numbers = #tpu.dot_dimension_numbers<[1], [0], [0], [1], [0, 0, 1, 1], [], []>} : vector<8x8xf32>, vector<8x8xf32>, vector<8x8xf32> -> vector<8x8xf32>
    %cst_113 = arith.constant dense<0.000000e+00> : vector<8x32xf32>
    %114 = tpu.matmul %113, %2, %cst_113 {dimension_numbers = #tpu.dot_dimension_numbers<[1], [0], [0], [1], [0, 0, 1, 1], [], []>} : vector<8x8xf32>, vector<8x32xf32>, vector<8x32xf32> -> vector<8x32xf32>
    %c9 = arith.constant 9 : index
    %c0_114 = arith.constant 0 : index
    %c0_115 = arith.constant 0 : index
    %115 = vector.load %arg3[%c9, %c0_114, %c0_115] : memref<16x32x128xf32, #tpu.memory_space<vmem>>, vector<1x32x128xf32>
    %116 = vector.shape_cast %115 : vector<1x32x128xf32> to vector<32x128xf32>
    %cst_116 = arith.constant dense<0.000000e+00> : vector<8x128xf32>
    %117 = tpu.matmul %114, %116, %cst_116 {dimension_numbers = #tpu.dot_dimension_numbers<[1], [0], [0], [1], [0, 0, 1, 1], [], []>} : vector<8x32xf32>, vector<32x128xf32>, vector<8x128xf32> -> vector<8x128xf32>
    %118 = arith.addf %108, %117 : vector<8x128xf32>
    %c9_117 = arith.constant 9 : index
    %c0_118 = arith.constant 0 : index
    %c0_119 = arith.constant 0 : index
    %119 = vector.load %arg4[%c9_117, %c0_118, %c0_119] : memref<16x32x128xf32, #tpu.memory_space<vmem>>, vector<1x32x128xf32>
    %120 = vector.shape_cast %119 : vector<1x32x128xf32> to vector<32x128xf32>
    %cst_120 = arith.constant dense<0.000000e+00> : vector<8x128xf32>
    %121 = tpu.matmul %114, %120, %cst_120 {dimension_numbers = #tpu.dot_dimension_numbers<[1], [0], [0], [1], [0, 0, 1, 1], [], []>} : vector<8x32xf32>, vector<32x128xf32>, vector<8x128xf32> -> vector<8x128xf32>
    %122 = arith.addf %112, %121 : vector<8x128xf32>
    %cst_121 = arith.constant dense<0.000000e+00> : vector<8x8xf32>
    %123 = tpu.matmul %102, %11, %cst_121 {dimension_numbers = #tpu.dot_dimension_numbers<[1], [0], [0], [1], [0, 0, 1, 1], [], []>} : vector<8x8xf32>, vector<8x8xf32>, vector<8x8xf32> -> vector<8x8xf32>
    %cst_122 = arith.constant dense<0.000000e+00> : vector<8x32xf32>
    %124 = tpu.matmul %123, %2, %cst_122 {dimension_numbers = #tpu.dot_dimension_numbers<[1], [0], [0], [1], [0, 0, 1, 1], [], []>} : vector<8x8xf32>, vector<8x32xf32>, vector<8x32xf32> -> vector<8x32xf32>
    %c10 = arith.constant 10 : index
    %c0_123 = arith.constant 0 : index
    %c0_124 = arith.constant 0 : index
    %125 = vector.load %arg3[%c10, %c0_123, %c0_124] : memref<16x32x128xf32, #tpu.memory_space<vmem>>, vector<1x32x128xf32>
    %126 = vector.shape_cast %125 : vector<1x32x128xf32> to vector<32x128xf32>
    %cst_125 = arith.constant dense<0.000000e+00> : vector<8x128xf32>
    %127 = tpu.matmul %124, %126, %cst_125 {dimension_numbers = #tpu.dot_dimension_numbers<[1], [0], [0], [1], [0, 0, 1, 1], [], []>} : vector<8x32xf32>, vector<32x128xf32>, vector<8x128xf32> -> vector<8x128xf32>
    %128 = arith.addf %118, %127 : vector<8x128xf32>
    %c10_126 = arith.constant 10 : index
    %c0_127 = arith.constant 0 : index
    %c0_128 = arith.constant 0 : index
    %129 = vector.load %arg4[%c10_126, %c0_127, %c0_128] : memref<16x32x128xf32, #tpu.memory_space<vmem>>, vector<1x32x128xf32>
    %130 = vector.shape_cast %129 : vector<1x32x128xf32> to vector<32x128xf32>
    %cst_129 = arith.constant dense<0.000000e+00> : vector<8x128xf32>
    %131 = tpu.matmul %124, %130, %cst_129 {dimension_numbers = #tpu.dot_dimension_numbers<[1], [0], [0], [1], [0, 0, 1, 1], [], []>} : vector<8x32xf32>, vector<32x128xf32>, vector<8x128xf32> -> vector<8x128xf32>
    %132 = arith.addf %122, %131 : vector<8x128xf32>
    %cst_130 = arith.constant dense<0.000000e+00> : vector<8x8xf32>
    %133 = tpu.matmul %102, %14, %cst_130 {dimension_numbers = #tpu.dot_dimension_numbers<[1], [0], [0], [1], [0, 0, 1, 1], [], []>} : vector<8x8xf32>, vector<8x8xf32>, vector<8x8xf32> -> vector<8x8xf32>
    %cst_131 = arith.constant dense<0.000000e+00> : vector<8x32xf32>
    %134 = tpu.matmul %133, %2, %cst_131 {dimension_numbers = #tpu.dot_dimension_numbers<[1], [0], [0], [1], [0, 0, 1, 1], [], []>} : vector<8x8xf32>, vector<8x32xf32>, vector<8x32xf32> -> vector<8x32xf32>
    %c11 = arith.constant 11 : index
    %c0_132 = arith.constant 0 : index
    %c0_133 = arith.constant 0 : index
    %135 = vector.load %arg3[%c11, %c0_132, %c0_133] : memref<16x32x128xf32, #tpu.memory_space<vmem>>, vector<1x32x128xf32>
    %136 = vector.shape_cast %135 : vector<1x32x128xf32> to vector<32x128xf32>
    %cst_134 = arith.constant dense<0.000000e+00> : vector<8x128xf32>
    %137 = tpu.matmul %134, %136, %cst_134 {dimension_numbers = #tpu.dot_dimension_numbers<[1], [0], [0], [1], [0, 0, 1, 1], [], []>} : vector<8x32xf32>, vector<32x128xf32>, vector<8x128xf32> -> vector<8x128xf32>
    %138 = arith.addf %128, %137 : vector<8x128xf32>
    %c11_135 = arith.constant 11 : index
    %c0_136 = arith.constant 0 : index
    %c0_137 = arith.constant 0 : index
    %139 = vector.load %arg4[%c11_135, %c0_136, %c0_137] : memref<16x32x128xf32, #tpu.memory_space<vmem>>, vector<1x32x128xf32>
    %140 = vector.shape_cast %139 : vector<1x32x128xf32> to vector<32x128xf32>
    %cst_138 = arith.constant dense<0.000000e+00> : vector<8x128xf32>
    %141 = tpu.matmul %134, %140, %cst_138 {dimension_numbers = #tpu.dot_dimension_numbers<[1], [0], [0], [1], [0, 0, 1, 1], [], []>} : vector<8x32xf32>, vector<32x128xf32>, vector<8x128xf32> -> vector<8x128xf32>
    %142 = arith.addf %132, %141 : vector<8x128xf32>
    %c3_139 = arith.constant 3 : index
    %c0_140 = arith.constant 0 : index
    %c0_141 = arith.constant 0 : index
    %143 = vector.load %arg1[%c3_139, %c0_140, %c0_141] : memref<4x8x8xf32, #tpu.memory_space<vmem>>, vector<1x8x8xf32>
    %144 = vector.shape_cast %143 : vector<1x8x8xf32> to vector<8x8xf32>
    %cst_142 = arith.constant dense<0.000000e+00> : vector<8x8xf32>
    %145 = tpu.matmul %144, %5, %cst_142 {dimension_numbers = #tpu.dot_dimension_numbers<[1], [0], [0], [1], [0, 0, 1, 1], [], []>} : vector<8x8xf32>, vector<8x8xf32>, vector<8x8xf32> -> vector<8x8xf32>
    %cst_143 = arith.constant dense<0.000000e+00> : vector<8x32xf32>
    %146 = tpu.matmul %145, %2, %cst_143 {dimension_numbers = #tpu.dot_dimension_numbers<[1], [0], [0], [1], [0, 0, 1, 1], [], []>} : vector<8x8xf32>, vector<8x32xf32>, vector<8x32xf32> -> vector<8x32xf32>
    %c12 = arith.constant 12 : index
    %c0_144 = arith.constant 0 : index
    %c0_145 = arith.constant 0 : index
    %147 = vector.load %arg3[%c12, %c0_144, %c0_145] : memref<16x32x128xf32, #tpu.memory_space<vmem>>, vector<1x32x128xf32>
    %148 = vector.shape_cast %147 : vector<1x32x128xf32> to vector<32x128xf32>
    %cst_146 = arith.constant dense<0.000000e+00> : vector<8x128xf32>
    %149 = tpu.matmul %146, %148, %cst_146 {dimension_numbers = #tpu.dot_dimension_numbers<[1], [0], [0], [1], [0, 0, 1, 1], [], []>} : vector<8x32xf32>, vector<32x128xf32>, vector<8x128xf32> -> vector<8x128xf32>
    %150 = arith.addf %138, %149 : vector<8x128xf32>
    %c12_147 = arith.constant 12 : index
    %c0_148 = arith.constant 0 : index
    %c0_149 = arith.constant 0 : index
    %151 = vector.load %arg4[%c12_147, %c0_148, %c0_149] : memref<16x32x128xf32, #tpu.memory_space<vmem>>, vector<1x32x128xf32>
    %152 = vector.shape_cast %151 : vector<1x32x128xf32> to vector<32x128xf32>
    %cst_150 = arith.constant dense<0.000000e+00> : vector<8x128xf32>
    %153 = tpu.matmul %146, %152, %cst_150 {dimension_numbers = #tpu.dot_dimension_numbers<[1], [0], [0], [1], [0, 0, 1, 1], [], []>} : vector<8x32xf32>, vector<32x128xf32>, vector<8x128xf32> -> vector<8x128xf32>
    %154 = arith.addf %142, %153 : vector<8x128xf32>
    %cst_151 = arith.constant dense<0.000000e+00> : vector<8x8xf32>
    %155 = tpu.matmul %144, %8, %cst_151 {dimension_numbers = #tpu.dot_dimension_numbers<[1], [0], [0], [1], [0, 0, 1, 1], [], []>} : vector<8x8xf32>, vector<8x8xf32>, vector<8x8xf32> -> vector<8x8xf32>
    %cst_152 = arith.constant dense<0.000000e+00> : vector<8x32xf32>
    %156 = tpu.matmul %155, %2, %cst_152 {dimension_numbers = #tpu.dot_dimension_numbers<[1], [0], [0], [1], [0, 0, 1, 1], [], []>} : vector<8x8xf32>, vector<8x32xf32>, vector<8x32xf32> -> vector<8x32xf32>
    %c13 = arith.constant 13 : index
    %c0_153 = arith.constant 0 : index
    %c0_154 = arith.constant 0 : index
    %157 = vector.load %arg3[%c13, %c0_153, %c0_154] : memref<16x32x128xf32, #tpu.memory_space<vmem>>, vector<1x32x128xf32>
    %158 = vector.shape_cast %157 : vector<1x32x128xf32> to vector<32x128xf32>
    %cst_155 = arith.constant dense<0.000000e+00> : vector<8x128xf32>
    %159 = tpu.matmul %156, %158, %cst_155 {dimension_numbers = #tpu.dot_dimension_numbers<[1], [0], [0], [1], [0, 0, 1, 1], [], []>} : vector<8x32xf32>, vector<32x128xf32>, vector<8x128xf32> -> vector<8x128xf32>
    %160 = arith.addf %150, %159 : vector<8x128xf32>
    %c13_156 = arith.constant 13 : index
    %c0_157 = arith.constant 0 : index
    %c0_158 = arith.constant 0 : index
    %161 = vector.load %arg4[%c13_156, %c0_157, %c0_158] : memref<16x32x128xf32, #tpu.memory_space<vmem>>, vector<1x32x128xf32>
    %162 = vector.shape_cast %161 : vector<1x32x128xf32> to vector<32x128xf32>
    %cst_159 = arith.constant dense<0.000000e+00> : vector<8x128xf32>
    %163 = tpu.matmul %156, %162, %cst_159 {dimension_numbers = #tpu.dot_dimension_numbers<[1], [0], [0], [1], [0, 0, 1, 1], [], []>} : vector<8x32xf32>, vector<32x128xf32>, vector<8x128xf32> -> vector<8x128xf32>
    %164 = arith.addf %154, %163 : vector<8x128xf32>
    %cst_160 = arith.constant dense<0.000000e+00> : vector<8x8xf32>
    %165 = tpu.matmul %144, %11, %cst_160 {dimension_numbers = #tpu.dot_dimension_numbers<[1], [0], [0], [1], [0, 0, 1, 1], [], []>} : vector<8x8xf32>, vector<8x8xf32>, vector<8x8xf32> -> vector<8x8xf32>
    %cst_161 = arith.constant dense<0.000000e+00> : vector<8x32xf32>
    %166 = tpu.matmul %165, %2, %cst_161 {dimension_numbers = #tpu.dot_dimension_numbers<[1], [0], [0], [1], [0, 0, 1, 1], [], []>} : vector<8x8xf32>, vector<8x32xf32>, vector<8x32xf32> -> vector<8x32xf32>
    %c14 = arith.constant 14 : index
    %c0_162 = arith.constant 0 : index
    %c0_163 = arith.constant 0 : index
    %167 = vector.load %arg3[%c14, %c0_162, %c0_163] : memref<16x32x128xf32, #tpu.memory_space<vmem>>, vector<1x32x128xf32>
    %168 = vector.shape_cast %167 : vector<1x32x128xf32> to vector<32x128xf32>
    %cst_164 = arith.constant dense<0.000000e+00> : vector<8x128xf32>
    %169 = tpu.matmul %166, %168, %cst_164 {dimension_numbers = #tpu.dot_dimension_numbers<[1], [0], [0], [1], [0, 0, 1, 1], [], []>} : vector<8x32xf32>, vector<32x128xf32>, vector<8x128xf32> -> vector<8x128xf32>
    %170 = arith.addf %160, %169 : vector<8x128xf32>
    %c14_165 = arith.constant 14 : index
    %c0_166 = arith.constant 0 : index
    %c0_167 = arith.constant 0 : index
    %171 = vector.load %arg4[%c14_165, %c0_166, %c0_167] : memref<16x32x128xf32, #tpu.memory_space<vmem>>, vector<1x32x128xf32>
    %172 = vector.shape_cast %171 : vector<1x32x128xf32> to vector<32x128xf32>
    %cst_168 = arith.constant dense<0.000000e+00> : vector<8x128xf32>
    %173 = tpu.matmul %166, %172, %cst_168 {dimension_numbers = #tpu.dot_dimension_numbers<[1], [0], [0], [1], [0, 0, 1, 1], [], []>} : vector<8x32xf32>, vector<32x128xf32>, vector<8x128xf32> -> vector<8x128xf32>
    %174 = arith.addf %164, %173 : vector<8x128xf32>
    %cst_169 = arith.constant dense<0.000000e+00> : vector<8x8xf32>
    %175 = tpu.matmul %144, %14, %cst_169 {dimension_numbers = #tpu.dot_dimension_numbers<[1], [0], [0], [1], [0, 0, 1, 1], [], []>} : vector<8x8xf32>, vector<8x8xf32>, vector<8x8xf32> -> vector<8x8xf32>
    %cst_170 = arith.constant dense<0.000000e+00> : vector<8x32xf32>
    %176 = tpu.matmul %175, %2, %cst_170 {dimension_numbers = #tpu.dot_dimension_numbers<[1], [0], [0], [1], [0, 0, 1, 1], [], []>} : vector<8x8xf32>, vector<8x32xf32>, vector<8x32xf32> -> vector<8x32xf32>
    %c15 = arith.constant 15 : index
    %c0_171 = arith.constant 0 : index
    %c0_172 = arith.constant 0 : index
    %177 = vector.load %arg3[%c15, %c0_171, %c0_172] : memref<16x32x128xf32, #tpu.memory_space<vmem>>, vector<1x32x128xf32>
    %178 = vector.shape_cast %177 : vector<1x32x128xf32> to vector<32x128xf32>
    %cst_173 = arith.constant dense<0.000000e+00> : vector<8x128xf32>
    %179 = tpu.matmul %176, %178, %cst_173 {dimension_numbers = #tpu.dot_dimension_numbers<[1], [0], [0], [1], [0, 0, 1, 1], [], []>} : vector<8x32xf32>, vector<32x128xf32>, vector<8x128xf32> -> vector<8x128xf32>
    %180 = arith.addf %170, %179 : vector<8x128xf32>
    %c15_174 = arith.constant 15 : index
    %c0_175 = arith.constant 0 : index
    %c0_176 = arith.constant 0 : index
    %181 = vector.load %arg4[%c15_174, %c0_175, %c0_176] : memref<16x32x128xf32, #tpu.memory_space<vmem>>, vector<1x32x128xf32>
    %182 = vector.shape_cast %181 : vector<1x32x128xf32> to vector<32x128xf32>
    %cst_177 = arith.constant dense<0.000000e+00> : vector<8x128xf32>
    %183 = tpu.matmul %176, %182, %cst_177 {dimension_numbers = #tpu.dot_dimension_numbers<[1], [0], [0], [1], [0, 0, 1, 1], [], []>} : vector<8x32xf32>, vector<32x128xf32>, vector<8x128xf32> -> vector<8x128xf32>
    %184 = arith.addf %174, %183 : vector<8x128xf32>
    %185 = vector.extract_strided_slice %180 {offsets = [0, 0], sizes = [8, 32], strides = [1, 1]} : vector<8x128xf32> to vector<8x32xf32>
    %186 = vector.extract_strided_slice %184 {offsets = [0, 0], sizes = [8, 32], strides = [1, 1]} : vector<8x128xf32> to vector<8x32xf32>
    %187 = arith.mulf %185, %186 : vector<8x32xf32>
    %188 = vector.shape_cast %187 : vector<8x32xf32> to vector<1x8x32xf32>
    %cst_178 = arith.constant dense<0.000000e+00> : vector<1xf32>
    %189 = vector.multi_reduction <add>, %188, %cst_178 [1, 2] : vector<1x8x32xf32> to vector<1xf32>
    %190 = vector.shape_cast %189 : vector<1xf32> to vector<1x1x1xf32>
    %191 = vector.extract %190[0, 0, 0] : f32 from vector<1x1x1xf32>
    %c0_179 = arith.constant 0 : index
    %c0_180 = arith.constant 0 : index
    %192 = memref.load %arg5[%c0_179, %c0_180] : memref<4x4xf32, #tpu.memory_space<smem>>
    %193 = arith.mulf %191, %192 : f32
    %cst_181 = arith.constant 0.000000e+00 : f32
    %194 = arith.addf %cst_181, %193 : f32
    %cst_182 = arith.constant 0.000000e+00 : f32
    %195 = arith.addf %cst_182, %191 : f32
    %196 = vector.extract_strided_slice %184 {offsets = [0, 32], sizes = [8, 32], strides = [1, 1]} : vector<8x128xf32> to vector<8x32xf32>
    %197 = arith.mulf %185, %196 : vector<8x32xf32>
    %198 = vector.shape_cast %197 : vector<8x32xf32> to vector<1x8x32xf32>
    %cst_183 = arith.constant dense<0.000000e+00> : vector<1xf32>
    %199 = vector.multi_reduction <add>, %198, %cst_183 [1, 2] : vector<1x8x32xf32> to vector<1xf32>
    %200 = vector.shape_cast %199 : vector<1xf32> to vector<1x1x1xf32>
    %201 = vector.extract %200[0, 0, 0] : f32 from vector<1x1x1xf32>
    %c0_184 = arith.constant 0 : index
    %c1_185 = arith.constant 1 : index
    %202 = memref.load %arg5[%c0_184, %c1_185] : memref<4x4xf32, #tpu.memory_space<smem>>
    %203 = arith.mulf %201, %202 : f32
    %204 = arith.addf %194, %203 : f32
    %205 = vector.extract_strided_slice %184 {offsets = [0, 64], sizes = [8, 32], strides = [1, 1]} : vector<8x128xf32> to vector<8x32xf32>
    %206 = arith.mulf %185, %205 : vector<8x32xf32>
    %207 = vector.shape_cast %206 : vector<8x32xf32> to vector<1x8x32xf32>
    %cst_186 = arith.constant dense<0.000000e+00> : vector<1xf32>
    %208 = vector.multi_reduction <add>, %207, %cst_186 [1, 2] : vector<1x8x32xf32> to vector<1xf32>
    %209 = vector.shape_cast %208 : vector<1xf32> to vector<1x1x1xf32>
    %210 = vector.extract %209[0, 0, 0] : f32 from vector<1x1x1xf32>
    %c1_187 = arith.constant 1 : index
    %c0_188 = arith.constant 0 : index
    %211 = memref.load %arg5[%c1_187, %c0_188] : memref<4x4xf32, #tpu.memory_space<smem>>
    %212 = arith.mulf %210, %211 : f32
    %213 = arith.addf %204, %212 : f32
    %214 = vector.extract_strided_slice %184 {offsets = [0, 96], sizes = [8, 32], strides = [1, 1]} : vector<8x128xf32> to vector<8x32xf32>
    %215 = arith.mulf %185, %214 : vector<8x32xf32>
    %216 = vector.shape_cast %215 : vector<8x32xf32> to vector<1x8x32xf32>
    %cst_189 = arith.constant dense<0.000000e+00> : vector<1xf32>
    %217 = vector.multi_reduction <add>, %216, %cst_189 [1, 2] : vector<1x8x32xf32> to vector<1xf32>
    %218 = vector.shape_cast %217 : vector<1xf32> to vector<1x1x1xf32>
    %219 = vector.extract %218[0, 0, 0] : f32 from vector<1x1x1xf32>
    %c1_190 = arith.constant 1 : index
    %c1_191 = arith.constant 1 : index
    %220 = memref.load %arg5[%c1_190, %c1_191] : memref<4x4xf32, #tpu.memory_space<smem>>
    %221 = arith.mulf %219, %220 : f32
    %222 = arith.addf %213, %221 : f32
    %223 = arith.addf %195, %219 : f32
    %224 = vector.extract_strided_slice %180 {offsets = [0, 32], sizes = [8, 32], strides = [1, 1]} : vector<8x128xf32> to vector<8x32xf32>
    %225 = vector.extract_strided_slice %184 {offsets = [0, 0], sizes = [8, 32], strides = [1, 1]} : vector<8x128xf32> to vector<8x32xf32>
    %226 = arith.mulf %224, %225 : vector<8x32xf32>
    %227 = vector.shape_cast %226 : vector<8x32xf32> to vector<1x8x32xf32>
    %cst_192 = arith.constant dense<0.000000e+00> : vector<1xf32>
    %228 = vector.multi_reduction <add>, %227, %cst_192 [1, 2] : vector<1x8x32xf32> to vector<1xf32>
    %229 = vector.shape_cast %228 : vector<1xf32> to vector<1x1x1xf32>
    %230 = vector.extract %229[0, 0, 0] : f32 from vector<1x1x1xf32>
    %c0_193 = arith.constant 0 : index
    %c2_194 = arith.constant 2 : index
    %231 = memref.load %arg5[%c0_193, %c2_194] : memref<4x4xf32, #tpu.memory_space<smem>>
    %232 = arith.mulf %230, %231 : f32
    %233 = arith.addf %222, %232 : f32
    %234 = vector.extract_strided_slice %184 {offsets = [0, 32], sizes = [8, 32], strides = [1, 1]} : vector<8x128xf32> to vector<8x32xf32>
    %235 = arith.mulf %224, %234 : vector<8x32xf32>
    %236 = vector.shape_cast %235 : vector<8x32xf32> to vector<1x8x32xf32>
    %cst_195 = arith.constant dense<0.000000e+00> : vector<1xf32>
    %237 = vector.multi_reduction <add>, %236, %cst_195 [1, 2] : vector<1x8x32xf32> to vector<1xf32>
    %238 = vector.shape_cast %237 : vector<1xf32> to vector<1x1x1xf32>
    %239 = vector.extract %238[0, 0, 0] : f32 from vector<1x1x1xf32>
    %c0_196 = arith.constant 0 : index
    %c3_197 = arith.constant 3 : index
    %240 = memref.load %arg5[%c0_196, %c3_197] : memref<4x4xf32, #tpu.memory_space<smem>>
    %241 = arith.mulf %239, %240 : f32
    %242 = arith.addf %233, %241 : f32
    %243 = vector.extract_strided_slice %184 {offsets = [0, 64], sizes = [8, 32], strides = [1, 1]} : vector<8x128xf32> to vector<8x32xf32>
    %244 = arith.mulf %224, %243 : vector<8x32xf32>
    %245 = vector.shape_cast %244 : vector<8x32xf32> to vector<1x8x32xf32>
    %cst_198 = arith.constant dense<0.000000e+00> : vector<1xf32>
    %246 = vector.multi_reduction <add>, %245, %cst_198 [1, 2] : vector<1x8x32xf32> to vector<1xf32>
    %247 = vector.shape_cast %246 : vector<1xf32> to vector<1x1x1xf32>
    %248 = vector.extract %247[0, 0, 0] : f32 from vector<1x1x1xf32>
    %c1_199 = arith.constant 1 : index
    %c2_200 = arith.constant 2 : index
    %249 = memref.load %arg5[%c1_199, %c2_200] : memref<4x4xf32, #tpu.memory_space<smem>>
    %250 = arith.mulf %248, %249 : f32
    %251 = arith.addf %242, %250 : f32
    %252 = vector.extract_strided_slice %184 {offsets = [0, 96], sizes = [8, 32], strides = [1, 1]} : vector<8x128xf32> to vector<8x32xf32>
    %253 = arith.mulf %224, %252 : vector<8x32xf32>
    %254 = vector.shape_cast %253 : vector<8x32xf32> to vector<1x8x32xf32>
    %cst_201 = arith.constant dense<0.000000e+00> : vector<1xf32>
    %255 = vector.multi_reduction <add>, %254, %cst_201 [1, 2] : vector<1x8x32xf32> to vector<1xf32>
    %256 = vector.shape_cast %255 : vector<1xf32> to vector<1x1x1xf32>
    %257 = vector.extract %256[0, 0, 0] : f32 from vector<1x1x1xf32>
    %c1_202 = arith.constant 1 : index
    %c3_203 = arith.constant 3 : index
    %258 = memref.load %arg5[%c1_202, %c3_203] : memref<4x4xf32, #tpu.memory_space<smem>>
    %259 = arith.mulf %257, %258 : f32
    %260 = arith.addf %251, %259 : f32
    %261 = vector.extract_strided_slice %180 {offsets = [0, 64], sizes = [8, 32], strides = [1, 1]} : vector<8x128xf32> to vector<8x32xf32>
    %262 = vector.extract_strided_slice %184 {offsets = [0, 0], sizes = [8, 32], strides = [1, 1]} : vector<8x128xf32> to vector<8x32xf32>
    %263 = arith.mulf %261, %262 : vector<8x32xf32>
    %264 = vector.shape_cast %263 : vector<8x32xf32> to vector<1x8x32xf32>
    %cst_204 = arith.constant dense<0.000000e+00> : vector<1xf32>
    %265 = vector.multi_reduction <add>, %264, %cst_204 [1, 2] : vector<1x8x32xf32> to vector<1xf32>
    %266 = vector.shape_cast %265 : vector<1xf32> to vector<1x1x1xf32>
    %267 = vector.extract %266[0, 0, 0] : f32 from vector<1x1x1xf32>
    %c2_205 = arith.constant 2 : index
    %c0_206 = arith.constant 0 : index
    %268 = memref.load %arg5[%c2_205, %c0_206] : memref<4x4xf32, #tpu.memory_space<smem>>
    %269 = arith.mulf %267, %268 : f32
    %270 = arith.addf %260, %269 : f32
    %271 = vector.extract_strided_slice %184 {offsets = [0, 32], sizes = [8, 32], strides = [1, 1]} : vector<8x128xf32> to vector<8x32xf32>
    %272 = arith.mulf %261, %271 : vector<8x32xf32>
    %273 = vector.shape_cast %272 : vector<8x32xf32> to vector<1x8x32xf32>
    %cst_207 = arith.constant dense<0.000000e+00> : vector<1xf32>
    %274 = vector.multi_reduction <add>, %273, %cst_207 [1, 2] : vector<1x8x32xf32> to vector<1xf32>
    %275 = vector.shape_cast %274 : vector<1xf32> to vector<1x1x1xf32>
    %276 = vector.extract %275[0, 0, 0] : f32 from vector<1x1x1xf32>
    %c2_208 = arith.constant 2 : index
    %c1_209 = arith.constant 1 : index
    %277 = memref.load %arg5[%c2_208, %c1_209] : memref<4x4xf32, #tpu.memory_space<smem>>
    %278 = arith.mulf %276, %277 : f32
    %279 = arith.addf %270, %278 : f32
    %280 = vector.extract_strided_slice %184 {offsets = [0, 64], sizes = [8, 32], strides = [1, 1]} : vector<8x128xf32> to vector<8x32xf32>
    %281 = arith.mulf %261, %280 : vector<8x32xf32>
    %282 = vector.shape_cast %281 : vector<8x32xf32> to vector<1x8x32xf32>
    %cst_210 = arith.constant dense<0.000000e+00> : vector<1xf32>
    %283 = vector.multi_reduction <add>, %282, %cst_210 [1, 2] : vector<1x8x32xf32> to vector<1xf32>
    %284 = vector.shape_cast %283 : vector<1xf32> to vector<1x1x1xf32>
    %285 = vector.extract %284[0, 0, 0] : f32 from vector<1x1x1xf32>
    %c3_211 = arith.constant 3 : index
    %c0_212 = arith.constant 0 : index
    %286 = memref.load %arg5[%c3_211, %c0_212] : memref<4x4xf32, #tpu.memory_space<smem>>
    %287 = arith.mulf %285, %286 : f32
    %288 = arith.addf %279, %287 : f32
    %289 = vector.extract_strided_slice %184 {offsets = [0, 96], sizes = [8, 32], strides = [1, 1]} : vector<8x128xf32> to vector<8x32xf32>
    %290 = arith.mulf %261, %289 : vector<8x32xf32>
    %291 = vector.shape_cast %290 : vector<8x32xf32> to vector<1x8x32xf32>
    %cst_213 = arith.constant dense<0.000000e+00> : vector<1xf32>
    %292 = vector.multi_reduction <add>, %291, %cst_213 [1, 2] : vector<1x8x32xf32> to vector<1xf32>
    %293 = vector.shape_cast %292 : vector<1xf32> to vector<1x1x1xf32>
    %294 = vector.extract %293[0, 0, 0] : f32 from vector<1x1x1xf32>
    %c3_214 = arith.constant 3 : index
    %c1_215 = arith.constant 1 : index
    %295 = memref.load %arg5[%c3_214, %c1_215] : memref<4x4xf32, #tpu.memory_space<smem>>
    %296 = arith.mulf %294, %295 : f32
    %297 = arith.addf %288, %296 : f32
    %298 = vector.extract_strided_slice %180 {offsets = [0, 96], sizes = [8, 32], strides = [1, 1]} : vector<8x128xf32> to vector<8x32xf32>
    %299 = vector.extract_strided_slice %184 {offsets = [0, 0], sizes = [8, 32], strides = [1, 1]} : vector<8x128xf32> to vector<8x32xf32>
    %300 = arith.mulf %298, %299 : vector<8x32xf32>
    %301 = vector.shape_cast %300 : vector<8x32xf32> to vector<1x8x32xf32>
    %cst_216 = arith.constant dense<0.000000e+00> : vector<1xf32>
    %302 = vector.multi_reduction <add>, %301, %cst_216 [1, 2] : vector<1x8x32xf32> to vector<1xf32>
    %303 = vector.shape_cast %302 : vector<1xf32> to vector<1x1x1xf32>
    %304 = vector.extract %303[0, 0, 0] : f32 from vector<1x1x1xf32>
    %c2_217 = arith.constant 2 : index
    %c2_218 = arith.constant 2 : index
    %305 = memref.load %arg5[%c2_217, %c2_218] : memref<4x4xf32, #tpu.memory_space<smem>>
    %306 = arith.mulf %304, %305 : f32
    %307 = arith.addf %297, %306 : f32
    %308 = arith.addf %223, %304 : f32
    %309 = vector.extract_strided_slice %184 {offsets = [0, 32], sizes = [8, 32], strides = [1, 1]} : vector<8x128xf32> to vector<8x32xf32>
    %310 = arith.mulf %298, %309 : vector<8x32xf32>
    %311 = vector.shape_cast %310 : vector<8x32xf32> to vector<1x8x32xf32>
    %cst_219 = arith.constant dense<0.000000e+00> : vector<1xf32>
    %312 = vector.multi_reduction <add>, %311, %cst_219 [1, 2] : vector<1x8x32xf32> to vector<1xf32>
    %313 = vector.shape_cast %312 : vector<1xf32> to vector<1x1x1xf32>
    %314 = vector.extract %313[0, 0, 0] : f32 from vector<1x1x1xf32>
    %c2_220 = arith.constant 2 : index
    %c3_221 = arith.constant 3 : index
    %315 = memref.load %arg5[%c2_220, %c3_221] : memref<4x4xf32, #tpu.memory_space<smem>>
    %316 = arith.mulf %314, %315 : f32
    %317 = arith.addf %307, %316 : f32
    %318 = vector.extract_strided_slice %184 {offsets = [0, 64], sizes = [8, 32], strides = [1, 1]} : vector<8x128xf32> to vector<8x32xf32>
    %319 = arith.mulf %298, %318 : vector<8x32xf32>
    %320 = vector.shape_cast %319 : vector<8x32xf32> to vector<1x8x32xf32>
    %cst_222 = arith.constant dense<0.000000e+00> : vector<1xf32>
    %321 = vector.multi_reduction <add>, %320, %cst_222 [1, 2] : vector<1x8x32xf32> to vector<1xf32>
    %322 = vector.shape_cast %321 : vector<1xf32> to vector<1x1x1xf32>
    %323 = vector.extract %322[0, 0, 0] : f32 from vector<1x1x1xf32>
    %c3_223 = arith.constant 3 : index
    %c2_224 = arith.constant 2 : index
    %324 = memref.load %arg5[%c3_223, %c2_224] : memref<4x4xf32, #tpu.memory_space<smem>>
    %325 = arith.mulf %323, %324 : f32
    %326 = arith.addf %317, %325 : f32
    %327 = vector.extract_strided_slice %184 {offsets = [0, 96], sizes = [8, 32], strides = [1, 1]} : vector<8x128xf32> to vector<8x32xf32>
    %328 = arith.mulf %298, %327 : vector<8x32xf32>
    %329 = vector.shape_cast %328 : vector<8x32xf32> to vector<1x8x32xf32>
    %cst_225 = arith.constant dense<0.000000e+00> : vector<1xf32>
    %330 = vector.multi_reduction <add>, %329, %cst_225 [1, 2] : vector<1x8x32xf32> to vector<1xf32>
    %331 = vector.shape_cast %330 : vector<1xf32> to vector<1x1x1xf32>
    %332 = vector.extract %331[0, 0, 0] : f32 from vector<1x1x1xf32>
    %c3_226 = arith.constant 3 : index
    %c3_227 = arith.constant 3 : index
    %333 = memref.load %arg5[%c3_226, %c3_227] : memref<4x4xf32, #tpu.memory_space<smem>>
    %334 = arith.mulf %332, %333 : f32
    %335 = arith.addf %326, %334 : f32
    %336 = arith.addf %308, %332 : f32
    %337 = arith.divf %335, %336 : f32
    %cst_228 = arith.constant 1.000000e+00 : f32
    %338 = vector.broadcast %cst_228 : f32 to vector<1x1xf32>
    %339 = vector.broadcast %337 : f32 to vector<1x1xf32>
    %340 = arith.mulf %339, %338 : vector<1x1xf32>
    %c0_229 = arith.constant 0 : index
    %c0_230 = arith.constant 0 : index
    %341 = vector.load %arg6[%c0_229, %c0_230] : memref<1x1xf32, #tpu.memory_space<vmem>>, vector<1x1xf32>
    tpu.vector_store %arg6[%c0_229, %c0_230], %340 {strides = array<i32>} : memref<1x1xf32, #tpu.memory_space<vmem>>, vector<1x1xf32>,
    return
  }
}

</mosaic_0001>

<bundles_post_ra>
// kernel: mul.39
= control target key start
LH: loop header
LB: loop body
LE: loop exit
PB: predicated region body
PF: predicated region fallthrough
CT: control target
= control target key end

     0   :  { %vm322_vm0 = vcmask 1047556   ;;  %s758_s10 = smov 2   ;;  %vm324_vm1 = vcmask 15360   ;;  %vm413_vm2 = vcmask 31760   ;;  %s1065_s0 = inlined_call_operand.vmem [shape: f32[2,2,2,2,2,2,2,2], index: 0, kind: input, shape index: {}]   ;;  %s1066_s1 = inlined_call_operand.vmem [shape: f32[4,4,4,4], index: 1, kind: output, shape index: {}]  }
   0x1   :  { %v735_v0 = vld [vmem:[%s1065_s0 + $0xe] sm:$0x3]  ;;  %v736_v1 = vld [vmem:[%s1065_s0 + $0xc] sm:$0x3]  ;;  %v737_v2 = vld [vmem:[%s1065_s0 + $0xa] sm:$0x3] }
   0x2   :  { %288 = vst [vmem:[#allocation1 + $0x38] sm:$0x3] %v735_v0  ;;  %293 = vst [vmem:[#allocation1 + $0x30] sm:$0x3] %v736_v1  ;;  %v738_v3 = vld [vmem:[%s1065_s0 + $0x8] sm:$0x3] }
   0x3   :  { %298 = vst [vmem:[#allocation1 + $0x28] sm:$0x3] %v737_v2  ;;  %v739_v4 = vld [vmem:[%s1065_s0 + $0x6] sm:$0x3]  ;;  %v740_v5 = vld [vmem:[%s1065_s0 + $0x4] sm:$0x3] }
   0x4   :  { %303 = vst [vmem:[#allocation1 + $0x20] sm:$0x3] %v738_v3  ;;  %308 = vst [vmem:[#allocation1 + $0x18] sm:$0x3] %v739_v4  ;;  %v741_v6 = vld [vmem:[%s1065_s0 + $0x2] sm:$0x3] }
   0x5   :  { %313 = vst [vmem:[#allocation1 + $0x10] sm:$0x3] %v740_v5  ;;  %v318_v7 = vld [vmem:[%s1065_s0] sm:$0x3]  ;;  %317 = vst [vmem:[#allocation1 + $0x8] sm:$0x3] %v741_v6 }
   0x6   :  { %319 = vst [vmem:[#allocation1] sm:$0x3] %v318_v7  ;;  %v703_v8 = vld [vmem:[%s1065_s0 + $0x4e] sm:$0x3]  ;;  %v704_v9 = vld [vmem:[%s1065_s0 + $0x4c] sm:$0x3] }
   0x7   :  { %v705_v10 = vld [vmem:[%s1065_s0 + $0x4a] sm:$0x3]  ;;  %128 = vst [vmem:[#allocation1 + $0x138] sm:$0x3] %v703_v8  ;;  %133 = vst [vmem:[#allocation1 + $0x130] sm:$0x3] %v704_v9 }
   0x8   :  { %138 = vst [vmem:[#allocation1 + $0x128] sm:$0x3] %v705_v10  ;;  %v706_v11 = vld [vmem:[%s1065_s0 + $0x48] sm:$0x3]  ;;  %v707_v12 = vld [vmem:[%s1065_s0 + $0x46] sm:$0x3] }
   0x9   :  { %v708_v13 = vld [vmem:[%s1065_s0 + $0x44] sm:$0x3]  ;;  %143 = vst [vmem:[#allocation1 + $0x120] sm:$0x3] %v706_v11  ;;  %148 = vst [vmem:[#allocation1 + $0x118] sm:$0x3] %v707_v12 }
   0xa   :  { %153 = vst [vmem:[#allocation1 + $0x110] sm:$0x3] %v708_v13  ;;  %v709_v14 = vld [vmem:[%s1065_s0 + $0x42] sm:$0x3]  ;;  %v710_v15 = vld [vmem:[%s1065_s0 + $0x40] sm:$0x3] }
   0xb   :  { %v719_v16 = vld [vmem:[%s1065_s0 + $0x2e] sm:$0x3]  ;;  %158 = vst [vmem:[#allocation1 + $0x108] sm:$0x3] %v709_v14  ;;  %163 = vst [vmem:[#allocation1 + $0x100] sm:$0x3] %v710_v15 }
   0xc   :  { %208 = vst [vmem:[#allocation1 + $0xb8] sm:$0x3] %v719_v16  ;;  %v720_v17 = vld [vmem:[%s1065_s0 + $0x2c] sm:$0x3]  ;;  %v721_v18 = vld [vmem:[%s1065_s0 + $0x2a] sm:$0x3] }
   0xd   :  { %v722_v19 = vld [vmem:[%s1065_s0 + $0x28] sm:$0x3]  ;;  %213 = vst [vmem:[#allocation1 + $0xb0] sm:$0x3] %v720_v17  ;;  %218 = vst [vmem:[#allocation1 + $0xa8] sm:$0x3] %v721_v18 }
   0xe   :  { %223 = vst [vmem:[#allocation1 + $0xa0] sm:$0x3] %v722_v19  ;;  %v723_v20 = vld [vmem:[%s1065_s0 + $0x26] sm:$0x3]  ;;  %v724_v21 = vld [vmem:[%s1065_s0 + $0x24] sm:$0x3] }
   0xf   :  { %v725_v22 = vld [vmem:[%s1065_s0 + $0x22] sm:$0x3]  ;;  %228 = vst [vmem:[#allocation1 + $0x98] sm:$0x3] %v723_v20  ;;  %233 = vst [vmem:[#allocation1 + $0x90] sm:$0x3] %v724_v21 }
  0x10   :  { %238 = vst [vmem:[#allocation1 + $0x88] sm:$0x3] %v725_v22  ;;  %v726_v23 = vld [vmem:[%s1065_s0 + $0x20] sm:$0x3]  ;;  %v687_v24 = vld [vmem:[%s1065_s0 + $0x6e] sm:$0x3] }
  0x11   :  { %v688_v25 = vld [vmem:[%s1065_s0 + $0x6c] sm:$0x3]  ;;  %v408_v26 = vld [vmem:[#allocation1 + $0x1] ss:$8 sm:$0xf0]  }
  0x12   :  { %243 = vst [vmem:[#allocation1 + $0x80] sm:$0x3] %v726_v23  ;;  %48 = vst [vmem:[#allocation1 + $0x1b8] sm:$0x3] %v687_v24  ;;  %v689_v27 = vld [vmem:[%s1065_s0 + $0x6a] sm:$0x3] }
  0x13   :  { %53 = vst [vmem:[#allocation1 + $0x1b0] sm:$0x3] %v688_v25  ;;  %v406_v28 = vld [vmem:[#allocation1 + $0x1] ss:$8 sm:$0xf]  }
  0x14   :  { %58 = vst [vmem:[#allocation1 + $0x1a8] sm:$0x3] %v689_v27  ;;  %v690_v29 = vld [vmem:[%s1065_s0 + $0x68] sm:$0x3]  ;;  %v410_v30 = vsel %vm322_vm0, %v408_v26, %v406_v28  ;;  %v691_v31 = vld [vmem:[%s1065_s0 + $0x66] sm:$0x3] }
  0x15   :  { %63 = vst [vmem:[#allocation1 + $0x1a0] sm:$0x3] %v690_v29  ;;  %v692_v32 = vld [vmem:[%s1065_s0 + $0x64] sm:$0x3]  ;;  %v693_v33 = vld [vmem:[%s1065_s0 + $0x62] sm:$0x3]  ;;  %411 = vrot.lane.b32.xlu0 %v410_v30, %s758_s10 }
  0x16   :  { %v433_v34 = vld [vmem:[#allocation1 + $0x101] ss:$8 sm:$0xf0]   ;;  %68 = vst [vmem:[#allocation1 + $0x198] sm:$0x3] %v691_v31 }
  0x17   :  { %73 = vst [vmem:[#allocation1 + $0x190] sm:$0x3] %v692_v32  ;;  %78 = vst [vmem:[#allocation1 + $0x188] sm:$0x3] %v693_v33  ;;  %v694_v35 = vld [vmem:[%s1065_s0 + $0x60] sm:$0x3] }
  0x18   :  { %v431_v36 = vld [vmem:[#allocation1 + $0x101] ss:$8 sm:$0xf]   ;;  %83 = vst [vmem:[#allocation1 + $0x180] sm:$0x3] %v694_v35 }
  0x19   :  { %v727_v37 = vld [vmem:[%s1065_s0 + $0x1e] sm:$0x3]  ;;  %v435_v38 = vsel %vm322_vm0, %v433_v34, %v431_v36  ;;  %v420_v39 = vld [vmem:[#allocation1 + $0x81] ss:$8 sm:$0xf0]  }
  0x1a   :  { %248 = vst [vmem:[#allocation1 + $0x78] sm:$0x3] %v727_v37  ;;  %v728_v40 = vld [vmem:[%s1065_s0 + $0x1c] sm:$0x3]  ;;  %436 = vrot.lane.b32.xlu1 %v435_v38, %s758_s10  ;;  %v729_v41 = vld [vmem:[%s1065_s0 + $0x1a] sm:$0x3] }
  0x1b   :  { %253 = vst [vmem:[#allocation1 + $0x70] sm:$0x3] %v728_v40  ;;  %v730_v42 = vld [vmem:[%s1065_s0 + $0x18] sm:$0x3]  ;;  %v731_v43 = vld [vmem:[%s1065_s0 + $0x16] sm:$0x3] }
  0x1c   :  { %v418_v44 = vld [vmem:[#allocation1 + $0x81] ss:$8 sm:$0xf]   ;;  %258 = vst [vmem:[#allocation1 + $0x68] sm:$0x3] %v729_v41 }
  0x1d   :  { %263 = vst [vmem:[#allocation1 + $0x60] sm:$0x3] %v730_v42  ;;  %268 = vst [vmem:[#allocation1 + $0x58] sm:$0x3] %v731_v43  ;;  %v732_v45 = vld [vmem:[%s1065_s0 + $0x14] sm:$0x3]  ;;  %v422_v46 = vsel %vm322_vm0, %v420_v39, %v418_v44 }
  0x1e   :  { %273 = vst [vmem:[#allocation1 + $0x50] sm:$0x3] %v732_v45  ;;  %v733_v47 = vld [vmem:[%s1065_s0 + $0x12] sm:$0x3]  ;;  %v734_v48 = vld [vmem:[%s1065_s0 + $0x10] sm:$0x3]  ;;  %423 = vrot.lane.b32.xlu0 %v422_v46, %s758_s10 }
  0x1f   :  { %v711_v49 = vld [vmem:[%s1065_s0 + $0x3e] sm:$0x3]  ;;  %v446_v50 = vld [vmem:[#allocation1 + $0x181] ss:$8 sm:$0xf0]  }
  0x20   :  { %278 = vst [vmem:[#allocation1 + $0x48] sm:$0x3] %v733_v47  ;;  %283 = vst [vmem:[#allocation1 + $0x40] sm:$0x3] %v734_v48  ;;  %v712_v51 = vld [vmem:[%s1065_s0 + $0x3c] sm:$0x3] }
  0x21   :  { %168 = vst [vmem:[#allocation1 + $0xf8] sm:$0x3] %v711_v49  ;;  %173 = vst [vmem:[#allocation1 + $0xf0] sm:$0x3] %v712_v51  ;;  %v713_v52 = vld [vmem:[%s1065_s0 + $0x3a] sm:$0x3] }
  0x22   :  { %v714_v53 = vld [vmem:[%s1065_s0 + $0x38] sm:$0x3]  ;;  %v715_v54 = vld [vmem:[%s1065_s0 + $0x36] sm:$0x3]  ;;  %178 = vst [vmem:[#allocation1 + $0xe8] sm:$0x3] %v713_v52 }
  0x23   :  { %v444_v55 = vld [vmem:[#allocation1 + $0x181] ss:$8 sm:$0xf]   ;;  %183 = vst [vmem:[#allocation1 + $0xe0] sm:$0x3] %v714_v53 }
  0x24   :  { %188 = vst [vmem:[#allocation1 + $0xd8] sm:$0x3] %v715_v54  ;;  %v716_v56 = vld [vmem:[%s1065_s0 + $0x34] sm:$0x3]  ;;  %v448_v57 = vsel %vm322_vm0, %v446_v50, %v444_v55  ;;  %v717_v58 = vld [vmem:[%s1065_s0 + $0x32] sm:$0x3] }
  0x25   :  { %193 = vst [vmem:[#allocation1 + $0xd0] sm:$0x3] %v716_v56  ;;  %v718_v59 = vld [vmem:[%s1065_s0 + $0x30] sm:$0x3]  ;;  %v695_v60 = vld [vmem:[%s1065_s0 + $0x5e] sm:$0x3]  ;;  %449 = vrot.lane.b32.xlu1 %v448_v57, %s758_s10 }
  0x26   :  { %198 = vst [vmem:[#allocation1 + $0xc8] sm:$0x3] %v717_v58  ;;  %203 = vst [vmem:[#allocation1 + $0xc0] sm:$0x3] %v718_v59  ;;  %v696_v61 = vld [vmem:[%s1065_s0 + $0x5c] sm:$0x3] }
  0x27   :  { %88 = vst [vmem:[#allocation1 + $0x178] sm:$0x3] %v695_v60  ;;  %v697_v62 = vld [vmem:[%s1065_s0 + $0x5a] sm:$0x3]  ;;  %v698_v63 = vld [vmem:[%s1065_s0 + $0x58] sm:$0x3] }
  0x28   :  { %v459_v0 = vld [vmem:[#allocation1 + $0x41] ss:$8 sm:$0xf0]   ;;  %93 = vst [vmem:[#allocation1 + $0x170] sm:$0x3] %v696_v61 }
  0x29   :  { %98 = vst [vmem:[#allocation1 + $0x168] sm:$0x3] %v697_v62  ;;  %103 = vst [vmem:[#allocation1 + $0x160] sm:$0x3] %v698_v63  ;;  %v699_v1 = vld [vmem:[%s1065_s0 + $0x56] sm:$0x3] }
  0x2a   :  { %108 = vst [vmem:[#allocation1 + $0x158] sm:$0x3] %v699_v1  ;;  %v700_v2 = vld [vmem:[%s1065_s0 + $0x54] sm:$0x3]  ;;  %v701_v3 = vld [vmem:[%s1065_s0 + $0x52] sm:$0x3] }
  0x2b   :  { %v702_v4 = vld [vmem:[%s1065_s0 + $0x50] sm:$0x3]  ;;  %113 = vst [vmem:[#allocation1 + $0x150] sm:$0x3] %v700_v2  ;;  %118 = vst [vmem:[#allocation1 + $0x148] sm:$0x3] %v701_v3 }
  0x2c   :  { %v457_v5 = vld [vmem:[#allocation1 + $0x41] ss:$8 sm:$0xf]   ;;  %123 = vst [vmem:[#allocation1 + $0x140] sm:$0x3] %v702_v4 }
  0x2d   :  { %v679_v6 = vld [vmem:[%s1065_s0 + $0x7e] sm:$0x3]  ;;  %v461_v7 = vsel %vm322_vm0, %v459_v0, %v457_v5  ;;  %v680_v8 = vld [vmem:[%s1065_s0 + $0x7c] sm:$0x3]  ;;  %v681_v9 = vld [vmem:[%s1065_s0 + $0x7a] sm:$0x3] }
  0x2e   :  { %8 = vst [vmem:[#allocation1 + $0x1f8] sm:$0x3] %v679_v6  ;;  %v682_v10 = vld [vmem:[%s1065_s0 + $0x78] sm:$0x3]  ;;  %462 = vrot.lane.b32.xlu0 %v461_v7, %s758_s10  ;;  %13 = vst [vmem:[#allocation1 + $0x1f0] sm:$0x3] %v680_v8 }
  0x2f   :  { %v472_v11 = vld [vmem:[#allocation1 + $0xc1] ss:$8 sm:$0xf0]   ;;  %18 = vst [vmem:[#allocation1 + $0x1e8] sm:$0x3] %v681_v9 }
  0x30   :  { %23 = vst [vmem:[#allocation1 + $0x1e0] sm:$0x3] %v682_v10  ;;  %v683_v12 = vld [vmem:[%s1065_s0 + $0x76] sm:$0x3]  ;;  %v684_v13 = vld [vmem:[%s1065_s0 + $0x74] sm:$0x3] }
  0x31   :  { %28 = vst [vmem:[#allocation1 + $0x1d8] sm:$0x3] %v683_v12  ;;  %v685_v14 = vld [vmem:[%s1065_s0 + $0x72] sm:$0x3]  ;;  %v686_v15 = vld [vmem:[%s1065_s0 + $0x70] sm:$0x3] }
  0x32   :  { %v470_v16 = vld [vmem:[#allocation1 + $0xc1] ss:$8 sm:$0xf]   ;;  %33 = vst [vmem:[#allocation1 + $0x1d0] sm:$0x3] %v684_v13 }
  0x33   :  { %38 = vst [vmem:[#allocation1 + $0x1c8] sm:$0x3] %v685_v14  ;;  %43 = vst [vmem:[#allocation1 + $0x1c0] sm:$0x3] %v686_v15  ;;  %v474_v18 = vsel %vm322_vm0, %v472_v11, %v470_v16 }
  0x34   :  { %v320_v17 = vld [vmem:[#allocation1] ss:$8 sm:$0xf]   ;;  %v485_v19 = vld [vmem:[#allocation1 + $0x141] ss:$8 sm:$0xf0]   ;;  %475 = vrot.lane.b32.xlu1 %v474_v18, %s758_s10 }
  0x35   :  { %v321_v20 = vld [vmem:[#allocation1] ss:$8 sm:$0xf0]   ;;  %v483_v24 = vld [vmem:[#allocation1 + $0x141] ss:$8 sm:$0xf]  }
  0x36   :  { %v323_v21 = vsel %vm322_vm0, %v321_v20, %v320_v17  ;;  %v362_v22 = vld [vmem:[#allocation1 + $0x100] ss:$8 sm:$0xf]   ;;  %v487_v27 = vsel %vm322_vm0, %v485_v19, %v483_v24 }
  0x37   :  { %v364_v23 = vld [vmem:[#allocation1 + $0x100] ss:$8 sm:$0xf0]   ;;  %325 = vst.msk [vmem:[#allocation0] sm:$0xf] %vm324_vm1, %v323_v21   ;;  %488 = vrot.lane.b32.xlu0 %v487_v27, %s758_s10 }
  0x38   :  { %327 = vst.msk [vmem:[#allocation0 + $0x4] sm:$0xf0] %vm324_vm1, %v323_v21   ;;  %v366_v25 = vsel %vm322_vm0, %v364_v23, %v362_v22  ;;  %v340_v26 = vld [vmem:[#allocation1 + $0x80] ss:$8 sm:$0xf]  }
  0x39   :  { %369 = vst.msk [vmem:[#allocation0 + $0x40] sm:$0xf] %vm324_vm1, %v366_v25   ;;  %371 = vst.msk [vmem:[#allocation0 + $0x44] sm:$0xf0] %vm324_vm1, %v366_v25  }
  0x3a   :  { %v342_v28 = vld [vmem:[#allocation1 + $0x80] ss:$8 sm:$0xf0]   ;;  %v498_v30 = vld [vmem:[#allocation1 + $0x1c1] ss:$8 sm:$0xf0]  }
  0x3b   :  { %v384_v29 = vld [vmem:[#allocation1 + $0x180] ss:$8 sm:$0xf]   ;;  %v344_v31 = vsel %vm322_vm0, %v342_v28, %v340_v26  ;;  %v496_v36 = vld [vmem:[#allocation1 + $0x1c1] ss:$8 sm:$0xf]  }
  0x3c   :  { %v386_v32 = vld [vmem:[#allocation1 + $0x180] ss:$8 sm:$0xf0]   ;;  %347 = vst.msk [vmem:[#allocation0 + $0x20] sm:$0xf] %vm324_vm1, %v344_v31   ;;  %v500_v39 = vsel %vm322_vm0, %v498_v30, %v496_v36 }
  0x3d   :  { %349 = vst.msk [vmem:[#allocation0 + $0x24] sm:$0xf0] %vm324_vm1, %v344_v31   ;;  %v388_v33 = vsel %vm322_vm0, %v386_v32, %v384_v29  ;;  %v329_v34 = vld [vmem:[#allocation1 + $0x40] ss:$8 sm:$0xf]   ;;  %501 = vrot.lane.b32.xlu1 %v500_v39, %s758_s10 }
  0x3e   :  { %v331_v35 = vld [vmem:[#allocation1 + $0x40] ss:$8 sm:$0xf0]   ;;  %391 = vst.msk [vmem:[#allocation0 + $0x60] sm:$0xf] %vm324_vm1, %v388_v33  }
  0x3f   :  { %393 = vst.msk [vmem:[#allocation0 + $0x64] sm:$0xf0] %vm324_vm1, %v388_v33   ;;  %v333_v37 = vsel %vm322_vm0, %v331_v35, %v329_v34  ;;  %v351_v38 = vld [vmem:[#allocation1 + $0xc0] ss:$8 sm:$0xf]  }
  0x40   :  { %336 = vst.msk [vmem:[#allocation0 + $0x10] sm:$0xf] %vm324_vm1, %v333_v37   ;;  %338 = vst.msk [vmem:[#allocation0 + $0x14] sm:$0xf0] %vm324_vm1, %v333_v37  }
  0x41   :  { %v353_v40 = vld [vmem:[#allocation1 + $0xc0] ss:$8 sm:$0xf0]  }
  0x42   :  { %v373_v41 = vld [vmem:[#allocation1 + $0x140] ss:$8 sm:$0xf]   ;;  %v355_v42 = vsel %vm322_vm0, %v353_v40, %v351_v38 }
  0x43   :  { %v375_v43 = vld [vmem:[#allocation1 + $0x140] ss:$8 sm:$0xf0]   ;;  %358 = vst.msk [vmem:[#allocation0 + $0x30] sm:$0xf] %vm324_vm1, %v355_v42  }
  0x44   :  { %v395_v44 = vld [vmem:[#allocation1 + $0x1c0] ss:$8 sm:$0xf]   ;;  %360 = vst.msk [vmem:[#allocation0 + $0x34] sm:$0xf0] %vm324_vm1, %v355_v42   ;;  %v377_v45 = vsel %vm322_vm0, %v375_v43, %v373_v41 }
  0x45   :  { %v397_v46 = vld [vmem:[#allocation1 + $0x1c0] ss:$8 sm:$0xf0]   ;;  %380 = vst.msk [vmem:[#allocation0 + $0x50] sm:$0xf] %vm324_vm1, %v377_v45  }
  0x46   :  { %382 = vst.msk [vmem:[#allocation0 + $0x54] sm:$0xf0] %vm324_vm1, %v377_v45   ;;  %v399_v47 = vsel %vm322_vm0, %v397_v46, %v395_v44 }
  0x47   :  { %402 = vst.msk [vmem:[#allocation0 + $0x70] sm:$0xf] %vm324_vm1, %v399_v47   ;;  %404 = vst.msk [vmem:[#allocation0 + $0x74] sm:$0xf0] %vm324_vm1, %v399_v47  }
  0x87   :  { %v412_v48 = vpop.permute.xlu0 %411  }
  0x88   :  { %414 = vst.msk [vmem:[#allocation0] sm:$0xf] %vm413_vm2, %v412_v48   ;;  %416 = vst.msk [vmem:[#allocation0 + $0x4] sm:$0xf0] %vm413_vm2, %v412_v48  }
  0x8c   :  { %v437_v49 = vpop.permute.xlu1 %436  }
  0x8d   :  { %440 = vst.msk [vmem:[#allocation0 + $0x40] sm:$0xf] %vm413_vm2, %v437_v49   ;;  %442 = vst.msk [vmem:[#allocation0 + $0x44] sm:$0xf0] %vm413_vm2, %v437_v49  }
  0x8f   :  { %v511_v51 = vld [vmem:[#allocation0] sm:$0xf]  ;;  %v515_v52 = vld [vmem:[#allocation0 + $0x8] sm:$0xf] }
  0x90   :  { %v424_v50 = vpop.permute.xlu0 %423   ;;  %513 = vst [vmem:[%s1066_s1] sm:$0xf] %v511_v51  ;;  %742 = vst [vmem:[%s1066_s1 + $0x4] sm:$0xf] %v515_v52 }
  0x91   :  { %427 = vst.msk [vmem:[#allocation0 + $0x20] sm:$0xf] %vm413_vm2, %v424_v50   ;;  %429 = vst.msk [vmem:[#allocation0 + $0x24] sm:$0xf0] %vm413_vm2, %v424_v50  }
  0x94   :  { %v556_v54 = vld [vmem:[#allocation0 + $0x40] sm:$0xf]  ;;  %v562_v55 = vld [vmem:[#allocation0 + $0x48] sm:$0xf] }
  0x95   :  { %749 = vst [vmem:[%s1066_s1 + $0x20] sm:$0xf] %v556_v54  ;;  %750 = vst [vmem:[%s1066_s1 + $0x24] sm:$0xf] %v562_v55 }
  0x97   :  { %v450_v53 = vpop.permute.xlu1 %449  }
  0x98   :  { %453 = vst.msk [vmem:[#allocation0 + $0x60] sm:$0xf] %vm413_vm2, %v450_v53   ;;  %455 = vst.msk [vmem:[#allocation0 + $0x64] sm:$0xf0] %vm413_vm2, %v450_v53   ;;  %v532_v56 = vld [vmem:[#allocation0 + $0x20] sm:$0xf] }
  0x99   :  { %v538_v57 = vld [vmem:[#allocation0 + $0x28] sm:$0xf]  ;;  %745 = vst [vmem:[%s1066_s1 + $0x10] sm:$0xf] %v532_v56 }
  0x9a   :  { %746 = vst [vmem:[%s1066_s1 + $0x14] sm:$0xf] %v538_v57 }
  0x9f   :  { %v580_v59 = vld [vmem:[#allocation0 + $0x60] sm:$0xf]  ;;  %v586_v60 = vld [vmem:[#allocation0 + $0x68] sm:$0xf] }
  0xa0   :  { %v463_v58 = vpop.permute.xlu0 %462   ;;  %753 = vst [vmem:[%s1066_s1 + $0x30] sm:$0xf] %v580_v59  ;;  %754 = vst [vmem:[%s1066_s1 + $0x34] sm:$0xf] %v586_v60 }
  0xa1   :  { %466 = vst.msk [vmem:[#allocation0 + $0x10] sm:$0xf] %vm413_vm2, %v463_v58   ;;  %468 = vst.msk [vmem:[#allocation0 + $0x14] sm:$0xf0] %vm413_vm2, %v463_v58  }
  0xa6   :  { %v476_v61 = vpop.permute.xlu1 %475  }
  0xa7   :  { %479 = vst.msk [vmem:[#allocation0 + $0x30] sm:$0xf] %vm413_vm2, %v476_v61   ;;  %481 = vst.msk [vmem:[#allocation0 + $0x34] sm:$0xf0] %vm413_vm2, %v476_v61  }
  0xa8   :  { %v520_v63 = vld [vmem:[#allocation0 + $0x10] sm:$0xf]  ;;  %v526_v0 = vld [vmem:[#allocation0 + $0x18] sm:$0xf] }
  0xa9   :  { %v489_v62 = vpop.permute.xlu0 %488   ;;  %743 = vst [vmem:[%s1066_s1 + $0x8] sm:$0xf] %v520_v63  ;;  %744 = vst [vmem:[%s1066_s1 + $0xc] sm:$0xf] %v526_v0 }
  0xaa   :  { %492 = vst.msk [vmem:[#allocation0 + $0x50] sm:$0xf] %vm413_vm2, %v489_v62   ;;  %494 = vst.msk [vmem:[#allocation0 + $0x54] sm:$0xf0] %vm413_vm2, %v489_v62  }
  0xae   :  { %v544_v2 = vld [vmem:[#allocation0 + $0x30] sm:$0xf]  ;;  %v550_v3 = vld [vmem:[#allocation0 + $0x38] sm:$0xf] }
  0xaf   :  { %v502_v1 = vpop.permute.xlu1 %501   ;;  %747 = vst [vmem:[%s1066_s1 + $0x18] sm:$0xf] %v544_v2  ;;  %748 = vst [vmem:[%s1066_s1 + $0x1c] sm:$0xf] %v550_v3 }
  0xb0   :  { %505 = vst.msk [vmem:[#allocation0 + $0x70] sm:$0xf] %vm413_vm2, %v502_v1   ;;  %507 = vst.msk [vmem:[#allocation0 + $0x74] sm:$0xf0] %vm413_vm2, %v502_v1  }
  0xb1   :  { %v568_v4 = vld [vmem:[#allocation0 + $0x50] sm:$0xf]  ;;  %v574_v5 = vld [vmem:[#allocation0 + $0x58] sm:$0xf] }
  0xb2   :  { %751 = vst [vmem:[%s1066_s1 + $0x28] sm:$0xf] %v568_v4  ;;  %752 = vst [vmem:[%s1066_s1 + $0x2c] sm:$0xf] %v574_v5 }
  0xb7   :  { %v592_v6 = vld [vmem:[#allocation0 + $0x70] sm:$0xf]  ;;  %v598_v7 = vld [vmem:[#allocation0 + $0x78] sm:$0xf] }
  0xb8   :  { %755 = vst [vmem:[%s1066_s1 + $0x38] sm:$0xf] %v592_v6  ;;  %756 = vst [vmem:[%s1066_s1 + $0x3c] sm:$0xf] %v598_v7 }

// kernel: mul.40
= control target key start
LH: loop header
LB: loop body
LE: loop exit
PB: predicated region body
PF: predicated region fallthrough
CT: control target
= control target key end

     0   :  { %s3556_s0 = inlined_call_operand.vmem [shape: f32[4,4,4,4], index: 0, kind: input, shape index: {}]   ;;  %s3557_s1 = inlined_call_operand.vmem [shape: f32[4,4,8,4,8,4], index: 1, kind: output, shape index: {}]  }
   0x1   :  { %v4_v0 = vld [vmem:[%s3556_s0] ss:$0 sm:$0xff]  ;;  %v1244_v1 = vld [vmem:[%s3556_s0 + $0x10] ss:$0 sm:$0xff]  ;;  %v1250_v4 = vld [vmem:[%s3556_s0 + $0x4] ss:$0 sm:$0xff] }
   0x2   :  { %v1246_v2 = vld [vmem:[%s3556_s0 + $0x20] ss:$0 sm:$0xff]  ;;  %5 = vst [vmem:[%s3557_s1] sm:$0xff] %v4_v0  ;;  %1245 = vst [vmem:[%s3557_s1 + $0x400] sm:$0xff] %v1244_v1  ;;  %v1248_v3 = vld [vmem:[%s3556_s0 + $0x30] ss:$0 sm:$0xff] }
   0x3   :  { %1247 = vst [vmem:[%s3557_s1 + $0x800] sm:$0xff] %v1246_v2  ;;  %v1252_v5 = vld [vmem:[%s3556_s0 + $0x14] ss:$0 sm:$0xff]  ;;  %1274 = vst [vmem:[%s3557_s1 + $0x20] sm:$0xff] %v4_v0  ;;  %v1254_v6 = vld [vmem:[%s3556_s0 + $0x24] ss:$0 sm:$0xff] }
   0x4   :  { %1275 = vst [vmem:[%s3557_s1 + $0x420] sm:$0xff] %v1244_v1  ;;  %1276 = vst [vmem:[%s3557_s1 + $0x820] sm:$0xff] %v1246_v2  ;;  %v1256_v7 = vld [vmem:[%s3556_s0 + $0x34] ss:$0 sm:$0xff]  ;;  %v1258_v8 = vld [vmem:[%s3556_s0 + $0x8] ss:$0 sm:$0xff] }
   0x5   :  { %1290 = vst [vmem:[%s3557_s1 + $0x40] sm:$0xff] %v4_v0  ;;  %1291 = vst [vmem:[%s3557_s1 + $0x440] sm:$0xff] %v1244_v1  ;;  %v1260_v9 = vld [vmem:[%s3556_s0 + $0x18] ss:$0 sm:$0xff]  ;;  %v1262_v10 = vld [vmem:[%s3556_s0 + $0x28] ss:$0 sm:$0xff] }
   0x6   :  { %1292 = vst [vmem:[%s3557_s1 + $0x840] sm:$0xff] %v1246_v2  ;;  %1306 = vst [vmem:[%s3557_s1 + $0x60] sm:$0xff] %v4_v0  ;;  %v1264_v11 = vld [vmem:[%s3556_s0 + $0x38] ss:$0 sm:$0xff]  ;;  %v1266_v12 = vld [vmem:[%s3556_s0 + $0xc] ss:$0 sm:$0xff] }
   0x7   :  { %1307 = vst [vmem:[%s3557_s1 + $0x460] sm:$0xff] %v1244_v1  ;;  %1308 = vst [vmem:[%s3557_s1 + $0x860] sm:$0xff] %v1246_v2  ;;  %v1268_v13 = vld [vmem:[%s3556_s0 + $0x1c] ss:$0 sm:$0xff]  ;;  %v1270_v14 = vld [vmem:[%s3556_s0 + $0x2c] ss:$0 sm:$0xff] }
   0x8   :  { %1322 = vst [vmem:[%s3557_s1 + $0x80] sm:$0xff] %v4_v0  ;;  %1323 = vst [vmem:[%s3557_s1 + $0x480] sm:$0xff] %v1244_v1  ;;  %v1272_v15 = vld [vmem:[%s3556_s0 + $0x3c] ss:$0 sm:$0xff]  ;;  %v1386_v16 = vld [vmem:[%s3556_s0 + $0x1] ss:$0 sm:$0xff] }
   0x9   :  { %1324 = vst [vmem:[%s3557_s1 + $0x880] sm:$0xff] %v1246_v2  ;;  %1338 = vst [vmem:[%s3557_s1 + $0xa0] sm:$0xff] %v4_v0  ;;  %v1388_v17 = vld [vmem:[%s3556_s0 + $0x11] ss:$0 sm:$0xff]  ;;  %v1390_v18 = vld [vmem:[%s3556_s0 + $0x21] ss:$0 sm:$0xff] }
   0xa   :  { %1339 = vst [vmem:[%s3557_s1 + $0x4a0] sm:$0xff] %v1244_v1  ;;  %1340 = vst [vmem:[%s3557_s1 + $0x8a0] sm:$0xff] %v1246_v2  ;;  %v1392_v19 = vld [vmem:[%s3556_s0 + $0x31] ss:$0 sm:$0xff]  ;;  %v1394_v20 = vld [vmem:[%s3556_s0 + $0x5] ss:$0 sm:$0xff] }
   0xb   :  { %1354 = vst [vmem:[%s3557_s1 + $0xc0] sm:$0xff] %v4_v0  ;;  %1355 = vst [vmem:[%s3557_s1 + $0x4c0] sm:$0xff] %v1244_v1  ;;  %v1396_v21 = vld [vmem:[%s3556_s0 + $0x15] ss:$0 sm:$0xff]  ;;  %v1398_v22 = vld [vmem:[%s3556_s0 + $0x25] ss:$0 sm:$0xff] }
   0xc   :  { %1356 = vst [vmem:[%s3557_s1 + $0x8c0] sm:$0xff] %v1246_v2  ;;  %1370 = vst [vmem:[%s3557_s1 + $0xe0] sm:$0xff] %v4_v0  ;;  %v1400_v23 = vld [vmem:[%s3556_s0 + $0x35] ss:$0 sm:$0xff]  ;;  %v1402_v24 = vld [vmem:[%s3556_s0 + $0x9] ss:$0 sm:$0xff] }
   0xd   :  { %1371 = vst [vmem:[%s3557_s1 + $0x4e0] sm:$0xff] %v1244_v1  ;;  %1372 = vst [vmem:[%s3557_s1 + $0x8e0] sm:$0xff] %v1246_v2  ;;  %v1404_v25 = vld [vmem:[%s3556_s0 + $0x19] ss:$0 sm:$0xff]  ;;  %v1406_v26 = vld [vmem:[%s3556_s0 + $0x29] ss:$0 sm:$0xff] }
   0xe   :  { %1249 = vst [vmem:[%s3557_s1 + $0xc00] sm:$0xff] %v1248_v3  ;;  %1251 = vst [vmem:[%s3557_s1 + $0x100] sm:$0xff] %v1250_v4  ;;  %v1408_v27 = vld [vmem:[%s3556_s0 + $0x39] ss:$0 sm:$0xff]  ;;  %v1410_v28 = vld [vmem:[%s3556_s0 + $0xd] ss:$0 sm:$0xff] }
   0xf   :  { %1253 = vst [vmem:[%s3557_s1 + $0x500] sm:$0xff] %v1252_v5  ;;  %1277 = vst [vmem:[%s3557_s1 + $0xc20] sm:$0xff] %v1248_v3  ;;  %v1412_v29 = vld [vmem:[%s3556_s0 + $0x1d] ss:$0 sm:$0xff]  ;;  %v1414_v30 = vld [vmem:[%s3556_s0 + $0x2d] ss:$0 sm:$0xff] }
  0x10   :  { %1278 = vst [vmem:[%s3557_s1 + $0x120] sm:$0xff] %v1250_v4  ;;  %1279 = vst [vmem:[%s3557_s1 + $0x520] sm:$0xff] %v1252_v5  ;;  %v1416_v31 = vld [vmem:[%s3556_s0 + $0x3d] ss:$0 sm:$0xff]  ;;  %v1530_v32 = vld [vmem:[%s3556_s0 + $0x2] ss:$0 sm:$0xff] }
  0x11   :  { %1293 = vst [vmem:[%s3557_s1 + $0xc40] sm:$0xff] %v1248_v3  ;;  %1294 = vst [vmem:[%s3557_s1 + $0x140] sm:$0xff] %v1250_v4  ;;  %v1532_v33 = vld [vmem:[%s3556_s0 + $0x12] ss:$0 sm:$0xff]  ;;  %v1534_v34 = vld [vmem:[%s3556_s0 + $0x22] ss:$0 sm:$0xff] }
  0x12   :  { %1295 = vst [vmem:[%s3557_s1 + $0x540] sm:$0xff] %v1252_v5  ;;  %1309 = vst [vmem:[%s3557_s1 + $0xc60] sm:$0xff] %v1248_v3  ;;  %v1536_v35 = vld [vmem:[%s3556_s0 + $0x32] ss:$0 sm:$0xff]  ;;  %v1538_v36 = vld [vmem:[%s3556_s0 + $0x6] ss:$0 sm:$0xff] }
  0x13   :  { %1310 = vst [vmem:[%s3557_s1 + $0x160] sm:$0xff] %v1250_v4  ;;  %1311 = vst [vmem:[%s3557_s1 + $0x560] sm:$0xff] %v1252_v5  ;;  %v1540_v37 = vld [vmem:[%s3556_s0 + $0x16] ss:$0 sm:$0xff]  ;;  %v1542_v38 = vld [vmem:[%s3556_s0 + $0x26] ss:$0 sm:$0xff] }
  0x14   :  { %1325 = vst [vmem:[%s3557_s1 + $0xc80] sm:$0xff] %v1248_v3  ;;  %1326 = vst [vmem:[%s3557_s1 + $0x180] sm:$0xff] %v1250_v4  ;;  %v1544_v39 = vld [vmem:[%s3556_s0 + $0x36] ss:$0 sm:$0xff]  ;;  %v1546_v40 = vld [vmem:[%s3556_s0 + $0xa] ss:$0 sm:$0xff] }
  0x15   :  { %1327 = vst [vmem:[%s3557_s1 + $0x580] sm:$0xff] %v1252_v5  ;;  %1341 = vst [vmem:[%s3557_s1 + $0xca0] sm:$0xff] %v1248_v3  ;;  %v1548_v41 = vld [vmem:[%s3556_s0 + $0x1a] ss:$0 sm:$0xff]  ;;  %v1550_v42 = vld [vmem:[%s3556_s0 + $0x2a] ss:$0 sm:$0xff] }
  0x16   :  { %1342 = vst [vmem:[%s3557_s1 + $0x1a0] sm:$0xff] %v1250_v4  ;;  %1343 = vst [vmem:[%s3557_s1 + $0x5a0] sm:$0xff] %v1252_v5  ;;  %v1552_v43 = vld [vmem:[%s3556_s0 + $0x3a] ss:$0 sm:$0xff]  ;;  %v1554_v44 = vld [vmem:[%s3556_s0 + $0xe] ss:$0 sm:$0xff] }
  0x17   :  { %1357 = vst [vmem:[%s3557_s1 + $0xcc0] sm:$0xff] %v1248_v3  ;;  %1358 = vst [vmem:[%s3557_s1 + $0x1c0] sm:$0xff] %v1250_v4  ;;  %v1556_v45 = vld [vmem:[%s3556_s0 + $0x1e] ss:$0 sm:$0xff]  ;;  %v1558_v46 = vld [vmem:[%s3556_s0 + $0x2e] ss:$0 sm:$0xff] }
  0x18   :  { %1359 = vst [vmem:[%s3557_s1 + $0x5c0] sm:$0xff] %v1252_v5  ;;  %1373 = vst [vmem:[%s3557_s1 + $0xce0] sm:$0xff] %v1248_v3  ;;  %v1560_v47 = vld [vmem:[%s3556_s0 + $0x3e] ss:$0 sm:$0xff]  ;;  %v1674_v48 = vld [vmem:[%s3556_s0 + $0x3] ss:$0 sm:$0xff] }
  0x19   :  { %1374 = vst [vmem:[%s3557_s1 + $0x1e0] sm:$0xff] %v1250_v4  ;;  %1375 = vst [vmem:[%s3557_s1 + $0x5e0] sm:$0xff] %v1252_v5  ;;  %v1676_v49 = vld [vmem:[%s3556_s0 + $0x13] ss:$0 sm:$0xff]  ;;  %v1678_v50 = vld [vmem:[%s3556_s0 + $0x23] ss:$0 sm:$0xff] }
  0x1a   :  { %1255 = vst [vmem:[%s3557_s1 + $0x900] sm:$0xff] %v1254_v6  ;;  %1257 = vst [vmem:[%s3557_s1 + $0xd00] sm:$0xff] %v1256_v7  ;;  %v1680_v51 = vld [vmem:[%s3556_s0 + $0x33] ss:$0 sm:$0xff]  ;;  %v1682_v52 = vld [vmem:[%s3556_s0 + $0x7] ss:$0 sm:$0xff] }
  0x1b   :  { %1259 = vst [vmem:[%s3557_s1 + $0x200] sm:$0xff] %v1258_v8  ;;  %1280 = vst [vmem:[%s3557_s1 + $0x920] sm:$0xff] %v1254_v6  ;;  %v1684_v53 = vld [vmem:[%s3556_s0 + $0x17] ss:$0 sm:$0xff]  ;;  %v1686_v54 = vld [vmem:[%s3556_s0 + $0x27] ss:$0 sm:$0xff] }
  0x1c   :  { %1281 = vst [vmem:[%s3557_s1 + $0xd20] sm:$0xff] %v1256_v7  ;;  %1282 = vst [vmem:[%s3557_s1 + $0x220] sm:$0xff] %v1258_v8  ;;  %v1688_v55 = vld [vmem:[%s3556_s0 + $0x37] ss:$0 sm:$0xff]  ;;  %v1690_v56 = vld [vmem:[%s3556_s0 + $0xb] ss:$0 sm:$0xff] }
  0x1d   :  { %1296 = vst [vmem:[%s3557_s1 + $0x940] sm:$0xff] %v1254_v6  ;;  %1297 = vst [vmem:[%s3557_s1 + $0xd40] sm:$0xff] %v1256_v7  ;;  %v1692_v57 = vld [vmem:[%s3556_s0 + $0x1b] ss:$0 sm:$0xff]  ;;  %v1694_v58 = vld [vmem:[%s3556_s0 + $0x2b] ss:$0 sm:$0xff] }
  0x1e   :  { %1298 = vst [vmem:[%s3557_s1 + $0x240] sm:$0xff] %v1258_v8  ;;  %1312 = vst [vmem:[%s3557_s1 + $0x960] sm:$0xff] %v1254_v6  ;;  %v1696_v59 = vld [vmem:[%s3556_s0 + $0x3b] ss:$0 sm:$0xff]  ;;  %v1698_v60 = vld [vmem:[%s3556_s0 + $0xf] ss:$0 sm:$0xff] }
  0x1f   :  { %1313 = vst [vmem:[%s3557_s1 + $0xd60] sm:$0xff] %v1256_v7  ;;  %1314 = vst [vmem:[%s3557_s1 + $0x260] sm:$0xff] %v1258_v8  ;;  %v1700_v61 = vld [vmem:[%s3556_s0 + $0x1f] ss:$0 sm:$0xff]  ;;  %v1702_v62 = vld [vmem:[%s3556_s0 + $0x2f] ss:$0 sm:$0xff] }
  0x20   :  { %1328 = vst [vmem:[%s3557_s1 + $0x980] sm:$0xff] %v1254_v6  ;;  %1329 = vst [vmem:[%s3557_s1 + $0xd80] sm:$0xff] %v1256_v7  ;;  %v1704_v63 = vld [vmem:[%s3556_s0 + $0x3f] ss:$0 sm:$0xff] }
  0x21   :  { %1330 = vst [vmem:[%s3557_s1 + $0x280] sm:$0xff] %v1258_v8  ;;  %1344 = vst [vmem:[%s3557_s1 + $0x9a0] sm:$0xff] %v1254_v6 }
  0x22   :  { %1345 = vst [vmem:[%s3557_s1 + $0xda0] sm:$0xff] %v1256_v7  ;;  %1346 = vst [vmem:[%s3557_s1 + $0x2a0] sm:$0xff] %v1258_v8 }
  0x23   :  { %1360 = vst [vmem:[%s3557_s1 + $0x9c0] sm:$0xff] %v1254_v6  ;;  %1361 = vst [vmem:[%s3557_s1 + $0xdc0] sm:$0xff] %v1256_v7 }
  0x24   :  { %1362 = vst [vmem:[%s3557_s1 + $0x2c0] sm:$0xff] %v1258_v8  ;;  %1376 = vst [vmem:[%s3557_s1 + $0x9e0] sm:$0xff] %v1254_v6 }
  0x25   :  { %1377 = vst [vmem:[%s3557_s1 + $0xde0] sm:$0xff] %v1256_v7  ;;  %1378 = vst [vmem:[%s3557_s1 + $0x2e0] sm:$0xff] %v1258_v8 }
  0x26   :  { %1261 = vst [vmem:[%s3557_s1 + $0x600] sm:$0xff] %v1260_v9  ;;  %1263 = vst [vmem:[%s3557_s1 + $0xa00] sm:$0xff] %v1262_v10 }
  0x27   :  { %1265 = vst [vmem:[%s3557_s1 + $0xe00] sm:$0xff] %v1264_v11  ;;  %1283 = vst [vmem:[%s3557_s1 + $0x620] sm:$0xff] %v1260_v9 }
  0x28   :  { %1284 = vst [vmem:[%s3557_s1 + $0xa20] sm:$0xff] %v1262_v10  ;;  %1285 = vst [vmem:[%s3557_s1 + $0xe20] sm:$0xff] %v1264_v11 }
  0x29   :  { %1299 = vst [vmem:[%s3557_s1 + $0x640] sm:$0xff] %v1260_v9  ;;  %1300 = vst [vmem:[%s3557_s1 + $0xa40] sm:$0xff] %v1262_v10 }
  0x2a   :  { %1301 = vst [vmem:[%s3557_s1 + $0xe40] sm:$0xff] %v1264_v11  ;;  %1315 = vst [vmem:[%s3557_s1 + $0x660] sm:$0xff] %v1260_v9 }
  0x2b   :  { %1316 = vst [vmem:[%s3557_s1 + $0xa60] sm:$0xff] %v1262_v10  ;;  %1317 = vst [vmem:[%s3557_s1 + $0xe60] sm:$0xff] %v1264_v11 }
  0x2c   :  { %1331 = vst [vmem:[%s3557_s1 + $0x680] sm:$0xff] %v1260_v9  ;;  %1332 = vst [vmem:[%s3557_s1 + $0xa80] sm:$0xff] %v1262_v10 }
  0x2d   :  { %1333 = vst [vmem:[%s3557_s1 + $0xe80] sm:$0xff] %v1264_v11  ;;  %1347 = vst [vmem:[%s3557_s1 + $0x6a0] sm:$0xff] %v1260_v9 }
  0x2e   :  { %1348 = vst [vmem:[%s3557_s1 + $0xaa0] sm:$0xff] %v1262_v10  ;;  %1349 = vst [vmem:[%s3557_s1 + $0xea0] sm:$0xff] %v1264_v11 }
  0x2f   :  { %1363 = vst [vmem:[%s3557_s1 + $0x6c0] sm:$0xff] %v1260_v9  ;;  %1364 = vst [vmem:[%s3557_s1 + $0xac0] sm:$0xff] %v1262_v10 }
  0x30   :  { %1365 = vst [vmem:[%s3557_s1 + $0xec0] sm:$0xff] %v1264_v11  ;;  %1379 = vst [vmem:[%s3557_s1 + $0x6e0] sm:$0xff] %v1260_v9 }
  0x31   :  { %1380 = vst [vmem:[%s3557_s1 + $0xae0] sm:$0xff] %v1262_v10  ;;  %1381 = vst [vmem:[%s3557_s1 + $0xee0] sm:$0xff] %v1264_v11 }
  0x32   :  { %1267 = vst [vmem:[%s3557_s1 + $0x300] sm:$0xff] %v1266_v12  ;;  %1269 = vst [vmem:[%s3557_s1 + $0x700] sm:$0xff] %v1268_v13 }
  0x33   :  { %1271 = vst [vmem:[%s3557_s1 + $0xb00] sm:$0xff] %v1270_v14  ;;  %1286 = vst [vmem:[%s3557_s1 + $0x320] sm:$0xff] %v1266_v12 }
  0x34   :  { %1287 = vst [vmem:[%s3557_s1 + $0x720] sm:$0xff] %v1268_v13  ;;  %1288 = vst [vmem:[%s3557_s1 + $0xb20] sm:$0xff] %v1270_v14 }
  0x35   :  { %1302 = vst [vmem:[%s3557_s1 + $0x340] sm:$0xff] %v1266_v12  ;;  %1303 = vst [vmem:[%s3557_s1 + $0x740] sm:$0xff] %v1268_v13 }
  0x36   :  { %1304 = vst [vmem:[%s3557_s1 + $0xb40] sm:$0xff] %v1270_v14  ;;  %1318 = vst [vmem:[%s3557_s1 + $0x360] sm:$0xff] %v1266_v12 }
  0x37   :  { %1319 = vst [vmem:[%s3557_s1 + $0x760] sm:$0xff] %v1268_v13  ;;  %1320 = vst [vmem:[%s3557_s1 + $0xb60] sm:$0xff] %v1270_v14 }
  0x38   :  { %1334 = vst [vmem:[%s3557_s1 + $0x380] sm:$0xff] %v1266_v12  ;;  %1335 = vst [vmem:[%s3557_s1 + $0x780] sm:$0xff] %v1268_v13 }
  0x39   :  { %1336 = vst [vmem:[%s3557_s1 + $0xb80] sm:$0xff] %v1270_v14  ;;  %1350 = vst [vmem:[%s3557_s1 + $0x3a0] sm:$0xff] %v1266_v12 }
  0x3a   :  { %1351 = vst [vmem:[%s3557_s1 + $0x7a0] sm:$0xff] %v1268_v13  ;;  %1352 = vst [vmem:[%s3557_s1 + $0xba0] sm:$0xff] %v1270_v14 }
  0x3b   :  { %1366 = vst [vmem:[%s3557_s1 + $0x3c0] sm:$0xff] %v1266_v12  ;;  %1367 = vst [vmem:[%s3557_s1 + $0x7c0] sm:$0xff] %v1268_v13 }
  0x3c   :  { %1368 = vst [vmem:[%s3557_s1 + $0xbc0] sm:$0xff] %v1270_v14  ;;  %1382 = vst [vmem:[%s3557_s1 + $0x3e0] sm:$0xff] %v1266_v12 }
  0x3d   :  { %1383 = vst [vmem:[%s3557_s1 + $0x7e0] sm:$0xff] %v1268_v13  ;;  %1384 = vst [vmem:[%s3557_s1 + $0xbe0] sm:$0xff] %v1270_v14 }
  0x3e   :  { %1273 = vst [vmem:[%s3557_s1 + $0xf00] sm:$0xff] %v1272_v15  ;;  %1289 = vst [vmem:[%s3557_s1 + $0xf20] sm:$0xff] %v1272_v15 }
  0x3f   :  { %1305 = vst [vmem:[%s3557_s1 + $0xf40] sm:$0xff] %v1272_v15  ;;  %1321 = vst [vmem:[%s3557_s1 + $0xf60] sm:$0xff] %v1272_v15 }
  0x40   :  { %1337 = vst [vmem:[%s3557_s1 + $0xf80] sm:$0xff] %v1272_v15  ;;  %1353 = vst [vmem:[%s3557_s1 + $0xfa0] sm:$0xff] %v1272_v15 }
  0x41   :  { %1369 = vst [vmem:[%s3557_s1 + $0xfc0] sm:$0xff] %v1272_v15  ;;  %1385 = vst [vmem:[%s3557_s1 + $0xfe0] sm:$0xff] %v1272_v15 }
  0x42   :  { %1387 = vst [vmem:[%s3557_s1 + $0x8] sm:$0xff] %v1386_v16  ;;  %1389 = vst [vmem:[%s3557_s1 + $0x408] sm:$0xff] %v1388_v17 }
  0x43   :  { %1418 = vst [vmem:[%s3557_s1 + $0x28] sm:$0xff] %v1386_v16  ;;  %1419 = vst [vmem:[%s3557_s1 + $0x428] sm:$0xff] %v1388_v17 }
  0x44   :  { %1434 = vst [vmem:[%s3557_s1 + $0x48] sm:$0xff] %v1386_v16  ;;  %1435 = vst [vmem:[%s3557_s1 + $0x448] sm:$0xff] %v1388_v17 }
  0x45   :  { %1450 = vst [vmem:[%s3557_s1 + $0x68] sm:$0xff] %v1386_v16  ;;  %1451 = vst [vmem:[%s3557_s1 + $0x468] sm:$0xff] %v1388_v17 }
  0x46   :  { %1466 = vst [vmem:[%s3557_s1 + $0x88] sm:$0xff] %v1386_v16  ;;  %1467 = vst [vmem:[%s3557_s1 + $0x488] sm:$0xff] %v1388_v17 }
  0x47   :  { %1482 = vst [vmem:[%s3557_s1 + $0xa8] sm:$0xff] %v1386_v16  ;;  %1483 = vst [vmem:[%s3557_s1 + $0x4a8] sm:$0xff] %v1388_v17 }
  0x48   :  { %1498 = vst [vmem:[%s3557_s1 + $0xc8] sm:$0xff] %v1386_v16  ;;  %1499 = vst [vmem:[%s3557_s1 + $0x4c8] sm:$0xff] %v1388_v17 }
  0x49   :  { %1514 = vst [vmem:[%s3557_s1 + $0xe8] sm:$0xff] %v1386_v16  ;;  %1515 = vst [vmem:[%s3557_s1 + $0x4e8] sm:$0xff] %v1388_v17 }
  0x4a   :  { %1391 = vst [vmem:[%s3557_s1 + $0x808] sm:$0xff] %v1390_v18  ;;  %1393 = vst [vmem:[%s3557_s1 + $0xc08] sm:$0xff] %v1392_v19 }
  0x4b   :  { %1395 = vst [vmem:[%s3557_s1 + $0x108] sm:$0xff] %v1394_v20  ;;  %1420 = vst [vmem:[%s3557_s1 + $0x828] sm:$0xff] %v1390_v18 }
  0x4c   :  { %1421 = vst [vmem:[%s3557_s1 + $0xc28] sm:$0xff] %v1392_v19  ;;  %1422 = vst [vmem:[%s3557_s1 + $0x128] sm:$0xff] %v1394_v20 }
  0x4d   :  { %1436 = vst [vmem:[%s3557_s1 + $0x848] sm:$0xff] %v1390_v18  ;;  %1437 = vst [vmem:[%s3557_s1 + $0xc48] sm:$0xff] %v1392_v19 }
  0x4e   :  { %1438 = vst [vmem:[%s3557_s1 + $0x148] sm:$0xff] %v1394_v20  ;;  %1452 = vst [vmem:[%s3557_s1 + $0x868] sm:$0xff] %v1390_v18 }
  0x4f   :  { %1453 = vst [vmem:[%s3557_s1 + $0xc68] sm:$0xff] %v1392_v19  ;;  %1454 = vst [vmem:[%s3557_s1 + $0x168] sm:$0xff] %v1394_v20 }
  0x50   :  { %1468 = vst [vmem:[%s3557_s1 + $0x888] sm:$0xff] %v1390_v18  ;;  %1469 = vst [vmem:[%s3557_s1 + $0xc88] sm:$0xff] %v1392_v19 }
  0x51   :  { %1470 = vst [vmem:[%s3557_s1 + $0x188] sm:$0xff] %v1394_v20  ;;  %1484 = vst [vmem:[%s3557_s1 + $0x8a8] sm:$0xff] %v1390_v18 }
  0x52   :  { %1485 = vst [vmem:[%s3557_s1 + $0xca8] sm:$0xff] %v1392_v19  ;;  %1486 = vst [vmem:[%s3557_s1 + $0x1a8] sm:$0xff] %v1394_v20 }
  0x53   :  { %1500 = vst [vmem:[%s3557_s1 + $0x8c8] sm:$0xff] %v1390_v18  ;;  %1501 = vst [vmem:[%s3557_s1 + $0xcc8] sm:$0xff] %v1392_v19 }
  0x54   :  { %1502 = vst [vmem:[%s3557_s1 + $0x1c8] sm:$0xff] %v1394_v20  ;;  %1516 = vst [vmem:[%s3557_s1 + $0x8e8] sm:$0xff] %v1390_v18 }
  0x55   :  { %1517 = vst [vmem:[%s3557_s1 + $0xce8] sm:$0xff] %v1392_v19  ;;  %1518 = vst [vmem:[%s3557_s1 + $0x1e8] sm:$0xff] %v1394_v20 }
  0x56   :  { %1397 = vst [vmem:[%s3557_s1 + $0x508] sm:$0xff] %v1396_v21  ;;  %1399 = vst [vmem:[%s3557_s1 + $0x908] sm:$0xff] %v1398_v22 }
  0x57   :  { %1401 = vst [vmem:[%s3557_s1 + $0xd08] sm:$0xff] %v1400_v23  ;;  %1423 = vst [vmem:[%s3557_s1 + $0x528] sm:$0xff] %v1396_v21 }
  0x58   :  { %1424 = vst [vmem:[%s3557_s1 + $0x928] sm:$0xff] %v1398_v22  ;;  %1425 = vst [vmem:[%s3557_s1 + $0xd28] sm:$0xff] %v1400_v23 }
  0x59   :  { %1439 = vst [vmem:[%s3557_s1 + $0x548] sm:$0xff] %v1396_v21  ;;  %1440 = vst [vmem:[%s3557_s1 + $0x948] sm:$0xff] %v1398_v22 }
  0x5a   :  { %1441 = vst [vmem:[%s3557_s1 + $0xd48] sm:$0xff] %v1400_v23  ;;  %1455 = vst [vmem:[%s3557_s1 + $0x568] sm:$0xff] %v1396_v21 }
  0x5b   :  { %1456 = vst [vmem:[%s3557_s1 + $0x968] sm:$0xff] %v1398_v22  ;;  %1457 = vst [vmem:[%s3557_s1 + $0xd68] sm:$0xff] %v1400_v23 }
  0x5c   :  { %1471 = vst [vmem:[%s3557_s1 + $0x588] sm:$0xff] %v1396_v21  ;;  %1472 = vst [vmem:[%s3557_s1 + $0x988] sm:$0xff] %v1398_v22 }
  0x5d   :  { %1473 = vst [vmem:[%s3557_s1 + $0xd88] sm:$0xff] %v1400_v23  ;;  %1487 = vst [vmem:[%s3557_s1 + $0x5a8] sm:$0xff] %v1396_v21 }
  0x5e   :  { %1488 = vst [vmem:[%s3557_s1 + $0x9a8] sm:$0xff] %v1398_v22  ;;  %1489 = vst [vmem:[%s3557_s1 + $0xda8] sm:$0xff] %v1400_v23 }
  0x5f   :  { %1503 = vst [vmem:[%s3557_s1 + $0x5c8] sm:$0xff] %v1396_v21  ;;  %1504 = vst [vmem:[%s3557_s1 + $0x9c8] sm:$0xff] %v1398_v22 }
  0x60   :  { %1505 = vst [vmem:[%s3557_s1 + $0xdc8] sm:$0xff] %v1400_v23  ;;  %1519 = vst [vmem:[%s3557_s1 + $0x5e8] sm:$0xff] %v1396_v21 }
  0x61   :  { %1520 = vst [vmem:[%s3557_s1 + $0x9e8] sm:$0xff] %v1398_v22  ;;  %1521 = vst [vmem:[%s3557_s1 + $0xde8] sm:$0xff] %v1400_v23 }
  0x62   :  { %1403 = vst [vmem:[%s3557_s1 + $0x208] sm:$0xff] %v1402_v24  ;;  %1405 = vst [vmem:[%s3557_s1 + $0x608] sm:$0xff] %v1404_v25 }
  0x63   :  { %1407 = vst [vmem:[%s3557_s1 + $0xa08] sm:$0xff] %v1406_v26  ;;  %1426 = vst [vmem:[%s3557_s1 + $0x228] sm:$0xff] %v1402_v24 }
  0x64   :  { %1427 = vst [vmem:[%s3557_s1 + $0x628] sm:$0xff] %v1404_v25  ;;  %1428 = vst [vmem:[%s3557_s1 + $0xa28] sm:$0xff] %v1406_v26 }
  0x65   :  { %1442 = vst [vmem:[%s3557_s1 + $0x248] sm:$0xff] %v1402_v24  ;;  %1443 = vst [vmem:[%s3557_s1 + $0x648] sm:$0xff] %v1404_v25 }
  0x66   :  { %1444 = vst [vmem:[%s3557_s1 + $0xa48] sm:$0xff] %v1406_v26  ;;  %1458 = vst [vmem:[%s3557_s1 + $0x268] sm:$0xff] %v1402_v24 }
  0x67   :  { %1459 = vst [vmem:[%s3557_s1 + $0x668] sm:$0xff] %v1404_v25  ;;  %1460 = vst [vmem:[%s3557_s1 + $0xa68] sm:$0xff] %v1406_v26 }
  0x68   :  { %1474 = vst [vmem:[%s3557_s1 + $0x288] sm:$0xff] %v1402_v24  ;;  %1475 = vst [vmem:[%s3557_s1 + $0x688] sm:$0xff] %v1404_v25 }
  0x69   :  { %1476 = vst [vmem:[%s3557_s1 + $0xa88] sm:$0xff] %v1406_v26  ;;  %1490 = vst [vmem:[%s3557_s1 + $0x2a8] sm:$0xff] %v1402_v24 }
  0x6a   :  { %1491 = vst [vmem:[%s3557_s1 + $0x6a8] sm:$0xff] %v1404_v25  ;;  %1492 = vst [vmem:[%s3557_s1 + $0xaa8] sm:$0xff] %v1406_v26 }
  0x6b   :  { %1506 = vst [vmem:[%s3557_s1 + $0x2c8] sm:$0xff] %v1402_v24  ;;  %1507 = vst [vmem:[%s3557_s1 + $0x6c8] sm:$0xff] %v1404_v25 }
  0x6c   :  { %1508 = vst [vmem:[%s3557_s1 + $0xac8] sm:$0xff] %v1406_v26  ;;  %1522 = vst [vmem:[%s3557_s1 + $0x2e8] sm:$0xff] %v1402_v24 }
  0x6d   :  { %1523 = vst [vmem:[%s3557_s1 + $0x6e8] sm:$0xff] %v1404_v25  ;;  %1524 = vst [vmem:[%s3557_s1 + $0xae8] sm:$0xff] %v1406_v26 }
  0x6e   :  { %1409 = vst [vmem:[%s3557_s1 + $0xe08] sm:$0xff] %v1408_v27  ;;  %1411 = vst [vmem:[%s3557_s1 + $0x308] sm:$0xff] %v1410_v28 }
  0x6f   :  { %1413 = vst [vmem:[%s3557_s1 + $0x708] sm:$0xff] %v1412_v29  ;;  %1429 = vst [vmem:[%s3557_s1 + $0xe28] sm:$0xff] %v1408_v27 }
  0x70   :  { %1430 = vst [vmem:[%s3557_s1 + $0x328] sm:$0xff] %v1410_v28  ;;  %1431 = vst [vmem:[%s3557_s1 + $0x728] sm:$0xff] %v1412_v29 }
  0x71   :  { %1445 = vst [vmem:[%s3557_s1 + $0xe48] sm:$0xff] %v1408_v27  ;;  %1446 = vst [vmem:[%s3557_s1 + $0x348] sm:$0xff] %v1410_v28 }
  0x72   :  { %1447 = vst [vmem:[%s3557_s1 + $0x748] sm:$0xff] %v1412_v29  ;;  %1461 = vst [vmem:[%s3557_s1 + $0xe68] sm:$0xff] %v1408_v27 }
  0x73   :  { %1462 = vst [vmem:[%s3557_s1 + $0x368] sm:$0xff] %v1410_v28  ;;  %1463 = vst [vmem:[%s3557_s1 + $0x768] sm:$0xff] %v1412_v29 }
  0x74   :  { %1477 = vst [vmem:[%s3557_s1 + $0xe88] sm:$0xff] %v1408_v27  ;;  %1478 = vst [vmem:[%s3557_s1 + $0x388] sm:$0xff] %v1410_v28 }
  0x75   :  { %1479 = vst [vmem:[%s3557_s1 + $0x788] sm:$0xff] %v1412_v29  ;;  %1493 = vst [vmem:[%s3557_s1 + $0xea8] sm:$0xff] %v1408_v27 }
  0x76   :  { %1494 = vst [vmem:[%s3557_s1 + $0x3a8] sm:$0xff] %v1410_v28  ;;  %1495 = vst [vmem:[%s3557_s1 + $0x7a8] sm:$0xff] %v1412_v29 }
  0x77   :  { %1509 = vst [vmem:[%s3557_s1 + $0xec8] sm:$0xff] %v1408_v27  ;;  %1510 = vst [vmem:[%s3557_s1 + $0x3c8] sm:$0xff] %v1410_v28 }
  0x78   :  { %1511 = vst [vmem:[%s3557_s1 + $0x7c8] sm:$0xff] %v1412_v29  ;;  %1525 = vst [vmem:[%s3557_s1 + $0xee8] sm:$0xff] %v1408_v27 }
  0x79   :  { %1526 = vst [vmem:[%s3557_s1 + $0x3e8] sm:$0xff] %v1410_v28  ;;  %1527 = vst [vmem:[%s3557_s1 + $0x7e8] sm:$0xff] %v1412_v29 }
  0x7a   :  { %1415 = vst [vmem:[%s3557_s1 + $0xb08] sm:$0xff] %v1414_v30  ;;  %1417 = vst [vmem:[%s3557_s1 + $0xf08] sm:$0xff] %v1416_v31 }
  0x7b   :  { %1432 = vst [vmem:[%s3557_s1 + $0xb28] sm:$0xff] %v1414_v30  ;;  %1433 = vst [vmem:[%s3557_s1 + $0xf28] sm:$0xff] %v1416_v31 }
  0x7c   :  { %1448 = vst [vmem:[%s3557_s1 + $0xb48] sm:$0xff] %v1414_v30  ;;  %1449 = vst [vmem:[%s3557_s1 + $0xf48] sm:$0xff] %v1416_v31 }
  0x7d   :  { %1464 = vst [vmem:[%s3557_s1 + $0xb68] sm:$0xff] %v1414_v30  ;;  %1465 = vst [vmem:[%s3557_s1 + $0xf68] sm:$0xff] %v1416_v31 }
  0x7e   :  { %1480 = vst [vmem:[%s3557_s1 + $0xb88] sm:$0xff] %v1414_v30  ;;  %1481 = vst [vmem:[%s3557_s1 + $0xf88] sm:$0xff] %v1416_v31 }
  0x7f   :  { %1496 = vst [vmem:[%s3557_s1 + $0xba8] sm:$0xff] %v1414_v30  ;;  %1497 = vst [vmem:[%s3557_s1 + $0xfa8] sm:$0xff] %v1416_v31 }
  0x80   :  { %1512 = vst [vmem:[%s3557_s1 + $0xbc8] sm:$0xff] %v1414_v30  ;;  %1513 = vst [vmem:[%s3557_s1 + $0xfc8] sm:$0xff] %v1416_v31 }
  0x81   :  { %1528 = vst [vmem:[%s3557_s1 + $0xbe8] sm:$0xff] %v1414_v30  ;;  %1529 = vst [vmem:[%s3557_s1 + $0xfe8] sm:$0xff] %v1416_v31 }
  0x82   :  { %1531 = vst [vmem:[%s3557_s1 + $0x10] sm:$0xff] %v1530_v32  ;;  %1562 = vst [vmem:[%s3557_s1 + $0x30] sm:$0xff] %v1530_v32 }
  0x83   :  { %1578 = vst [vmem:[%s3557_s1 + $0x50] sm:$0xff] %v1530_v32  ;;  %1594 = vst [vmem:[%s3557_s1 + $0x70] sm:$0xff] %v1530_v32 }
  0x84   :  { %1610 = vst [vmem:[%s3557_s1 + $0x90] sm:$0xff] %v1530_v32  ;;  %1626 = vst [vmem:[%s3557_s1 + $0xb0] sm:$0xff] %v1530_v32 }
  0x85   :  { %1642 = vst [vmem:[%s3557_s1 + $0xd0] sm:$0xff] %v1530_v32  ;;  %1658 = vst [vmem:[%s3557_s1 + $0xf0] sm:$0xff] %v1530_v32 }
  0x86   :  { %1533 = vst [vmem:[%s3557_s1 + $0x410] sm:$0xff] %v1532_v33  ;;  %1535 = vst [vmem:[%s3557_s1 + $0x810] sm:$0xff] %v1534_v34 }
  0x87   :  { %1537 = vst [vmem:[%s3557_s1 + $0xc10] sm:$0xff] %v1536_v35  ;;  %1563 = vst [vmem:[%s3557_s1 + $0x430] sm:$0xff] %v1532_v33 }
  0x88   :  { %1564 = vst [vmem:[%s3557_s1 + $0x830] sm:$0xff] %v1534_v34  ;;  %1565 = vst [vmem:[%s3557_s1 + $0xc30] sm:$0xff] %v1536_v35 }
  0x89   :  { %1579 = vst [vmem:[%s3557_s1 + $0x450] sm:$0xff] %v1532_v33  ;;  %1580 = vst [vmem:[%s3557_s1 + $0x850] sm:$0xff] %v1534_v34 }
  0x8a   :  { %1581 = vst [vmem:[%s3557_s1 + $0xc50] sm:$0xff] %v1536_v35  ;;  %1595 = vst [vmem:[%s3557_s1 + $0x470] sm:$0xff] %v1532_v33 }
  0x8b   :  { %1596 = vst [vmem:[%s3557_s1 + $0x870] sm:$0xff] %v1534_v34  ;;  %1597 = vst [vmem:[%s3557_s1 + $0xc70] sm:$0xff] %v1536_v35 }
  0x8c   :  { %1611 = vst [vmem:[%s3557_s1 + $0x490] sm:$0xff] %v1532_v33  ;;  %1612 = vst [vmem:[%s3557_s1 + $0x890] sm:$0xff] %v1534_v34 }
  0x8d   :  { %1613 = vst [vmem:[%s3557_s1 + $0xc90] sm:$0xff] %v1536_v35  ;;  %1627 = vst [vmem:[%s3557_s1 + $0x4b0] sm:$0xff] %v1532_v33 }
  0x8e   :  { %1628 = vst [vmem:[%s3557_s1 + $0x8b0] sm:$0xff] %v1534_v34  ;;  %1629 = vst [vmem:[%s3557_s1 + $0xcb0] sm:$0xff] %v1536_v35 }
  0x8f   :  { %1643 = vst [vmem:[%s3557_s1 + $0x4d0] sm:$0xff] %v1532_v33  ;;  %1644 = vst [vmem:[%s3557_s1 + $0x8d0] sm:$0xff] %v1534_v34 }
  0x90   :  { %1645 = vst [vmem:[%s3557_s1 + $0xcd0] sm:$0xff] %v1536_v35  ;;  %1659 = vst [vmem:[%s3557_s1 + $0x4f0] sm:$0xff] %v1532_v33 }
  0x91   :  { %1660 = vst [vmem:[%s3557_s1 + $0x8f0] sm:$0xff] %v1534_v34  ;;  %1661 = vst [vmem:[%s3557_s1 + $0xcf0] sm:$0xff] %v1536_v35 }
  0x92   :  { %1539 = vst [vmem:[%s3557_s1 + $0x110] sm:$0xff] %v1538_v36  ;;  %1541 = vst [vmem:[%s3557_s1 + $0x510] sm:$0xff] %v1540_v37 }
  0x93   :  { %1543 = vst [vmem:[%s3557_s1 + $0x910] sm:$0xff] %v1542_v38  ;;  %1566 = vst [vmem:[%s3557_s1 + $0x130] sm:$0xff] %v1538_v36 }
  0x94   :  { %1567 = vst [vmem:[%s3557_s1 + $0x530] sm:$0xff] %v1540_v37  ;;  %1568 = vst [vmem:[%s3557_s1 + $0x930] sm:$0xff] %v1542_v38 }
  0x95   :  { %1582 = vst [vmem:[%s3557_s1 + $0x150] sm:$0xff] %v1538_v36  ;;  %1583 = vst [vmem:[%s3557_s1 + $0x550] sm:$0xff] %v1540_v37 }
  0x96   :  { %1584 = vst [vmem:[%s3557_s1 + $0x950] sm:$0xff] %v1542_v38  ;;  %1598 = vst [vmem:[%s3557_s1 + $0x170] sm:$0xff] %v1538_v36 }
  0x97   :  { %1599 = vst [vmem:[%s3557_s1 + $0x570] sm:$0xff] %v1540_v37  ;;  %1600 = vst [vmem:[%s3557_s1 + $0x970] sm:$0xff] %v1542_v38 }
  0x98   :  { %1614 = vst [vmem:[%s3557_s1 + $0x190] sm:$0xff] %v1538_v36  ;;  %1615 = vst [vmem:[%s3557_s1 + $0x590] sm:$0xff] %v1540_v37 }
  0x99   :  { %1616 = vst [vmem:[%s3557_s1 + $0x990] sm:$0xff] %v1542_v38  ;;  %1630 = vst [vmem:[%s3557_s1 + $0x1b0] sm:$0xff] %v1538_v36 }
  0x9a   :  { %1631 = vst [vmem:[%s3557_s1 + $0x5b0] sm:$0xff] %v1540_v37  ;;  %1632 = vst [vmem:[%s3557_s1 + $0x9b0] sm:$0xff] %v1542_v38 }
  0x9b   :  { %1646 = vst [vmem:[%s3557_s1 + $0x1d0] sm:$0xff] %v1538_v36  ;;  %1647 = vst [vmem:[%s3557_s1 + $0x5d0] sm:$0xff] %v1540_v37 }
  0x9c   :  { %1648 = vst [vmem:[%s3557_s1 + $0x9d0] sm:$0xff] %v1542_v38  ;;  %1662 = vst [vmem:[%s3557_s1 + $0x1f0] sm:$0xff] %v1538_v36 }
  0x9d   :  { %1663 = vst [vmem:[%s3557_s1 + $0x5f0] sm:$0xff] %v1540_v37  ;;  %1664 = vst [vmem:[%s3557_s1 + $0x9f0] sm:$0xff] %v1542_v38 }
  0x9e   :  { %1545 = vst [vmem:[%s3557_s1 + $0xd10] sm:$0xff] %v1544_v39  ;;  %1547 = vst [vmem:[%s3557_s1 + $0x210] sm:$0xff] %v1546_v40 }
  0x9f   :  { %1549 = vst [vmem:[%s3557_s1 + $0x610] sm:$0xff] %v1548_v41  ;;  %1569 = vst [vmem:[%s3557_s1 + $0xd30] sm:$0xff] %v1544_v39 }
  0xa0   :  { %1570 = vst [vmem:[%s3557_s1 + $0x230] sm:$0xff] %v1546_v40  ;;  %1571 = vst [vmem:[%s3557_s1 + $0x630] sm:$0xff] %v1548_v41 }
  0xa1   :  { %1585 = vst [vmem:[%s3557_s1 + $0xd50] sm:$0xff] %v1544_v39  ;;  %1586 = vst [vmem:[%s3557_s1 + $0x250] sm:$0xff] %v1546_v40 }
  0xa2   :  { %1587 = vst [vmem:[%s3557_s1 + $0x650] sm:$0xff] %v1548_v41  ;;  %1601 = vst [vmem:[%s3557_s1 + $0xd70] sm:$0xff] %v1544_v39 }
  0xa3   :  { %1602 = vst [vmem:[%s3557_s1 + $0x270] sm:$0xff] %v1546_v40  ;;  %1603 = vst [vmem:[%s3557_s1 + $0x670] sm:$0xff] %v1548_v41 }
  0xa4   :  { %1617 = vst [vmem:[%s3557_s1 + $0xd90] sm:$0xff] %v1544_v39  ;;  %1618 = vst [vmem:[%s3557_s1 + $0x290] sm:$0xff] %v1546_v40 }
  0xa5   :  { %1619 = vst [vmem:[%s3557_s1 + $0x690] sm:$0xff] %v1548_v41  ;;  %1633 = vst [vmem:[%s3557_s1 + $0xdb0] sm:$0xff] %v1544_v39 }
  0xa6   :  { %1634 = vst [vmem:[%s3557_s1 + $0x2b0] sm:$0xff] %v1546_v40  ;;  %1635 = vst [vmem:[%s3557_s1 + $0x6b0] sm:$0xff] %v1548_v41 }
  0xa7   :  { %1649 = vst [vmem:[%s3557_s1 + $0xdd0] sm:$0xff] %v1544_v39  ;;  %1650 = vst [vmem:[%s3557_s1 + $0x2d0] sm:$0xff] %v1546_v40 }
  0xa8   :  { %1651 = vst [vmem:[%s3557_s1 + $0x6d0] sm:$0xff] %v1548_v41  ;;  %1665 = vst [vmem:[%s3557_s1 + $0xdf0] sm:$0xff] %v1544_v39 }
  0xa9   :  { %1666 = vst [vmem:[%s3557_s1 + $0x2f0] sm:$0xff] %v1546_v40  ;;  %1667 = vst [vmem:[%s3557_s1 + $0x6f0] sm:$0xff] %v1548_v41 }
  0xaa   :  { %1551 = vst [vmem:[%s3557_s1 + $0xa10] sm:$0xff] %v1550_v42  ;;  %1553 = vst [vmem:[%s3557_s1 + $0xe10] sm:$0xff] %v1552_v43 }
  0xab   :  { %1555 = vst [vmem:[%s3557_s1 + $0x310] sm:$0xff] %v1554_v44  ;;  %1572 = vst [vmem:[%s3557_s1 + $0xa30] sm:$0xff] %v1550_v42 }
  0xac   :  { %1573 = vst [vmem:[%s3557_s1 + $0xe30] sm:$0xff] %v1552_v43  ;;  %1574 = vst [vmem:[%s3557_s1 + $0x330] sm:$0xff] %v1554_v44 }
  0xad   :  { %1588 = vst [vmem:[%s3557_s1 + $0xa50] sm:$0xff] %v1550_v42  ;;  %1589 = vst [vmem:[%s3557_s1 + $0xe50] sm:$0xff] %v1552_v43 }
  0xae   :  { %1590 = vst [vmem:[%s3557_s1 + $0x350] sm:$0xff] %v1554_v44  ;;  %1604 = vst [vmem:[%s3557_s1 + $0xa70] sm:$0xff] %v1550_v42 }
  0xaf   :  { %1605 = vst [vmem:[%s3557_s1 + $0xe70] sm:$0xff] %v1552_v43  ;;  %1606 = vst [vmem:[%s3557_s1 + $0x370] sm:$0xff] %v1554_v44 }
  0xb0   :  { %1620 = vst [vmem:[%s3557_s1 + $0xa90] sm:$0xff] %v1550_v42  ;;  %1621 = vst [vmem:[%s3557_s1 + $0xe90] sm:$0xff] %v1552_v43 }
  0xb1   :  { %1622 = vst [vmem:[%s3557_s1 + $0x390] sm:$0xff] %v1554_v44  ;;  %1636 = vst [vmem:[%s3557_s1 + $0xab0] sm:$0xff] %v1550_v42 }
  0xb2   :  { %1637 = vst [vmem:[%s3557_s1 + $0xeb0] sm:$0xff] %v1552_v43  ;;  %1638 = vst [vmem:[%s3557_s1 + $0x3b0] sm:$0xff] %v1554_v44 }
  0xb3   :  { %1652 = vst [vmem:[%s3557_s1 + $0xad0] sm:$0xff] %v1550_v42  ;;  %1653 = vst [vmem:[%s3557_s1 + $0xed0] sm:$0xff] %v1552_v43 }
  0xb4   :  { %1654 = vst [vmem:[%s3557_s1 + $0x3d0] sm:$0xff] %v1554_v44  ;;  %1668 = vst [vmem:[%s3557_s1 + $0xaf0] sm:$0xff] %v1550_v42 }
  0xb5   :  { %1669 = vst [vmem:[%s3557_s1 + $0xef0] sm:$0xff] %v1552_v43  ;;  %1670 = vst [vmem:[%s3557_s1 + $0x3f0] sm:$0xff] %v1554_v44 }
  0xb6   :  { %1557 = vst [vmem:[%s3557_s1 + $0x710] sm:$0xff] %v1556_v45  ;;  %1559 = vst [vmem:[%s3557_s1 + $0xb10] sm:$0xff] %v1558_v46 }
  0xb7   :  { %1561 = vst [vmem:[%s3557_s1 + $0xf10] sm:$0xff] %v1560_v47  ;;  %1575 = vst [vmem:[%s3557_s1 + $0x730] sm:$0xff] %v1556_v45 }
  0xb8   :  { %1576 = vst [vmem:[%s3557_s1 + $0xb30] sm:$0xff] %v1558_v46  ;;  %1577 = vst [vmem:[%s3557_s1 + $0xf30] sm:$0xff] %v1560_v47 }
  0xb9   :  { %1591 = vst [vmem:[%s3557_s1 + $0x750] sm:$0xff] %v1556_v45  ;;  %1592 = vst [vmem:[%s3557_s1 + $0xb50] sm:$0xff] %v1558_v46 }
  0xba   :  { %1593 = vst [vmem:[%s3557_s1 + $0xf50] sm:$0xff] %v1560_v47  ;;  %1607 = vst [vmem:[%s3557_s1 + $0x770] sm:$0xff] %v1556_v45 }
  0xbb   :  { %1608 = vst [vmem:[%s3557_s1 + $0xb70] sm:$0xff] %v1558_v46  ;;  %1609 = vst [vmem:[%s3557_s1 + $0xf70] sm:$0xff] %v1560_v47 }
  0xbc   :  { %1623 = vst [vmem:[%s3557_s1 + $0x790] sm:$0xff] %v1556_v45  ;;  %1624 = vst [vmem:[%s3557_s1 + $0xb90] sm:$0xff] %v1558_v46 }
  0xbd   :  { %1625 = vst [vmem:[%s3557_s1 + $0xf90] sm:$0xff] %v1560_v47  ;;  %1639 = vst [vmem:[%s3557_s1 + $0x7b0] sm:$0xff] %v1556_v45 }
  0xbe   :  { %1640 = vst [vmem:[%s3557_s1 + $0xbb0] sm:$0xff] %v1558_v46  ;;  %1641 = vst [vmem:[%s3557_s1 + $0xfb0] sm:$0xff] %v1560_v47 }
  0xbf   :  { %1655 = vst [vmem:[%s3557_s1 + $0x7d0] sm:$0xff] %v1556_v45  ;;  %1656 = vst [vmem:[%s3557_s1 + $0xbd0] sm:$0xff] %v1558_v46 }
  0xc0   :  { %1657 = vst [vmem:[%s3557_s1 + $0xfd0] sm:$0xff] %v1560_v47  ;;  %1671 = vst [vmem:[%s3557_s1 + $0x7f0] sm:$0xff] %v1556_v45 }
  0xc1   :  { %1672 = vst [vmem:[%s3557_s1 + $0xbf0] sm:$0xff] %v1558_v46  ;;  %1673 = vst [vmem:[%s3557_s1 + $0xff0] sm:$0xff] %v1560_v47 }
  0xc2   :  { %1675 = vst [vmem:[%s3557_s1 + $0x18] sm:$0xff] %v1674_v48  ;;  %1677 = vst [vmem:[%s3557_s1 + $0x418] sm:$0xff] %v1676_v49 }
  0xc3   :  { %1679 = vst [vmem:[%s3557_s1 + $0x818] sm:$0xff] %v1678_v50  ;;  %1706 = vst [vmem:[%s3557_s1 + $0x38] sm:$0xff] %v1674_v48 }
  0xc4   :  { %1707 = vst [vmem:[%s3557_s1 + $0x438] sm:$0xff] %v1676_v49  ;;  %1708 = vst [vmem:[%s3557_s1 + $0x838] sm:$0xff] %v1678_v50 }
  0xc5   :  { %1722 = vst [vmem:[%s3557_s1 + $0x58] sm:$0xff] %v1674_v48  ;;  %1723 = vst [vmem:[%s3557_s1 + $0x458] sm:$0xff] %v1676_v49 }
  0xc6   :  { %1724 = vst [vmem:[%s3557_s1 + $0x858] sm:$0xff] %v1678_v50  ;;  %1738 = vst [vmem:[%s3557_s1 + $0x78] sm:$0xff] %v1674_v48 }
  0xc7   :  { %1739 = vst [vmem:[%s3557_s1 + $0x478] sm:$0xff] %v1676_v49  ;;  %1740 = vst [vmem:[%s3557_s1 + $0x878] sm:$0xff] %v1678_v50 }
  0xc8   :  { %1754 = vst [vmem:[%s3557_s1 + $0x98] sm:$0xff] %v1674_v48  ;;  %1755 = vst [vmem:[%s3557_s1 + $0x498] sm:$0xff] %v1676_v49 }
  0xc9   :  { %1756 = vst [vmem:[%s3557_s1 + $0x898] sm:$0xff] %v1678_v50  ;;  %1770 = vst [vmem:[%s3557_s1 + $0xb8] sm:$0xff] %v1674_v48 }
  0xca   :  { %1771 = vst [vmem:[%s3557_s1 + $0x4b8] sm:$0xff] %v1676_v49  ;;  %1772 = vst [vmem:[%s3557_s1 + $0x8b8] sm:$0xff] %v1678_v50 }
  0xcb   :  { %1786 = vst [vmem:[%s3557_s1 + $0xd8] sm:$0xff] %v1674_v48  ;;  %1787 = vst [vmem:[%s3557_s1 + $0x4d8] sm:$0xff] %v1676_v49 }
  0xcc   :  { %1788 = vst [vmem:[%s3557_s1 + $0x8d8] sm:$0xff] %v1678_v50  ;;  %1802 = vst [vmem:[%s3557_s1 + $0xf8] sm:$0xff] %v1674_v48 }
  0xcd   :  { %1803 = vst [vmem:[%s3557_s1 + $0x4f8] sm:$0xff] %v1676_v49  ;;  %1804 = vst [vmem:[%s3557_s1 + $0x8f8] sm:$0xff] %v1678_v50 }
  0xce   :  { %1681 = vst [vmem:[%s3557_s1 + $0xc18] sm:$0xff] %v1680_v51  ;;  %1683 = vst [vmem:[%s3557_s1 + $0x118] sm:$0xff] %v1682_v52 }
  0xcf   :  { %1685 = vst [vmem:[%s3557_s1 + $0x518] sm:$0xff] %v1684_v53  ;;  %1709 = vst [vmem:[%s3557_s1 + $0xc38] sm:$0xff] %v1680_v51 }
  0xd0   :  { %1710 = vst [vmem:[%s3557_s1 + $0x138] sm:$0xff] %v1682_v52  ;;  %1711 = vst [vmem:[%s3557_s1 + $0x538] sm:$0xff] %v1684_v53 }
  0xd1   :  { %1725 = vst [vmem:[%s3557_s1 + $0xc58] sm:$0xff] %v1680_v51  ;;  %1726 = vst [vmem:[%s3557_s1 + $0x158] sm:$0xff] %v1682_v52 }
  0xd2   :  { %1727 = vst [vmem:[%s3557_s1 + $0x558] sm:$0xff] %v1684_v53  ;;  %1741 = vst [vmem:[%s3557_s1 + $0xc78] sm:$0xff] %v1680_v51 }
  0xd3   :  { %1742 = vst [vmem:[%s3557_s1 + $0x178] sm:$0xff] %v1682_v52  ;;  %1743 = vst [vmem:[%s3557_s1 + $0x578] sm:$0xff] %v1684_v53 }
  0xd4   :  { %1757 = vst [vmem:[%s3557_s1 + $0xc98] sm:$0xff] %v1680_v51  ;;  %1758 = vst [vmem:[%s3557_s1 + $0x198] sm:$0xff] %v1682_v52 }
  0xd5   :  { %1759 = vst [vmem:[%s3557_s1 + $0x598] sm:$0xff] %v1684_v53  ;;  %1773 = vst [vmem:[%s3557_s1 + $0xcb8] sm:$0xff] %v1680_v51 }
  0xd6   :  { %1774 = vst [vmem:[%s3557_s1 + $0x1b8] sm:$0xff] %v1682_v52  ;;  %1775 = vst [vmem:[%s3557_s1 + $0x5b8] sm:$0xff] %v1684_v53 }
  0xd7   :  { %1789 = vst [vmem:[%s3557_s1 + $0xcd8] sm:$0xff] %v1680_v51  ;;  %1790 = vst [vmem:[%s3557_s1 + $0x1d8] sm:$0xff] %v1682_v52 }
  0xd8   :  { %1791 = vst [vmem:[%s3557_s1 + $0x5d8] sm:$0xff] %v1684_v53  ;;  %1805 = vst [vmem:[%s3557_s1 + $0xcf8] sm:$0xff] %v1680_v51 }
  0xd9   :  { %1806 = vst [vmem:[%s3557_s1 + $0x1f8] sm:$0xff] %v1682_v52  ;;  %1807 = vst [vmem:[%s3557_s1 + $0x5f8] sm:$0xff] %v1684_v53 }
  0xda   :  { %1687 = vst [vmem:[%s3557_s1 + $0x918] sm:$0xff] %v1686_v54  ;;  %1689 = vst [vmem:[%s3557_s1 + $0xd18] sm:$0xff] %v1688_v55 }
  0xdb   :  { %1691 = vst [vmem:[%s3557_s1 + $0x218] sm:$0xff] %v1690_v56  ;;  %1712 = vst [vmem:[%s3557_s1 + $0x938] sm:$0xff] %v1686_v54 }
  0xdc   :  { %1713 = vst [vmem:[%s3557_s1 + $0xd38] sm:$0xff] %v1688_v55  ;;  %1714 = vst [vmem:[%s3557_s1 + $0x238] sm:$0xff] %v1690_v56 }
  0xdd   :  { %1728 = vst [vmem:[%s3557_s1 + $0x958] sm:$0xff] %v1686_v54  ;;  %1729 = vst [vmem:[%s3557_s1 + $0xd58] sm:$0xff] %v1688_v55 }
  0xde   :  { %1730 = vst [vmem:[%s3557_s1 + $0x258] sm:$0xff] %v1690_v56  ;;  %1744 = vst [vmem:[%s3557_s1 + $0x978] sm:$0xff] %v1686_v54 }
  0xdf   :  { %1745 = vst [vmem:[%s3557_s1 + $0xd78] sm:$0xff] %v1688_v55  ;;  %1746 = vst [vmem:[%s3557_s1 + $0x278] sm:$0xff] %v1690_v56 }
  0xe0   :  { %1760 = vst [vmem:[%s3557_s1 + $0x998] sm:$0xff] %v1686_v54  ;;  %1761 = vst [vmem:[%s3557_s1 + $0xd98] sm:$0xff] %v1688_v55 }
  0xe1   :  { %1762 = vst [vmem:[%s3557_s1 + $0x298] sm:$0xff] %v1690_v56  ;;  %1776 = vst [vmem:[%s3557_s1 + $0x9b8] sm:$0xff] %v1686_v54 }
  0xe2   :  { %1777 = vst [vmem:[%s3557_s1 + $0xdb8] sm:$0xff] %v1688_v55  ;;  %1778 = vst [vmem:[%s3557_s1 + $0x2b8] sm:$0xff] %v1690_v56 }
  0xe3   :  { %1792 = vst [vmem:[%s3557_s1 + $0x9d8] sm:$0xff] %v1686_v54  ;;  %1793 = vst [vmem:[%s3557_s1 + $0xdd8] sm:$0xff] %v1688_v55 }
  0xe4   :  { %1794 = vst [vmem:[%s3557_s1 + $0x2d8] sm:$0xff] %v1690_v56  ;;  %1808 = vst [vmem:[%s3557_s1 + $0x9f8] sm:$0xff] %v1686_v54 }
  0xe5   :  { %1809 = vst [vmem:[%s3557_s1 + $0xdf8] sm:$0xff] %v1688_v55  ;;  %1810 = vst [vmem:[%s3557_s1 + $0x2f8] sm:$0xff] %v1690_v56 }
  0xe6   :  { %1693 = vst [vmem:[%s3557_s1 + $0x618] sm:$0xff] %v1692_v57  ;;  %1695 = vst [vmem:[%s3557_s1 + $0xa18] sm:$0xff] %v1694_v58 }
  0xe7   :  { %1697 = vst [vmem:[%s3557_s1 + $0xe18] sm:$0xff] %v1696_v59  ;;  %1715 = vst [vmem:[%s3557_s1 + $0x638] sm:$0xff] %v1692_v57 }
  0xe8   :  { %1716 = vst [vmem:[%s3557_s1 + $0xa38] sm:$0xff] %v1694_v58  ;;  %1717 = vst [vmem:[%s3557_s1 + $0xe38] sm:$0xff] %v1696_v59 }
  0xe9   :  { %1731 = vst [vmem:[%s3557_s1 + $0x658] sm:$0xff] %v1692_v57  ;;  %1732 = vst [vmem:[%s3557_s1 + $0xa58] sm:$0xff] %v1694_v58 }
  0xea   :  { %1733 = vst [vmem:[%s3557_s1 + $0xe58] sm:$0xff] %v1696_v59  ;;  %1747 = vst [vmem:[%s3557_s1 + $0x678] sm:$0xff] %v1692_v57 }
  0xeb   :  { %1748 = vst [vmem:[%s3557_s1 + $0xa78] sm:$0xff] %v1694_v58  ;;  %1749 = vst [vmem:[%s3557_s1 + $0xe78] sm:$0xff] %v1696_v59 }
  0xec   :  { %1763 = vst [vmem:[%s3557_s1 + $0x698] sm:$0xff] %v1692_v57  ;;  %1764 = vst [vmem:[%s3557_s1 + $0xa98] sm:$0xff] %v1694_v58 }
  0xed   :  { %1765 = vst [vmem:[%s3557_s1 + $0xe98] sm:$0xff] %v1696_v59  ;;  %1779 = vst [vmem:[%s3557_s1 + $0x6b8] sm:$0xff] %v1692_v57 }
  0xee   :  { %1780 = vst [vmem:[%s3557_s1 + $0xab8] sm:$0xff] %v1694_v58  ;;  %1781 = vst [vmem:[%s3557_s1 + $0xeb8] sm:$0xff] %v1696_v59 }
  0xef   :  { %1795 = vst [vmem:[%s3557_s1 + $0x6d8] sm:$0xff] %v1692_v57  ;;  %1796 = vst [vmem:[%s3557_s1 + $0xad8] sm:$0xff] %v1694_v58 }
  0xf0   :  { %1797 = vst [vmem:[%s3557_s1 + $0xed8] sm:$0xff] %v1696_v59  ;;  %1811 = vst [vmem:[%s3557_s1 + $0x6f8] sm:$0xff] %v1692_v57 }
  0xf1   :  { %1812 = vst [vmem:[%s3557_s1 + $0xaf8] sm:$0xff] %v1694_v58  ;;  %1813 = vst [vmem:[%s3557_s1 + $0xef8] sm:$0xff] %v1696_v59 }
  0xf2   :  { %1699 = vst [vmem:[%s3557_s1 + $0x318] sm:$0xff] %v1698_v60  ;;  %1701 = vst [vmem:[%s3557_s1 + $0x718] sm:$0xff] %v1700_v61 }
  0xf3   :  { %1703 = vst [vmem:[%s3557_s1 + $0xb18] sm:$0xff] %v1702_v62  ;;  %1718 = vst [vmem:[%s3557_s1 + $0x338] sm:$0xff] %v1698_v60 }
  0xf4   :  { %1719 = vst [vmem:[%s3557_s1 + $0x738] sm:$0xff] %v1700_v61  ;;  %1720 = vst [vmem:[%s3557_s1 + $0xb38] sm:$0xff] %v1702_v62 }
  0xf5   :  { %1734 = vst [vmem:[%s3557_s1 + $0x358] sm:$0xff] %v1698_v60  ;;  %1735 = vst [vmem:[%s3557_s1 + $0x758] sm:$0xff] %v1700_v61 }
  0xf6   :  { %1736 = vst [vmem:[%s3557_s1 + $0xb58] sm:$0xff] %v1702_v62  ;;  %1750 = vst [vmem:[%s3557_s1 + $0x378] sm:$0xff] %v1698_v60 }
  0xf7   :  { %1751 = vst [vmem:[%s3557_s1 + $0x778] sm:$0xff] %v1700_v61  ;;  %1752 = vst [vmem:[%s3557_s1 + $0xb78] sm:$0xff] %v1702_v62 }
  0xf8   :  { %1766 = vst [vmem:[%s3557_s1 + $0x398] sm:$0xff] %v1698_v60  ;;  %1767 = vst [vmem:[%s3557_s1 + $0x798] sm:$0xff] %v1700_v61 }
  0xf9   :  { %1768 = vst [vmem:[%s3557_s1 + $0xb98] sm:$0xff] %v1702_v62  ;;  %1782 = vst [vmem:[%s3557_s1 + $0x3b8] sm:$0xff] %v1698_v60 }
  0xfa   :  { %1783 = vst [vmem:[%s3557_s1 + $0x7b8] sm:$0xff] %v1700_v61  ;;  %1784 = vst [vmem:[%s3557_s1 + $0xbb8] sm:$0xff] %v1702_v62 }
  0xfb   :  { %1798 = vst [vmem:[%s3557_s1 + $0x3d8] sm:$0xff] %v1698_v60  ;;  %1799 = vst [vmem:[%s3557_s1 + $0x7d8] sm:$0xff] %v1700_v61 }
  0xfc   :  { %1800 = vst [vmem:[%s3557_s1 + $0xbd8] sm:$0xff] %v1702_v62  ;;  %1814 = vst [vmem:[%s3557_s1 + $0x3f8] sm:$0xff] %v1698_v60 }
  0xfd   :  { %1815 = vst [vmem:[%s3557_s1 + $0x7f8] sm:$0xff] %v1700_v61  ;;  %1816 = vst [vmem:[%s3557_s1 + $0xbf8] sm:$0xff] %v1702_v62 }
  0xfe   :  { %1705 = vst [vmem:[%s3557_s1 + $0xf18] sm:$0xff] %v1704_v63  ;;  %1721 = vst [vmem:[%s3557_s1 + $0xf38] sm:$0xff] %v1704_v63 }
  0xff   :  { %1737 = vst [vmem:[%s3557_s1 + $0xf58] sm:$0xff] %v1704_v63  ;;  %1753 = vst [vmem:[%s3557_s1 + $0xf78] sm:$0xff] %v1704_v63 }
 0x100   :  { %1769 = vst [vmem:[%s3557_s1 + $0xf98] sm:$0xff] %v1704_v63  ;;  %1785 = vst [vmem:[%s3557_s1 + $0xfb8] sm:$0xff] %v1704_v63 }
 0x101   :  { %1801 = vst [vmem:[%s3557_s1 + $0xfd8] sm:$0xff] %v1704_v63  ;;  %1817 = vst [vmem:[%s3557_s1 + $0xff8] sm:$0xff] %v1704_v63 }

// kernel: ipeps_forward.12
= control target key start
LH: loop header
LB: loop body
LE: loop exit
PB: predicated region body
PF: predicated region fallthrough
CT: control target
= control target key end

     0   :  { %vm12_vm0 = vcmask 123904   ;;  %vm68_vm1 = vcmask 1041408   ;;  %vm61_vm2 = vcmask 15360   ;;  %vm147_vm3 = vcmask 130048   ;;  %s205_s0 = inlined_call_operand.vmem [shape: f32[2,16], index: 0, kind: input, shape index: {}]   ;;  %s206_s1 = inlined_call_operand.vmem [shape: f32[2,16], index: 1, kind: output, shape index: {0}]   ;;  %s207_s2 = inlined_call_operand.vmem [shape: f32[16,16], index: 2, kind: output, shape index: {1}]  }
   0x1   :  { %v10_v0 = vld [vmem:[%s205_s0] sm:$0x3] }
   0x2   :  { %v11_v1 = vmul.f32 %v10_v0, %v10_v0 }
   0x4   :  { %v13_v2 = vsel %vm12_vm0, %v11_v1, 0.0 }
   0x5   :  { %14 = vadd.xlane.f32.xlu0 %v13_v2 }
  0x92   :  { %v15_v3 = vpop.xlane.xlu0 %14 }
  0x93   :  { %v16_v4 = vrot.slane %v15_v3, 4 }
  0x95   :  { %v17_v5 = vadd.f32 %v16_v4, %v15_v3 }
  0x97   :  { %v18_v6 = vrot.slane %v17_v5, 2 }
  0x99   :  { %v19_v7 = vadd.f32 %v18_v6, %v17_v5 }
  0x9b   :  { %v20_v8 = vrot.slane %v19_v7, 1 }
  0x9d   :  { %v21_v9 = vadd.f32 %v20_v8, %v19_v7 }
  0x9f   :  { %169 = vpush %v21_v9 }
  0xd0   :  { %s170_s11 = spop %169 }
  0xd1   :  { %v23_v10 = vstv %s170_s11 }
  0xd2   :  { %174 = vrsqrt.f32 %v23_v10 }
  0xdc   :  { %v175_v11 = vpop.eup %174 }
  0xdd   :  { %171 = vpush %v175_v11 }
 0x10e   :  { %s172_s12 = spop %171 }
 0x10f   :  { %v26_v12 = vstv %s172_s12 }
 0x110   :  { %v27_v13 = vmul.f32 %v26_v12, %v10_v0 }
 0x112   :  { %28 = vst.msk [vmem:[%s206_s1] sm:$0x3] %vm12_vm0, %v27_v13  ;;  %29 = vxpose.xlu0.b32.start.end [1/1] (short) (narrow) %v27_v13, 16  ;;  %164 = vmatprep.subr.msk.mxu0 %vm68_vm1, %v27_v13 }
 0x113   :  { %165 = vmatpush3.msk.msra.mxu0 %vm68_vm1, %v27_v13 }
 0x192   :  { %v45_v14 = vpop.trf.xlu0 }
 0x193   :  { %166 = vmatprep.mubr.msk.f32.mxu0 %vm61_vm2, %v45_v14 }
 0x196   :  { %v46_v15 = vpop.trf.xlu0 }
 0x197   :  { %167 = vmatmul.mubr.msk.f32.vlgmr.msra.gmra.mrb[0].mxu0 %vm61_vm2, %v46_v15 }
 0x26a   :  { %v168_v16 = vpop.f32.mrb[0].mxu0 }
 0x26b   :  { %149 = vst.msk [vmem:[%s207_s2 + $0x8] sm:$0xff] %vm147_vm3, %v168_v16  ;;  %v138_v17 = vpop.f32.mrb[1].mxu0 }
 0x26c   :  { %148 = vst.msk [vmem:[%s207_s2] sm:$0xff] %vm147_vm3, %v138_v17 }

// kernel: custom-call.6
= control target key start
LH: loop header
LB: loop body
LE: loop exit
PB: predicated region body
PF: predicated region fallthrough
CT: control target
= control target key end

     0   :  { %s3478_s0 = inlined_call_operand.vmem [shape: f32[16,16], index: 0, kind: input, shape index: {}]   ;;  %s3479_s1 = inlined_call_operand.vmem [shape: f32[16,16], index: 1, kind: input, shape index: {}]   ;;  %s3480_s2 = inlined_call_operand.vmem [shape: f32[16,16], index: 2, kind: input, shape index: {}]   ;;  %s3481_s3 = inlined_call_operand.vmem [shape: f32[16,16], index: 3, kind: input, shape index: {}]   ;;  %s3482_s4 = inlined_call_operand.vmem [shape: f32[16], index: 4, kind: output, shape index: {0}]   ;;  %s3483_s5 = inlined_call_operand.vmem [shape: f32[16], index: 5, kind: output, shape index: {1}]   ;;  %s3484_s6 = inlined_call_operand.vmem [shape: f32[16,16], index: 6, kind: output, shape index: {2}]   ;;  %s3485_s7 = inlined_call_operand.vmem [shape: f32[16,16], index: 7, kind: output, shape index: {3}]   ;;  %s3486_s8 = inlined_call_operand.vmem [shape: f32[16,16], index: 8, kind: output, shape index: {4}]   ;;  %s3487_s9 = inlined_call_operand.vmem [shape: f32[16,16], index: 9, kind: output, shape index: {5}]  }
   0x1   :  { %s24_s11 = scalar_lea.vmem %s3478_s0, 8 }
   0x2   :  { %p1741_p0 = scmp.gt.s32.totalorder %s3478_s0, %s24_s11 }
   0x3   :  { %s2918_s14 = smov (!%p1741_p0), [#allocation0]   ;;  %s2922_s17 = smov (!%p1741_p0), %s3478_s0  }
   0x4   :  { %1742 = sbr.rel (%p1741_p0) target bundleno = 21 (0x15), region = 421 }
   0xb LB: > { %v58_v0 = vld [vmem:[%s2924_s17] sm:$0xff]  ;;  %s60_s17 = scalar_lea.vmem %s2924_s17, 8   ;;  %s2924_s17 = sphi %s2922_s17, %s60_s17   ;;  %s2920_s14 = sphi %s2918_s14, %s61_s14  }
   0xc   : > { %59 = vst [vmem:[%s2920_s14] sm:$0xff] %v58_v0  ;;  %s61_s14 = scalar_lea.vmem %s2920_s14, 8   ;;  %p55_p1 = scmp.gt.s32.totalorder %s60_s17, %s24_s11 }
   0xe   :  { %57 = sbr.rel (!%p55_p1) target bundleno = 11 (0xb), region = 427 }
  0x15 PF:  { %s86_s20 = scalar_lea.vmem %s3479_s1, 8 }
  0x16   :  { %p1761_p2 = scmp.gt.s32.totalorder %s3479_s1, %s86_s20 }
  0x17   :  { %s2926_s0 = smov (!%p1761_p2), [#allocation1]   ;;  %s2930_s25 = smov (!%p1761_p2), %s3479_s1  }
  0x18   :  { %1762 = sbr.rel (%p1761_p2) target bundleno = 41 (0x29), region = 443 }
  0x1f LB: > { %v120_v1 = vld [vmem:[%s2932_s25] sm:$0xff]  ;;  %s122_s25 = scalar_lea.vmem %s2932_s25, 8   ;;  %s2932_s25 = sphi %s2930_s25, %s122_s25   ;;  %s2928_s0 = sphi %s2926_s0, %s123_s0  }
  0x20   : > { %121 = vst [vmem:[%s2928_s0] sm:$0xff] %v120_v1  ;;  %s123_s0 = scalar_lea.vmem %s2928_s0, 8   ;;  %p117_p3 = scmp.gt.s32.totalorder %s122_s25, %s86_s20 }
  0x22   :  { %119 = sbr.rel (!%p117_p3) target bundleno = 31 (0x1f), region = 449 }
  0x29 PF:  { %s148_s28 = scalar_lea.vmem %s3480_s2, 8 }
  0x2a   :  { %p1781_p4 = scmp.gt.s32.totalorder %s3480_s2, %s148_s28 }
  0x2b   :  { %s2934_s1 = smov (!%p1781_p4), [#allocation2]   ;;  %s2938_s12 = smov (!%p1781_p4), %s3480_s2  }
  0x2c   :  { %1782 = sbr.rel (%p1781_p4) target bundleno = 61 (0x3d), region = 465 }
  0x33 LB: > { %v182_v2 = vld [vmem:[%s2940_s12] sm:$0xff]  ;;  %s184_s12 = scalar_lea.vmem %s2940_s12, 8   ;;  %s2940_s12 = sphi %s2938_s12, %s184_s12   ;;  %s2936_s1 = sphi %s2934_s1, %s185_s1  }
  0x34   : > { %183 = vst [vmem:[%s2936_s1] sm:$0xff] %v182_v2  ;;  %s185_s1 = scalar_lea.vmem %s2936_s1, 8   ;;  %p179_p5 = scmp.gt.s32.totalorder %s184_s12, %s148_s28 }
  0x36   :  { %181 = sbr.rel (!%p179_p5) target bundleno = 51 (0x33), region = 471 }
  0x3d PF:  { %s210_s15 = scalar_lea.vmem %s3481_s3, 8 }
  0x3e   :  { %p1801_p6 = scmp.gt.s32.totalorder %s3481_s3, %s210_s15 }
  0x3f   :  { %s2942_s2 = smov (!%p1801_p6), [#allocation3]   ;;  %s2946_s20 = smov (!%p1801_p6), %s3481_s3  }
  0x40   :  { %1802 = sbr.rel (%p1801_p6) target bundleno = 81 (0x51), region = 487 }
  0x47 LB: > { %v244_v3 = vld [vmem:[%s2948_s20] sm:$0xff]  ;;  %s246_s20 = scalar_lea.vmem %s2948_s20, 8   ;;  %s2948_s20 = sphi %s2946_s20, %s246_s20   ;;  %s2944_s2 = sphi %s2942_s2, %s247_s2  }
  0x48   : > { %245 = vst [vmem:[%s2944_s2] sm:$0xff] %v244_v3  ;;  %s247_s2 = scalar_lea.vmem %s2944_s2, 8   ;;  %p241_p7 = scmp.gt.s32.totalorder %s246_s20, %s210_s15 }
  0x4a   :  { %243 = sbr.rel (!%p241_p7) target bundleno = 71 (0x47), region = 493 }
  0x51 PF:  { %s259_s21 = smov [#allocation12]  ;;  %v260_v4 = vld [vmem:[#allocation0] sm:$0xff]  ;;  %v264_v5 = vld [vmem:[#allocation0 + $0x8] sm:$0xff]  ;;  %s266_s22 = smov [#allocation13]  ;;  %v267_v6 = vld [vmem:[#allocation1] sm:$0xff]  ;;  %v300_v7 = vlaneseq  ;;  %v2990_v11 = vmov 0.0  }
  0x52   :  { %261 = vst [vmem:[%s259_s21] sm:$0xff] %v260_v4  ;;  %2066 = vst [vmem:[%s259_s21 + $0x8] sm:$0xff] %v264_v5  ;;  %v271_v8 = vld [vmem:[#allocation1 + $0x8] sm:$0xff]  ;;  %s273_s3 = smov [#allocation14]  ;;  %v274_v9 = vld [vmem:[#allocation2] sm:$0xff]  ;;  %s280_s0 = smov [#allocation15] }
  0x53   :  { %268 = vst [vmem:[%s266_s22] sm:$0xff] %v267_v6  ;;  %v278_v10 = vld [vmem:[#allocation2 + $0x8] sm:$0xff]  ;;  %287 = vst [vmem:[#allocation8] sm:$0xff] %v2990_v11  ;;  %v281_v12 = vld [vmem:[#allocation3] sm:$0xff]  ;;  %v3079_v14 = vand.u32 127, %v300_v7  ;;  %v3081_v15 = vshrl.u32 %v300_v7, 7  ;;  %s299_s23 = smov [#allocation8] }
  0x54   :  { %289 = vst [vmem:[#allocation8 + $0x8] sm:$0xff] %v2990_v11  ;;  %290 = vst [vmem:[#allocation9] sm:$0xff] %v2990_v11  ;;  %v285_v13 = vld [vmem:[#allocation3 + $0x8] sm:$0xff]  ;;  %s319_s24 = smov [#allocation11]  ;;  %s1819_s25 = smov [#allocation12] }
  0x55   :  { %292 = vst [vmem:[#allocation9 + $0x8] sm:$0xff] %v2990_v11  ;;  %293 = vst [vmem:[#allocation10] sm:$0xff] %v2990_v11  ;;  %v302_v14 = vmov %v3079_v14  ;;  %v305_v15 = vmov %v3081_v15  ;;  %vm1823_vm4 = vcmp.lt.s32.totalorder %v3079_v14, 16  ;;  %s1845_s26 = smov [#allocation13]  ;;  %s1868_s27 = smov [#allocation14] }
  0x56   :  { %295 = vst [vmem:[#allocation10 + $0x8] sm:$0xff] %v2990_v11  ;;  %296 = vst [vmem:[#allocation11] sm:$0xff] %v2990_v11  ;;  %v322_v14 = vmov %v3079_v14  ;;  %v325_v15 = vmov %v3081_v15  ;;  %v315_v16 = vadd.s32 8, %v305_v15  ;;  %vm309_vm0 = vcmp.eq.s32.totalorder %v305_v15, %v302_v14  ;;  %s1891_s28 = smov [#allocation15] }
  0x57   :  { %298 = vst [vmem:[#allocation11 + $0x8] sm:$0xff] %v2990_v11  ;;  %2067 = vst [vmem:[%s266_s22 + $0x8] sm:$0xff] %v271_v8  ;;  %v335_v17 = vadd.s32 8, %v325_v15  ;;  %vm329_vm1 = vcmp.eq.s32.totalorder %v325_v15, %v322_v14  ;;  %v1818_v15 = vmov %v3081_v15 }
  0x58   :  { %275 = vst [vmem:[%s273_s3] sm:$0xff] %v274_v9  ;;  %2068 = vst [vmem:[%s273_s3 + $0x8] sm:$0xff] %v278_v10  ;;  %vm316_vm2 = vcmp.eq.s32.totalorder %v315_v16, %v302_v14  ;;  %v1834_v34 = vadd.s32 8, %v1818_v15 }
  0x59   :  { %282 = vst [vmem:[%s280_s0] sm:$0xff] %v281_v12  ;;  %2069 = vst [vmem:[%s280_s0 + $0x8] sm:$0xff] %v285_v13  ;;  %vm336_vm3 = vcmp.eq.s32.totalorder %v335_v17, %v322_v14  ;;  %v1815_v14 = vmov %v3079_v14  ;;  %v1825_v26 = vld [vmem:[%s1819_s25] sm:$0xff]  ;;  %v2074_v27 = vld [vmem:[%s1819_s25 + $0x8] sm:$0xff] }
  0x5a   :  { %vm1828_vm5 = vcmp.eq.s32.totalorder %v1818_v15, %v1815_v14  ;;  %v1841_v14 = vmov %v3079_v14  ;;  %v1826_v29 = vsel %vm1823_vm4, %v1825_v26, 0.0  ;;  %v1832_v30 = vsel %vm1823_vm4, %v2074_v27, 0.0 }
  0x5b   :  { %v306_v18 = vld [vmem:[%s299_s23] sm:$0xff]  ;;  %v2070_v19 = vld [vmem:[%s299_s23 + $0x8] sm:$0xff]  ;;  %v1827_v35 = vmul.f32 %v1826_v29, %v1826_v29  ;;  %v1833_v36 = vmul.f32 %v1832_v30, %v1832_v30  ;;  %vm1835_vm6 = vcmp.eq.s32.totalorder %v1834_v34, %v1815_v14  ;;  %v1890_v15 = vmov %v3081_v15 }
  0x5c   :  { %v310_v21 = vsel %vm309_vm0, 1.0, %v306_v18  ;;  %v317_v22 = vsel %vm316_vm2, 1.0, %v2070_v19  ;;  %v1844_v15 = vmov %v3081_v15  ;;  %v1864_v14 = vmov %v3079_v14 }
  0x5d   :  { %311 = vst [vmem:[%s299_s23] sm:$0xff] %v310_v21  ;;  %2071 = vst [vmem:[%s299_s23 + $0x8] sm:$0xff] %v317_v22  ;;  %v1838_v41 = vadd.f32 %v1833_v36, %v1827_v35  ;;  %v1829_v45 = vsel %vm1828_vm5, 0.0, %v1827_v35  ;;  %v1836_v49 = vsel %vm1835_vm6, 0.0, %v1833_v36  ;;  %v1887_v14 = vmov %v3079_v14 }
  0x5e   :  { %v326_v20 = vld [vmem:[%s319_s24] sm:$0xff]  ;;  %v2072_v24 = vld [vmem:[%s319_s24 + $0x8] sm:$0xff]  ;;  %v1837_v51 = vadd.f32 %v1836_v49, %v1829_v45  ;;  %v1867_v15 = vmov %v3081_v15  ;;  %v1908_v56 = vadd.s32 8, %v1890_v15  ;;  %vm1900_vm7 = vcmp.eq.s32.totalorder %v1890_v15, %v1887_v14 }
  0x5f   :  { %v330_v23 = vsel %vm329_vm1, 1.0, %v326_v20  ;;  %v337_v25 = vsel %vm336_vm3, 1.0, %v2072_v24  ;;  %v1851_v28 = vld [vmem:[%s1845_s26] sm:$0xff]  ;;  %v2075_v32 = vld [vmem:[%s1845_s26 + $0x8] sm:$0xff] }
  0x60   :  { %331 = vst [vmem:[%s319_s24] sm:$0xff] %v330_v23  ;;  %2073 = vst [vmem:[%s319_s24 + $0x8] sm:$0xff] %v337_v25  ;;  %v1852_v31 = vsel %vm1823_vm4, %v1851_v28, 0.0  ;;  %v1874_v33 = vld [vmem:[%s1868_s27] sm:$0xff]  ;;  %v1858_v38 = vsel %vm1823_vm4, %v2075_v32, 0.0  ;;  %v2076_v39 = vld [vmem:[%s1868_s27 + $0x8] sm:$0xff]  ;;  %vm1909_vm8 = vcmp.eq.s32.totalorder %v1908_v56, %v1887_v14 }
  0x61   :  { %v1853_v37 = vmul.f32 %v1852_v31, %v1852_v31  ;;  %v1875_v40 = vsel %vm1823_vm4, %v1874_v33, 0.0  ;;  %v1859_v42 = vmul.f32 %v1858_v38, %v1858_v38  ;;  %v1897_v43 = vld [vmem:[%s1891_s28] sm:$0xff]  ;;  %v1881_v44 = vsel %vm1823_vm4, %v2076_v39, 0.0  ;;  %v2077_v48 = vld [vmem:[%s1891_s28 + $0x8] sm:$0xff] }
  0x62   :  { %v1876_v47 = vmul.f32 %v1875_v40, %v1875_v40  ;;  %v1898_v50 = vsel %vm1823_vm4, %v1897_v43, 0.0  ;;  %v1882_v53 = vmul.f32 %v1881_v44, %v1881_v44  ;;  %v1906_v54 = vsel %vm1823_vm4, %v2077_v48, 0.0 }
  0x63   :  { %v1855_v46 = vadd.f32 %v1853_v37, %v1838_v41  ;;  %v1854_v55 = vadd.f32 %v1853_v37, %v1837_v51  ;;  %v1899_v58 = vmul.f32 %v1898_v50, %v1898_v50  ;;  %v1907_v61 = vmul.f32 %v1906_v54, %v1906_v54 }
  0x65   :  { %v1861_v52 = vadd.f32 %v1859_v42, %v1855_v46  ;;  %v1860_v59 = vadd.f32 %v1859_v42, %v1854_v55  ;;  %v1901_v0 = vsel %vm1900_vm7, 0.0, %v1899_v58  ;;  %v1910_v3 = vsel %vm1909_vm8, 0.0, %v1907_v61 }
  0x67   :  { %v1878_v57 = vadd.f32 %v1876_v47, %v1861_v52  ;;  %v1877_v62 = vadd.f32 %v1876_v47, %v1860_v59 }
  0x69   :  { %v1884_v60 = vadd.f32 %v1882_v53, %v1878_v57  ;;  %v1883_v1 = vadd.f32 %v1882_v53, %v1877_v62 }
  0x6b   :  { %v1903_v63 = vadd.f32 %v1899_v58, %v1884_v60  ;;  %v1902_v4 = vadd.f32 %v1901_v0, %v1883_v1 }
  0x6d   :  { %v1912_v2 = vadd.f32 %v1907_v61, %v1903_v63  ;;  %v1911_v5 = vadd.f32 %v1910_v3, %v1902_v4 }
  0x6f   :  { %1913 = vadd.xlane.f32.xlu0 %v1912_v2 }
  0x73   :  { %1921 = vadd.xlane.f32.xlu0 %v1911_v5 }
  0xfc   :  { %v1914_v6 = vpop.xlane.xlu0 %1913 }
  0xfd   :  { %v1915_v7 = vrot.slane %v1914_v6, 4 }
  0xff   :  { %v1916_v8 = vadd.f32 %v1915_v7, %v1914_v6 }
 0x100   :  { %v1922_v9 = vpop.xlane.xlu0 %1921 }
 0x101   :  { %v1917_v10 = vrot.slane %v1916_v8, 2  ;;  %v1923_v11 = vrot.slane %v1922_v9, 4 }
 0x103   :  { %v1924_v12 = vadd.f32 %v1923_v11, %v1922_v9  ;;  %v1918_v13 = vadd.f32 %v1917_v10, %v1916_v8 }
 0x105   :  { %v1925_v16 = vrot.slane %v1924_v12, 2  ;;  %v1919_v18 = vrot.slane %v1918_v13, 1 }
 0x107   :  { %v1926_v17 = vadd.f32 %v1925_v16, %v1924_v12  ;;  %v1920_v21 = vadd.f32 %v1919_v18, %v1918_v13 }
 0x109   :  { %v1927_v19 = vrot.slane %v1926_v17, 1 }
 0x10b   :  { %v1928_v20 = vadd.f32 %v1927_v19, %v1926_v17 }
 0x10d   :  { %2199 = vpush %v1928_v20 }
 0x10e   :  { %2201 = vpush %v1920_v21 }
 0x13e   :  { %s2200_s29 = spop %2199 }
 0x13f   :  { %s2202_s30 = spop %2201 }
 0x140   :  { %s1931_s1 = smul.f32 1e-10, %s2202_s30 }
 0x142   :  { %p1932_p8 = scmp.le.f32.partialorder %s2200_s29, %s1931_s1 }
 0x143   :  { %s3113_s10 = smov (!%p1932_p8), 0  }
 0x144   :  { %1935 = sbr.rel (%p1932_p8) target bundleno = 1051 (0x41b), region = 509 }
 0x14b LB: > { %s3118_s11 = smov 0   ;;  %s2952_s10 = sphi %s3113_s10, %s3488_s10  }
 0x14c LB: >> { %s475_s12 = smov [#allocation12]  ;;  %v479_v14 = vmov %v3079_v14  ;;  %v482_v15 = vmov %v3081_v15  ;;  %s501_s13 = smov [#allocation13]  ;;  %vm1008_vm8 = vcmp.eq.s32.totalorder %v3081_v15, 0  ;;  %s2956_s11 = sphi %s3118_s11, %s474_s11  }
 0x14d   : >> { %v505_v14 = vmov %v3079_v14  ;;  %v508_v15 = vmov %v3081_v15  ;;  %v483_v22 = vld [vmem:[%s475_s12] sm:$0xff]  ;;  %vm486_vm9 = vcmp.eq.s32.totalorder %v482_v15, %v479_v14  ;;  %v2078_v23 = vld [vmem:[%s475_s12 + $0x8] sm:$0xff]  ;;  %v491_v24 = vadd.s32 8, %v482_v15  ;;  %s527_s14 = smov [#allocation15]  ;;  %s476_s15 = smov [#allocation16] }
 0x14e   : >> { %vm512_vm10 = vcmp.eq.s32.totalorder %v508_v15, %v505_v14  ;;  %v517_v25 = vadd.s32 8, %v508_v15  ;;  %v487_v26 = vsel %vm486_vm9, %v483_v22, 0.0  ;;  %v509_v27 = vld [vmem:[%s501_s13] sm:$0xff]  ;;  %v2079_v28 = vld [vmem:[%s501_s13 + $0x8] sm:$0xff]  ;;  %v531_v14 = vmov %v3079_v14  ;;  %s502_s16 = smov [#allocation17]  ;;  %s528_s17 = smov [#allocation18] }
 0x14f   : >> { %v534_v15 = vmov %v3081_v15  ;;  %vm492_vm11 = vcmp.eq.s32.totalorder %v491_v24, %v479_v14  ;;  %v513_v29 = vsel %vm512_vm10, %v509_v27, 0.0  ;;  %v535_v30 = vld [vmem:[%s527_s14] sm:$0xff]  ;;  %v2080_v34 = vld [vmem:[%s527_s14 + $0x8] sm:$0xff]  ;;  %s557_s2 = smov [#allocation17]  ;;  %s555_s18 = smov [#allocation16]  ;;  %vm1032_vm9 = vcmp.eq.s32.totalorder %v3081_v15, 7 }
 0x150   : >> { %vm518_vm12 = vcmp.eq.s32.totalorder %v517_v25, %v505_v14  ;;  %vm538_vm13 = vcmp.eq.s32.totalorder %v534_v15, %v531_v14  ;;  %v493_v31 = vsel %vm492_vm11, %v2078_v23, %v487_v26  ;;  %v543_v35 = vadd.s32 8, %v534_v15  ;;  %s559_s19 = smov [#allocation18]  ;;  %s594_s20 = smov [#allocation19] }
 0x151   : >> { %v519_v32 = vsel %vm518_vm12, %v2079_v28, %v513_v29  ;;  %v539_v33 = vsel %vm538_vm13, %v535_v30, 0.0  ;;  %v494_v36 = vrot.slane %v493_v31, 4  ;;  %s596_s21 = smov [#allocation20]  ;;  %s553_s22 = smov [#allocation21]  ;;  %v624_v15 = vmov %v3081_v15 }
 0x152   : >> { %v520_v37 = vrot.slane %v519_v32, 4  ;;  %vm544_vm14 = vcmp.eq.s32.totalorder %v543_v35, %v531_v14  ;;  %s554_s3 = smov [#allocation22]  ;;  %s598_s22 = smov %s553_s22  ;;  %v655_v15 = vmov %v3081_v15  ;;  %v625_v24 = vadd.s32 8, %v624_v15 }
 0x153   : >> { %v495_v38 = vadd.f32 %v494_v36, %v493_v31  ;;  %v545_v40 = vsel %vm544_vm14, %v2080_v34, %v539_v33  ;;  %s600_s3 = smov %s554_s3  ;;  %v606_v14 = vmov %v3079_v14  ;;  %v609_v15 = vmov %v3081_v15  ;;  %s602_s0 = smov [#allocation21] }
 0x154   : >> { %v521_v39 = vadd.f32 %v520_v37, %v519_v32  ;;  %v546_v41 = vrot.slane %v545_v40, 4  ;;  %v621_v14 = vmov %v3079_v14  ;;  %v656_v25 = vadd.s32 8, %v655_v15  ;;  %s617_s23 = smov [#allocation21]  ;;  %s633_s24 = smov [#allocation22] }
 0x155   : >> { %v496_v42 = vrot.slane %v495_v38, 2  ;;  %v637_v14 = vmov %v3079_v14  ;;  %v640_v15 = vmov %v3081_v15  ;;  %vm611_vm3 = vcmp.eq.s32.totalorder %v609_v15, %v606_v14  ;;  %s648_s25 = smov [#allocation22]  ;;  %s615_s26 = smov [#allocation23] }
 0x156   : >> { %v522_v43 = vrot.slane %v521_v39, 2  ;;  %v547_v44 = vadd.f32 %v546_v41, %v545_v40  ;;  %v652_v14 = vmov %v3079_v14  ;;  %vm626_vm5 = vcmp.eq.s32.totalorder %v625_v24, %v621_v14  ;;  %s630_s27 = smov [#allocation23]  ;;  %s664_s28 = smov [#allocation23] }
 0x157   : >> { %v497_v45 = vadd.f32 %v496_v42, %v495_v38  ;;  %vm642_vm6 = vcmp.eq.s32.totalorder %v640_v15, %v637_v14  ;;  %vm657_vm7 = vcmp.eq.s32.totalorder %v656_v25, %v652_v14  ;;  %s646_s29 = smov [#allocation24]  ;;  %s3137_s30 = smov [#allocation12]  ;;  %v811_v15 = vmov %v3081_v15 }
 0x158   : >> { %v523_v46 = vadd.f32 %v522_v43, %v521_v39  ;;  %v548_v47 = vrot.slane %v547_v44, 2  ;;  %s661_s1 = smov [#allocation24]  ;;  %s3139_s12 = smov [#allocation13]  ;;  %v672_v38 = vld [vmem:[%s3137_s30] sm:$0xff]  ;;  %v789_v15 = vmov %v3081_v15  ;;  %v808_v14 = vmov %v3079_v14 }
 0x159   : >> { %v498_v48 = vrot.slane %v497_v45, 1  ;;  %s3141_s13 = smov [#allocation14]  ;;  %s3143_s14 = smov [#allocation15]  ;;  %v673_v39 = vld [vmem:[%s3139_s12] sm:$0xff]  ;;  %v831_v15 = vmov %v3081_v15  ;;  %v786_v14 = vmov %v3079_v14  ;;  %vm815_vm10 = vcmp.eq.s32.totalorder %v811_v15, %v808_v14 }
 0x15a   : >> { %v524_v49 = vrot.slane %v523_v46, 1  ;;  %v549_v50 = vadd.f32 %v548_v47, %v547_v44  ;;  %v674_v40 = vld [vmem:[%s3141_s13] sm:$0xff]  ;;  %v852_v15 = vmov %v3081_v15  ;;  %v828_v14 = vmov %v3079_v14  ;;  %s474_s11 = sadd.s32 1, %s2956_s11  }
 0x15b   : >> { %v499_v51 = vadd.f32 %v498_v48, %v497_v45  ;;  %v675_v41 = vld [vmem:[%s3143_s14] sm:$0xff]  ;;  %v849_v14 = vmov %v3079_v14  ;;  %vm794_vm12 = vcmp.eq.s32.totalorder %v789_v15, %v786_v14  ;;  %vm835_vm14 = vcmp.eq.s32.totalorder %v831_v15, %v828_v14  ;;  %p471_p9 = scmp.ge.s32.totalorder %s474_s11, 31  }
 0x15c   : >> { %v525_v52 = vadd.f32 %v524_v49, %v523_v46  ;;  %v550_v53 = vrot.slane %v549_v50, 1  ;;  %s422_s11 = smov (%p471_p9), [#allocation15] }
 0x15d   : >> { %500 = vst [vmem:[%s476_s15] sm:$0x1] %v499_v51  ;;  %s1088_s15 = smov [#allocation23] }
 0x15e   : >> { %526 = vst [vmem:[%s502_s16] sm:$0x1] %v525_v52  ;;  %v551_v54 = vadd.f32 %v550_v53, %v549_v50  ;;  %s3145_s16 = smov [#allocation8] }
 0x15f   : >> { %v1096_v42 = vld [vmem:[%s3145_s16] sm:$0xff] }
 0x160   : >> { %552 = vst [vmem:[%s528_s17] sm:$0x1] %v551_v54  ;;  %s3147_s17 = smov [#allocation9] }
 0x161   : >> { %v1097_v43 = vld [vmem:[%s3147_s17] sm:$0xff] }
 0x164   : >> { %v556_v57 = vld [vmem:[%s555_s18] sm:$0xff]  ;;  %s3152_s18 = smov [#allocation11] }
 0x165   : >> { %v558_v55 = vld [vmem:[%s557_s2] sm:$0xff]  ;;  %v579_v6 = vand.u32 2147483647, %v556_v57  ;;  %s3150_s2 = smov [#allocation10] }
 0x166   : >> { %v562_v56 = vmul.f32 2.0, %v558_v55  ;;  %v580_v11 = vand.u32 2147483647, %v558_v55  ;;  %v1098_v45 = vld [vmem:[%s3150_s2] sm:$0xff] }
 0x167   : >> { %v560_v58 = vld [vmem:[%s559_s19] sm:$0xff]  ;;  %s666_s19 = smov [#allocation24] }
 0x168   : >> { %2678 = vrcp.f32 %v562_v56  ;;  %v561_v59 = vsub.f32 %v560_v58, %v556_v57  ;;  %v581_v7 = vand.u32 2147483647, %v560_v58  ;;  %v1099_v46 = vld [vmem:[%s3152_s18] sm:$0xff] }
 0x16a   : >> { %v582_v10 = vmin.f32 %v579_v6, %v581_v7 }
 0x16c   : >> { %v583_v12 = vmul.f32 1.1920929e-08, %v582_v10 }
 0x16e   : >> { %vm584_vm2 = vcmp.le.f32.partialorder %v580_v11, %v583_v12 }
 0x172   : >> { %v2679_v60 = vpop.eup %2678 }
 0x173   : >> { %v564_v61 = vmul.f32 %v2679_v60, %v561_v59 }
 0x175   : >> { %v566_v62 = vmul.f32 %v564_v61, %v564_v61  ;;  %vm565_vm1 = vcmp.ge.f32.partialorder %v564_v61, 0.0 }
 0x177   : >> { %v567_v63 = vadd.f32 1.0, %v566_v62 }
 0x179   : >> { %2680 = vrsqrt.f32 %v567_v63  ;;  %vm570_vm15 = vcmp.eq.f32.partialorder %v567_v63, inf  ;;  %v573_v1 = vand.u32 2147483648, %v567_v63  ;;  %vm572_vm0 = vcmp.eq.f32.partialorder %v567_v63, 0.0 }
 0x183   : >> { %v2681_v0 = vpop.eup %2680 }
 0x184   : >> { %v569_v2 = vmul.f32 %v2681_v0, %v567_v63 }
 0x186   : >> { %v571_v3 = vsel %vm570_vm15, %v567_v63, %v569_v2 }
 0x187   : >> { %v574_v4 = vsel %vm572_vm0, %v573_v1, %v571_v3  ;;  %vm857_vm0 = vcmp.eq.s32.totalorder %v852_v15, %v849_v14 }
 0x188   : >> { %v575_v5 = vxor.u32 2147483648, %v574_v4 }
 0x18a   : >> { %v576_v8 = vsel %vm565_vm1, %v574_v4, %v575_v5 }
 0x18b   : >> { %v577_v9 = vadd.f32 %v576_v8, %v564_v61 }
 0x18d   : >> { %2682 = vrcp.f32 %v577_v9 }
 0x197   : >> { %v2683_v13 = vpop.eup %2682 }
 0x198   : >> { %v585_v16 = vsel %vm584_vm2, 0.0, %v2683_v13  ;;  %vm879_vm2 = vcmp.eq.s32.totalorder %v3079_v14, 0 }
 0x199   : >> { %v586_v17 = vmul.f32 %v585_v16, %v585_v16  ;;  %v590_v18 = vmul.f32 %v585_v16, %v558_v55 }
 0x19b   : >> { %v587_v19 = vadd.f32 1.0, %v586_v17  ;;  %v591_v20 = vsub.f32 %v556_v57, %v590_v18  ;;  %v593_v21 = vadd.f32 %v590_v18, %v560_v58 }
 0x19d   : >> { %2684 = vrsqrt.f32 %v587_v19  ;;  %595 = vst [vmem:[%s594_s20] sm:$0xff] %v591_v20  ;;  %597 = vst [vmem:[%s596_s21] sm:$0xff] %v593_v21  ;;  %s1090_s20 = smov [#allocation24]  ;;  %s692_s21 = smov [#allocation23] }
 0x1a7   : >> { %v2685_v22 = vpop.eup %2684 }
 0x1a8   : >> { %599 = vst [vmem:[%s598_s22] sm:$0xff] %v2685_v22  ;;  %v589_v23 = vmul.f32 %v2685_v22, %v585_v16  ;;  %s1116_s22 = smov [#allocation23] }
 0x1aa   : >> { %601 = vst [vmem:[%s600_s3] sm:$0xff] %v589_v23  ;;  %s695_s3 = smov [#allocation24] }
 0x1af   : >> { %v603_v26 = vld [vmem:[%s602_s0] ss:$0 sm:$0xff]  ;;  %s3169_s0 = smov [#allocation12] }
 0x1b0   : >> { %v618_v27 = vld [vmem:[%s617_s23] ss:$0 sm:$0xff]  ;;  %v612_v28 = vsel %vm611_vm3, %v603_v26, 0.0  ;;  %s3171_s23 = smov [#allocation14]  ;;  %vm883_vm3 = vcmp.eq.s32.totalorder %v3079_v14, 1 }
 0x1b1   : >> { %v627_v29 = vsel %vm626_vm5, %v618_v27, 0.0  ;;  %613 = vadd.xlane.f32.xlu0 %v612_v28  ;;  %v634_v30 = vld [vmem:[%s633_s24] ss:$0 sm:$0xff]  ;;  %s1119_s24 = smov [#allocation24]  ;;  %vm896_vm5 = vcmp.eq.s32.totalorder %v3079_v14, 15 }
 0x1b2   : >> { %628 = vadd.xlane.f32.xlu1 %v627_v29  ;;  %v649_v31 = vld [vmem:[%s648_s25] ss:$0 sm:$0xff]  ;;  %v643_v32 = vsel %vm642_vm6, %v634_v30, 0.0  ;;  %s3173_s25 = smov [#allocation15] }
 0x1b3   : >> { %v658_v33 = vsel %vm657_vm7, %v649_v31, 0.0 }
 0x1b5   : >> { %644 = vadd.xlane.f32.xlu0 %v643_v32 }
 0x1b6   : >> { %659 = vadd.xlane.f32.xlu1 %v658_v33 }
 0x23e   : >> { %v614_v34 = vpop.xlane.xlu0 %613 }
 0x23f   : >> { %v629_v35 = vpop.xlane.xlu1 %628  ;;  %616 = vst [vmem:[%s615_s26] sm:$0xff] %v614_v34  ;;  %s3175_s26 = smov [#allocation8] }
 0x240   : >> { %2081 = vst [vmem:[%s630_s27 + $0x8] sm:$0xff] %v629_v35  ;;  %s3177_s27 = smov [#allocation9] }
 0x242   : >> { %v645_v36 = vpop.xlane.xlu0 %644 }
 0x243   : >> { %v660_v37 = vpop.xlane.xlu1 %659  ;;  %647 = vst [vmem:[%s646_s29] sm:$0xff] %v645_v36  ;;  %s3181_s29 = smov [#allocation11] }
 0x244   : >> { %2082 = vst [vmem:[%s661_s1 + $0x8] sm:$0xff] %v660_v37  ;;  %s3197_s1 = smov [#allocation8] }
 0x247   : >> { %v665_v44 = vld [vmem:[%s664_s28] sm:$0xff]  ;;  %v2083_v10 = vld [vmem:[%s692_s21 + $0x8] sm:$0xff]  ;;  %s3179_s28 = smov [#allocation10]  ;;  %s756_s21 = smov [#allocation13] }
 0x248   : >> { %v1089_v47 = vld [vmem:[%s1088_s15] sm:$0xff]  ;;  %v676_v48 = vmul.f32 %v672_v38, %v665_v44  ;;  %v679_v49 = vmul.f32 %v673_v39, %v665_v44  ;;  %v683_v50 = vmul.f32 %v674_v40, %v665_v44  ;;  %v686_v51 = vmul.f32 %v675_v41, %v665_v44  ;;  %v2141_v11 = vld [vmem:[%s1116_s22 + $0x8] sm:$0xff]  ;;  %s728_s15 = smov [#allocation22]  ;;  %s758_s22 = smov [#allocation14] }
 0x249   : >> { %v1100_v52 = vmul.f32 %v1096_v42, %v1089_v47  ;;  %v1103_v53 = vmul.f32 %v1097_v43, %v1089_v47  ;;  %v1107_v54 = vmul.f32 %v1098_v45, %v1089_v47  ;;  %v1110_v55 = vmul.f32 %v1099_v46, %v1089_v47 }
 0x24b   : >> { %v667_v56 = vld [vmem:[%s666_s19] sm:$0xff]  ;;  %v2084_v12 = vld [vmem:[%s695_s3 + $0x8] sm:$0xff]  ;;  %s3217_s19 = smov [#allocation15]  ;;  %s760_s3 = smov [#allocation15] }
 0x24c   : >> { %v1091_v57 = vld [vmem:[%s1090_s20] sm:$0xff]  ;;  %v677_v58 = vmul.f32 %v674_v40, %v667_v56  ;;  %v680_v59 = vmul.f32 %v675_v41, %v667_v56  ;;  %v682_v60 = vmul.f32 %v672_v38, %v667_v56  ;;  %v685_v61 = vmul.f32 %v673_v39, %v667_v56  ;;  %v2142_v13 = vld [vmem:[%s1119_s24 + $0x8] sm:$0xff]  ;;  %s754_s20 = smov [#allocation12]  ;;  %s805_s24 = smov [#allocation13] }
 0x24d   : >> { %v1101_v62 = vmul.f32 %v1098_v45, %v1091_v57  ;;  %v1104_v63 = vmul.f32 %v1099_v46, %v1091_v57  ;;  %v1106_v0 = vmul.f32 %v1096_v42, %v1091_v57  ;;  %v1109_v1 = vmul.f32 %v1097_v43, %v1091_v57 }
 0x24e   : >> { %v678_v2 = vsub.f32 %v676_v48, %v677_v58  ;;  %v681_v3 = vsub.f32 %v679_v49, %v680_v59  ;;  %v684_v4 = vadd.f32 %v683_v50, %v682_v60  ;;  %v687_v5 = vadd.f32 %v686_v51, %v685_v61 }
 0x24f   : >> { %v1102_v6 = vsub.f32 %v1100_v52, %v1101_v62  ;;  %v1105_v7 = vsub.f32 %v1103_v53, %v1104_v63  ;;  %v1108_v8 = vadd.f32 %v1107_v54, %v1106_v0  ;;  %v1111_v9 = vadd.f32 %v1110_v55, %v1109_v1  ;;  %v3224_v52 = vld [vmem:[%s728_s15] ss:$0 sm:$0xff]  ;;  %s3325_s15 = smov [#allocation13] }
 0x250   : >> { %688 = vst [vmem:[%s3137_s30] sm:$0xff] %v678_v2  ;;  %690 = vst [vmem:[%s3141_s13] sm:$0xff] %v684_v4  ;;  %s3183_s30 = smov [#allocation13]  ;;  %s3202_s13 = smov [#allocation9] }
 0x251   : >> { %691 = vst [vmem:[%s3143_s14] sm:$0xff] %v687_v5  ;;  %689 = vst [vmem:[%s3139_s12] sm:$0xff] %v681_v3  ;;  %s3199_s12 = smov [#allocation10]  ;;  %s726_s14 = smov [#allocation21] }
 0x252   : >> { %1112 = vst [vmem:[%s3145_s16] sm:$0xff] %v1102_v6  ;;  %1113 = vst [vmem:[%s3147_s17] sm:$0xff] %v1105_v7  ;;  %s3207_s16 = smov [#allocation12]  ;;  %s3210_s17 = smov [#allocation11]  ;;  %v3222_v51 = vld [vmem:[%s726_s14] ss:$0 sm:$0xff] }
 0x253   : >> { %1114 = vst [vmem:[%s3150_s2] sm:$0xff] %v1108_v8  ;;  %1115 = vst [vmem:[%s3152_s18] sm:$0xff] %v1111_v9  ;;  %s3212_s2 = smov [#allocation13]  ;;  %s3215_s18 = smov [#allocation14] }
 0x254   : >> { %s3321_s14 = smov [#allocation15] }
 0x257   : >> { %v2085_v16 = vld [vmem:[%s3169_s0 + $0x8] sm:$0xff] }
 0x258   : >> { %v2087_v17 = vld [vmem:[%s3171_s23 + $0x8] sm:$0xff]  ;;  %v710_v19 = vmul.f32 %v2085_v16, %v2083_v10  ;;  %v716_v22 = vmul.f32 %v2085_v16, %v2084_v12 }
 0x259   : >> { %v2088_v18 = vld [vmem:[%s3173_s25 + $0x8] sm:$0xff]  ;;  %v711_v20 = vmul.f32 %v2087_v17, %v2084_v12  ;;  %v717_v26 = vmul.f32 %v2087_v17, %v2083_v10 }
 0x25a   : >> { %v714_v21 = vmul.f32 %v2088_v18, %v2084_v12  ;;  %v2143_v23 = vld [vmem:[%s3175_s26 + $0x8] sm:$0xff]  ;;  %v720_v27 = vmul.f32 %v2088_v18, %v2083_v10 }
 0x25b   : >> { %v2144_v24 = vld [vmem:[%s3177_s27 + $0x8] sm:$0xff]  ;;  %v1134_v29 = vmul.f32 %v2143_v23, %v2141_v11  ;;  %v712_v32 = vsub.f32 %v710_v19, %v711_v20  ;;  %v1140_v35 = vmul.f32 %v2143_v23, %v2142_v13  ;;  %v718_v36 = vadd.f32 %v717_v26, %v716_v22 }
 0x25c   : >> { %v2145_v25 = vld [vmem:[%s3179_s28 + $0x8] sm:$0xff]  ;;  %v1137_v33 = vmul.f32 %v2144_v24, %v2141_v11  ;;  %v1143_v39 = vmul.f32 %v2144_v24, %v2142_v13 }
 0x25d   : >> { %v2146_v28 = vld [vmem:[%s3181_s29 + $0x8] sm:$0xff]  ;;  %v1135_v30 = vmul.f32 %v2145_v25, %v2142_v13  ;;  %v1141_v38 = vmul.f32 %v2145_v25, %v2141_v11  ;;  %2089 = vst [vmem:[%s3169_s0 + $0x8] sm:$0xff] %v712_v32  ;;  %2091 = vst [vmem:[%s3171_s23 + $0x8] sm:$0xff] %v718_v36  ;;  %s783_s0 = smov [#allocation19]  ;;  %s846_s23 = smov [#allocation20] }
 0x25e   : >> { %v2086_v31 = vld [vmem:[%s3183_s30 + $0x8] sm:$0xff]  ;;  %v1138_v34 = vmul.f32 %v2146_v28, %v2142_v13  ;;  %v1144_v41 = vmul.f32 %v2146_v28, %v2141_v11 }
 0x25f   : >> { %v1136_v37 = vsub.f32 %v1134_v29, %v1135_v30  ;;  %v713_v42 = vmul.f32 %v2086_v31, %v2083_v10  ;;  %v719_v43 = vmul.f32 %v2086_v31, %v2084_v12  ;;  %v1142_v44 = vadd.f32 %v1141_v38, %v1140_v35 }
 0x260   : >> { %v1139_v40 = vsub.f32 %v1137_v33, %v1138_v34  ;;  %v1145_v45 = vadd.f32 %v1144_v41, %v1143_v39 }
 0x261   : >> { %2147 = vst [vmem:[%s3175_s26 + $0x8] sm:$0xff] %v1136_v37  ;;  %v715_v46 = vsub.f32 %v713_v42, %v714_v21  ;;  %v721_v47 = vadd.f32 %v720_v27, %v719_v43  ;;  %2149 = vst [vmem:[%s3179_s28 + $0x8] sm:$0xff] %v1142_v44  ;;  %s825_s26 = smov [#allocation14]  ;;  %s3310_s28 = smov [#allocation13] }
 0x262   : >> { %2148 = vst [vmem:[%s3177_s27 + $0x8] sm:$0xff] %v1139_v40  ;;  %2150 = vst [vmem:[%s3181_s29 + $0x8] sm:$0xff] %v1145_v45  ;;  %s845_s27 = smov [#allocation15]  ;;  %s3312_s29 = smov [#allocation12] }
 0x263   : >> { %2090 = vst [vmem:[%s3183_s30 + $0x8] sm:$0xff] %v715_v46  ;;  %2092 = vst [vmem:[%s3173_s25 + $0x8] sm:$0xff] %v721_v47  ;;  %v821_v46 = vadd.s32 8, %v811_v15  ;;  %v801_v47 = vadd.s32 8, %v789_v15  ;;  %s3298_s25 = smov [#allocation12]  ;;  %s2991_s30 = smov 1  }
 0x264   : >> { %v734_v53 = vld [vmem:[%s3207_s16] sm:$0xff] }
 0x265   : >> { %v738_v11 = vmul.f32 %v734_v53, %v3222_v51  ;;  %v741_v12 = vmul.f32 %v734_v53, %v3224_v52  ;;  %v736_v18 = vld [vmem:[%s3215_s18] sm:$0xff]  ;;  %vm822_vm11 = vcmp.eq.s32.totalorder %v821_v46, %v808_v14  ;;  %vm802_vm13 = vcmp.eq.s32.totalorder %v801_v47, %v786_v14 }
 0x266   : >> { %v744_v22 = vmul.f32 %v736_v18, %v3222_v51  ;;  %v747_v24 = vmul.f32 %v736_v18, %v3224_v52 }
 0x268   : >> { %v1152_v48 = vld [vmem:[%s3197_s1] ss:$0 sm:$0xff]  ;;  %v2152_v50 = vld [vmem:[%s3197_s1 + $0x7] ss:$0 sm:$0xff]  ;;  %v2153_v55 = vld [vmem:[%s3197_s1 + $0x7] sm:$0xfe] }
 0x269   : >> { %v2151_v49 = vld [vmem:[%s3197_s1 - $0x1] sm:$0xfe]  ;;  %v2154_v56 = vld [vmem:[%s3197_s1 + $0xf] ss:$0 sm:$0xff]  ;;  %v1170_v58 = vsel %vm1008_vm8, %v2152_v50, %v2153_v55  ;;  %v2158_v61 = vld [vmem:[%s3199_s12 + $0x8] ss:$0 sm:$0xff] }
 0x26a   : >> { %v1159_v54 = vsel %vm1008_vm8, %v1152_v48, %v2151_v49  ;;  %v1196_v57 = vld [vmem:[%s3202_s13] ss:$0 sm:$0xff]  ;;  %v2157_v60 = vld [vmem:[%s3199_s12 + $0x9] sm:$0x7f]  ;;  %2155 = vst [vmem:[%s3197_s1 + $0x8] sm:$0xff] %v1170_v58  ;;  %v841_v48 = vadd.s32 8, %v831_v15 }
 0x26b   : >> { %1162 = vst [vmem:[%s3197_s1] sm:$0xff] %v1159_v54  ;;  %v1174_v59 = vld [vmem:[%s3199_s12] ss:$0 sm:$0xff]  ;;  %v1183_v62 = vsel %vm1032_vm9, %v2154_v56, %v2157_v60  ;;  %v2160_v63 = vld [vmem:[%s3199_s12 + $0x1] sm:$0x7f]  ;;  %v2163_v4 = vld [vmem:[%s3202_s13 + $0x7] sm:$0xfe] }
 0x26c   : >> { %2156 = vst [vmem:[%s3197_s1 + $0x1] sm:$0x1] %v1174_v59  ;;  %v2161_v0 = vld [vmem:[%s3202_s13 - $0x1] sm:$0xfe]  ;;  %v2162_v1 = vld [vmem:[%s3202_s13 + $0x7] ss:$0 sm:$0xff]  ;;  %v1191_v2 = vsel %vm1032_vm9, %v2158_v61, %v2160_v63  ;;  %vm842_vm15 = vcmp.eq.s32.totalorder %v841_v48, %v828_v14 }
 0x26d   : >> { %2159 = vst [vmem:[%s3199_s12 + $0x8] sm:$0xff] %v1183_v62  ;;  %v1203_v3 = vsel %vm1008_vm8, %v1196_v57, %v2161_v0  ;;  %v2164_v5 = vld [vmem:[%s3202_s13 + $0xf] ss:$0 sm:$0xff]  ;;  %v1218_v6 = vld [vmem:[%s3210_s17] ss:$0 sm:$0xff]  ;;  %1193 = vst [vmem:[%s3199_s12] sm:$0xff] %v1191_v2  ;;  %v1214_v7 = vsel %vm1008_vm8, %v2162_v1, %v2163_v4  ;;  %v864_v49 = vadd.s32 8, %v852_v15  ;;  %v346_v15 = vmov (%p471_p9), %v3081_v15 }
 0x26e   : >> { %1206 = vst [vmem:[%s3202_s13] sm:$0xff] %v1203_v3  ;;  %v2167_v8 = vld [vmem:[%s3210_s17 + $0x9] sm:$0x7f]  ;;  %v2168_v9 = vld [vmem:[%s3210_s17 + $0x8] ss:$0 sm:$0xff]  ;;  %v2170_v10 = vld [vmem:[%s3210_s17 + $0x1] sm:$0x7f] }
 0x26f   : >> { %2165 = vst [vmem:[%s3202_s13 + $0x8] sm:$0xff] %v1214_v7  ;;  %2166 = vst [vmem:[%s3202_s13 + $0x1] sm:$0x1] %v1218_v6  ;;  %v1227_v13 = vsel %vm1032_vm9, %v2164_v5, %v2167_v8  ;;  %v1235_v16 = vsel %vm1032_vm9, %v2168_v9, %v2170_v10  ;;  %v735_v17 = vld [vmem:[%s3212_s2] sm:$0xff]  ;;  %vm865_vm1 = vcmp.eq.s32.totalorder %v864_v49, %v849_v14  ;;  %s3316_s1 = smov [#allocation12]  ;;  %s3319_s12 = smov [#allocation14]  ;;  %v343_v14 = vmov (%p471_p9), %v3079_v14 }
 0x270   : >> { %v737_v19 = vld [vmem:[%s3217_s19] sm:$0xff]  ;;  %2169 = vst [vmem:[%s3210_s17 + $0x8] sm:$0xff] %v1227_v13  ;;  %1237 = vst [vmem:[%s3210_s17] sm:$0xff] %v1235_v16  ;;  %v739_v20 = vmul.f32 %v735_v17, %v3224_v52  ;;  %v742_v21 = vmul.f32 %v735_v17, %v3222_v51  ;;  %s2992_s13 = smov 127   ;;  %s3330_s17 = smov [#allocation15]  ;;  %vm358_vm6 = vcmp.eq.s32.totalorder (%p471_p9), %v346_v15, %v343_v14  ;;  %v372_v14 = vmov (%p471_p9), %v3079_v14 }
 0x271   : >> { %v745_v23 = vmul.f32 %v737_v19, %v3224_v52  ;;  %v748_v25 = vmul.f32 %v737_v19, %v3222_v51  ;;  %v790_v50 = vld [vmem:[%s783_s0] ss:$0 sm:$0xff]  ;;  %s399_s0 = smov (%p471_p9), [#allocation14] }
 0x272   : >> { %v740_v26 = vsub.f32 %v738_v11, %v739_v20  ;;  %v743_v27 = vadd.f32 %v742_v21, %v741_v12 }
 0x273   : >> { %v746_v28 = vsub.f32 %v744_v22, %v745_v23  ;;  %v749_v29 = vadd.f32 %v748_v25, %v747_v24 }
 0x274   : >> { %750 = vst [vmem:[%s3207_s16] sm:$0xff] %v740_v26  ;;  %751 = vst [vmem:[%s3212_s2] sm:$0xff] %v743_v27  ;;  %s3328_s16 = smov [#allocation14]  ;;  %s3368_s2 = smov [#allocation12] }
 0x275   : >> { %752 = vst [vmem:[%s3215_s18] sm:$0xff] %v746_v28  ;;  %753 = vst [vmem:[%s3217_s19] sm:$0xff] %v749_v29  ;;  %s3372_s18 = smov [#allocation13]  ;;  %s3377_s19 = smov [#allocation14] }
 0x27b   : >> { %v2093_v30 = vld [vmem:[%s754_s20 + $0x8] sm:$0xff] }
 0x27c   : >> { %v2094_v31 = vld [vmem:[%s756_s21 + $0x8] sm:$0xff]  ;;  %v769_v34 = vmul.f32 %v2093_v30, %v3224_v52  ;;  %v766_v36 = vmul.f32 %v2093_v30, %v3222_v51 }
 0x27d   : >> { %v2095_v32 = vld [vmem:[%s758_s22 + $0x8] sm:$0xff]  ;;  %v767_v33 = vmul.f32 %v2094_v31, %v3224_v52  ;;  %v770_v35 = vmul.f32 %v2094_v31, %v3222_v51 }
 0x27e   : >> { %v2096_v37 = vld [vmem:[%s760_s3 + $0x8] sm:$0xff]  ;;  %v772_v38 = vmul.f32 %v2095_v32, %v3222_v51  ;;  %v775_v40 = vmul.f32 %v2095_v32, %v3224_v52 }
 0x27f   : >> { %v773_v39 = vmul.f32 %v2096_v37, %v3224_v52  ;;  %v776_v41 = vmul.f32 %v2096_v37, %v3222_v51  ;;  %v771_v42 = vadd.f32 %v770_v35, %v769_v34  ;;  %v768_v43 = vsub.f32 %v766_v36, %v767_v33  ;;  %v853_v51 = vld [vmem:[%s846_s23] ss:$0 sm:$0xff] }
 0x281   : >> { %v774_v44 = vsub.f32 %v772_v38, %v773_v39  ;;  %v777_v45 = vadd.f32 %v776_v41, %v775_v40  ;;  %2098 = vst [vmem:[%s756_s21 + $0x8] sm:$0xff] %v771_v42  ;;  %2097 = vst [vmem:[%s754_s20 + $0x8] sm:$0xff] %v768_v43  ;;  %s1045_s20 = smov [#allocation15]  ;;  %s1238_s21 = sadd.s32 (%p471_p9), 1, %s2952_s10  }
 0x282   : > { %p467_p10 = scmp.ge.s32.totalorder (%p471_p9), %s1238_s21, 15  ;;  %s3488_s10 = smov (%p471_p9), %s1238_s21 }
 0x283   : >> { %2099 = vst [vmem:[%s758_s22 + $0x8] sm:$0xff] %v774_v44  ;;  %2100 = vst [vmem:[%s760_s3 + $0x8] sm:$0xff] %v777_v45  ;;  %s347_s22 = smov (%p471_p9), [#allocation12]  ;;  %s376_s3 = smov (%p471_p9), [#allocation13] }
 0x288   : >> { %v812_v52 = vld [vmem:[%s805_s24] sm:$0xff]  ;;  %v2103_v53 = vld [vmem:[%s805_s24 + $0x8] sm:$0xff] }
 0x289   : >> { %v791_v54 = vld [vmem:[%s3298_s25] sm:$0xff]  ;;  %v816_v55 = vsel %vm815_vm10, 0.0, %v812_v52  ;;  %v823_v56 = vsel %vm822_vm11, 0.0, %v2103_v53  ;;  %v2101_v58 = vld [vmem:[%s3298_s25 + $0x8] sm:$0xff] }
 0x28a   : >> { %v795_v57 = vsel %vm794_vm12, %v790_v50, %v791_v54  ;;  %v832_v59 = vld [vmem:[%s825_s26] sm:$0xff]  ;;  %v2105_v60 = vld [vmem:[%s825_s26 + $0x8] sm:$0xff]  ;;  %817 = vst [vmem:[%s805_s24] sm:$0xff] %v816_v55  ;;  %2104 = vst [vmem:[%s805_s24 + $0x8] sm:$0xff] %v823_v56  ;;  %v803_v61 = vsel %vm802_vm13, %v790_v50, %v2101_v58 }
 0x28b   : >> { %796 = vst [vmem:[%s3298_s25] sm:$0xff] %v795_v57  ;;  %v836_v62 = vsel %vm835_vm14, 0.0, %v832_v59  ;;  %v843_v63 = vsel %vm842_vm15, 0.0, %v2105_v60  ;;  %v854_v0 = vld [vmem:[%s845_s27] sm:$0xff]  ;;  %v2107_v1 = vld [vmem:[%s845_s27 + $0x8] sm:$0xff]  ;;  %2102 = vst [vmem:[%s3298_s25 + $0x8] sm:$0xff] %v803_v61 }
 0x28c   : >> { %837 = vst [vmem:[%s825_s26] sm:$0xff] %v836_v62  ;;  %2106 = vst [vmem:[%s825_s26 + $0x8] sm:$0xff] %v843_v63  ;;  %v858_v2 = vsel %vm857_vm0, %v853_v51, %v854_v0  ;;  %v866_v3 = vsel %vm865_vm1, %v853_v51, %v2107_v1 }
 0x28d   : >> { %859 = vst [vmem:[%s845_s27] sm:$0xff] %v858_v2  ;;  %2108 = vst [vmem:[%s845_s27 + $0x8] sm:$0xff] %v866_v3 }
 0x291   : >> { %v870_v4 = vld [vmem:[%s3310_s28] sm:$0xff]  ;;  %v2109_v9 = vld [vmem:[%s3325_s15 + $0x8] sm:$0xff] }
 0x292   : >> { %871 = vrot.lane.b32.xlu1 %v870_v4, %s2991_s30  ;;  %v874_v5 = vld [vmem:[%s3312_s29] sm:$0xff]  ;;  %v2111_v6 = vld [vmem:[%s3316_s1 + $0x8] sm:$0xff] }
 0x293   : >> { %875 = vrot.lane.b32.xlu0 %v874_v5, %s2991_s30  ;;  %v940_v7 = vld [vmem:[%s3319_s12] sm:$0xff]  ;;  %v2117_v10 = vld [vmem:[%s3328_s16 + $0x8] sm:$0xff] }
 0x294   : >> { %v936_v8 = vld [vmem:[%s3321_s14] sm:$0xff]  ;;  %v2115_v11 = vld [vmem:[%s3330_s17 + $0x8] sm:$0xff] }
 0x296   : >> { %907 = vrot.lane.b32.xlu1 %v2111_v6, %s2991_s30 }
 0x297   : >> { %892 = vrot.lane.b32.xlu0 %v870_v4, %s2992_s13 }
 0x29a   : >> { %941 = vrot.lane.b32.xlu1 %v940_v7, %s2991_s30 }
 0x29b   : >> { %937 = vrot.lane.b32.xlu0 %v936_v8, %s2991_s30 }
 0x29e   : >> { %903 = vrot.lane.b32.xlu1 %v2109_v9, %s2991_s30 }
 0x29f   : >> { %924 = vrot.lane.b32.xlu0 %v2109_v9, %s2992_s13 }
 0x2a2   : >> { %973 = vrot.lane.b32.xlu1 %v2117_v10, %s2991_s30 }
 0x2a3   : >> { %969 = vrot.lane.b32.xlu0 %v2115_v11, %s2991_s30 }
 0x2a6   : >> { %958 = vrot.lane.b32.xlu1 %v936_v8, %s2992_s13 }
 0x2aa   : >> { %990 = vrot.lane.b32.xlu1 %v2115_v11, %s2992_s13 }
 0x304   : >> { %v872_v12 = vpop.permute.xlu1 %871 }
 0x305   : >> { %v876_v13 = vpop.permute.xlu0 %875 }
 0x306   : >> { %v880_v16 = vsel %vm879_vm2, %v874_v5, %v876_v13 }
 0x307   : >> { %v884_v17 = vsel %vm883_vm3, %v872_v12, %v880_v16 }
 0x308   : >> { %v890_v18 = vsel %vm1823_vm4, %v884_v17, 0.0  ;;  %v908_v19 = vpop.permute.xlu1 %907 }
 0x309   : >> { %v893_v20 = vpop.permute.xlu0 %892  ;;  %930 = vst [vmem:[%s3312_s29] sm:$0xff] %v890_v18  ;;  %v912_v27 = vsel %vm879_vm2, %v2111_v6, %v908_v19 }
 0x30a   : >> { %v897_v21 = vsel %vm896_vm5, %v874_v5, %v893_v20 }
 0x30b   : >> { %931 = vst [vmem:[%s3310_s28] sm:$0xff] %v897_v21 }
 0x30c   : >> { %v942_v22 = vpop.permute.xlu1 %941 }
 0x30d   : >> { %v946_v23 = vsel %vm879_vm2, %v940_v7, %v942_v22  ;;  %v938_v24 = vpop.permute.xlu0 %937 }
 0x30e   : >> { %v950_v25 = vsel %vm883_vm3, %v938_v24, %v946_v23 }
 0x30f   : >> { %v956_v26 = vsel %vm1823_vm4, %v950_v25, 0.0 }
 0x310   : >> { %v904_v28 = vpop.permute.xlu1 %903  ;;  %996 = vst [vmem:[%s3319_s12] sm:$0xff] %v956_v26 }
 0x311   : >> { %v916_v29 = vsel %vm883_vm3, %v904_v28, %v912_v27  ;;  %v925_v30 = vpop.permute.xlu0 %924 }
 0x312   : >> { %v922_v31 = vsel %vm1823_vm4, %v916_v29, 0.0  ;;  %v929_v32 = vsel %vm896_vm5, %v2111_v6, %v925_v30 }
 0x313   : >> { %2113 = vst [vmem:[%s3316_s1 + $0x8] sm:$0xff] %v922_v31  ;;  %2114 = vst [vmem:[%s3325_s15 + $0x8] sm:$0xff] %v929_v32 }
 0x314   : >> { %v974_v33 = vpop.permute.xlu1 %973 }
 0x315   : >> { %v978_v34 = vsel %vm879_vm2, %v2117_v10, %v974_v33  ;;  %v970_v35 = vpop.permute.xlu0 %969 }
 0x316   : >> { %v982_v36 = vsel %vm883_vm3, %v970_v35, %v978_v34 }
 0x317   : >> { %v988_v37 = vsel %vm1823_vm4, %v982_v36, 0.0 }
 0x318   : >> { %v959_v38 = vpop.permute.xlu1 %958  ;;  %2119 = vst [vmem:[%s3328_s16 + $0x8] sm:$0xff] %v988_v37 }
 0x319   : >> { %v963_v39 = vsel %vm896_vm5, %v940_v7, %v959_v38  ;;  %v365_v7 = vadd.s32 (%p471_p9), 8, %v346_v15  ;;  %v375_v15 = vmov (%p471_p9), %v3081_v15 }
 0x31a   : >> { %v1002_v40 = vld [vmem:[%s3368_s2] ss:$0 sm:$0xff]  ;;  %v2122_v42 = vld [vmem:[%s3368_s2 + $0x7] ss:$0 sm:$0xff]  ;;  %997 = vst [vmem:[%s3321_s14] sm:$0xff] %v963_v39  ;;  %v2123_v44 = vld [vmem:[%s3368_s2 + $0x7] sm:$0xfe]  ;;  %v421_v15 = vmov (%p471_p9), %v3081_v15 }
 0x31b   : >> { %v2121_v41 = vld [vmem:[%s3368_s2 - $0x1] sm:$0xfe]  ;;  %v1020_v47 = vsel %vm1008_vm8, %v2122_v42, %v2123_v44  ;;  %v2132_v49 = vld [vmem:[%s3372_s18 + $0x7] ss:$0 sm:$0xff]  ;;  %v2133_v50 = vld [vmem:[%s3372_s18 + $0x7] sm:$0xfe]  ;;  %vm366_vm7 = vcmp.eq.s32.totalorder (%p471_p9), %v365_v7, %v343_v14  ;;  %v395_v14 = vmov (%p471_p9), %v3079_v14  ;;  %v398_v15 = vmov (%p471_p9), %v3081_v15 }
 0x31c   : >> { %v1009_v43 = vsel %vm1008_vm8, %v1002_v40, %v2121_v41  ;;  %v1046_v45 = vld [vmem:[%s3372_s18] ss:$0 sm:$0xff]  ;;  %v2134_v51 = vld [vmem:[%s3372_s18 + $0xf] ss:$0 sm:$0xff]  ;;  %v991_v52 = vpop.permute.xlu1 %990  ;;  %v1064_v53 = vsel %vm1008_vm8, %v2132_v49, %v2133_v50  ;;  %v418_v14 = vmov (%p471_p9), %v3079_v14  ;;  %v442_v36 = vadd.s32 (%p471_p9), 8, %v421_v15 }
 0x31d   : >> { %v2131_v46 = vld [vmem:[%s3372_s18 - $0x1] sm:$0xfe]  ;;  %1012 = vst [vmem:[%s3368_s2] sm:$0xff] %v1009_v43  ;;  %v995_v54 = vsel %vm896_vm5, %v2117_v10, %v991_v52  ;;  %v2124_v55 = vld [vmem:[%s3368_s2 + $0xf] ss:$0 sm:$0xff]  ;;  %2135 = vst [vmem:[%s3372_s18 + $0x8] sm:$0xff] %v1064_v53 }
 0x31e   : >> { %v1053_v48 = vsel %vm1008_vm8, %v1046_v45, %v2131_v46  ;;  %2120 = vst [vmem:[%s3330_s17 + $0x8] sm:$0xff] %v995_v54  ;;  %2125 = vst [vmem:[%s3368_s2 + $0x8] sm:$0xff] %v1020_v47  ;;  %vm433_vm8 = vcmp.eq.s32.totalorder (%p471_p9), %v421_v15, %v418_v14 }
 0x31f   : >> { %1056 = vst [vmem:[%s3372_s18] sm:$0xff] %v1053_v48  ;;  %v1024_v56 = vld [vmem:[%s3377_s19] ss:$0 sm:$0xff]  ;;  %v2127_v57 = vld [vmem:[%s3377_s19 + $0x9] sm:$0x7f]  ;;  %v2128_v58 = vld [vmem:[%s3377_s19 + $0x8] ss:$0 sm:$0xff] }
 0x320   : >> { %2126 = vst [vmem:[%s3368_s2 + $0x1] sm:$0x1] %v1024_v56  ;;  %v1033_v59 = vsel %vm1032_vm9, %v2124_v55, %v2127_v57  ;;  %v2130_v60 = vld [vmem:[%s3377_s19 + $0x1] sm:$0x7f] }
 0x321   : >> { %2129 = vst [vmem:[%s3377_s19 + $0x8] sm:$0xff] %v1033_v59  ;;  %v1041_v61 = vsel %vm1032_vm9, %v2128_v58, %v2130_v60 }
 0x322   : >> { %1043 = vst [vmem:[%s3377_s19] sm:$0xff] %v1041_v61 }
 0x324   : > { %473 = sbr.rel (!%p471_p9) target bundleno = 332 (0x14c), region = 504 }
 0x325   : >> { %v1068_v62 = vld [vmem:[%s1045_s20] ss:$0 sm:$0xff]  ;;  %v2137_v63 = vld [vmem:[%s1045_s20 + $0x9] sm:$0x7f]  ;;  %v2138_v0 = vld [vmem:[%s1045_s20 + $0x8] ss:$0 sm:$0xff] }
 0x326   : >> { %2136 = vst [vmem:[%s3372_s18 + $0x1] sm:$0x1] %v1068_v62  ;;  %v1077_v1 = vsel %vm1032_vm9, %v2134_v51, %v2137_v63  ;;  %v2140_v2 = vld [vmem:[%s1045_s20 + $0x1] sm:$0x7f] }
 0x327   : >> { %2139 = vst [vmem:[%s1045_s20 + $0x8] sm:$0xff] %v1077_v1  ;;  %v1085_v3 = vsel %vm1032_vm9, %v2138_v0, %v2140_v2  ;;  %v353_v4 = vld [vmem:[%s347_s22] sm:$0xff] (%p471_p9)  ;;  %v2171_v5 = vld [vmem:[%s347_s22 + $0x8] sm:$0xff] (%p471_p9)  ;;  %vm443_vm9 = vcmp.eq.s32.totalorder (%p471_p9), %v442_v36, %v418_v14 }
 0x328   : >> { %1087 = vst [vmem:[%s1045_s20] sm:$0xff] %v1085_v3  ;;  %v354_v8 = vsel (%p471_p9), %vm1823_vm4, %v353_v4, 0.0  ;;  %v362_v9 = vsel (%p471_p9), %vm1823_vm4, %v2171_v5, 0.0 }
 0x329   : > { %v405_v12 = vld [vmem:[%s399_s0] sm:$0xff] (%p471_p9)  ;;  %v355_v13 = vmul.f32 (%p471_p9), %v354_v8, %v354_v8  ;;  %v363_v16 = vmul.f32 (%p471_p9), %v362_v9, %v362_v9  ;;  %v2173_v19 = vld [vmem:[%s399_s0 + $0x8] sm:$0xff] (%p471_p9) }
 0x32a   : > { %v406_v20 = vsel (%p471_p9), %vm1823_vm4, %v405_v12, 0.0  ;;  %v412_v24 = vsel (%p471_p9), %vm1823_vm4, %v2173_v19, 0.0 }
 0x32b   : > { %v369_v21 = vadd.f32 %v363_v16, %v355_v13  ;;  %v359_v25 = vsel %vm358_vm6, 0.0, %v355_v13  ;;  %v407_v27 = vmul.f32 %v406_v20, %v406_v20  ;;  %v367_v29 = vsel %vm366_vm7, 0.0, %v363_v16 }
 0x32c   : > { %v368_v31 = vadd.f32 %v367_v29, %v359_v25  ;;  %v413_v33 = vmul.f32 %v412_v24, %v412_v24 }
 0x32d   : > { %v382_v6 = vld [vmem:[%s376_s3] sm:$0xff]  ;;  %v2172_v11 = vld [vmem:[%s376_s3 + $0x8] sm:$0xff] }
 0x32e   : > { %v383_v10 = vsel %vm1823_vm4, %v382_v6, 0.0  ;;  %v389_v18 = vsel %vm1823_vm4, %v2172_v11, 0.0 }
 0x32f   : > { %v384_v17 = vmul.f32 %v383_v10, %v383_v10  ;;  %v390_v22 = vmul.f32 %v389_v18, %v389_v18  ;;  %v428_v23 = vld [vmem:[%s422_s11] sm:$0xff]  ;;  %v2174_v28 = vld [vmem:[%s422_s11 + $0x8] sm:$0xff] }
 0x330   : > { %v429_v30 = vsel %vm1823_vm4, %v428_v23, 0.0  ;;  %v439_v34 = vsel %vm1823_vm4, %v2174_v28, 0.0 }
 0x331   : > { %v386_v26 = vadd.f32 %v384_v17, %v369_v21  ;;  %v385_v35 = vadd.f32 %v384_v17, %v368_v31  ;;  %v430_v38 = vmul.f32 %v429_v30, %v429_v30  ;;  %v440_v41 = vmul.f32 %v439_v34, %v439_v34 }
 0x333   : > { %v392_v32 = vadd.f32 %v390_v22, %v386_v26  ;;  %v391_v39 = vadd.f32 %v390_v22, %v385_v35  ;;  %v434_v44 = vsel %vm433_vm8, 0.0, %v430_v38  ;;  %v444_v47 = vsel %vm443_vm9, 0.0, %v440_v41 }
 0x335   : > { %v409_v37 = vadd.f32 %v407_v27, %v392_v32  ;;  %v408_v42 = vadd.f32 %v407_v27, %v391_v39 }
 0x337   : > { %v415_v40 = vadd.f32 %v413_v33, %v409_v37  ;;  %v414_v45 = vadd.f32 %v413_v33, %v408_v42 }
 0x339   : > { %v436_v43 = vadd.f32 %v430_v38, %v415_v40  ;;  %v435_v48 = vadd.f32 %v434_v44, %v414_v45 }
 0x33b   : > { %v446_v46 = vadd.f32 %v440_v41, %v436_v43  ;;  %v445_v49 = vadd.f32 %v444_v47, %v435_v48 }
 0x33d   : > { %447 = vadd.xlane.f32.xlu0 %v446_v46 }
 0x341   : > { %455 = vadd.xlane.f32.xlu0 %v445_v49 }
 0x3ca   : > { %v448_v50 = vpop.xlane.xlu0 %447 }
 0x3cb   : > { %v449_v51 = vrot.slane %v448_v50, 4 }
 0x3cd   : > { %v450_v52 = vadd.f32 %v449_v51, %v448_v50 }
 0x3ce   : > { %v456_v53 = vpop.xlane.xlu0 %455 }
 0x3cf   : > { %v451_v54 = vrot.slane %v450_v52, 2  ;;  %v457_v55 = vrot.slane %v456_v53, 4 }
 0x3d1   : > { %v458_v56 = vadd.f32 %v457_v55, %v456_v53  ;;  %v452_v57 = vadd.f32 %v451_v54, %v450_v52 }
 0x3d3   : > { %v459_v58 = vrot.slane %v458_v56, 2  ;;  %v453_v60 = vrot.slane %v452_v57, 1 }
 0x3d5   : > { %v460_v59 = vadd.f32 %v459_v58, %v458_v56  ;;  %v454_v63 = vadd.f32 %v453_v60, %v452_v57 }
 0x3d7   : > { %v461_v61 = vrot.slane %v460_v59, 1 }
 0x3d9   : > { %v462_v62 = vadd.f32 %v461_v61, %v460_v59 }
 0x3db   : > { %2203 = vpush %v462_v62 }
 0x3dc   : > { %2205 = vpush %v454_v63 }
 0x40c   : > { %s2204_s23 = spop %2203 }
 0x40d   : > { %s2206_s24 = spop %2205 }
 0x40e   : > { %s465_s25 = smul.f32 1e-10, %s2206_s24 }
 0x410   : > { %p466_p11 = scmp.le.f32.partialorder %s2204_s23, %s465_s25 }
 0x412   : > { %p468_p12 = por %p467_p10, %p466_p11 }
 0x414   :  { %1240 = sbr.rel (!%p468_p12) target bundleno = 331 (0x14b), region = 515 }
 0x41b PF:  { %s1241_s26 = smov [#allocation12]  ;;  %v1245_v14 = vmov %v3079_v14  ;;  %v1248_v15 = vmov %v3081_v15  ;;  %s1267_s27 = smov [#allocation15] }
 0x41c   :  { %v1271_v14 = vmov %v3079_v14  ;;  %v1274_v15 = vmov %v3081_v15  ;;  %v1249_v0 = vld [vmem:[%s1241_s26] sm:$0xff]  ;;  %vm1252_vm10 = vcmp.eq.s32.totalorder %v1248_v15, %v1245_v14  ;;  %v2175_v1 = vld [vmem:[%s1241_s26 + $0x8] sm:$0xff]  ;;  %v1257_v2 = vadd.s32 8, %v1248_v15  ;;  %s1242_s10 = smov [#allocation4]  ;;  %s1268_s28 = smov [#allocation6] }
 0x41d   :  { %vm1278_vm11 = vcmp.eq.s32.totalorder %v1274_v15, %v1271_v14  ;;  %v1283_v3 = vadd.s32 8, %v1274_v15  ;;  %v1253_v4 = vsel %vm1252_vm10, %v1249_v0, 0.0  ;;  %v1275_v5 = vld [vmem:[%s1267_s27] sm:$0xff]  ;;  %v2176_v6 = vld [vmem:[%s1267_s27 + $0x8] sm:$0xff]  ;;  %s2958_s15 = smov %s3484_s6   ;;  %s2962_s16 = smov [#allocation8]  }
 0x41e   :  { %vm1258_vm4 = vcmp.eq.s32.totalorder %v1257_v2, %v1245_v14  ;;  %v1279_v7 = vsel %vm1278_vm11, %v1275_v5, 0.0 }
 0x41f   :  { %vm1284_vm12 = vcmp.eq.s32.totalorder %v1283_v3, %v1271_v14  ;;  %v1259_v8 = vsel %vm1258_vm4, %v2175_v1, %v1253_v4 }
 0x420   :  { %v1285_v9 = vsel %vm1284_vm12, %v2176_v6, %v1279_v7  ;;  %v1260_v10 = vrot.slane %v1259_v8, 4 }
 0x421   :  { %v1286_v11 = vrot.slane %v1285_v9, 4 }
 0x422   :  { %v1261_v12 = vadd.f32 %v1260_v10, %v1259_v8 }
 0x423   :  { %v1287_v13 = vadd.f32 %v1286_v11, %v1285_v9 }
 0x424   :  { %v1262_v16 = vrot.slane %v1261_v12, 2 }
 0x425   :  { %v1288_v17 = vrot.slane %v1287_v13, 2 }
 0x426   :  { %v1263_v18 = vadd.f32 %v1262_v16, %v1261_v12 }
 0x427   :  { %v1289_v19 = vadd.f32 %v1288_v17, %v1287_v13 }
 0x428   :  { %v1264_v20 = vrot.slane %v1263_v18, 1 }
 0x429   :  { %v1290_v21 = vrot.slane %v1289_v19, 1 }
 0x42a   :  { %v1265_v15 = vadd.f32 %v1264_v20, %v1263_v18 }
 0x42b   :  { %v1291_v22 = vadd.f32 %v1290_v21, %v1289_v19 }
 0x42c   :  { %1266 = vst [vmem:[%s1242_s10] sm:$0x1] %v1265_v15 }
 0x42d   :  { %1292 = vst [vmem:[%s1268_s28] sm:$0x1] %v1291_v22 }
 0x433   :  { %v1296_v23 = vld [vmem:[#allocation4] sm:$0x1] }
 0x434   :  { %v1302_v14 = vld [vmem:[#allocation6] sm:$0x1]  ;;  %1298 = vst [vmem:[#allocation5] sm:$0x1] %v1296_v23 }
 0x435   :  { %1304 = vst [vmem:[#allocation7] sm:$0x1] %v1302_v14 }
 0x43b   :  { %v1367_v24 = vld [vmem:[#allocation5] sm:$0x1] }
 0x43c   :  { %v1431_v25 = vld [vmem:[#allocation7] sm:$0x1]  ;;  %1368 = vst [vmem:[%s3482_s4] sm:$0x1] %v1367_v24 }
 0x43d   :  { %1432 = vst [vmem:[%s3483_s5] sm:$0x1] %v1431_v25 }
 0x43e LB: > { %v1480_v26 = vld [vmem:[%s2964_s16] sm:$0xff]  ;;  %s1482_s16 = scalar_lea.vmem %s2964_s16, 8   ;;  %s2964_s16 = sphi %s2962_s16, %s1482_s16   ;;  %s2960_s15 = sphi %s2958_s15, %s1483_s15  }
 0x43f   : > { %1481 = vst [vmem:[%s2960_s15] sm:$0xff] %v1480_v26  ;;  %s1483_s15 = scalar_lea.vmem %s2960_s15, 8   ;;  %p1477_p13 = scmp.gt.s32.totalorder %s1482_s16, [#allocation8 + $0x8] }
 0x440   :  { %s2966_s5 = smov (%p1477_p13), %s3485_s7   ;;  %s2970_s2 = smov (%p1477_p13), [#allocation9]  }
 0x441   :  { %1479 = sbr.rel (!%p1477_p13) target bundleno = 1086 (0x43e), region = 581 }
 0x448 LB: > { %v1542_v27 = vld [vmem:[%s2972_s2] sm:$0xff]  ;;  %s1544_s2 = scalar_lea.vmem %s2972_s2, 8   ;;  %s2972_s2 = sphi %s2970_s2, %s1544_s2   ;;  %s2968_s5 = sphi %s2966_s5, %s1545_s5  }
 0x449   : > { %1543 = vst [vmem:[%s2968_s5] sm:$0xff] %v1542_v27  ;;  %s1545_s5 = scalar_lea.vmem %s2968_s5, 8   ;;  %p1539_p0 = scmp.gt.s32.totalorder %s1544_s2, [#allocation9 + $0x8] }
 0x44a   :  { %s2974_s19 = smov (%p1539_p0), %s3486_s8   ;;  %s2978_s20 = smov (%p1539_p0), [#allocation10]  }
 0x44b   :  { %1541 = sbr.rel (!%p1539_p0) target bundleno = 1096 (0x448), region = 603 }
 0x452 LB: > { %v1604_v28 = vld [vmem:[%s2980_s20] sm:$0xff]  ;;  %s1606_s20 = scalar_lea.vmem %s2980_s20, 8   ;;  %s2980_s20 = sphi %s2978_s20, %s1606_s20   ;;  %s2976_s19 = sphi %s2974_s19, %s1607_s19  }
 0x453   : > { %1605 = vst [vmem:[%s2976_s19] sm:$0xff] %v1604_v28  ;;  %s1607_s19 = scalar_lea.vmem %s2976_s19, 8   ;;  %p1601_p1 = scmp.gt.s32.totalorder %s1606_s20, [#allocation10 + $0x8] }
 0x454   :  { %s2982_s22 = smov (%p1601_p1), %s3487_s9   ;;  %s2986_s3 = smov (%p1601_p1), [#allocation11]  }
 0x455   :  { %1603 = sbr.rel (!%p1601_p1) target bundleno = 1106 (0x452), region = 625 }
 0x45c LB: > { %v1666_v29 = vld [vmem:[%s2988_s3] sm:$0xff]  ;;  %s1668_s3 = scalar_lea.vmem %s2988_s3, 8   ;;  %s2988_s3 = sphi %s2986_s3, %s1668_s3   ;;  %s2984_s22 = sphi %s2982_s22, %s1669_s22  }
 0x45d   : > { %1667 = vst [vmem:[%s2984_s22] sm:$0xff] %v1666_v29  ;;  %s1669_s22 = scalar_lea.vmem %s2984_s22, 8   ;;  %p1663_p2 = scmp.gt.s32.totalorder %s1668_s3, [#allocation11 + $0x8] }
 0x45f   :  { %1665 = sbr.rel (!%p1663_p2) target bundleno = 1116 (0x45c), region = 647 }

// kernel: ipeps_forward.13
= control target key start
LH: loop header
LB: loop body
LE: loop exit
PB: predicated region body
PF: predicated region fallthrough
CT: control target
= control target key end

     0   :  { %v5926_v0 = vmov 0.0   ;;  %vm23_vm0 = vcmask 64512   ;;  %vm5927_vm1 = vmmov 0   ;;  %vm4744_vm3 = vcmask 261120   ;;  %s6806_s1 = inlined_call_operand.vmem [shape: f32[4,8,8], index: 1, kind: input, shape index: {}]   ;;  %s6807_s0 = inlined_call_operand.vmem [shape: f32[8,8], index: 0, kind: input, shape index: {}]   ;;  %s6808_s3 = inlined_call_operand.vmem [shape: f32[32,8], index: 3, kind: input, shape index: {}]   ;;  %s6809_s2 = inlined_call_operand.vmem [shape: f32[16,32,32], index: 2, kind: input, shape index: {}]   ;;  %s6810_s4 = inlined_call_operand.vmem [shape: f32[32,32], index: 4, kind: output, shape index: {}]  }
   0x1   :  { %5276 = vmatprep.subr.mxu0 %v5926_v0  ;;  %5281 = vmatprep.subr.mxu1 %v5926_v0  ;;  %v22_v1 = vld [vmem:[%s6806_s1] sm:$0xff]  ;;  %v4754_v2 = vld [vmem:[%s6806_s1 + $0x8] sm:$0xff]  ;;  %v4756_v4 = vld [vmem:[%s6806_s1 + $0x10] sm:$0xff] }
   0x2   :  { %v17_v3 = vld [vmem:[%s6807_s0] sm:$0xff]  ;;  %5277 = vmatpush3.msra.mxu0 %v22_v1  ;;  %5278 = vmatprep.mubr.msk.f32.mxu0 %vm5927_vm1, %v5926_v0  ;;  %v4758_v5 = vld [vmem:[%s6806_s1 + $0x18] sm:$0xff]  ;;  %v6018_v18 = vld [vmem:[%s6808_s3 + $0x8] sm:$0xff] }
   0x3   :  { %5282 = vmatpush3.msra.mxu1 %v4754_v2  ;;  %5283 = vmatprep.mubr.msk.f32.mxu1 %vm5927_vm1, %v5926_v0  ;;  %v6009_v15 = vld [vmem:[%s6808_s3] sm:$0xff]  ;;  %v6027_v22 = vld [vmem:[%s6808_s3 + $0x10] sm:$0xff]  ;;  %vm6031_vm2 = vmpackc.low %vm23_vm0, %vm23_vm0 }
   0x4   :  { %5279 = vmatmul.mubr.msk.f32.vlgmr.msra.gmra.mrb[0].mxu0 %vm23_vm0, %v17_v3  ;;  %5284 = vmatmul.mubr.msk.f32.vlgmr.msra.gmra.mrb[0].mxu1 %vm23_vm0, %v17_v3  ;;  %v6022_v21 = vpack.c.bf16 %v6018_v18, %v6009_v15  ;;  %v6046_v24 = vld [vmem:[%s6808_s3 + $0x18] sm:$0xff]  ;;  %v613_v34 = vld [vmem:[%s6809_s2 + $0x8] sm:$0xff]  ;;  %v612_v36 = vld [vmem:[%s6809_s2] sm:$0xff] }
   0x5   :  { %313 = vxpose.xlu0.b32.start.end [1/1] (short) (narrow) %v22_v1, 8  ;;  %5286 = vmatprep.subr.mxu0 %v5926_v0  ;;  %v6056_v25 = vpack.c.bf16 %v6046_v24, %v6027_v22  ;;  %v4787_v35 = vld [vmem:[%s6809_s2 + $0x28] sm:$0xff]  ;;  %v4786_v37 = vld [vmem:[%s6809_s2 + $0x20] sm:$0xff]  ;;  %v615_v46 = vld [vmem:[%s6809_s2 + $0x18] sm:$0xff] }
   0x6   :  { %5287 = vmatpush3.msra.mxu0 %v4756_v4  ;;  %5288 = vmatprep.mubr.msk.f32.mxu0 %vm5927_vm1, %v5926_v0  ;;  %v4789_v47 = vld [vmem:[%s6809_s2 + $0x38] sm:$0xff]  ;;  %v614_v49 = vld [vmem:[%s6809_s2 + $0x10] sm:$0xff]  ;;  %v5008_v23 = vld [vmem:[%s6809_s2 + $0x1c8] sm:$0xff] }
   0x7   :  { %5291 = vmatprep.subr.mxu1 %v5926_v0  ;;  %5293 = vmatprep.mubr.msk.f32.mxu1 %vm5927_vm1, %v5926_v0  ;;  %v4788_v50 = vld [vmem:[%s6809_s2 + $0x30] sm:$0xff] }
   0x8   :  { %5289 = vmatmul.mubr.msk.f32.vlgmr.msra.gmra.mrb[2].mxu0 %vm23_vm0, %v17_v3  ;;  %5292 = vmatpush3.msra.mxu1 %v4758_v5 }
   0x9   :  { %5294 = vmatmul.mubr.msk.f32.vlgmr.msra.gmra.mrb[2].mxu1 %vm23_vm0, %v17_v3  ;;  %5296 = vmatprep.subr.mxu0 %v5926_v0 }
   0xa   :  { %5323 = vmatprep.subr.mxu1 %v5926_v0  ;;  %5298 = vmatprep.mubr.msk.f32.mxu0 %vm5927_vm1, %v5926_v0 }
   0xb   :  { %5325 = vmatprep.mubr.msk.f32.mxu1 %vm5927_vm1, %v5926_v0  ;;  %1419 = vxpose.xlu0.b32.start.end [1/1] (short) (narrow) %v4754_v2, 8 }
   0xc   :  { %2514 = vxpose.xlu1.b32.start.end [1/1] (short) (narrow) %v4756_v4, 8 }
  0x10   :  { %3609 = vxpose.xlu1.b32.start.end [1/1] (short) (narrow) %v4758_v5, 8 }
  0x85   :  { %v5990_v6 = vpop.trf.xlu0 }
  0xd7   :  { %v5992_v7 = vpop.f32.mrb[0].mxu0  ;;  %v5994_v8 = vpop.f32.mrb[0].mxu1 }
  0xd8   :  { %v5280_v9 = vpop.f32.mrb[1].mxu0  ;;  %5297 = vmatpush3.msra.mxu0 %v5992_v7  ;;  %5324 = vmatpush3.msra.mxu1 %v5994_v8  ;;  %v5285_v10 = vpop.f32.mrb[1].mxu1 }
  0xd9   :  { %5299 = vmatmul.mubr.msk.f32.vlgmr.msra.gmra.mrb[4].mxu0 %vm23_vm0, %v5990_v6  ;;  %5326 = vmatmul.mubr.msk.f32.vlgmr.msra.gmra.mrb[4].mxu1 %vm23_vm0, %v5990_v6 }
  0xda   :  { %5303 = vmatprep.mubr.msk.f32.mxu0 %vm23_vm0, %v6009_v15  ;;  %5330 = vmatprep.mubr.msk.f32.mxu1 %vm23_vm0, %v6009_v15 }
  0xdb   :  { %v6002_v11 = vpop.f32.mrb[2].mxu0 }
  0xdc   :  { %v5290_v12 = vpop.f32.mrb[3].mxu0  ;;  %v6004_v13 = vpop.f32.mrb[2].mxu1 }
  0xdd   :  { %v5295_v14 = vpop.f32.mrb[3].mxu1 }
 0x1ac   :  { %v414_v16 = vpop.f32.mrb[4].mxu0  ;;  %v690_v17 = vpop.f32.mrb[4].mxu1 }
 0x1ad   :  { %v5300_v19 = vpop.f32.mrb[5].mxu0  ;;  %5301 = vmatprep.subr.mxu0 %v414_v16  ;;  %v5327_v20 = vpop.f32.mrb[5].mxu1  ;;  %5328 = vmatprep.subr.mxu1 %v690_v17 }
 0x1ae   :  { %5302 = vmatpush3.msra.mxu0 %v414_v16  ;;  %5329 = vmatpush3.msra.mxu1 %v690_v17  ;;  %v6184_v16 = vpop.trf.xlu0  ;;  %v4804_v17 = vld [vmem:[%s6809_s2 + $0x48] sm:$0xff]  ;;  %v4803_v19 = vld [vmem:[%s6809_s2 + $0x40] sm:$0xff] }
 0x1af   :  { %5304 = vmatmul.mubr.msk.f32.vlgmr.msra.gmra.mrb[6].mxu0 %vm23_vm0, %v6018_v18  ;;  %5331 = vmatmul.mubr.msk.f32.vlgmr.msra.gmra.mrb[6].mxu1 %vm23_vm0, %v6018_v18 }
 0x1b0   :  { %5306 = vmatprep.mubr.msk.f32.mxu0 %vm23_vm0, %v6027_v22  ;;  %5333 = vmatprep.mubr.msk.f32.mxu1 %vm23_vm0, %v6027_v22 }
 0x1b1   :  { %5730 = vmatprep.subr.msk.bf16.mxu0 %vm6031_vm2, %v6022_v21  ;;  %5742 = vmatprep.subr.msk.bf16.mxu1 %vm6031_vm2, %v6022_v21 }
 0x1b3   :  { %5307 = vmatmul.mubr.msk.f32.gmra.mrb[8].mxu0 %vm23_vm0, %v6046_v24  ;;  %5334 = vmatmul.mubr.msk.f32.gmra.mrb[8].mxu1 %vm23_vm0, %v6046_v24 }
 0x1b5   :  { %5733 = vmatpush3.bf16.xpose.msk.msra.mxu0 %vm6031_vm2, %v6022_v21  ;;  %5745 = vmatpush3.bf16.xpose.msk.msra.mxu1 %vm6031_vm2, %v6022_v21 }
 0x1b6   :  { %5736 = vmatprep.subr.msk.bf16.mxu0 %vm6031_vm2, %v6056_v25  ;;  %5748 = vmatprep.subr.msk.bf16.mxu1 %vm6031_vm2, %v6056_v25 }
 0x1bd   :  { %5739 = vmatpush3.bf16.xpose.msk.msra.mxu0 %vm6031_vm2, %v6056_v25  ;;  %5751 = vmatpush3.bf16.xpose.msk.msra.mxu1 %vm6031_vm2, %v6056_v25 }
 0x1be   :  { %5350 = vmatprep.subr.mxu0 %v5926_v0  ;;  %5377 = vmatprep.subr.mxu1 %v5926_v0 }
 0x282   :  { %v5305_v26 = vpop.f32.mrb[6].mxu0  ;;  %v5332_v27 = vpop.f32.mrb[6].mxu1 }
 0x283   :  { %v496_v28 = vpop.f32.mrb[7].mxu0  ;;  %v760_v29 = vpop.f32.mrb[7].mxu1 }
 0x284   :  { %5317 = vmatprep.mubr.msk.f32.mxu0 %vm23_vm0, %v496_v28  ;;  %5344 = vmatprep.mubr.msk.f32.mxu1 %vm23_vm0, %v760_v29 }
 0x285   :  { %5318 = vmatmul.mubr.msk.f32.vlgmr.msra.gmra.mrb[10].mxu0 %vm23_vm0, %v5305_v26  ;;  %5345 = vmatmul.mubr.msk.f32.vlgmr.msra.gmra.mrb[10].mxu1 %vm23_vm0, %v5332_v27  ;;  %v4821_v27 = vld [vmem:[%s6809_s2 + $0x68] sm:$0xff] }
 0x286   :  { %5351 = vmatpush3.msra.mxu0 %v6002_v11  ;;  %5378 = vmatpush3.msra.mxu1 %v6004_v13  ;;  %v5308_v30 = vpop.f32.mrb[8].mxu0  ;;  %v5335_v31 = vpop.f32.mrb[8].mxu1 }
 0x287   :  { %v506_v32 = vpop.f32.mrb[9].mxu0  ;;  %v770_v33 = vpop.f32.mrb[9].mxu1 }
 0x288   :  { %5320 = vmatprep.mubr.msk.f32.mxu0 %vm23_vm0, %v506_v32  ;;  %5347 = vmatprep.mubr.msk.f32.mxu1 %vm23_vm0, %v770_v33  ;;  %v4806_v33 = vld [vmem:[%s6809_s2 + $0x58] sm:$0xff] }
 0x289   :  { %5321 = vmatmul.mubr.msk.f32.gmra.mrb[12].mxu0 %vm23_vm0, %v5308_v30  ;;  %5348 = vmatmul.mubr.msk.f32.gmra.mrb[12].mxu1 %vm23_vm0, %v5335_v31  ;;  %v4820_v31 = vld [vmem:[%s6809_s2 + $0x60] sm:$0xff] }
 0x28a   :  { %5352 = vmatprep.mubr.msk.f32.mxu0 %vm5927_vm1, %v5926_v0  ;;  %5379 = vmatprep.mubr.msk.f32.mxu1 %vm5927_vm1, %v5926_v0 }
 0x28d   :  { %5353 = vmatmul.mubr.msk.f32.vlgmr.msra.gmra.mrb[14].mxu0 %vm23_vm0, %v5990_v6  ;;  %5380 = vmatmul.mubr.msk.f32.vlgmr.msra.gmra.mrb[14].mxu1 %vm23_vm0, %v5990_v6 }
 0x28e   :  { %5357 = vmatprep.mubr.msk.f32.mxu0 %vm23_vm0, %v6009_v15  ;;  %5384 = vmatprep.mubr.msk.f32.mxu1 %vm23_vm0, %v6009_v15 }
 0x358   :  { %v5319_v38 = vpop.f32.mrb[10].mxu0  ;;  %v5346_v39 = vpop.f32.mrb[10].mxu1 }
 0x359   :  { %v617_v40 = vmul.f32 %v5319_v38, %v613_v34  ;;  %v882_v41 = vmul.f32 %v5346_v39, %v4787_v35  ;;  %v593_v42 = vpop.f32.mrb[11].mxu0  ;;  %v857_v43 = vpop.f32.mrb[11].mxu1 }
 0x35a   :  { %v616_v44 = vmul.f32 %v612_v36, %v593_v42  ;;  %v881_v45 = vmul.f32 %v4786_v37, %v857_v43  ;;  %v4805_v36 = vld [vmem:[%s6809_s2 + $0x50] sm:$0xff] }
 0x35b   :  { %v6122_v48 = vadd.f32 %v882_v41, %v617_v40  ;;  %v4823_v41 = vld [vmem:[%s6809_s2 + $0x78] sm:$0xff] }
 0x35c   :  { %v6130_v51 = vadd.f32 %v881_v45, %v616_v44  ;;  %v5322_v52 = vpop.f32.mrb[12].mxu0  ;;  %v5349_v53 = vpop.f32.mrb[12].mxu1 }
 0x35d   :  { %v619_v54 = vmul.f32 %v5322_v52, %v615_v46  ;;  %v884_v55 = vmul.f32 %v5349_v53, %v4789_v47  ;;  %v603_v56 = vpop.f32.mrb[13].mxu0  ;;  %v867_v57 = vpop.f32.mrb[13].mxu1  ;;  %v4822_v46 = vld [vmem:[%s6809_s2 + $0x70] sm:$0xff] }
 0x35e   :  { %v618_v58 = vmul.f32 %v614_v49, %v603_v56  ;;  %v883_v59 = vmul.f32 %v4788_v50, %v867_v57 }
 0x35f   :  { %v6132_v60 = vadd.f32 %v884_v55, %v619_v54 }
 0x360   :  { %v6134_v61 = vadd.f32 %v883_v59, %v618_v58  ;;  %v955_v62 = vpop.f32.mrb[14].mxu0  ;;  %v1220_v63 = vpop.f32.mrb[14].mxu1 }
 0x361   :  { %v5354_v1 = vpop.f32.mrb[15].mxu0  ;;  %5355 = vmatprep.subr.mxu0 %v955_v62  ;;  %v5381_v2 = vpop.f32.mrb[15].mxu1  ;;  %5382 = vmatprep.subr.mxu1 %v1220_v63 }
 0x362   :  { %5356 = vmatpush3.msra.mxu0 %v955_v62  ;;  %5383 = vmatpush3.msra.mxu1 %v1220_v63 }
 0x363   :  { %5358 = vmatmul.mubr.msk.f32.vlgmr.msra.gmra.mrb[16].mxu0 %vm23_vm0, %v6018_v18  ;;  %5385 = vmatmul.mubr.msk.f32.vlgmr.msra.gmra.mrb[16].mxu1 %vm23_vm0, %v6018_v18 }
 0x364   :  { %5360 = vmatprep.mubr.msk.f32.mxu0 %vm23_vm0, %v6027_v22  ;;  %5387 = vmatprep.mubr.msk.f32.mxu1 %vm23_vm0, %v6027_v22 }
 0x365   :  { %5754 = vmatprep.subr.msk.bf16.mxu0 %vm6031_vm2, %v6022_v21  ;;  %5766 = vmatprep.subr.msk.bf16.mxu1 %vm6031_vm2, %v6022_v21 }
 0x367   :  { %5361 = vmatmul.mubr.msk.f32.gmra.mrb[18].mxu0 %vm23_vm0, %v6046_v24  ;;  %5388 = vmatmul.mubr.msk.f32.gmra.mrb[18].mxu1 %vm23_vm0, %v6046_v24 }
 0x369   :  { %5757 = vmatpush3.bf16.xpose.msk.msra.mxu0 %vm6031_vm2, %v6022_v21  ;;  %5769 = vmatpush3.bf16.xpose.msk.msra.mxu1 %vm6031_vm2, %v6022_v21 }
 0x36a   :  { %5760 = vmatprep.subr.msk.bf16.mxu0 %vm6031_vm2, %v6056_v25  ;;  %5772 = vmatprep.subr.msk.bf16.mxu1 %vm6031_vm2, %v6056_v25 }
 0x371   :  { %5763 = vmatpush3.bf16.xpose.msk.msra.mxu0 %vm6031_vm2, %v6056_v25  ;;  %5775 = vmatpush3.bf16.xpose.msk.msra.mxu1 %vm6031_vm2, %v6056_v25 }
 0x372   :  { %5404 = vmatprep.subr.mxu0 %v5926_v0  ;;  %5431 = vmatprep.subr.mxu1 %v5926_v0 }
 0x436   :  { %v5359_v3 = vpop.f32.mrb[16].mxu0  ;;  %v5386_v4 = vpop.f32.mrb[16].mxu1 }
 0x437   :  { %v1025_v5 = vpop.f32.mrb[17].mxu0  ;;  %v1290_v6 = vpop.f32.mrb[17].mxu1 }
 0x438   :  { %5371 = vmatprep.mubr.msk.f32.mxu0 %vm23_vm0, %v1025_v5  ;;  %5398 = vmatprep.mubr.msk.f32.mxu1 %vm23_vm0, %v1290_v6  ;;  %v4837_v5 = vld [vmem:[%s6809_s2 + $0x80] sm:$0xff] }
 0x439   :  { %5372 = vmatmul.mubr.msk.f32.vlgmr.msra.gmra.mrb[20].mxu0 %vm23_vm0, %v5359_v3  ;;  %5399 = vmatmul.mubr.msk.f32.vlgmr.msra.gmra.mrb[20].mxu1 %vm23_vm0, %v5386_v4  ;;  %v4838_v4 = vld [vmem:[%s6809_s2 + $0x88] sm:$0xff] }
 0x43a   :  { %5405 = vmatpush3.msra.mxu0 %v5992_v7  ;;  %5432 = vmatpush3.msra.mxu1 %v5994_v8  ;;  %v5362_v9 = vpop.f32.mrb[18].mxu0  ;;  %v5389_v10 = vpop.f32.mrb[18].mxu1 }
 0x43b   :  { %v1035_v12 = vpop.f32.mrb[19].mxu0  ;;  %v1300_v14 = vpop.f32.mrb[19].mxu1 }
 0x43c   :  { %5374 = vmatprep.mubr.msk.f32.mxu0 %vm23_vm0, %v1035_v12  ;;  %5401 = vmatprep.mubr.msk.f32.mxu1 %vm23_vm0, %v1300_v14 }
 0x43d   :  { %5375 = vmatmul.mubr.msk.f32.gmra.mrb[22].mxu0 %vm23_vm0, %v5362_v9  ;;  %5402 = vmatmul.mubr.msk.f32.gmra.mrb[22].mxu1 %vm23_vm0, %v5389_v10  ;;  %v4855_v10 = vld [vmem:[%s6809_s2 + $0xa8] sm:$0xff] }
 0x43e   :  { %5406 = vmatprep.mubr.msk.f32.mxu0 %vm5927_vm1, %v5926_v0  ;;  %5433 = vmatprep.mubr.msk.f32.mxu1 %vm5927_vm1, %v5926_v0 }
 0x441   :  { %5407 = vmatmul.mubr.msk.f32.vlgmr.msra.gmra.mrb[24].mxu0 %vm23_vm0, %v6184_v16  ;;  %5434 = vmatmul.mubr.msk.f32.vlgmr.msra.gmra.mrb[24].mxu1 %vm23_vm0, %v6184_v16 }
 0x442   :  { %5411 = vmatprep.mubr.msk.f32.mxu0 %vm23_vm0, %v6009_v15  ;;  %5438 = vmatprep.mubr.msk.f32.mxu1 %vm23_vm0, %v6009_v15 }
 0x50c   :  { %v5373_v20 = vpop.f32.mrb[20].mxu0  ;;  %v5400_v26 = vpop.f32.mrb[20].mxu1 }
 0x50d   :  { %v1147_v28 = vmul.f32 %v5373_v20, %v4804_v17  ;;  %v1122_v29 = vpop.f32.mrb[21].mxu0  ;;  %v1387_v30 = vpop.f32.mrb[21].mxu1  ;;  %v1412_v35 = vmul.f32 %v5400_v26, %v4821_v27  ;;  %v4854_v17 = vld [vmem:[%s6809_s2 + $0xa0] sm:$0xff]  ;;  %v4840_v20 = vld [vmem:[%s6809_s2 + $0x98] sm:$0xff] }
 0x50e   :  { %v1146_v32 = vmul.f32 %v4803_v19, %v1122_v29  ;;  %v1411_v38 = vmul.f32 %v4820_v31, %v1387_v30 }
 0x50f   :  { %v1151_v34 = vadd.f32 %v1147_v28, %v6122_v48  ;;  %v4839_v28 = vld [vmem:[%s6809_s2 + $0x90] sm:$0xff] }
 0x510   :  { %v1150_v37 = vadd.f32 %v1146_v32, %v6130_v51  ;;  %v5376_v39 = vpop.f32.mrb[22].mxu0  ;;  %v5403_v40 = vpop.f32.mrb[22].mxu1 }
 0x511   :  { %v6221_v42 = vadd.f32 %v1412_v35, %v1151_v34  ;;  %v1149_v43 = vmul.f32 %v5376_v39, %v4806_v33  ;;  %v1132_v44 = vpop.f32.mrb[23].mxu0  ;;  %v1397_v45 = vpop.f32.mrb[23].mxu1  ;;  %v1414_v50 = vmul.f32 %v5403_v40, %v4823_v41  ;;  %v4857_v33 = vld [vmem:[%s6809_s2 + $0xb8] sm:$0xff] }
 0x512   :  { %v6226_v47 = vadd.f32 %v1411_v38, %v1150_v37  ;;  %v1148_v48 = vmul.f32 %v4805_v36, %v1132_v44  ;;  %v1413_v52 = vmul.f32 %v4822_v46, %v1397_v45  ;;  %v4856_v38 = vld [vmem:[%s6809_s2 + $0xb0] sm:$0xff] }
 0x513   :  { %v1153_v49 = vadd.f32 %v1149_v43, %v6132_v60 }
 0x514   :  { %v1152_v51 = vadd.f32 %v1148_v48, %v6134_v61  ;;  %v1520_v53 = vpop.f32.mrb[24].mxu0  ;;  %v1785_v54 = vpop.f32.mrb[24].mxu1 }
 0x515   :  { %v6230_v55 = vadd.f32 %v1414_v50, %v1153_v49  ;;  %v5408_v56 = vpop.f32.mrb[25].mxu0  ;;  %5409 = vmatprep.subr.mxu0 %v1520_v53  ;;  %v5435_v57 = vpop.f32.mrb[25].mxu1  ;;  %5436 = vmatprep.subr.mxu1 %v1785_v54 }
 0x516   :  { %v6232_v58 = vadd.f32 %v1413_v52, %v1152_v51  ;;  %5410 = vmatpush3.msra.mxu0 %v1520_v53  ;;  %5437 = vmatpush3.msra.mxu1 %v1785_v54 }
 0x517   :  { %5412 = vmatmul.mubr.msk.f32.vlgmr.msra.gmra.mrb[26].mxu0 %vm23_vm0, %v6018_v18  ;;  %5439 = vmatmul.mubr.msk.f32.vlgmr.msra.gmra.mrb[26].mxu1 %vm23_vm0, %v6018_v18 }
 0x518   :  { %5414 = vmatprep.mubr.msk.f32.mxu0 %vm23_vm0, %v6027_v22  ;;  %5441 = vmatprep.mubr.msk.f32.mxu1 %vm23_vm0, %v6027_v22 }
 0x519   :  { %5778 = vmatprep.subr.msk.bf16.mxu0 %vm6031_vm2, %v6022_v21  ;;  %5790 = vmatprep.subr.msk.bf16.mxu1 %vm6031_vm2, %v6022_v21 }
 0x51b   :  { %5415 = vmatmul.mubr.msk.f32.gmra.mrb[28].mxu0 %vm23_vm0, %v6046_v24  ;;  %5442 = vmatmul.mubr.msk.f32.gmra.mrb[28].mxu1 %vm23_vm0, %v6046_v24 }
 0x51d   :  { %5781 = vmatpush3.bf16.xpose.msk.msra.mxu0 %vm6031_vm2, %v6022_v21  ;;  %5793 = vmatpush3.bf16.xpose.msk.msra.mxu1 %vm6031_vm2, %v6022_v21 }
 0x51e   :  { %5784 = vmatprep.subr.msk.bf16.mxu0 %vm6031_vm2, %v6056_v25  ;;  %5796 = vmatprep.subr.msk.bf16.mxu1 %vm6031_vm2, %v6056_v25 }
 0x525   :  { %5787 = vmatpush3.bf16.xpose.msk.msra.mxu0 %vm6031_vm2, %v6056_v25  ;;  %5799 = vmatpush3.bf16.xpose.msk.msra.mxu1 %vm6031_vm2, %v6056_v25 }
 0x526   :  { %5458 = vmatprep.subr.mxu0 %v5926_v0  ;;  %5485 = vmatprep.subr.mxu1 %v5926_v0 }
 0x5ea   :  { %v5413_v59 = vpop.f32.mrb[26].mxu0  ;;  %v5440_v60 = vpop.f32.mrb[26].mxu1 }
 0x5eb   :  { %v1590_v61 = vpop.f32.mrb[27].mxu0  ;;  %v1855_v62 = vpop.f32.mrb[27].mxu1 }
 0x5ec   :  { %5425 = vmatprep.mubr.msk.f32.mxu0 %vm23_vm0, %v1590_v61  ;;  %5452 = vmatprep.mubr.msk.f32.mxu1 %vm23_vm0, %v1855_v62  ;;  %v4871_v61 = vld [vmem:[%s6809_s2 + $0xc0] sm:$0xff] }
 0x5ed   :  { %5426 = vmatmul.mubr.msk.f32.vlgmr.msra.gmra.mrb[30].mxu0 %vm23_vm0, %v5413_v59  ;;  %5453 = vmatmul.mubr.msk.f32.vlgmr.msra.gmra.mrb[30].mxu1 %vm23_vm0, %v5440_v60  ;;  %v6378_v59 = vpop.trf.xlu1  ;;  %v4872_v60 = vld [vmem:[%s6809_s2 + $0xc8] sm:$0xff] }
 0x5ee   :  { %5459 = vmatpush3.msra.mxu0 %v6002_v11  ;;  %5486 = vmatpush3.msra.mxu1 %v6004_v13  ;;  %v5416_v63 = vpop.f32.mrb[28].mxu0  ;;  %v5443_v1 = vpop.f32.mrb[28].mxu1 }
 0x5ef   :  { %v1600_v2 = vpop.f32.mrb[29].mxu0  ;;  %v1865_v3 = vpop.f32.mrb[29].mxu1 }
 0x5f0   :  { %5428 = vmatprep.mubr.msk.f32.mxu0 %vm23_vm0, %v1600_v2  ;;  %5455 = vmatprep.mubr.msk.f32.mxu1 %vm23_vm0, %v1865_v3 }
 0x5f1   :  { %5429 = vmatmul.mubr.msk.f32.gmra.mrb[32].mxu0 %vm23_vm0, %v5416_v63  ;;  %5456 = vmatmul.mubr.msk.f32.gmra.mrb[32].mxu1 %vm23_vm0, %v5443_v1  ;;  %v4889_v1 = vld [vmem:[%s6809_s2 + $0xe8] sm:$0xff] }
 0x5f2   :  { %5460 = vmatprep.mubr.msk.f32.mxu0 %vm5927_vm1, %v5926_v0  ;;  %5487 = vmatprep.mubr.msk.f32.mxu1 %vm5927_vm1, %v5926_v0 }
 0x5f5   :  { %5461 = vmatmul.mubr.msk.f32.vlgmr.msra.gmra.mrb[34].mxu0 %vm23_vm0, %v6184_v16  ;;  %5488 = vmatmul.mubr.msk.f32.vlgmr.msra.gmra.mrb[34].mxu1 %vm23_vm0, %v6184_v16 }
 0x5f6   :  { %5465 = vmatprep.mubr.msk.f32.mxu0 %vm23_vm0, %v6009_v15  ;;  %5492 = vmatprep.mubr.msk.f32.mxu1 %vm23_vm0, %v6009_v15 }
 0x6c0   :  { %v5427_v6 = vpop.f32.mrb[30].mxu0  ;;  %v5454_v9 = vpop.f32.mrb[30].mxu1 }
 0x6c1   :  { %v1712_v12 = vmul.f32 %v5427_v6, %v4838_v4  ;;  %v1687_v14 = vpop.f32.mrb[31].mxu0  ;;  %v1952_v16 = vpop.f32.mrb[31].mxu1  ;;  %v1977_v27 = vmul.f32 %v5454_v9, %v4855_v10  ;;  %v4874_v9 = vld [vmem:[%s6809_s2 + $0xd8] sm:$0xff] }
 0x6c2   :  { %v1711_v19 = vmul.f32 %v4837_v5, %v1687_v14  ;;  %v1976_v30 = vmul.f32 %v4854_v17, %v1952_v16  ;;  %v4888_v5 = vld [vmem:[%s6809_s2 + $0xe0] sm:$0xff]  ;;  %v4873_v14 = vld [vmem:[%s6809_s2 + $0xd0] sm:$0xff] }
 0x6c3   :  { %v1716_v26 = vadd.f32 %v1712_v12, %v6221_v42 }
 0x6c4   :  { %v1715_v29 = vadd.f32 %v1711_v19, %v6226_v47  ;;  %v5430_v31 = vpop.f32.mrb[32].mxu0  ;;  %v5457_v32 = vpop.f32.mrb[32].mxu1 }
 0x6c5   :  { %v6317_v34 = vadd.f32 %v1977_v27, %v1716_v26  ;;  %v1714_v35 = vmul.f32 %v5430_v31, %v4840_v20  ;;  %v1697_v36 = vpop.f32.mrb[33].mxu0  ;;  %v1962_v37 = vpop.f32.mrb[33].mxu1  ;;  %v1979_v42 = vmul.f32 %v5457_v32, %v4857_v33  ;;  %v4891_v26 = vld [vmem:[%s6809_s2 + $0xf8] sm:$0xff]  ;;  %v4890_v31 = vld [vmem:[%s6809_s2 + $0xf0] sm:$0xff] }
 0x6c6   :  { %v6322_v39 = vadd.f32 %v1976_v30, %v1715_v29  ;;  %v1713_v40 = vmul.f32 %v4839_v28, %v1697_v36  ;;  %v1978_v44 = vmul.f32 %v4856_v38, %v1962_v37 }
 0x6c7   :  { %v1718_v41 = vadd.f32 %v1714_v35, %v6230_v55 }
 0x6c8   :  { %v1717_v43 = vadd.f32 %v1713_v40, %v6232_v58  ;;  %v2050_v45 = vpop.f32.mrb[34].mxu0  ;;  %v2315_v46 = vpop.f32.mrb[34].mxu1 }
 0x6c9   :  { %v6326_v47 = vadd.f32 %v1979_v42, %v1718_v41  ;;  %v5462_v48 = vpop.f32.mrb[35].mxu0  ;;  %5463 = vmatprep.subr.mxu0 %v2050_v45  ;;  %v5489_v49 = vpop.f32.mrb[35].mxu1  ;;  %5490 = vmatprep.subr.mxu1 %v2315_v46 }
 0x6ca   :  { %v6328_v50 = vadd.f32 %v1978_v44, %v1717_v43  ;;  %5464 = vmatpush3.msra.mxu0 %v2050_v45  ;;  %5491 = vmatpush3.msra.mxu1 %v2315_v46 }
 0x6cb   :  { %5466 = vmatmul.mubr.msk.f32.vlgmr.msra.gmra.mrb[36].mxu0 %vm23_vm0, %v6018_v18  ;;  %5493 = vmatmul.mubr.msk.f32.vlgmr.msra.gmra.mrb[36].mxu1 %vm23_vm0, %v6018_v18 }
 0x6cc   :  { %5468 = vmatprep.mubr.msk.f32.mxu0 %vm23_vm0, %v6027_v22  ;;  %5495 = vmatprep.mubr.msk.f32.mxu1 %vm23_vm0, %v6027_v22 }
 0x6cd   :  { %5802 = vmatprep.subr.msk.bf16.mxu0 %vm6031_vm2, %v6022_v21  ;;  %5814 = vmatprep.subr.msk.bf16.mxu1 %vm6031_vm2, %v6022_v21 }
 0x6cf   :  { %5469 = vmatmul.mubr.msk.f32.gmra.mrb[38].mxu0 %vm23_vm0, %v6046_v24  ;;  %5496 = vmatmul.mubr.msk.f32.gmra.mrb[38].mxu1 %vm23_vm0, %v6046_v24 }
 0x6d1   :  { %5805 = vmatpush3.bf16.xpose.msk.msra.mxu0 %vm6031_vm2, %v6022_v21  ;;  %5817 = vmatpush3.bf16.xpose.msk.msra.mxu1 %vm6031_vm2, %v6022_v21 }
 0x6d2   :  { %5808 = vmatprep.subr.msk.bf16.mxu0 %vm6031_vm2, %v6056_v25  ;;  %5820 = vmatprep.subr.msk.bf16.mxu1 %vm6031_vm2, %v6056_v25 }
 0x6d9   :  { %5811 = vmatpush3.bf16.xpose.msk.msra.mxu0 %vm6031_vm2, %v6056_v25  ;;  %5823 = vmatpush3.bf16.xpose.msk.msra.mxu1 %vm6031_vm2, %v6056_v25 }
 0x6da   :  { %5512 = vmatprep.subr.mxu0 %v5926_v0  ;;  %5539 = vmatprep.subr.mxu1 %v5926_v0 }
 0x79e   :  { %v5467_v51 = vpop.f32.mrb[36].mxu0  ;;  %v5494_v52 = vpop.f32.mrb[36].mxu1 }
 0x79f   :  { %v2120_v53 = vpop.f32.mrb[37].mxu0  ;;  %v2385_v54 = vpop.f32.mrb[37].mxu1 }
 0x7a0   :  { %5479 = vmatprep.mubr.msk.f32.mxu0 %vm23_vm0, %v2120_v53  ;;  %5506 = vmatprep.mubr.msk.f32.mxu1 %vm23_vm0, %v2385_v54  ;;  %v4905_v53 = vld [vmem:[%s6809_s2 + $0x100] sm:$0xff] }
 0x7a1   :  { %5480 = vmatmul.mubr.msk.f32.vlgmr.msra.gmra.mrb[40].mxu0 %vm23_vm0, %v5467_v51  ;;  %5507 = vmatmul.mubr.msk.f32.vlgmr.msra.gmra.mrb[40].mxu1 %vm23_vm0, %v5494_v52  ;;  %v4906_v52 = vld [vmem:[%s6809_s2 + $0x108] sm:$0xff] }
 0x7a2   :  { %5513 = vmatpush3.msra.mxu0 %v5992_v7  ;;  %5540 = vmatpush3.msra.mxu1 %v5994_v8  ;;  %v5470_v55 = vpop.f32.mrb[38].mxu0  ;;  %v5497_v56 = vpop.f32.mrb[38].mxu1 }
 0x7a3   :  { %v2130_v57 = vpop.f32.mrb[39].mxu0  ;;  %v2395_v58 = vpop.f32.mrb[39].mxu1 }
 0x7a4   :  { %5482 = vmatprep.mubr.msk.f32.mxu0 %vm23_vm0, %v2130_v57  ;;  %5509 = vmatprep.mubr.msk.f32.mxu1 %vm23_vm0, %v2395_v58 }
 0x7a5   :  { %5483 = vmatmul.mubr.msk.f32.gmra.mrb[42].mxu0 %vm23_vm0, %v5470_v55  ;;  %5510 = vmatmul.mubr.msk.f32.gmra.mrb[42].mxu1 %vm23_vm0, %v5497_v56  ;;  %v4923_v56 = vld [vmem:[%s6809_s2 + $0x128] sm:$0xff] }
 0x7a6   :  { %5514 = vmatprep.mubr.msk.f32.mxu0 %vm5927_vm1, %v5926_v0  ;;  %5541 = vmatprep.mubr.msk.f32.mxu1 %vm5927_vm1, %v5926_v0 }
 0x7a9   :  { %5515 = vmatmul.mubr.msk.f32.vlgmr.msra.gmra.mrb[44].mxu0 %vm23_vm0, %v6378_v59  ;;  %5542 = vmatmul.mubr.msk.f32.vlgmr.msra.gmra.mrb[44].mxu1 %vm23_vm0, %v6378_v59 }
 0x7aa   :  { %5519 = vmatprep.mubr.msk.f32.mxu0 %vm23_vm0, %v6009_v15  ;;  %5546 = vmatprep.mubr.msk.f32.mxu1 %vm23_vm0, %v6009_v15 }
 0x874   :  { %v5481_v62 = vpop.f32.mrb[40].mxu0  ;;  %v5508_v63 = vpop.f32.mrb[40].mxu1 }
 0x875   :  { %v2242_v2 = vmul.f32 %v5481_v62, %v4872_v60  ;;  %v2217_v3 = vpop.f32.mrb[41].mxu0  ;;  %v2482_v4 = vpop.f32.mrb[41].mxu1  ;;  %v2507_v12 = vmul.f32 %v5508_v63, %v4889_v1  ;;  %v4922_v60 = vld [vmem:[%s6809_s2 + $0x120] sm:$0xff]  ;;  %v4908_v62 = vld [vmem:[%s6809_s2 + $0x118] sm:$0xff] }
 0x876   :  { %v2241_v6 = vmul.f32 %v4871_v61, %v2217_v3  ;;  %v2506_v17 = vmul.f32 %v4888_v5, %v2482_v4 }
 0x877   :  { %v2246_v10 = vadd.f32 %v2242_v2, %v6317_v34  ;;  %v4907_v2 = vld [vmem:[%s6809_s2 + $0x110] sm:$0xff] }
 0x878   :  { %v2245_v16 = vadd.f32 %v2241_v6, %v6322_v39  ;;  %v5484_v19 = vpop.f32.mrb[42].mxu0  ;;  %v5511_v20 = vpop.f32.mrb[42].mxu1 }
 0x879   :  { %v6415_v27 = vadd.f32 %v2507_v12, %v2246_v10  ;;  %v2244_v28 = vmul.f32 %v5484_v19, %v4874_v9  ;;  %v2227_v29 = vpop.f32.mrb[43].mxu0  ;;  %v2492_v30 = vpop.f32.mrb[43].mxu1  ;;  %v2509_v35 = vmul.f32 %v5511_v20, %v4891_v26  ;;  %v4925_v9 = vld [vmem:[%s6809_s2 + $0x138] sm:$0xff] }
 0x87a   :  { %v6420_v32 = vadd.f32 %v2506_v17, %v2245_v16  ;;  %v2243_v33 = vmul.f32 %v4873_v14, %v2227_v29  ;;  %v2508_v37 = vmul.f32 %v4890_v31, %v2492_v30  ;;  %v4924_v17 = vld [vmem:[%s6809_s2 + $0x130] sm:$0xff] }
 0x87b   :  { %v2248_v34 = vadd.f32 %v2244_v28, %v6326_v47 }
 0x87c   :  { %v2247_v36 = vadd.f32 %v2243_v33, %v6328_v50  ;;  %v2615_v38 = vpop.f32.mrb[44].mxu0  ;;  %v2880_v39 = vpop.f32.mrb[44].mxu1 }
 0x87d   :  { %v6424_v40 = vadd.f32 %v2509_v35, %v2248_v34  ;;  %v5516_v41 = vpop.f32.mrb[45].mxu0  ;;  %5517 = vmatprep.subr.mxu0 %v2615_v38  ;;  %v5543_v42 = vpop.f32.mrb[45].mxu1  ;;  %5544 = vmatprep.subr.mxu1 %v2880_v39 }
 0x87e   :  { %v6426_v43 = vadd.f32 %v2508_v37, %v2247_v36  ;;  %5518 = vmatpush3.msra.mxu0 %v2615_v38  ;;  %5545 = vmatpush3.msra.mxu1 %v2880_v39 }
 0x87f   :  { %5520 = vmatmul.mubr.msk.f32.vlgmr.msra.gmra.mrb[46].mxu0 %vm23_vm0, %v6018_v18  ;;  %5547 = vmatmul.mubr.msk.f32.vlgmr.msra.gmra.mrb[46].mxu1 %vm23_vm0, %v6018_v18 }
 0x880   :  { %5522 = vmatprep.mubr.msk.f32.mxu0 %vm23_vm0, %v6027_v22  ;;  %5549 = vmatprep.mubr.msk.f32.mxu1 %vm23_vm0, %v6027_v22 }
 0x881   :  { %5826 = vmatprep.subr.msk.bf16.mxu0 %vm6031_vm2, %v6022_v21  ;;  %5838 = vmatprep.subr.msk.bf16.mxu1 %vm6031_vm2, %v6022_v21 }
 0x883   :  { %5523 = vmatmul.mubr.msk.f32.gmra.mrb[48].mxu0 %vm23_vm0, %v6046_v24  ;;  %5550 = vmatmul.mubr.msk.f32.gmra.mrb[48].mxu1 %vm23_vm0, %v6046_v24 }
 0x885   :  { %5829 = vmatpush3.bf16.xpose.msk.msra.mxu0 %vm6031_vm2, %v6022_v21  ;;  %5841 = vmatpush3.bf16.xpose.msk.msra.mxu1 %vm6031_vm2, %v6022_v21 }
 0x886   :  { %5832 = vmatprep.subr.msk.bf16.mxu0 %vm6031_vm2, %v6056_v25  ;;  %5844 = vmatprep.subr.msk.bf16.mxu1 %vm6031_vm2, %v6056_v25 }
 0x88d   :  { %5835 = vmatpush3.bf16.xpose.msk.msra.mxu0 %vm6031_vm2, %v6056_v25  ;;  %5847 = vmatpush3.bf16.xpose.msk.msra.mxu1 %vm6031_vm2, %v6056_v25 }
 0x88e   :  { %5566 = vmatprep.subr.mxu0 %v5926_v0  ;;  %5593 = vmatprep.subr.mxu1 %v5926_v0 }
 0x952   :  { %v5521_v44 = vpop.f32.mrb[46].mxu0  ;;  %v5548_v45 = vpop.f32.mrb[46].mxu1 }
 0x953   :  { %v2685_v46 = vpop.f32.mrb[47].mxu0  ;;  %v2950_v47 = vpop.f32.mrb[47].mxu1 }
 0x954   :  { %5533 = vmatprep.mubr.msk.f32.mxu0 %vm23_vm0, %v2685_v46  ;;  %5560 = vmatprep.mubr.msk.f32.mxu1 %vm23_vm0, %v2950_v47  ;;  %v4957_v47 = vld [vmem:[%s6809_s2 + $0x168] sm:$0xff] }
 0x955   :  { %5534 = vmatmul.mubr.msk.f32.vlgmr.msra.gmra.mrb[50].mxu0 %vm23_vm0, %v5521_v44  ;;  %5561 = vmatmul.mubr.msk.f32.vlgmr.msra.gmra.mrb[50].mxu1 %vm23_vm0, %v5548_v45  ;;  %v6572_v44 = vpop.trf.xlu1 }
 0x956   :  { %5567 = vmatpush3.msra.mxu0 %v6002_v11  ;;  %5594 = vmatpush3.msra.mxu1 %v6004_v13  ;;  %v5524_v48 = vpop.f32.mrb[48].mxu0  ;;  %v5551_v49 = vpop.f32.mrb[48].mxu1 }
 0x957   :  { %v2695_v50 = vpop.f32.mrb[49].mxu0  ;;  %v2960_v51 = vpop.f32.mrb[49].mxu1 }
 0x958   :  { %5536 = vmatprep.mubr.msk.f32.mxu0 %vm23_vm0, %v2695_v50  ;;  %5563 = vmatprep.mubr.msk.f32.mxu1 %vm23_vm0, %v2960_v51 }
 0x959   :  { %5537 = vmatmul.mubr.msk.f32.gmra.mrb[52].mxu0 %vm23_vm0, %v5524_v48  ;;  %5564 = vmatmul.mubr.msk.f32.gmra.mrb[52].mxu1 %vm23_vm0, %v5551_v49 }
 0x95a   :  { %5568 = vmatprep.mubr.msk.f32.mxu0 %vm5927_vm1, %v5926_v0  ;;  %5595 = vmatprep.mubr.msk.f32.mxu1 %vm5927_vm1, %v5926_v0 }
 0x95d   :  { %5569 = vmatmul.mubr.msk.f32.vlgmr.msra.gmra.mrb[54].mxu0 %vm23_vm0, %v6378_v59  ;;  %5596 = vmatmul.mubr.msk.f32.vlgmr.msra.gmra.mrb[54].mxu1 %vm23_vm0, %v6378_v59 }
 0x95e   :  { %5573 = vmatprep.mubr.msk.f32.mxu0 %vm23_vm0, %v6009_v15  ;;  %5600 = vmatprep.mubr.msk.f32.mxu1 %vm23_vm0, %v6009_v15 }
 0xa28   :  { %v5535_v54 = vpop.f32.mrb[50].mxu0  ;;  %v5562_v55 = vpop.f32.mrb[50].mxu1 }
 0xa29   :  { %v2807_v57 = vmul.f32 %v5535_v54, %v4906_v52  ;;  %v2782_v58 = vpop.f32.mrb[51].mxu0  ;;  %v3047_v59 = vpop.f32.mrb[51].mxu1  ;;  %v3072_v1 = vmul.f32 %v5562_v55, %v4923_v56  ;;  %v4942_v52 = vld [vmem:[%s6809_s2 + $0x158] sm:$0xff]  ;;  %v4941_v55 = vld [vmem:[%s6809_s2 + $0x150] sm:$0xff] }
 0xa2a   :  { %v2806_v61 = vmul.f32 %v4905_v53, %v2782_v58  ;;  %v3071_v4 = vmul.f32 %v4922_v60, %v3047_v59  ;;  %v4959_v60 = vld [vmem:[%s6809_s2 + $0x178] sm:$0xff] }
 0xa2b   :  { %v2811_v63 = vadd.f32 %v2807_v57, %v6415_v27 }
 0xa2c   :  { %v2810_v3 = vadd.f32 %v2806_v61, %v6420_v32  ;;  %v5538_v5 = vpop.f32.mrb[52].mxu0  ;;  %v5565_v6 = vpop.f32.mrb[52].mxu1 }
 0xa2d   :  { %v6511_v10 = vadd.f32 %v3072_v1, %v2811_v63  ;;  %v2809_v12 = vmul.f32 %v5538_v5, %v4908_v62  ;;  %v2792_v14 = vpop.f32.mrb[53].mxu0  ;;  %v3057_v16 = vpop.f32.mrb[53].mxu1  ;;  %v3074_v27 = vmul.f32 %v5565_v6, %v4925_v9 }
 0xa2e   :  { %v6516_v19 = vadd.f32 %v3071_v4, %v2810_v3  ;;  %v2808_v20 = vmul.f32 %v4907_v2, %v2792_v14  ;;  %v3073_v29 = vmul.f32 %v4924_v17, %v3057_v16  ;;  %v4958_v2 = vld [vmem:[%s6809_s2 + $0x170] sm:$0xff] }
 0xa2f   :  { %v2813_v26 = vadd.f32 %v2809_v12, %v6424_v40 }
 0xa30   :  { %v2812_v28 = vadd.f32 %v2808_v20, %v6426_v43  ;;  %v3145_v30 = vpop.f32.mrb[54].mxu0  ;;  %v3410_v31 = vpop.f32.mrb[54].mxu1 }
 0xa31   :  { %v6520_v32 = vadd.f32 %v3074_v27, %v2813_v26  ;;  %v5570_v33 = vpop.f32.mrb[55].mxu0  ;;  %5571 = vmatprep.subr.mxu0 %v3145_v30  ;;  %v5597_v34 = vpop.f32.mrb[55].mxu1  ;;  %5598 = vmatprep.subr.mxu1 %v3410_v31 }
 0xa32   :  { %v6522_v35 = vadd.f32 %v3073_v29, %v2812_v28  ;;  %5572 = vmatpush3.msra.mxu0 %v3145_v30  ;;  %5599 = vmatpush3.msra.mxu1 %v3410_v31  ;;  %v4991_v33 = vld [vmem:[%s6809_s2 + $0x1a8] sm:$0xff] }
 0xa33   :  { %5574 = vmatmul.mubr.msk.f32.vlgmr.msra.gmra.mrb[56].mxu0 %vm23_vm0, %v6018_v18  ;;  %5601 = vmatmul.mubr.msk.f32.vlgmr.msra.gmra.mrb[56].mxu1 %vm23_vm0, %v6018_v18 }
 0xa34   :  { %5576 = vmatprep.mubr.msk.f32.mxu0 %vm23_vm0, %v6027_v22  ;;  %5603 = vmatprep.mubr.msk.f32.mxu1 %vm23_vm0, %v6027_v22 }
 0xa35   :  { %5850 = vmatprep.subr.msk.bf16.mxu0 %vm6031_vm2, %v6022_v21  ;;  %5862 = vmatprep.subr.msk.bf16.mxu1 %vm6031_vm2, %v6022_v21 }
 0xa37   :  { %5577 = vmatmul.mubr.msk.f32.gmra.mrb[58].mxu0 %vm23_vm0, %v6046_v24  ;;  %5604 = vmatmul.mubr.msk.f32.gmra.mrb[58].mxu1 %vm23_vm0, %v6046_v24 }
 0xa39   :  { %5853 = vmatpush3.bf16.xpose.msk.msra.mxu0 %vm6031_vm2, %v6022_v21  ;;  %5865 = vmatpush3.bf16.xpose.msk.msra.mxu1 %vm6031_vm2, %v6022_v21 }
 0xa3a   :  { %5856 = vmatprep.subr.msk.bf16.mxu0 %vm6031_vm2, %v6056_v25  ;;  %5868 = vmatprep.subr.msk.bf16.mxu1 %vm6031_vm2, %v6056_v25 }
 0xa41   :  { %5859 = vmatpush3.bf16.xpose.msk.msra.mxu0 %vm6031_vm2, %v6056_v25  ;;  %5871 = vmatpush3.bf16.xpose.msk.msra.mxu1 %vm6031_vm2, %v6056_v25 }
 0xa42   :  { %5620 = vmatprep.subr.mxu0 %v5926_v0  ;;  %5647 = vmatprep.subr.mxu1 %v5926_v0 }
 0xb06   :  { %v5575_v36 = vpop.f32.mrb[56].mxu0  ;;  %v5602_v37 = vpop.f32.mrb[56].mxu1 }
 0xb07   :  { %v3215_v38 = vpop.f32.mrb[57].mxu0  ;;  %v3480_v39 = vpop.f32.mrb[57].mxu1 }
 0xb08   :  { %5587 = vmatprep.mubr.msk.f32.mxu0 %vm23_vm0, %v3215_v38  ;;  %5614 = vmatprep.mubr.msk.f32.mxu1 %vm23_vm0, %v3480_v39  ;;  %v4976_v39 = vld [vmem:[%s6809_s2 + $0x198] sm:$0xff] }
 0xb09   :  { %5588 = vmatmul.mubr.msk.f32.vlgmr.msra.gmra.mrb[60].mxu0 %vm23_vm0, %v5575_v36  ;;  %5615 = vmatmul.mubr.msk.f32.vlgmr.msra.gmra.mrb[60].mxu1 %vm23_vm0, %v5602_v37  ;;  %v4990_v37 = vld [vmem:[%s6809_s2 + $0x1a0] sm:$0xff] }
 0xb0a   :  { %5621 = vmatpush3.msra.mxu0 %v5992_v7  ;;  %5648 = vmatpush3.msra.mxu1 %v5994_v8  ;;  %v5578_v40 = vpop.f32.mrb[58].mxu0  ;;  %v5605_v41 = vpop.f32.mrb[58].mxu1  ;;  %v4940_v7 = vld [vmem:[%s6809_s2 + $0x148] sm:$0xff]  ;;  %v4939_v8 = vld [vmem:[%s6809_s2 + $0x140] sm:$0xff] }
 0xb0b   :  { %v3225_v42 = vpop.f32.mrb[59].mxu0  ;;  %v3490_v43 = vpop.f32.mrb[59].mxu1 }
 0xb0c   :  { %5590 = vmatprep.mubr.msk.f32.mxu0 %vm23_vm0, %v3225_v42  ;;  %5617 = vmatprep.mubr.msk.f32.mxu1 %vm23_vm0, %v3490_v43  ;;  %v4975_v42 = vld [vmem:[%s6809_s2 + $0x190] sm:$0xff] }
 0xb0d   :  { %5591 = vmatmul.mubr.msk.f32.gmra.mrb[62].mxu0 %vm23_vm0, %v5578_v40  ;;  %5618 = vmatmul.mubr.msk.f32.gmra.mrb[62].mxu1 %vm23_vm0, %v5605_v41 }
 0xb0e   :  { %5622 = vmatprep.mubr.msk.f32.mxu0 %vm5927_vm1, %v5926_v0  ;;  %5649 = vmatprep.mubr.msk.f32.mxu1 %vm5927_vm1, %v5926_v0 }
 0xb11   :  { %5623 = vmatmul.mubr.msk.f32.vlgmr.msra.gmra.mrb[64].mxu0 %vm23_vm0, %v6572_v44  ;;  %5650 = vmatmul.mubr.msk.f32.vlgmr.msra.gmra.mrb[64].mxu1 %vm23_vm0, %v6572_v44 }
 0xb12   :  { %5627 = vmatprep.mubr.msk.f32.mxu0 %vm23_vm0, %v6009_v15  ;;  %5654 = vmatprep.mubr.msk.f32.mxu1 %vm23_vm0, %v6009_v15  ;;  %v4956_v15 = vld [vmem:[%s6809_s2 + $0x160] sm:$0xff] }
 0xbdc   :  { %v5589_v45 = vpop.f32.mrb[60].mxu0  ;;  %v5616_v46 = vpop.f32.mrb[60].mxu1 }
 0xbdd   :  { %v3337_v48 = vmul.f32 %v5589_v45, %v4940_v7  ;;  %v3312_v49 = vpop.f32.mrb[61].mxu0  ;;  %v3577_v50 = vpop.f32.mrb[61].mxu1  ;;  %v3602_v54 = vmul.f32 %v5616_v46, %v4957_v47  ;;  %v4993_v45 = vld [vmem:[%s6809_s2 + $0x1b8] sm:$0xff] }
 0xbde   :  { %v3336_v51 = vmul.f32 %v4939_v8, %v3312_v49  ;;  %v3601_v57 = vmul.f32 %v4956_v15, %v3577_v50  ;;  %v4992_v50 = vld [vmem:[%s6809_s2 + $0x1b0] sm:$0xff] }
 0xbdf   :  { %v3341_v53 = vadd.f32 %v3337_v48, %v6511_v10 }
 0xbe0   :  { %v3340_v56 = vadd.f32 %v3336_v51, %v6516_v19  ;;  %v5592_v58 = vpop.f32.mrb[62].mxu0  ;;  %v5619_v59 = vpop.f32.mrb[62].mxu1 }
 0xbe1   :  { %v6609_v61 = vadd.f32 %v3602_v54, %v3341_v53  ;;  %v3339_v62 = vmul.f32 %v5592_v58, %v4942_v52  ;;  %v3322_v63 = vpop.f32.mrb[63].mxu0  ;;  %v3587_v1 = vpop.f32.mrb[63].mxu1  ;;  %v3604_v6 = vmul.f32 %v5619_v59, %v4959_v60 }
 0xbe2   :  { %v6614_v3 = vadd.f32 %v3601_v57, %v3340_v56  ;;  %v3338_v4 = vmul.f32 %v4941_v55, %v3322_v63  ;;  %v3603_v10 = vmul.f32 %v4958_v2, %v3587_v1  ;;  %v5924_v63 = vld [vmem:[%s6808_s3 + $0x10] sm:$0xff]  ;;  %v5925_v1 = vld [vmem:[%s6808_s3 + $0x18] sm:$0xff] }
 0xbe3   :  { %v3343_v5 = vadd.f32 %v3339_v62, %v6520_v32  ;;  %v5923_v62 = vld [vmem:[%s6808_s3 + $0x8] sm:$0xff] }
 0xbe4   :  { %v3342_v9 = vadd.f32 %v3338_v4, %v6522_v35  ;;  %v3710_v12 = vpop.f32.mrb[64].mxu0  ;;  %v3975_v14 = vpop.f32.mrb[64].mxu1 }
 0xbe5   :  { %v6618_v16 = vadd.f32 %v3604_v6, %v3343_v5  ;;  %v5624_v17 = vpop.f32.mrb[65].mxu0  ;;  %5625 = vmatprep.subr.mxu0 %v3710_v12  ;;  %v5651_v19 = vpop.f32.mrb[65].mxu1  ;;  %5652 = vmatprep.subr.mxu1 %v3975_v14 }
 0xbe6   :  { %v6620_v20 = vadd.f32 %v3603_v10, %v3342_v9  ;;  %5626 = vmatpush3.msra.mxu0 %v3710_v12  ;;  %5653 = vmatpush3.msra.mxu1 %v3975_v14 }
 0xbe7   :  { %5628 = vmatmul.mubr.msk.f32.vlgmr.msra.gmra.mrb[66].mxu0 %vm23_vm0, %v6018_v18  ;;  %5655 = vmatmul.mubr.msk.f32.vlgmr.msra.gmra.mrb[66].mxu1 %vm23_vm0, %v6018_v18 }
 0xbe8   :  { %5630 = vmatprep.mubr.msk.f32.mxu0 %vm23_vm0, %v6027_v22  ;;  %5657 = vmatprep.mubr.msk.f32.mxu1 %vm23_vm0, %v6027_v22 }
 0xbe9   :  { %5874 = vmatprep.subr.msk.bf16.mxu0 %vm6031_vm2, %v6022_v21  ;;  %5886 = vmatprep.subr.msk.bf16.mxu1 %vm6031_vm2, %v6022_v21 }
 0xbeb   :  { %5631 = vmatmul.mubr.msk.f32.gmra.mrb[68].mxu0 %vm23_vm0, %v6046_v24  ;;  %5658 = vmatmul.mubr.msk.f32.gmra.mrb[68].mxu1 %vm23_vm0, %v6046_v24 }
 0xbed   :  { %5877 = vmatpush3.bf16.xpose.msk.msra.mxu0 %vm6031_vm2, %v6022_v21  ;;  %5889 = vmatpush3.bf16.xpose.msk.msra.mxu1 %vm6031_vm2, %v6022_v21 }
 0xbee   :  { %5880 = vmatprep.subr.msk.bf16.mxu0 %vm6031_vm2, %v6056_v25  ;;  %5892 = vmatprep.subr.msk.bf16.mxu1 %vm6031_vm2, %v6056_v25 }
 0xbf5   :  { %5883 = vmatpush3.bf16.xpose.msk.msra.mxu0 %vm6031_vm2, %v6056_v25  ;;  %5895 = vmatpush3.bf16.xpose.msk.msra.mxu1 %vm6031_vm2, %v6056_v25 }
 0xbf6   :  { %5674 = vmatprep.subr.mxu0 %v5926_v0  ;;  %5701 = vmatprep.subr.mxu1 %v5926_v0 }
 0xcba   :  { %v5629_v18 = vpop.f32.mrb[66].mxu0  ;;  %v5656_v22 = vpop.f32.mrb[66].mxu1 }
 0xcbb   :  { %v3780_v24 = vpop.f32.mrb[67].mxu0  ;;  %v4045_v26 = vpop.f32.mrb[67].mxu1 }
 0xcbc   :  { %5641 = vmatprep.mubr.msk.f32.mxu0 %vm23_vm0, %v3780_v24  ;;  %5668 = vmatprep.mubr.msk.f32.mxu1 %vm23_vm0, %v4045_v26  ;;  %v5010_v24 = vld [vmem:[%s6809_s2 + $0x1d8] sm:$0xff] }
 0xcbd   :  { %5642 = vmatmul.mubr.msk.f32.vlgmr.msra.gmra.mrb[70].mxu0 %vm23_vm0, %v5629_v18  ;;  %5669 = vmatmul.mubr.msk.f32.vlgmr.msra.gmra.mrb[70].mxu1 %vm23_vm0, %v5656_v22  ;;  %v5024_v18 = vld [vmem:[%s6809_s2 + $0x1e0] sm:$0xff]  ;;  %v5027_v26 = vld [vmem:[%s6809_s2 + $0x1f8] sm:$0xff] }
 0xcbe   :  { %5675 = vmatpush3.msra.mxu0 %v6002_v11  ;;  %5702 = vmatpush3.msra.mxu1 %v6004_v13  ;;  %v5632_v27 = vpop.f32.mrb[68].mxu0  ;;  %v5659_v28 = vpop.f32.mrb[68].mxu1  ;;  %v5922_v11 = vld [vmem:[%s6808_s3] sm:$0xff]  ;;  %v4974_v13 = vld [vmem:[%s6809_s2 + $0x188] sm:$0xff] }
 0xcbf   :  { %v3790_v29 = vpop.f32.mrb[69].mxu0  ;;  %v4055_v30 = vpop.f32.mrb[69].mxu1 }
 0xcc0   :  { %5644 = vmatprep.mubr.msk.f32.mxu0 %vm23_vm0, %v3790_v29  ;;  %5671 = vmatprep.mubr.msk.f32.mxu1 %vm23_vm0, %v4055_v30  ;;  %v5009_v29 = vld [vmem:[%s6809_s2 + $0x1d0] sm:$0xff] }
 0xcc1   :  { %5645 = vmatmul.mubr.msk.f32.gmra.mrb[72].mxu0 %vm23_vm0, %v5632_v27  ;;  %5672 = vmatmul.mubr.msk.f32.gmra.mrb[72].mxu1 %vm23_vm0, %v5659_v28  ;;  %v5026_v30 = vld [vmem:[%s6809_s2 + $0x1f0] sm:$0xff] }
 0xcc2   :  { %5676 = vmatprep.mubr.msk.f32.mxu0 %vm5927_vm1, %v5926_v0  ;;  %5703 = vmatprep.mubr.msk.f32.mxu1 %vm5927_vm1, %v5926_v0  ;;  %v4973_v0 = vld [vmem:[%s6809_s2 + $0x180] sm:$0xff] }
 0xcc5   :  { %5677 = vmatmul.mubr.msk.f32.vlgmr.msra.gmra.mrb[74].mxu0 %vm23_vm0, %v6572_v44  ;;  %5704 = vmatmul.mubr.msk.f32.vlgmr.msra.gmra.mrb[74].mxu1 %vm23_vm0, %v6572_v44 }
 0xcc6   :  { %5681 = vmatprep.mubr.msk.f32.mxu0 %vm23_vm0, %v5922_v11  ;;  %5708 = vmatprep.mubr.msk.f32.mxu1 %vm23_vm0, %v5922_v11 }
 0xd90   :  { %v5643_v31 = vpop.f32.mrb[70].mxu0  ;;  %v5670_v32 = vpop.f32.mrb[70].mxu1 }
 0xd91   :  { %v3902_v34 = vmul.f32 %v5643_v31, %v4974_v13  ;;  %v3877_v35 = vpop.f32.mrb[71].mxu0  ;;  %v4142_v36 = vpop.f32.mrb[71].mxu1  ;;  %v4167_v41 = vmul.f32 %v5670_v32, %v4991_v33 }
 0xd92   :  { %v3901_v38 = vmul.f32 %v4973_v0, %v3877_v35  ;;  %v4166_v44 = vmul.f32 %v4990_v37, %v4142_v36 }
 0xd93   :  { %v3906_v40 = vadd.f32 %v3902_v34, %v6609_v61 }
 0xd94   :  { %v3905_v43 = vadd.f32 %v3901_v38, %v6614_v3  ;;  %v5646_v7 = vpop.f32.mrb[72].mxu0  ;;  %v5673_v8 = vpop.f32.mrb[72].mxu1 }
 0xd95   :  { %v6706_v46 = vadd.f32 %v4167_v41, %v3906_v40  ;;  %v3904_v47 = vmul.f32 %v5646_v7, %v4976_v39  ;;  %v3887_v48 = vpop.f32.mrb[73].mxu0  ;;  %v4152_v49 = vpop.f32.mrb[73].mxu1  ;;  %v4169_v53 = vmul.f32 %v5673_v8, %v4993_v45 }
 0xd96   :  { %v6711_v15 = vadd.f32 %v4166_v44, %v3905_v43  ;;  %v3903_v51 = vmul.f32 %v4975_v42, %v3887_v48  ;;  %v4168_v55 = vmul.f32 %v4992_v50, %v4152_v49 }
 0xd97   :  { %v3908_v52 = vadd.f32 %v3904_v47, %v6618_v16  ;;  %v5025_v16 = vld [vmem:[%s6809_s2 + $0x1e8] sm:$0xff] }
 0xd98   :  { %v3907_v54 = vadd.f32 %v3903_v51, %v6620_v20  ;;  %v4240_v56 = vpop.f32.mrb[74].mxu0  ;;  %v4505_v57 = vpop.f32.mrb[74].mxu1 }
 0xd99   :  { %v6715_v58 = vadd.f32 %v4169_v53, %v3908_v52  ;;  %v5678_v59 = vpop.f32.mrb[75].mxu0  ;;  %5679 = vmatprep.subr.mxu0 %v4240_v56  ;;  %v5705_v60 = vpop.f32.mrb[75].mxu1  ;;  %5706 = vmatprep.subr.mxu1 %v4505_v57 }
 0xd9a   :  { %v6717_v61 = vadd.f32 %v4168_v55, %v3907_v54  ;;  %5680 = vmatpush3.msra.mxu0 %v4240_v56  ;;  %5707 = vmatpush3.msra.mxu1 %v4505_v57 }
 0xd9b   :  { %5682 = vmatmul.mubr.msk.f32.vlgmr.msra.gmra.mrb[76].mxu0 %vm23_vm0, %v5923_v62  ;;  %5709 = vmatmul.mubr.msk.f32.vlgmr.msra.gmra.mrb[76].mxu1 %vm23_vm0, %v5923_v62 }
 0xd9c   :  { %5684 = vmatprep.mubr.msk.f32.mxu0 %vm23_vm0, %v5924_v63  ;;  %5711 = vmatprep.mubr.msk.f32.mxu1 %vm23_vm0, %v5924_v63 }
 0xd9d   :  { %5898 = vmatprep.subr.msk.bf16.mxu0 %vm6031_vm2, %v6022_v21  ;;  %5910 = vmatprep.subr.msk.bf16.mxu1 %vm6031_vm2, %v6022_v21 }
 0xd9f   :  { %5685 = vmatmul.mubr.msk.f32.gmra.mrb[78].mxu0 %vm23_vm0, %v5925_v1  ;;  %5712 = vmatmul.mubr.msk.f32.gmra.mrb[78].mxu1 %vm23_vm0, %v5925_v1 }
 0xda1   :  { %5901 = vmatpush3.bf16.xpose.msk.msra.mxu0 %vm6031_vm2, %v6022_v21  ;;  %5913 = vmatpush3.bf16.xpose.msk.msra.mxu1 %vm6031_vm2, %v6022_v21 }
 0xda2   :  { %5904 = vmatprep.subr.msk.bf16.mxu0 %vm6031_vm2, %v6056_v25  ;;  %5916 = vmatprep.subr.msk.bf16.mxu1 %vm6031_vm2, %v6056_v25 }
 0xda9   :  { %5907 = vmatpush3.bf16.xpose.msk.msra.mxu0 %vm6031_vm2, %v6056_v25  ;;  %5919 = vmatpush3.bf16.xpose.msk.msra.mxu1 %vm6031_vm2, %v6056_v25  ;;  %v5007_v25 = vld [vmem:[%s6809_s2 + $0x1c0] sm:$0xff] }
 0xe6e   :  { %v5683_v2 = vpop.f32.mrb[76].mxu0  ;;  %v5710_v3 = vpop.f32.mrb[76].mxu1 }
 0xe6f   :  { %v4310_v4 = vpop.f32.mrb[77].mxu0  ;;  %v4575_v21 = vpop.f32.mrb[77].mxu1 }
 0xe70   :  { %5695 = vmatprep.mubr.msk.f32.mxu0 %vm23_vm0, %v4310_v4  ;;  %5722 = vmatprep.mubr.msk.f32.mxu1 %vm23_vm0, %v4575_v21 }
 0xe71   :  { %5696 = vmatmul.mubr.msk.f32.vlgmr.msra.gmra.mrb[80].mxu0 %vm23_vm0, %v5683_v2  ;;  %5723 = vmatmul.mubr.msk.f32.vlgmr.msra.gmra.mrb[80].mxu1 %vm23_vm0, %v5710_v3 }
 0xe72   :  { %v5686_v5 = vpop.f32.mrb[78].mxu0  ;;  %v5713_v6 = vpop.f32.mrb[78].mxu1 }
 0xe73   :  { %v4320_v9 = vpop.f32.mrb[79].mxu0  ;;  %v4585_v10 = vpop.f32.mrb[79].mxu1 }
 0xe74   :  { %5698 = vmatprep.mubr.msk.f32.mxu0 %vm23_vm0, %v4320_v9  ;;  %5725 = vmatprep.mubr.msk.f32.mxu1 %vm23_vm0, %v4585_v10 }
 0xe75   :  { %5699 = vmatmul.mubr.msk.f32.gmra.mrb[82].mxu0 %vm23_vm0, %v5686_v5  ;;  %5726 = vmatmul.mubr.msk.f32.gmra.mrb[82].mxu1 %vm23_vm0, %v5713_v6 }
 0xf44   :  { %v5697_v12 = vpop.f32.mrb[80].mxu0  ;;  %v5724_v14 = vpop.f32.mrb[80].mxu1 }
 0xf45   :  { %v4432_v17 = vmul.f32 %v5697_v12, %v5008_v23  ;;  %v4407_v19 = vpop.f32.mrb[81].mxu0  ;;  %v4672_v20 = vpop.f32.mrb[81].mxu1  ;;  %v4697_v28 = vmul.f32 %v5724_v14, %v5025_v16 }
 0xf46   :  { %v4431_v22 = vmul.f32 %v5007_v25, %v4407_v19  ;;  %v4696_v13 = vmul.f32 %v5024_v18, %v4672_v20 }
 0xf47   :  { %v4436_v27 = vadd.f32 %v4432_v17, %v6706_v46 }
 0xf48   :  { %v4435_v11 = vadd.f32 %v4431_v22, %v6711_v15  ;;  %v5700_v0 = vpop.f32.mrb[82].mxu0  ;;  %v5727_v31 = vpop.f32.mrb[82].mxu1 }
 0xf49   :  { %v4701_v32 = vadd.f32 %v4697_v28, %v4436_v27  ;;  %v4434_v33 = vmul.f32 %v5700_v0, %v5010_v24  ;;  %v4417_v34 = vpop.f32.mrb[83].mxu0  ;;  %v4699_v35 = vmul.f32 %v5727_v31, %v5027_v26  ;;  %v4682_v36 = vpop.f32.mrb[83].mxu1 }
 0xf4a   :  { %v4433_v37 = vmul.f32 %v5009_v29, %v4417_v34  ;;  %v4698_v38 = vmul.f32 %v5026_v30, %v4682_v36  ;;  %v4700_v39 = vadd.f32 %v4696_v13, %v4435_v11 }
 0xf4b   :  { %v4438_v40 = vadd.f32 %v4434_v33, %v6715_v58 }
 0xf4c   :  { %v4437_v41 = vadd.f32 %v4433_v37, %v6717_v61  ;;  %4704 = vxpose.xlu0.b32.start [1/4] (short) (narrow) %v4700_v39, 32 }
 0xf4d   :  { %v4703_v42 = vadd.f32 %v4699_v35, %v4438_v40 }
 0xf4e   :  { %v4702_v43 = vadd.f32 %v4698_v38, %v4437_v41 }
 0xf50   :  { %4705 = vxpose.xlu0.b32.cont [2/4] (short) (narrow) %v4701_v32, 32 }
 0xf54   :  { %4706 = vxpose.xlu0.b32.cont [3/4] (short) (narrow) %v4702_v43, 32 }
 0xf58   :  { %4707 = vxpose.xlu0.b32.end [4/4] (short) (narrow) %v4703_v42, 32 }
 0xfcc   :  { %v4720_v44 = vpop.trf.xlu0 }
 0xfcd   :  { %v4736_v7 = vadd.f32 %v4720_v44, %v4700_v39 }
 0xfcf   :  { %v4740_v8 = vmul.f32 0.5, %v4736_v7 }
 0xfd0   :  { %v4721_v45 = vpop.trf.xlu0 }
 0xfd1   :  { %4745 = vst.msk [vmem:[%s6810_s4] sm:$0xff] %vm4744_vm3, %v4740_v8  ;;  %v4737_v46 = vadd.f32 %v4721_v45, %v4701_v32 }
 0xfd3   :  { %v4741_v47 = vmul.f32 0.5, %v4737_v46 }
 0xfd4   :  { %v4722_v48 = vpop.trf.xlu0 }
 0xfd5   :  { %4746 = vst.msk [vmem:[%s6810_s4 + $0x8] sm:$0xff] %vm4744_vm3, %v4741_v47  ;;  %v4738_v49 = vadd.f32 %v4722_v48, %v4702_v43 }
 0xfd7   :  { %v4742_v50 = vmul.f32 0.5, %v4738_v49 }
 0xfd8   :  { %v4723_v15 = vpop.trf.xlu0 }
 0xfd9   :  { %4747 = vst.msk [vmem:[%s6810_s4 + $0x10] sm:$0xff] %vm4744_vm3, %v4742_v50  ;;  %v4739_v51 = vadd.f32 %v4723_v15, %v4703_v42 }
 0xfdb   :  { %v4743_v52 = vmul.f32 0.5, %v4739_v51 }
 0xfdd   :  { %4748 = vst.msk [vmem:[%s6810_s4 + $0x18] sm:$0xff] %vm4744_vm3, %v4743_v52 }

// kernel: mul.32
= control target key start
LH: loop header
LB: loop body
LE: loop exit
PB: predicated region body
PF: predicated region fallthrough
CT: control target
= control target key end

     0   :  { %vm7_vm0 = vcmask 15360   ;;  %s135_s8 = smov 122   ;;  %s136_s9 = smov 124   ;;  %s194_s0 = inlined_call_operand.vmem [shape: f32[2,16], index: 0, kind: input, shape index: {}]   ;;  %s195_s1 = inlined_call_operand.vmem [shape: f32[2,2,2,2,2], index: 1, kind: output, shape index: {}]  }
   0x1   :  { %v4_v0 = vld [vmem:[%s194_s0] sm:$0x3]  ;;  %s134_s0 = smov 126   ;;  %s137_s10 = smov 120  }
   0x2   :  { %5 = vst [vmem:[#allocation1] sm:$0x3] %v4_v0  ;;  %s138_s11 = smov 118   ;;  %s139_s12 = smov 116  }
   0x3   :  { %s140_s13 = smov 114  }
   0x9   :  { %v11_v1 = vld [vmem:[#allocation1] sm:$0x3]  }
   0xa   :  { %v27_v2 = vld [vmem:[#allocation1] sm:$0x3]   ;;  %12 = vrot.lane.b32.xlu0 %v11_v1, %s134_s0 }
   0xb   :  { %28 = vrot.lane.b32.xlu1 %v27_v2, %s135_s8  ;;  %v19_v3 = vld [vmem:[#allocation1] sm:$0x3]  }
   0xc   :  { %v35_v4 = vld [vmem:[#allocation1] sm:$0x3]  }
   0xd   :  { %v6_v5 = vld [vmem:[#allocation1] sm:$0x3]  }
   0xe   :  { %8 = vst.msk [vmem:[#allocation0] sm:$0x1] %vm7_vm0, %v6_v5   ;;  %10 = vst.msk [vmem:[#allocation0 + $0x1f] sm:$0x2] %vm7_vm0, %v6_v5   ;;  %20 = vrot.lane.b32.xlu0 %v19_v3, %s136_s9  ;;  %v43_v6 = vld [vmem:[#allocation1] sm:$0x3]  }
   0xf   :  { %36 = vrot.lane.b32.xlu1 %v35_v4, %s137_s10  ;;  %v51_v7 = vld [vmem:[#allocation1] sm:$0x3]  }
  0x10   :  { %v59_v8 = vld [vmem:[#allocation1] sm:$0x3]  }
  0x12   :  { %44 = vrot.lane.b32.xlu0 %v43_v6, %s138_s11 }
  0x13   :  { %52 = vrot.lane.b32.xlu1 %v51_v7, %s139_s12 }
  0x16   :  { %60 = vrot.lane.b32.xlu0 %v59_v8, %s140_s13 }
  0x7c   :  { %v13_v9 = vpop.permute.xlu0 %12  }
  0x7d   :  { %v29_v10 = vpop.permute.xlu1 %28   ;;  %16 = vst.msk [vmem:[#allocation0 + $0x1] sm:$0x1] %vm7_vm0, %v13_v9   ;;  %18 = vst.msk [vmem:[#allocation0 + $0x20] sm:$0x2] %vm7_vm0, %v13_v9  }
  0x7e   :  { %32 = vst.msk [vmem:[#allocation0 + $0x9] sm:$0x1] %vm7_vm0, %v29_v10   ;;  %34 = vst.msk [vmem:[#allocation0 + $0x28] sm:$0x2] %vm7_vm0, %v29_v10  }
  0x80   :  { %v21_v11 = vpop.permute.xlu0 %20  }
  0x81   :  { %v37_v12 = vpop.permute.xlu1 %36   ;;  %24 = vst.msk [vmem:[#allocation0 + $0x8] sm:$0x1] %vm7_vm0, %v21_v11   ;;  %26 = vst.msk [vmem:[#allocation0 + $0x27] sm:$0x2] %vm7_vm0, %v21_v11  }
  0x82   :  { %40 = vst.msk [vmem:[#allocation0 + $0x10] sm:$0x1] %vm7_vm0, %v37_v12   ;;  %42 = vst.msk [vmem:[#allocation0 + $0x2f] sm:$0x2] %vm7_vm0, %v37_v12  }
  0x84   :  { %v70_v13 = vld [vmem:[#allocation0] sm:$0x3]  ;;  %v45_v15 = vpop.permute.xlu0 %44  }
  0x85   :  { %v91_v14 = vld [vmem:[#allocation0 + $0x20] sm:$0x3]  ;;  %v53_v16 = vpop.permute.xlu1 %52   ;;  %72 = vst [vmem:[%s195_s1] sm:$0x3] %v70_v13  ;;  %48 = vst.msk [vmem:[#allocation0 + $0x11] sm:$0x1] %vm7_vm0, %v45_v15  }
  0x86   :  { %123 = vst [vmem:[%s195_s1 + $0x8] sm:$0x3] %v91_v14  ;;  %50 = vst.msk [vmem:[#allocation0 + $0x30] sm:$0x2] %vm7_vm0, %v45_v15  }
  0x87   :  { %56 = vst.msk [vmem:[#allocation0 + $0x18] sm:$0x1] %vm7_vm0, %v53_v16   ;;  %58 = vst.msk [vmem:[#allocation0 + $0x37] sm:$0x2] %vm7_vm0, %v53_v16  }
  0x88   :  { %v97_v17 = vld [vmem:[#allocation0 + $0x28] sm:$0x3]  ;;  %v61_v19 = vpop.permute.xlu0 %60  }
  0x89   :  { %v74_v18 = vld [vmem:[#allocation0 + $0x8] sm:$0x3]  ;;  %124 = vst [vmem:[%s195_s1 + $0xa] sm:$0x3] %v97_v17  ;;  %64 = vst.msk [vmem:[#allocation0 + $0x19] sm:$0x1] %vm7_vm0, %v61_v19  }
  0x8a   :  { %120 = vst [vmem:[%s195_s1 + $0x2] sm:$0x3] %v74_v18  ;;  %66 = vst.msk [vmem:[#allocation0 + $0x38] sm:$0x2] %vm7_vm0, %v61_v19  }
  0x8c   :  { %v79_v20 = vld [vmem:[#allocation0 + $0x10] sm:$0x3] }
  0x8d   :  { %v103_v21 = vld [vmem:[#allocation0 + $0x30] sm:$0x3]  ;;  %121 = vst [vmem:[%s195_s1 + $0x4] sm:$0x3] %v79_v20 }
  0x8e   :  { %125 = vst [vmem:[%s195_s1 + $0xc] sm:$0x3] %v103_v21 }
  0x90   :  { %v85_v22 = vld [vmem:[#allocation0 + $0x18] sm:$0x3] }
  0x91   :  { %v109_v23 = vld [vmem:[#allocation0 + $0x38] sm:$0x3]  ;;  %122 = vst [vmem:[%s195_s1 + $0x6] sm:$0x3] %v85_v22 }
  0x92   :  { %126 = vst [vmem:[%s195_s1 + $0xe] sm:$0x3] %v109_v23 }

// kernel: ipeps_forward.14
= control target key start
LH: loop header
LB: loop body
LE: loop exit
PB: predicated region body
PF: predicated region fallthrough
CT: control target
= control target key end

     0   :  { %v5051_v8 = vmov 0.0|0.0   ;;  %vm5052_vm0 = vmmov 0   ;;  %v5053_v12 = vmov 0.0   ;;  %s5705_s0 = inlined_call_operand.vmem [shape: f32[32,32], index: 0, kind: input, shape index: {}]   ;;  %s5706_s1 = inlined_call_operand.vmem [shape: f32[32,8], index: 1, kind: input, shape index: {}]   ;;  %s5707_s2 = inlined_call_operand.vmem [shape: f32[4,8,8], index: 2, kind: input, shape index: {}]   ;;  %s5708_s3 = inlined_call_operand.vmem [shape: f32[8,32], index: 3, kind: input, shape index: {}]   ;;  %s5709_s4 = inlined_call_operand.vmem [shape: f32[4,8,8], index: 4, kind: input, shape index: {}]   ;;  %s5710_s5 = inlined_call_operand.vmem [shape: f32[16,32,32], index: 5, kind: input, shape index: {}]   ;;  %s5711_s6 = inlined_call_operand.vmem [shape: f32[8,8], index: 6, kind: output, shape index: {0}]   ;;  %s5712_s7 = inlined_call_operand.vmem [shape: f32[4,8,8], index: 7, kind: output, shape index: {1}]   ;;  %s5713_s8 = inlined_call_operand.hbm [shape: f32[8,32], index: 8, kind: output, shape index: {2}]  }
   0x1   :  { %v27_v0 = vld [vmem:[%s5706_s1] sm:$0xff]  ;;  %v28_v2 = vld [vmem:[%s5706_s1 + $0x8] sm:$0xff]  ;;  %v29_v5 = vld [vmem:[%s5706_s1 + $0x10] sm:$0xff]  ;;  %4862 = vmatprep.subr.bf16.mxu1 %v5051_v8  ;;  %4512 = vmatprep.mubr.msk.f32.mxu1 %vm5052_vm0, %v5053_v12 }
   0x2   :  { %v267_v1 = vld [vmem:[%s5707_s2] sm:$0xff]  ;;  %36 = vxpose.xlu0.b32.start [1/4] (short) (narrow) %v27_v0, 8  ;;  %v4869_v3 = vpack.c.bf16 %v28_v2, %v27_v0  ;;  %v4235_v4 = vld [vmem:[%s5707_s2 + $0x8] sm:$0xff]  ;;  %v30_v6 = vld [vmem:[%s5706_s1 + $0x18] sm:$0xff]  ;;  %4526 = vmatprep.subr.mxu0 %v5053_v12 }
   0x3   :  { %268 = vxpose.xlu1.b32.start.end [1/1] (short) (narrow) %v267_v1, 8  ;;  %v4872_v7 = vpack.c.bf16 %v30_v6, %v29_v5  ;;  %v31_v9 = vld [vmem:[%s5705_s0] sm:$0xff]  ;;  %v32_v10 = vld [vmem:[%s5705_s0 + $0x8] sm:$0xff]  ;;  %v33_v11 = vld [vmem:[%s5705_s0 + $0x10] sm:$0xff]  ;;  %4528 = vmatprep.mubr.msk.f32.mxu0 %vm5052_vm0, %v5053_v12 }
   0x4   :  { %v4863_v13 = vpack.c.bf16 %v32_v10, %v31_v9  ;;  %v34_v14 = vld [vmem:[%s5705_s0 + $0x18] sm:$0xff]  ;;  %v5144_v15 = vld [vmem:[%s5709_s4] sm:$0xff] }
   0x5   :  { %14 = vsyncpa [#allocation3], 0  ;;  %4527 = vmatpush3.msra.mxu0 %v5144_v15  ;;  %v4866_v16 = vpack.c.bf16 %v34_v14, %v33_v11  ;;  %v4244_v17 = vld [vmem:[%s5707_s2 + $0x10] sm:$0xff]  ;;  %vm68_vm1 = vcmask 261120   ;;  %vm250_vm2 = vcmask 64512   ;;  %v4252_v21 = vld [vmem:[%s5707_s2 + $0x18] sm:$0xff] }
   0x6   :  { %37 = vxpose.xlu0.b32.cont [2/4] (short) (narrow) %v28_v2, 8  ;;  %4864 = vmatpush3.bf16.msra.mxu1 %v4863_v13  ;;  %v5180_v22 = vld [vmem:[%s5708_s3] sm:$0xff]  ;;  %v4239_v31 = vld [vmem:[%s5710_s5 + $0x28] sm:$0xff]  ;;  %v4240_v33 = vld [vmem:[%s5710_s5 + $0x30] sm:$0xff]  ;;  %s5055_s9 = smov 120   ;;  %s5056_s10 = smov 104  }
   0x7   :  { %452 = vxpose.xlu1.b32.start.end [1/1] (short) (narrow) %v4235_v4, 8  ;;  %4536 = vmatprep.subr.mxu0 %v5053_v12  ;;  %v4238_v30 = vld [vmem:[%s5710_s5 + $0x20] sm:$0xff]  ;;  %v4241_v34 = vld [vmem:[%s5710_s5 + $0x38] sm:$0xff]  ;;  %v447_v39 = vld [vmem:[%s5710_s5 + $0x8] sm:$0xff]  ;;  %s5057_s11 = smov 16   ;;  %s5058_s12 = smov 8  }
   0x8   :  { %4865 = vmatprep.subr.bf16.mxu1 %v5051_v8  ;;  %v4875_v32 = vpack.c.bf16 %v4239_v31, %v4238_v30  ;;  %v4878_v35 = vpack.c.bf16 %v4241_v34, %v4240_v33  ;;  %v446_v38 = vld [vmem:[%s5710_s5] sm:$0xff]  ;;  %v448_v43 = vld [vmem:[%s5710_s5 + $0x10] sm:$0xff]  ;;  %v449_v44 = vld [vmem:[%s5710_s5 + $0x18] sm:$0xff]  ;;  %s5059_s13 = smov 24   ;;  %vm4058_vm3 = vcmask 130112   ;;  %vm4166_vm4 = vcmask 261312  }
   0x9   :  { %v4881_v42 = vpack.c.bf16 %v447_v39, %v446_v38  ;;  %v4884_v47 = vpack.c.bf16 %v449_v44, %v448_v43  ;;  %v4247_v48 = vld [vmem:[%s5710_s5 + $0x40] sm:$0xff]  ;;  %v4248_v49 = vld [vmem:[%s5710_s5 + $0x48] sm:$0xff]  ;;  %v4249_v54 = vld [vmem:[%s5710_s5 + $0x50] sm:$0xff]  ;;  %vm4112_vm5 = vcmask 195712   ;;  %s5060_s15 = smov 1e-30  }
   0xa   :  { %38 = vxpose.xlu0.b32.cont [3/4] (short) (narrow) %v29_v5, 8  ;;  %4867 = vmatpush3.bf16.msra.mxu1 %v4866_v16  ;;  %v4887_v53 = vpack.c.bf16 %v4248_v49, %v4247_v48  ;;  %v4250_v55 = vld [vmem:[%s5710_s5 + $0x58] sm:$0xff]  ;;  %v4255_v57 = vld [vmem:[%s5710_s5 + $0x60] sm:$0xff]  ;;  %v4256_v58 = vld [vmem:[%s5710_s5 + $0x68] sm:$0xff]  ;;  %s5061_s26 = smov [#allocation2]  }
   0xb   :  { %783 = vxpose.xlu1.b32.start.end [1/1] (short) (narrow) %v4244_v17, 8  ;;  %4868 = vmatprep.subr.bf16.mxu1 %v5051_v8  ;;  %v4890_v56 = vpack.c.bf16 %v4250_v55, %v4249_v54  ;;  %v4893_v59 = vpack.c.bf16 %v4256_v58, %v4255_v57  ;;  %v4257_v61 = vld [vmem:[%s5710_s5 + $0x70] sm:$0xff]  ;;  %v4258_v62 = vld [vmem:[%s5710_s5 + $0x78] sm:$0xff]  ;;  %v5286_v0 = vld [vmem:[%s5709_s4 + $0x8] sm:$0xff]  ;;  %s4219_s27 = sshll.u32 %s5061_s26, 4  ;;  %s4220_s27 = int_to_ptr.vmem [resolvable:$true] %s4219_s27 }
   0xc   :  { %v4896_v1 = vpack.c.bf16 %v4258_v62, %v4257_v61  ;;  %v4263_v4 = vld [vmem:[%s5710_s5 + $0x80] sm:$0xff]  ;;  %v4264_v5 = vld [vmem:[%s5710_s5 + $0x88] sm:$0xff]  ;;  %v4265_v9 = vld [vmem:[%s5710_s5 + $0x90] sm:$0xff]  ;;  %p5032_p1 = scmp.lt.s32.totalorder %s4220_s27, %s4220_s27 }
   0xd   :  { %v4266_v10 = vld [vmem:[%s5710_s5 + $0x98] sm:$0xff]  ;;  %v4270_v16 = vld [vmem:[%s5710_s5 + $0xa0] sm:$0xff]  ;;  %v4271_v17 = vld [vmem:[%s5710_s5 + $0xa8] sm:$0xff] }
   0xe   :  { %39 = vxpose.xlu0.b32.end [4/4] (short) (narrow) %v30_v6, 8  ;;  %v4899_v6 = vpack.c.bf16 %v4264_v5, %v4263_v4  ;;  %v4902_v13 = vpack.c.bf16 %v4266_v10, %v4265_v9  ;;  %v4277_v30 = vld [vmem:[%s5710_s5 + $0xc0] sm:$0xff]  ;;  %v4278_v31 = vld [vmem:[%s5710_s5 + $0xc8] sm:$0xff]  ;;  %v4279_v34 = vld [vmem:[%s5710_s5 + $0xd0] sm:$0xff] }
   0xf   :  { %1042 = vxpose.xlu1.b32.start.end [1/1] (short) (narrow) %v4252_v21, 8  ;;  %v5403_v48 = vld [vmem:[%s5709_s4 + $0x10] sm:$0xff]  ;;  %v4293_v54 = vld [vmem:[%s5710_s5 + $0x108] sm:$0xff]  ;;  %v4295_v58 = vld [vmem:[%s5710_s5 + $0x118] sm:$0xff] }
  0x10   :  { %v4294_v57 = vld [vmem:[%s5710_s5 + $0x110] sm:$0xff]  ;;  %v4302_v4 = vld [vmem:[%s5710_s5 + $0x138] sm:$0xff]  ;;  %v4306_v10 = vld [vmem:[%s5710_s5 + $0x140] sm:$0xff] }
  0x82   :  { %v52_v18 = vpop.trf.xlu0 }
  0x83   :  { %v5155_v19 = vpop.trf.xlu1  ;;  %4513 = vmatmul.mubr.msk.f32.vlgmr.msra.gmra.mrb[0].mxu1 %vm68_vm1, %v52_v18  ;;  %v4905_v18 = vpack.c.bf16 %v4271_v17, %v4270_v16  ;;  %v4309_v16 = vld [vmem:[%s5710_s5 + $0x158] sm:$0xff] }
  0x84   :  { %4529 = vmatmul.mubr.msk.f32.vlgmr.msra.gmra.mrb[0].mxu0 %vm250_vm2, %v5155_v19  ;;  %4870 = vmatpush3.bf16.msra.mxu1 %v4869_v3 }
  0x85   :  { %4537 = vmatpush3.msra.mxu0 %v5144_v15  ;;  %4538 = vmatprep.mubr.msk.f32.mxu0 %vm5052_vm0, %v5053_v12 }
  0x86   :  { %4523 = vmatprep.mubr.msk.f32.mxu1 %vm5052_vm0, %v5053_v12  ;;  %4871 = vmatprep.subr.bf16.mxu1 %v5051_v8 }
  0x87   :  { %v5165_v20 = vpop.trf.xlu1  ;;  %4874 = vmatprep.subr.bf16.mxu0 %v5051_v8 }
  0x88   :  { %4539 = vmatmul.mubr.msk.f32.vlgmr.msra.gmra.mrb[2].mxu0 %vm250_vm2, %v5165_v20  ;;  %4873 = vmatpush3.bf16.msra.mxu1 %v4872_v7 }
  0x89   :  { %4554 = vmatprep.mubr.msk.f32.mxu0 %vm5052_vm0, %v5053_v12  ;;  %4531 = vmatprep.subr.mxu1 %v5053_v12 }
  0x8a   :  { %4876 = vmatpush3.bf16.msra.mxu0 %v4875_v32  ;;  %v4911_v32 = vpack.c.bf16 %v4278_v31, %v4277_v30  ;;  %v4316_v30 = vld [vmem:[%s5710_s5 + $0x178] sm:$0xff] }
  0x8b   :  { %v5194_v29 = vpop.trf.xlu1  ;;  %4877 = vmatprep.subr.bf16.mxu0 %v5051_v8 }
  0x8e   :  { %4879 = vmatpush3.bf16.msra.mxu0 %v4878_v35  ;;  %v4280_v35 = vld [vmem:[%s5710_s5 + $0xd8] sm:$0xff] }
  0x8f   :  { %4880 = vmatprep.subr.bf16.mxu0 %v5051_v8  ;;  %v5245_v52 = vpop.trf.xlu1  ;;  %v4914_v38 = vpack.c.bf16 %v4280_v35, %v4279_v34 }
 0x156   :  { %v138_v23 = vpop.f32.mrb[0].mxu1 }
 0x157   :  { %v369_v24 = vpop.f32.mrb[0].mxu0  ;;  %v4514_v25 = vpop.f32.mrb[1].mxu1  ;;  %4524 = vmatmul.mubr.msk.f32.vlgmr.msra.gmra.mrb[2].mxu1 %vm68_vm1, %v138_v23  ;;  %v4272_v23 = vld [vmem:[%s5710_s5 + $0xb0] sm:$0xff] }
 0x158   :  { %v4530_v26 = vpop.f32.mrb[1].mxu0  ;;  %4532 = vmatpush3.msra.mxu1 %v5180_v22  ;;  %4533 = vmatprep.mubr.msk.f32.mxu1 %vm5052_vm0, %v5053_v12 }
 0x159   :  { %4541 = vmatprep.subr.mxu1 %v5053_v12 }
 0x15b   :  { %v553_v27 = vpop.f32.mrb[2].mxu0  ;;  %4534 = vmatmul.mubr.msk.f32.vlgmr.msra.gmra.mrb[4].mxu1 %vm250_vm2, %v369_v24  ;;  %v4273_v24 = vld [vmem:[%s5710_s5 + $0xb8] sm:$0xff] }
 0x15c   :  { %v4540_v28 = vpop.f32.mrb[3].mxu0  ;;  %4542 = vmatpush3.msra.mxu1 %v5180_v22  ;;  %4543 = vmatprep.mubr.msk.f32.mxu1 %vm5052_vm0, %v5053_v12  ;;  %v4908_v26 = vpack.c.bf16 %v4273_v24, %v4272_v23  ;;  %v4313_v24 = vld [vmem:[%s5710_s5 + $0x160] sm:$0xff] }
 0x15d   :  { %4568 = vmatprep.subr.mxu1 %v5053_v12 }
 0x15f   :  { %4544 = vmatmul.mubr.msk.f32.vlgmr.msra.gmra.mrb[6].mxu1 %vm250_vm2, %v553_v27 }
 0x160   :  { %4569 = vmatpush3.msra.mxu1 %v5144_v15  ;;  %4570 = vmatprep.mubr.msk.f32.mxu1 %vm5052_vm0, %v5053_v12 }
 0x161   :  { %4573 = vmatprep.subr.mxu1 %v5053_v12 }
 0x163   :  { %4571 = vmatmul.mubr.msk.f32.vlgmr.msra.gmra.mrb[8].mxu1 %vm250_vm2, %v5194_v29 }
 0x164   :  { %4574 = vmatpush3.msra.mxu1 %v5180_v22  ;;  %4575 = vmatprep.mubr.msk.f32.mxu1 %vm5052_vm0, %v5053_v12 }
 0x165   :  { %4589 = vmatprep.subr.mxu1 %v5053_v12 }
 0x22a   :  { %v5219_v36 = vpop.f32.mrb[2].mxu1 }
 0x22b   :  { %v4525_v37 = vpop.f32.mrb[3].mxu1 }
 0x22e   :  { %v442_v40 = vpop.f32.mrb[4].mxu1 }
 0x22f   :  { %v4535_v41 = vpop.f32.mrb[5].mxu1 }
 0x230   :  { %v4284_v41 = vld [vmem:[%s5710_s5 + $0xe0] sm:$0xff] }
 0x232   :  { %v626_v45 = vpop.f32.mrb[6].mxu1 }
 0x233   :  { %v4545_v46 = vpop.f32.mrb[7].mxu1  ;;  %4555 = vmatmul.mubr.msk.f32.vlgmr.msra.gmra.mrb[4].mxu0 %vm68_vm1, %v626_v45  ;;  %v4286_v45 = vld [vmem:[%s5710_s5 + $0xf0] sm:$0xff] }
 0x234   :  { %4882 = vmatpush3.bf16.msra.mxu0 %v4881_v42  ;;  %4565 = vmatprep.mubr.msk.f32.mxu0 %vm5052_vm0, %v5053_v12  ;;  %v4285_v42 = vld [vmem:[%s5710_s5 + $0xe8] sm:$0xff]  ;;  %v4287_v46 = vld [vmem:[%s5710_s5 + $0xf8] sm:$0xff] }
 0x235   :  { %4883 = vmatprep.subr.bf16.mxu0 %v5051_v8  ;;  %v4917_v43 = vpack.c.bf16 %v4285_v42, %v4284_v41  ;;  %v4920_v49 = vpack.c.bf16 %v4287_v46, %v4286_v45  ;;  %v4324_v41 = vld [vmem:[%s5710_s5 + $0x198] sm:$0xff]  ;;  %v4328_v46 = vld [vmem:[%s5710_s5 + $0x1a0] sm:$0xff] }
 0x236   :  { %v884_v50 = vpop.f32.mrb[8].mxu1 }
 0x237   :  { %v4572_v51 = vpop.f32.mrb[9].mxu1  ;;  %4576 = vmatmul.mubr.msk.f32.vlgmr.msra.gmra.mrb[10].mxu1 %vm250_vm2, %v884_v50 }
 0x238   :  { %4590 = vmatpush3.msra.mxu1 %v5144_v15  ;;  %4885 = vmatpush3.bf16.msra.mxu0 %v4884_v47 }
 0x239   :  { %4591 = vmatprep.mubr.msk.f32.mxu1 %vm5052_vm0, %v5053_v12  ;;  %4886 = vmatprep.subr.bf16.mxu0 %v5051_v8 }
 0x23a   :  { %4594 = vmatprep.subr.mxu1 %v5053_v12 }
 0x23b   :  { %4566 = vmatmul.mubr.msk.f32.vlgmr.msra.gmra.mrb[4].mxu0 %vm68_vm1, %v442_v40  ;;  %4592 = vmatmul.mubr.msk.f32.vlgmr.msra.gmra.mrb[12].mxu1 %vm250_vm2, %v5245_v52 }
 0x23c   :  { %4888 = vmatpush3.bf16.msra.mxu0 %v4887_v53  ;;  %4586 = vmatprep.mubr.msk.f32.mxu0 %vm5052_vm0, %v5053_v12  ;;  %v4292_v53 = vld [vmem:[%s5710_s5 + $0x100] sm:$0xff] }
 0x23d   :  { %4889 = vmatprep.subr.bf16.mxu0 %v5051_v8  ;;  %4595 = vmatpush3.msra.mxu1 %v5180_v22  ;;  %v4923_v55 = vpack.c.bf16 %v4293_v54, %v4292_v53 }
 0x23e   :  { %4596 = vmatprep.mubr.msk.f32.mxu1 %vm5052_vm0, %v5053_v12  ;;  %4610 = vmatprep.subr.mxu1 %v5053_v12 }
 0x240   :  { %4891 = vmatpush3.bf16.msra.mxu0 %v4890_v56 }
 0x241   :  { %4892 = vmatprep.subr.bf16.mxu0 %v5051_v8 }
 0x30a   :  { %v957_v60 = vpop.f32.mrb[10].mxu1 }
 0x30b   :  { %v4577_v63 = vpop.f32.mrb[11].mxu1  ;;  %4587 = vmatmul.mubr.msk.f32.vlgmr.msra.gmra.mrb[4].mxu0 %vm68_vm1, %v957_v60  ;;  %v4926_v60 = vpack.c.bf16 %v4295_v58, %v4294_v57  ;;  %v4336_v57 = vld [vmem:[%s5710_s5 + $0x1c8] sm:$0xff] }
 0x30c   :  { %4894 = vmatpush3.bf16.msra.mxu0 %v4893_v59  ;;  %4607 = vmatprep.mubr.msk.f32.mxu0 %vm5052_vm0, %v5053_v12  ;;  %v4299_v63 = vld [vmem:[%s5710_s5 + $0x120] sm:$0xff] }
 0x30d   :  { %4895 = vmatprep.subr.bf16.mxu0 %v5051_v8 }
 0x30e   :  { %v1143_v2 = vpop.f32.mrb[12].mxu1 }
 0x30f   :  { %v4593_v3 = vpop.f32.mrb[13].mxu1  ;;  %4597 = vmatmul.mubr.msk.f32.vlgmr.msra.gmra.mrb[14].mxu1 %vm250_vm2, %v1143_v2 }
 0x310   :  { %4611 = vmatpush3.msra.mxu1 %v5286_v0  ;;  %4612 = vmatprep.mubr.msk.f32.mxu1 %vm5052_vm0, %v5053_v12  ;;  %v4301_v3 = vld [vmem:[%s5710_s5 + $0x130] sm:$0xff] }
 0x311   :  { %4897 = vmatpush3.bf16.msra.mxu0 %v4896_v1  ;;  %4615 = vmatprep.subr.mxu1 %v5053_v12 }
 0x312   :  { %4898 = vmatprep.subr.bf16.mxu0 %v5051_v8 }
 0x313   :  { %4613 = vmatmul.mubr.msk.f32.vlgmr.msra.gmra.mrb[16].mxu1 %vm250_vm2, %v5155_v19 }
 0x314   :  { %4616 = vmatpush3.msra.mxu1 %v5180_v22  ;;  %4617 = vmatprep.mubr.msk.f32.mxu1 %vm5052_vm0, %v5053_v12 }
 0x315   :  { %4631 = vmatprep.subr.mxu1 %v5053_v12 }
 0x3e2   :  { %v1216_v7 = vpop.f32.mrb[14].mxu1 }
 0x3e3   :  { %v4598_v11 = vpop.f32.mrb[15].mxu1  ;;  %4608 = vmatmul.mubr.msk.f32.vlgmr.msra.gmra.mrb[4].mxu0 %vm68_vm1, %v1216_v7 }
 0x3e4   :  { %4900 = vmatpush3.bf16.msra.mxu0 %v4899_v6  ;;  %4628 = vmatprep.mubr.msk.f32.mxu0 %vm5052_vm0, %v5053_v12  ;;  %v4932_v6 = vpack.c.bf16 %v4302_v4, %v4301_v3  ;;  %v4307_v11 = vld [vmem:[%s5710_s5 + $0x148] sm:$0xff]  ;;  %v4344_v4 = vld [vmem:[%s5710_s5 + $0x1f0] sm:$0xff] }
 0x3e5   :  { %4901 = vmatprep.subr.bf16.mxu0 %v5051_v8 }
 0x3e6   :  { %v1367_v14 = vpop.f32.mrb[16].mxu1 }
 0x3e7   :  { %v4614_v15 = vpop.f32.mrb[17].mxu1  ;;  %4618 = vmatmul.mubr.msk.f32.vlgmr.msra.gmra.mrb[18].mxu1 %vm250_vm2, %v1367_v14 }
 0x3e8   :  { %4632 = vmatpush3.msra.mxu1 %v5286_v0  ;;  %4633 = vmatprep.mubr.msk.f32.mxu1 %vm5052_vm0, %v5053_v12  ;;  %v4308_v15 = vld [vmem:[%s5710_s5 + $0x150] sm:$0xff] }
 0x3e9   :  { %4903 = vmatpush3.bf16.msra.mxu0 %v4902_v13  ;;  %4636 = vmatprep.subr.mxu1 %v5053_v12  ;;  %v4935_v13 = vpack.c.bf16 %v4307_v11, %v4306_v10 }
 0x3ea   :  { %4904 = vmatprep.subr.bf16.mxu0 %v5051_v8 }
 0x3eb   :  { %4634 = vmatmul.mubr.msk.f32.vlgmr.msra.gmra.mrb[20].mxu1 %vm250_vm2, %v5165_v20 }
 0x3ec   :  { %4637 = vmatpush3.msra.mxu1 %v5180_v22  ;;  %4638 = vmatprep.mubr.msk.f32.mxu1 %vm5052_vm0, %v5053_v12 }
 0x3ed   :  { %4652 = vmatprep.subr.mxu1 %v5053_v12 }
 0x4ba   :  { %v1440_v21 = vpop.f32.mrb[18].mxu1 }
 0x4bb   :  { %v4619_v25 = vpop.f32.mrb[19].mxu1  ;;  %4629 = vmatmul.mubr.msk.f32.vlgmr.msra.gmra.mrb[4].mxu0 %vm68_vm1, %v1440_v21 }
 0x4bc   :  { %4906 = vmatpush3.bf16.msra.mxu0 %v4905_v18  ;;  %4649 = vmatprep.mubr.msk.f32.mxu0 %vm5052_vm0, %v5053_v12  ;;  %v4938_v18 = vpack.c.bf16 %v4309_v16, %v4308_v15  ;;  %v4314_v25 = vld [vmem:[%s5710_s5 + $0x168] sm:$0xff] }
 0x4bd   :  { %4907 = vmatprep.subr.bf16.mxu0 %v5051_v8 }
 0x4be   :  { %v1589_v27 = vpop.f32.mrb[20].mxu1 }
 0x4bf   :  { %v4635_v28 = vpop.f32.mrb[21].mxu1  ;;  %4639 = vmatmul.mubr.msk.f32.vlgmr.msra.gmra.mrb[22].mxu1 %vm250_vm2, %v1589_v27 }
 0x4c0   :  { %4653 = vmatpush3.msra.mxu1 %v5286_v0  ;;  %4654 = vmatprep.mubr.msk.f32.mxu1 %vm5052_vm0, %v5053_v12  ;;  %v4315_v28 = vld [vmem:[%s5710_s5 + $0x170] sm:$0xff] }
 0x4c1   :  { %4909 = vmatpush3.bf16.msra.mxu0 %v4908_v26  ;;  %4657 = vmatprep.subr.mxu1 %v5053_v12  ;;  %v4941_v26 = vpack.c.bf16 %v4314_v25, %v4313_v24 }
 0x4c2   :  { %4910 = vmatprep.subr.bf16.mxu0 %v5051_v8 }
 0x4c3   :  { %4655 = vmatmul.mubr.msk.f32.vlgmr.msra.gmra.mrb[24].mxu1 %vm250_vm2, %v5194_v29 }
 0x4c4   :  { %4658 = vmatpush3.msra.mxu1 %v5180_v22  ;;  %4659 = vmatprep.mubr.msk.f32.mxu1 %vm5052_vm0, %v5053_v12 }
 0x4c5   :  { %4673 = vmatprep.subr.mxu1 %v5053_v12 }
 0x592   :  { %v1662_v33 = vpop.f32.mrb[22].mxu1 }
 0x593   :  { %v4640_v37 = vpop.f32.mrb[23].mxu1  ;;  %4650 = vmatmul.mubr.msk.f32.vlgmr.msra.gmra.mrb[4].mxu0 %vm68_vm1, %v1662_v33  ;;  %v4944_v33 = vpack.c.bf16 %v4316_v30, %v4315_v28 }
 0x594   :  { %4912 = vmatpush3.bf16.msra.mxu0 %v4911_v32  ;;  %4670 = vmatprep.mubr.msk.f32.mxu0 %vm5052_vm0, %v5053_v12  ;;  %v5520_v32 = vld [vmem:[%s5709_s4 + $0x18] sm:$0xff]  ;;  %v4321_v37 = vld [vmem:[%s5710_s5 + $0x180] sm:$0xff] }
 0x595   :  { %4913 = vmatprep.subr.bf16.mxu0 %v5051_v8 }
 0x596   :  { %v1811_v39 = vpop.f32.mrb[24].mxu1 }
 0x597   :  { %v4656_v40 = vpop.f32.mrb[25].mxu1  ;;  %4660 = vmatmul.mubr.msk.f32.vlgmr.msra.gmra.mrb[26].mxu1 %vm250_vm2, %v1811_v39 }
 0x598   :  { %4674 = vmatpush3.msra.mxu1 %v5286_v0  ;;  %4675 = vmatprep.mubr.msk.f32.mxu1 %vm5052_vm0, %v5053_v12  ;;  %v4300_v0 = vld [vmem:[%s5710_s5 + $0x128] sm:$0xff] }
 0x599   :  { %4915 = vmatpush3.bf16.msra.mxu0 %v4914_v38  ;;  %4678 = vmatprep.subr.mxu1 %v5053_v12  ;;  %v4929_v1 = vpack.c.bf16 %v4300_v0, %v4299_v63  ;;  %v4322_v38 = vld [vmem:[%s5710_s5 + $0x188] sm:$0xff] }
 0x59a   :  { %4916 = vmatprep.subr.bf16.mxu0 %v5051_v8  ;;  %v4947_v39 = vpack.c.bf16 %v4322_v38, %v4321_v37 }
 0x59b   :  { %4676 = vmatmul.mubr.msk.f32.vlgmr.msra.gmra.mrb[28].mxu1 %vm250_vm2, %v5245_v52 }
 0x59c   :  { %4679 = vmatpush3.msra.mxu1 %v5180_v22  ;;  %4680 = vmatprep.mubr.msk.f32.mxu1 %vm5052_vm0, %v5053_v12 }
 0x59d   :  { %4694 = vmatprep.subr.mxu1 %v5053_v12 }
 0x66a   :  { %v1884_v44 = vpop.f32.mrb[26].mxu1 }
 0x66b   :  { %v4661_v47 = vpop.f32.mrb[27].mxu1  ;;  %4671 = vmatmul.mubr.msk.f32.vlgmr.msra.gmra.mrb[4].mxu0 %vm68_vm1, %v1884_v44 }
 0x66c   :  { %4918 = vmatpush3.bf16.msra.mxu0 %v4917_v43  ;;  %4691 = vmatprep.mubr.msk.f32.mxu0 %vm5052_vm0, %v5053_v12  ;;  %v4329_v47 = vld [vmem:[%s5710_s5 + $0x1a8] sm:$0xff] }
 0x66d   :  { %4919 = vmatprep.subr.bf16.mxu0 %v5051_v8 }
 0x66e   :  { %v2033_v50 = vpop.f32.mrb[28].mxu1 }
 0x66f   :  { %v4677_v51 = vpop.f32.mrb[29].mxu1  ;;  %4681 = vmatmul.mubr.msk.f32.vlgmr.msra.gmra.mrb[30].mxu1 %vm250_vm2, %v2033_v50  ;;  %v4331_v50 = vld [vmem:[%s5710_s5 + $0x1b8] sm:$0xff] }
 0x670   :  { %4695 = vmatpush3.msra.mxu1 %v5403_v48  ;;  %4696 = vmatprep.mubr.msk.f32.mxu1 %vm5052_vm0, %v5053_v12 }
 0x671   :  { %4921 = vmatpush3.bf16.msra.mxu0 %v4920_v49  ;;  %4699 = vmatprep.subr.mxu1 %v5053_v12 }
 0x672   :  { %4922 = vmatprep.subr.bf16.mxu0 %v5051_v8 }
 0x673   :  { %4697 = vmatmul.mubr.msk.f32.vlgmr.msra.gmra.mrb[32].mxu1 %vm250_vm2, %v5155_v19 }
 0x674   :  { %4700 = vmatpush3.msra.mxu1 %v5180_v22  ;;  %4701 = vmatprep.mubr.msk.f32.mxu1 %vm5052_vm0, %v5053_v12 }
 0x675   :  { %4715 = vmatprep.subr.mxu1 %v5053_v12 }
 0x742   :  { %v2106_v56 = vpop.f32.mrb[30].mxu1 }
 0x743   :  { %v4682_v59 = vpop.f32.mrb[31].mxu1  ;;  %4692 = vmatmul.mubr.msk.f32.vlgmr.msra.gmra.mrb[4].mxu0 %vm68_vm1, %v2106_v56  ;;  %v4335_v56 = vld [vmem:[%s5710_s5 + $0x1c0] sm:$0xff] }
 0x744   :  { %4924 = vmatpush3.bf16.msra.mxu0 %v4923_v55  ;;  %4712 = vmatprep.mubr.msk.f32.mxu0 %vm5052_vm0, %v5053_v12  ;;  %v4959_v58 = vpack.c.bf16 %v4336_v57, %v4335_v56 }
 0x745   :  { %4925 = vmatprep.subr.bf16.mxu0 %v5051_v8 }
 0x746   :  { %v2257_v61 = vpop.f32.mrb[32].mxu1 }
 0x747   :  { %v4698_v62 = vpop.f32.mrb[33].mxu1  ;;  %4702 = vmatmul.mubr.msk.f32.vlgmr.msra.gmra.mrb[34].mxu1 %vm250_vm2, %v2257_v61 }
 0x748   :  { %4716 = vmatpush3.msra.mxu1 %v5403_v48  ;;  %4717 = vmatprep.mubr.msk.f32.mxu1 %vm5052_vm0, %v5053_v12 }
 0x749   :  { %4927 = vmatpush3.bf16.msra.mxu0 %v4926_v60  ;;  %4720 = vmatprep.subr.mxu1 %v5053_v12  ;;  %v4338_v60 = vld [vmem:[%s5710_s5 + $0x1d8] sm:$0xff] }
 0x74a   :  { %4928 = vmatprep.subr.bf16.mxu0 %v5051_v8 }
 0x74b   :  { %4718 = vmatmul.mubr.msk.f32.vlgmr.msra.gmra.mrb[36].mxu1 %vm250_vm2, %v5165_v20 }
 0x74c   :  { %4721 = vmatpush3.msra.mxu1 %v5180_v22  ;;  %4722 = vmatprep.mubr.msk.f32.mxu1 %vm5052_vm0, %v5053_v12 }
 0x74d   :  { %4736 = vmatprep.subr.mxu1 %v5053_v12 }
 0x81a   :  { %v2330_v2 = vpop.f32.mrb[34].mxu1 }
 0x81b   :  { %v4703_v5 = vpop.f32.mrb[35].mxu1  ;;  %4713 = vmatmul.mubr.msk.f32.vlgmr.msra.gmra.mrb[4].mxu0 %vm68_vm1, %v2330_v2  ;;  %v4343_v2 = vld [vmem:[%s5710_s5 + $0x1e8] sm:$0xff] }
 0x81c   :  { %4930 = vmatpush3.bf16.msra.mxu0 %v4929_v1  ;;  %4733 = vmatprep.mubr.msk.f32.mxu0 %vm5052_vm0, %v5053_v12  ;;  %v4342_v1 = vld [vmem:[%s5710_s5 + $0x1e0] sm:$0xff] }
 0x81d   :  { %4931 = vmatprep.subr.bf16.mxu0 %v5051_v8  ;;  %v4965_v3 = vpack.c.bf16 %v4343_v2, %v4342_v1 }
 0x81e   :  { %v2479_v7 = vpop.f32.mrb[36].mxu1 }
 0x81f   :  { %v4719_v9 = vpop.f32.mrb[37].mxu1  ;;  %4723 = vmatmul.mubr.msk.f32.vlgmr.msra.gmra.mrb[38].mxu1 %vm250_vm2, %v2479_v7 }
 0x820   :  { %4737 = vmatpush3.msra.mxu1 %v5403_v48  ;;  %4738 = vmatprep.mubr.msk.f32.mxu1 %vm5052_vm0, %v5053_v12 }
 0x821   :  { %4933 = vmatpush3.bf16.msra.mxu0 %v4932_v6  ;;  %4741 = vmatprep.subr.mxu1 %v5053_v12 }
 0x822   :  { %4934 = vmatprep.subr.bf16.mxu0 %v5051_v8 }
 0x823   :  { %4739 = vmatmul.mubr.msk.f32.vlgmr.msra.gmra.mrb[40].mxu1 %vm250_vm2, %v5194_v29 }
 0x824   :  { %4742 = vmatpush3.msra.mxu1 %v5180_v22  ;;  %4743 = vmatprep.mubr.msk.f32.mxu1 %vm5052_vm0, %v5053_v12 }
 0x825   :  { %4757 = vmatprep.subr.mxu1 %v5053_v12 }
 0x8f2   :  { %v2552_v14 = vpop.f32.mrb[38].mxu1 }
 0x8f3   :  { %v4724_v17 = vpop.f32.mrb[39].mxu1  ;;  %4734 = vmatmul.mubr.msk.f32.vlgmr.msra.gmra.mrb[4].mxu0 %vm68_vm1, %v2552_v14 }
 0x8f4   :  { %4936 = vmatpush3.bf16.msra.mxu0 %v4935_v13  ;;  %4754 = vmatprep.mubr.msk.f32.mxu0 %vm5052_vm0, %v5053_v12 }
 0x8f5   :  { %4937 = vmatprep.subr.bf16.mxu0 %v5051_v8 }
 0x8f6   :  { %v2701_v21 = vpop.f32.mrb[40].mxu1 }
 0x8f7   :  { %v4740_v23 = vpop.f32.mrb[41].mxu1  ;;  %4744 = vmatmul.mubr.msk.f32.vlgmr.msra.gmra.mrb[42].mxu1 %vm250_vm2, %v2701_v21 }
 0x8f8   :  { %4758 = vmatpush3.msra.mxu1 %v5403_v48  ;;  %4759 = vmatprep.mubr.msk.f32.mxu1 %vm5052_vm0, %v5053_v12  ;;  %v4953_v48 = vpack.c.bf16 %v4329_v47, %v4328_v46 }
 0x8f9   :  { %4939 = vmatpush3.bf16.msra.mxu0 %v4938_v18  ;;  %4762 = vmatprep.subr.mxu1 %v5053_v12 }
 0x8fa   :  { %4940 = vmatprep.subr.bf16.mxu0 %v5051_v8 }
 0x8fb   :  { %4760 = vmatmul.mubr.msk.f32.vlgmr.msra.gmra.mrb[44].mxu1 %vm250_vm2, %v5245_v52 }
 0x8fc   :  { %4763 = vmatpush3.msra.mxu1 %v5180_v22  ;;  %4764 = vmatprep.mubr.msk.f32.mxu1 %vm5052_vm0, %v5053_v12 }
 0x8fd   :  { %4778 = vmatprep.subr.mxu1 %v5053_v12 }
 0x9ca   :  { %v2774_v27 = vpop.f32.mrb[42].mxu1 }
 0x9cb   :  { %v4745_v31 = vpop.f32.mrb[43].mxu1  ;;  %4755 = vmatmul.mubr.msk.f32.vlgmr.msra.gmra.mrb[4].mxu0 %vm68_vm1, %v2774_v27 }
 0x9cc   :  { %4942 = vmatpush3.bf16.msra.mxu0 %v4941_v26  ;;  %4775 = vmatprep.mubr.msk.f32.mxu0 %vm5052_vm0, %v5053_v12 }
 0x9cd   :  { %4943 = vmatprep.subr.bf16.mxu0 %v5051_v8 }
 0x9ce   :  { %v2923_v34 = vpop.f32.mrb[44].mxu1 }
 0x9cf   :  { %v4761_v35 = vpop.f32.mrb[45].mxu1  ;;  %4765 = vmatmul.mubr.msk.f32.vlgmr.msra.gmra.mrb[46].mxu1 %vm250_vm2, %v2923_v34 }
 0x9d0   :  { %4779 = vmatpush3.msra.mxu1 %v5520_v32  ;;  %4780 = vmatprep.mubr.msk.f32.mxu1 %vm5052_vm0, %v5053_v12 }
 0x9d1   :  { %4945 = vmatpush3.bf16.msra.mxu0 %v4944_v33  ;;  %4783 = vmatprep.subr.mxu1 %v5053_v12 }
 0x9d2   :  { %4946 = vmatprep.subr.bf16.mxu0 %v5051_v8 }
 0x9d3   :  { %4781 = vmatmul.mubr.msk.f32.vlgmr.msra.gmra.mrb[48].mxu1 %vm250_vm2, %v5155_v19  ;;  %v4323_v19 = vld [vmem:[%s5710_s5 + $0x190] sm:$0xff] }
 0x9d4   :  { %4784 = vmatpush3.msra.mxu1 %v5180_v22  ;;  %4785 = vmatprep.mubr.msk.f32.mxu1 %vm5052_vm0, %v5053_v12  ;;  %v4950_v43 = vpack.c.bf16 %v4324_v41, %v4323_v19 }
 0x9d5   :  { %4799 = vmatprep.subr.mxu1 %v5053_v12 }
 0xaa2   :  { %v2996_v40 = vpop.f32.mrb[46].mxu1 }
 0xaa3   :  { %v4766_v42 = vpop.f32.mrb[47].mxu1  ;;  %4776 = vmatmul.mubr.msk.f32.vlgmr.msra.gmra.mrb[4].mxu0 %vm68_vm1, %v2996_v40 }
 0xaa4   :  { %4948 = vmatpush3.bf16.msra.mxu0 %v4947_v39  ;;  %4796 = vmatprep.mubr.msk.f32.mxu0 %vm5052_vm0, %v5053_v12 }
 0xaa5   :  { %4949 = vmatprep.subr.bf16.mxu0 %v5051_v8 }
 0xaa6   :  { %v3147_v44 = vpop.f32.mrb[48].mxu1 }
 0xaa7   :  { %v4782_v45 = vpop.f32.mrb[49].mxu1  ;;  %4786 = vmatmul.mubr.msk.f32.vlgmr.msra.gmra.mrb[50].mxu1 %vm250_vm2, %v3147_v44 }
 0xaa8   :  { %4800 = vmatpush3.msra.mxu1 %v5520_v32  ;;  %4801 = vmatprep.mubr.msk.f32.mxu1 %vm5052_vm0, %v5053_v12 }
 0xaa9   :  { %4951 = vmatpush3.bf16.msra.mxu0 %v4950_v43  ;;  %4804 = vmatprep.subr.mxu1 %v5053_v12 }
 0xaaa   :  { %4952 = vmatprep.subr.bf16.mxu0 %v5051_v8 }
 0xaab   :  { %4802 = vmatmul.mubr.msk.f32.vlgmr.msra.gmra.mrb[52].mxu1 %vm250_vm2, %v5165_v20  ;;  %v4330_v20 = vld [vmem:[%s5710_s5 + $0x1b0] sm:$0xff] }
 0xaac   :  { %4805 = vmatpush3.msra.mxu1 %v5180_v22  ;;  %4806 = vmatprep.mubr.msk.f32.mxu1 %vm5052_vm0, %v5053_v12  ;;  %v4956_v53 = vpack.c.bf16 %v4331_v50, %v4330_v20 }
 0xaad   :  { %4820 = vmatprep.subr.mxu1 %v5053_v12 }
 0xb7a   :  { %v3220_v49 = vpop.f32.mrb[50].mxu1 }
 0xb7b   :  { %v4787_v51 = vpop.f32.mrb[51].mxu1  ;;  %4797 = vmatmul.mubr.msk.f32.vlgmr.msra.gmra.mrb[4].mxu0 %vm68_vm1, %v3220_v49 }
 0xb7c   :  { %4954 = vmatpush3.bf16.msra.mxu0 %v4953_v48  ;;  %4817 = vmatprep.mubr.msk.f32.mxu0 %vm5052_vm0, %v5053_v12 }
 0xb7d   :  { %4955 = vmatprep.subr.bf16.mxu0 %v5051_v8 }
 0xb7e   :  { %v3369_v54 = vpop.f32.mrb[52].mxu1 }
 0xb7f   :  { %v4803_v55 = vpop.f32.mrb[53].mxu1  ;;  %4807 = vmatmul.mubr.msk.f32.vlgmr.msra.gmra.mrb[54].mxu1 %vm250_vm2, %v3369_v54 }
 0xb80   :  { %4821 = vmatpush3.msra.mxu1 %v5520_v32  ;;  %4822 = vmatprep.mubr.msk.f32.mxu1 %vm5052_vm0, %v5053_v12 }
 0xb81   :  { %4957 = vmatpush3.bf16.msra.mxu0 %v4956_v53  ;;  %4825 = vmatprep.subr.mxu1 %v5053_v12 }
 0xb82   :  { %4958 = vmatprep.subr.bf16.mxu0 %v5051_v8 }
 0xb83   :  { %4823 = vmatmul.mubr.msk.f32.vlgmr.msra.gmra.mrb[56].mxu1 %vm250_vm2, %v5194_v29  ;;  %v4337_v29 = vld [vmem:[%s5710_s5 + $0x1d0] sm:$0xff] }
 0xb84   :  { %4826 = vmatpush3.msra.mxu1 %v5180_v22  ;;  %4827 = vmatprep.mubr.msk.f32.mxu1 %vm5052_vm0, %v5053_v12  ;;  %v4962_v62 = vpack.c.bf16 %v4338_v60, %v4337_v29 }
 0xb85   :  { %4841 = vmatprep.subr.mxu1 %v5053_v12 }
 0xc52   :  { %v3442_v59 = vpop.f32.mrb[54].mxu1 }
 0xc53   :  { %v4808_v61 = vpop.f32.mrb[55].mxu1  ;;  %4818 = vmatmul.mubr.msk.f32.vlgmr.msra.gmra.mrb[4].mxu0 %vm68_vm1, %v3442_v59 }
 0xc54   :  { %4960 = vmatpush3.bf16.msra.mxu0 %v4959_v58  ;;  %4838 = vmatprep.mubr.msk.f32.mxu0 %vm5052_vm0, %v5053_v12 }
 0xc55   :  { %4961 = vmatprep.subr.bf16.mxu0 %v5051_v8 }
 0xc56   :  { %v3591_v63 = vpop.f32.mrb[56].mxu1 }
 0xc57   :  { %v4824_v0 = vpop.f32.mrb[57].mxu1  ;;  %4828 = vmatmul.mubr.msk.f32.vlgmr.msra.gmra.mrb[58].mxu1 %vm250_vm2, %v3591_v63 }
 0xc58   :  { %4842 = vmatpush3.msra.mxu1 %v5520_v32  ;;  %4843 = vmatprep.mubr.msk.f32.mxu1 %vm5052_vm0, %v5053_v12 }
 0xc59   :  { %4963 = vmatpush3.bf16.msra.mxu0 %v4962_v62  ;;  %4846 = vmatprep.subr.mxu1 %v5053_v12 }
 0xc5a   :  { %4964 = vmatprep.subr.bf16.mxu0 %v5051_v8 }
 0xc5b   :  { %4844 = vmatmul.mubr.msk.f32.vlgmr.msra.gmra.mrb[60].mxu1 %vm250_vm2, %v5245_v52 }
 0xc5c   :  { %4847 = vmatpush3.msra.mxu1 %v5180_v22  ;;  %4848 = vmatprep.mubr.msk.f32.mxu1 %vm5052_vm0, %v5053_v12  ;;  %v4345_v22 = vld [vmem:[%s5710_s5 + $0x1f8] sm:$0xff]  ;;  %s5054_s5 = smov 112  }
 0xc5d   :  { %v4968_v6 = vpack.c.bf16 %v4345_v22, %v4344_v4 }
 0xd2a   :  { %v3664_v52 = vpop.f32.mrb[58].mxu1 }
 0xd2b   :  { %v4829_v5 = vpop.f32.mrb[59].mxu1  ;;  %4839 = vmatmul.mubr.msk.f32.vlgmr.msra.gmra.mrb[4].mxu0 %vm68_vm1, %v3664_v52 }
 0xd2c   :  { %4966 = vmatpush3.bf16.msra.mxu0 %v4965_v3  ;;  %4859 = vmatprep.mubr.msk.f32.mxu0 %vm5052_vm0, %v5053_v12 }
 0xd2d   :  { %4967 = vmatprep.subr.bf16.mxu0 %v5051_v8 }
 0xd2e   :  { %v3813_v7 = vpop.f32.mrb[60].mxu1 }
 0xd2f   :  { %v4845_v9 = vpop.f32.mrb[61].mxu1  ;;  %4849 = vmatmul.mubr.msk.f32.vlgmr.msra.gmra.mrb[62].mxu1 %vm250_vm2, %v3813_v7 }
 0xd30   :  { %4969 = vmatpush3.bf16.msra.mxu0 %v4968_v6 }
 0xe02   :  { %v3886_v10 = vpop.f32.mrb[62].mxu1 }
 0xe03   :  { %v4850_v11 = vpop.f32.mrb[63].mxu1  ;;  %4860 = vmatmul.mubr.msk.f32.vlgmr.msra.gmra.mrb[4].mxu0 %vm68_vm1, %v3886_v10 }
 0xed6   :  { %v3964_v13 = vpop.f32.mrb[4].mxu0 }
 0xed7   :  { %4070 = vrot.lane.b32.xlu1 %v3964_v13, %s5054_s5  ;;  %4016 = vrot.lane.b32.xlu0 %v3964_v13, %s5055_s9  ;;  %v4861_v14 = vpop.f32.mrb[5].mxu0 }
 0xedb   :  { %4124 = vrot.lane.b32.xlu1 %v3964_v13, %s5056_s10 }
 0xf49   :  { %v4071_v8 = vpop.permute.xlu1 %4070  ;;  %v4017_v12 = vpop.permute.xlu0 %4016 }
 0xf4a   :  { %4073 = vxpose.xlu0.b32.start.end [1/1] (short) (narrow) %v4071_v8, 8  ;;  %4019 = vxpose.xlu1.b32.start.end [1/1] (short) (narrow) %v4017_v12, 8 }
 0xf4d   :  { %v4125_v15 = vpop.permute.xlu1 %4124 }
 0xf4e   :  { %4127 = vxpose.xlu0.b32.start.end [1/1] (short) (narrow) %v4125_v15, 8 }
 0xfca   :  { %v4089_v16 = vpop.trf.xlu0  ;;  %v4035_v17 = vpop.trf.xlu1 }
 0xfcb   :  { %4106 = vrot.lane.b32.xlu1 %v4089_v16, %s5057_s11  ;;  %4052 = vrot.lane.b32.xlu0 %v4035_v17, %s5058_s12 }
 0xfce   :  { %v4143_v18 = vpop.trf.xlu0 }
 0xfcf   :  { %4160 = vrot.lane.b32.xlu1 %v4143_v18, %s5059_s13 }
 0xfe9   :  { %3969 = vxpose.xlu0.b32.start.end [1/1] (short) (narrow) %v3964_v13, 8 }
 0xff8   :  { %215 = vxpose.xlu1.b32.start.end [1/1] (short) (narrow) %v5219_v36, 8 }
0x103d   :  { %v4107_v21 = vpop.permute.xlu1 %4106  ;;  %v4053_v23 = vpop.permute.xlu0 %4052 }
0x103e   :  { %v4055_v24 = vadd.f32 %v4053_v23, %v3964_v13  ;;  %v4109_v39 = vadd.f32 %v4107_v21, %v3964_v13 }
0x1040   :  { %v5640_v28 = vmul.f32 0.5, %v4055_v24  ;;  %v5653_v42 = vmul.f32 0.5, %v4109_v39 }
0x1041   :  { %v4161_v25 = vpop.permute.xlu1 %4160 }
0x1042   :  { %v4163_v30 = vadd.f32 %v4161_v25, %v3964_v13  ;;  %v4057_v35 = vand.u32 2147483647, %v5640_v28  ;;  %v4111_v46 = vand.u32 2147483647, %v5653_v42 }
0x1044   :  { %v5645_v33 = vmul.f32 0.5, %v4163_v30  ;;  %v4059_v37 = vsel %vm4058_vm3, %v4057_v35, -inf  ;;  %v4113_v47 = vsel %vm4112_vm5, %v4111_v46, -inf }
0x1046   :  { %v4165_v38 = vand.u32 2147483647, %v5645_v33 }
0x1048   :  { %v4167_v19 = vsel %vm4166_vm4, %v4165_v38, -inf }
0x1069   :  { %v3985_v26 = vpop.trf.xlu0 }
0x106a   :  { %v4001_v27 = vadd.f32 %v3985_v26, %v3964_v13 }
0x106c   :  { %v5642_v31 = vmul.f32 0.5, %v4001_v27 }
0x106e   :  { %v4003_v32 = vand.u32 2147483647, %v5642_v31 }
0x1070   :  { %v4004_v34 = vsel %vm250_vm2, %v4003_v32, -inf }
0x1071   :  { %4005 = vmax.xlane.f32.xlu1 %v4004_v34 }
0x1075   :  { %4060 = vmax.xlane.f32.xlu1 %v4059_v37 }
0x1078   :  { %v231_v40 = vpop.trf.xlu1 }
0x1079   :  { %v247_v41 = vadd.f32 %v231_v40, %v5219_v36  ;;  %4168 = vmax.xlane.f32.xlu1 %v4167_v19 }
0x107b   :  { %v5655_v43 = vmul.f32 0.5, %v247_v41 }
0x107d   :  { %v249_v44 = vand.u32 2147483647, %v5655_v43 }
0x107f   :  { %v251_v45 = vsel %vm250_vm2, %v249_v44, -inf }
0x1080   :  { %252 = vmax.xlane.f32.xlu0 %v251_v45 }
0x1084   :  { %4114 = vmax.xlane.f32.xlu0 %v4113_v47 }
0x10fe   :  { %v4006_v48 = vpop.xlane.xlu1 %4005 }
0x10ff   :  { %v4007_v20 = vrot.slane %v4006_v48, 4 }
0x1101   :  { %v4008_v51 = vmax.f32 %v4006_v48, %v4007_v20 }
0x1102   :  { %v4061_v49 = vpop.xlane.xlu1 %4060 }
0x1103   :  { %v4062_v36 = vrot.slane %v4061_v49, 4  ;;  %v4009_v55 = vrot.slane %v4008_v51, 2 }
0x1105   :  { %v4063_v54 = vmax.f32 %v4061_v49, %v4062_v36  ;;  %v4010_v62 = vmax.f32 %v4008_v51, %v4009_v55 }
0x1106   :  { %v4169_v50 = vpop.xlane.xlu1 %4168 }
0x1107   :  { %v4170_v53 = vrot.slane %v4169_v50, 4  ;;  %v4064_v58 = vrot.slane %v4063_v54, 2  ;;  %v4011_v4 = vrot.slane %v4010_v62, 1 }
0x1109   :  { %v4171_v56 = vmax.f32 %v4169_v50, %v4170_v53  ;;  %v4065_v1 = vmax.f32 %v4063_v54, %v4064_v58  ;;  %v4012_v10 = vmax.f32 %v4010_v62, %v4011_v4 }
0x110b   :  { %v4172_v60 = vrot.slane %v4171_v56, 2  ;;  %v4066_v6 = vrot.slane %v4065_v1, 1 }
0x110d   :  { %v253_v57 = vpop.xlane.xlu0 %252  ;;  %v4173_v22 = vmax.f32 %v4171_v56, %v4172_v60  ;;  %v4067_v13 = vmax.f32 %v4065_v1, %v4066_v6 }
0x110e   :  { %v254_v59 = vrot.slane %v253_v57, 4 }
0x110f   :  { %v4174_v11 = vrot.slane %v4173_v22, 1 }
0x1110   :  { %v255_v29 = vmax.f32 %v253_v57, %v254_v59 }
0x1111   :  { %v4115_v61 = vpop.xlane.xlu0 %4114  ;;  %v4175_v12 = vmax.f32 %v4173_v22, %v4174_v11 }
0x1112   :  { %v256_v63 = vrot.slane %v255_v29, 2  ;;  %v4116_v0 = vrot.slane %v4115_v61, 4 }
0x1114   :  { %v4117_v2 = vmax.f32 %v4115_v61, %v4116_v0  ;;  %v257_v3 = vmax.f32 %v255_v29, %v256_v63 }
0x1116   :  { %v4118_v52 = vrot.slane %v4117_v2, 2  ;;  %v258_v5 = vrot.slane %v257_v3, 1 }
0x1118   :  { %v259_v7 = vmax.f32 %v257_v3, %v258_v5  ;;  %v4119_v9 = vmax.f32 %v4117_v2, %v4118_v52 }
0x111a   :  { %5000 = vpush %v259_v7  ;;  %v4120_v14 = vrot.slane %v4119_v9, 1 }
0x111b   :  { %5002 = vpush %v4012_v10 }
0x111c   :  { %5004 = vpush %v4067_v13  ;;  %v4121_v8 = vmax.f32 %v4119_v9, %v4120_v14 }
0x111e   :  { %5006 = vpush %v4121_v8 }
0x111f   :  { %5008 = vpush %v4175_v12 }
0x114b   :  { %s5001_s14 = spop %5000 }
0x114c   :  { %s261_s16 = smax.f32 %s5060_s15, %s5001_s14  ;;  %s5003_s17 = spop %5002 }
0x114d   :  { %v262_v15 = vstv %s261_s16  ;;  %s4014_s18 = smax.f32 %s5060_s15, %s5003_s17  ;;  %s5005_s19 = spop %5004 }
0x114e   :  { %5023 = vrcp.f32 %v262_v15  ;;  %s4069_s20 = smax.f32 %s5005_s19, %s4014_s18 }
0x114f   :  { %s5007_s21 = spop %5006 }
0x1150   :  { %s4123_s22 = smax.f32 %s5007_s21, %s4069_s20  ;;  %s5009_s1 = spop %5008 }
0x1151   :  { %s4177_s23 = smax.f32 %s5009_s1, %s4123_s22 }
0x1152   :  { %v4178_v16 = vstv %s4177_s23 }
0x1153   :  { %5025 = vrcp.f32 %v4178_v16 }
0x1158   :  { %v5024_v17 = vpop.eup %5023 }
0x1159   :  { %v264_v18 = vmul.f32 %v5024_v17, %v5655_v43 }
0x115b   :  { %265 = vst.msk [vmem:[%s5711_s6] sm:$0xff] %vm250_vm2, %v264_v18  ;;  %s5027_s6 = scalar_lea.vmem %s4220_s27, 128 }
0x115c   :  { %p5028_p0 = scmp.ne.s32.totalorder %s4220_s27, %s5027_s6  ;;  %p5033_p2 = scmp.lt.s32.totalorder %s5027_s6, %s5027_s6 }
0x115d   :  { %v5026_v21 = vpop.eup %5025 }
0x115e   :  { %5010 = vpush %v5026_v21  ;;  %p5034_p3 = por %p5033_p2, %p5032_p1 }
0x1160   :  { %p5035_p4 = pnand %p5034_p3, %p5028_p0 }
0x118f   :  { %s5011_s0 = spop %5010 }
0x1190   :  { %v4181_v23 = vstv %s5011_s0 }
0x1191   :  { %v4182_v24 = vmul.f32 %v4181_v23, %v5642_v31  ;;  %v4185_v25 = vmul.f32 %v4181_v23, %v5640_v28  ;;  %v4193_v26 = vmul.f32 %v4181_v23, %v5653_v42  ;;  %v4201_v27 = vmul.f32 %v4181_v23, %v5645_v33 }
0x1193   :  { %4183 = vst.msk [vmem:[%s5712_s7] sm:$0xff] %vm250_vm2, %v4182_v24  ;;  %4184 = vst.msk [vmem:[#allocation2] sm:$0xff] %vm250_vm2, %v4182_v24  ;;  %4195 = vrot.lane.b32.xlu1 %v4193_v26, %s5054_s5  ;;  %4187 = vrot.lane.b32.xlu0 %v4185_v25, %s5055_s9 }
0x1194   :  { %4192 = vst.msk [vmem:[#allocation2] sm:$0xff] %vm4058_vm3, %v4185_v25 }
0x1195   :  { %4200 = vst.msk [vmem:[#allocation2] sm:$0xff] %vm4112_vm5, %v4193_v26 }
0x1196   :  { %4208 = vst.msk [vmem:[#allocation2] sm:$0xff] %vm4166_vm4, %v4201_v27 }
0x1197   :  { %4203 = vrot.lane.b32.xlu1 %v4201_v27, %s5056_s10 }
0x1198   :  { %5038 = shalt.err (!%p5035_p4)
}
0x1199   :  { %s5039_s2 = scalar_lea.hbm %s5713_s8, 128 }
0x119a   :  { %p5040_p5 = scmp.ne.s32.totalorder %s5713_s8, %s5039_s2  ;;  %p5043_p6 = scmp.lt.u32.totalorder %s5039_s2, %s5713_s8 }
0x119c   :  { %p5045_p7 = pnand %p5043_p6, %p5040_p5 }
0x119e   :  { %5048 = shalt.err (!%p5045_p7)
}
0x119f   :  { %4222 = dma.vmem_to_hbm [thread:$0]  %s4220_s27, 128, %s5713_s8, [#allocation3]  }
0x1205   :  { %v4196_v28 = vpop.permute.xlu1 %4195  ;;  %v4188_v30 = vpop.permute.xlu0 %4187 }
0x1206   :  { %4348 = vst.msk [vmem:[%s5712_s7 + $0x10] sm:$0xff] %vm250_vm2, %v4196_v28  ;;  %4347 = vst.msk [vmem:[%s5712_s7 + $0x8] sm:$0xff] %vm250_vm2, %v4188_v30 }
0x1209   :  { %v4204_v31 = vpop.permute.xlu1 %4203 }
0x120a   :  { %4349 = vst.msk [vmem:[%s5712_s7 + $0x18] sm:$0xff] %vm250_vm2, %v4204_v31 }
0x120b   :  { %5049 = dma.done.wait [#allocation3], 128  }
0x120c   :  { %5050 = vsyncadd [#allocation3], 4294967168 }
0x120d   :  { %4230 = vsyncpa [#allocation3], 1 }

// kernel: ipeps_forward.22
= control target key start
LH: loop header
LB: loop body
LE: loop exit
PB: predicated region body
PF: predicated region fallthrough
CT: control target
= control target key end

     0   :  { %v5015_v3 = vmov 0.0|0.0   ;;  %vm5016_vm0 = vmmov 0   ;;  %v5017_v4 = vmov 0.0   ;;  %vm67_vm1 = vcmask 261120   ;;  %s5019_s9 = smov 120   ;;  %s5020_s10 = smov 104   ;;  %s5668_s1 = inlined_call_operand.vmem [shape: f32[32,8], index: 1, kind: input, shape index: {}]   ;;  %s5669_s2 = inlined_call_operand.vmem [shape: f32[4,8,8], index: 2, kind: input, shape index: {}]   ;;  %s5670_s0 = inlined_call_operand.vmem [shape: f32[32,32], index: 0, kind: input, shape index: {}]   ;;  %s5671_s4 = inlined_call_operand.vmem [shape: f32[4,8,8], index: 4, kind: input, shape index: {}]   ;;  %s5672_s3 = inlined_call_operand.vmem [shape: f32[8,32], index: 3, kind: input, shape index: {}]   ;;  %s5673_s5 = inlined_call_operand.vmem [shape: f32[16,32,32], index: 5, kind: input, shape index: {}]   ;;  %s5674_s6 = inlined_call_operand.vmem [shape: f32[8,8], index: 6, kind: output, shape index: {0}]   ;;  %s5675_s8 = inlined_call_operand.vmem [shape: f32[8,32], index: 8, kind: output, shape index: {2}]   ;;  %s5676_s7 = inlined_call_operand.vmem [shape: f32[4,8,8], index: 7, kind: output, shape index: {1}]  }
   0x1   :  { %v26_v0 = vld [vmem:[%s5668_s1] sm:$0xff]  ;;  %v27_v2 = vld [vmem:[%s5668_s1 + $0x8] sm:$0xff]  ;;  %4851 = vmatprep.subr.bf16.mxu1 %v5015_v3  ;;  %4501 = vmatprep.mubr.msk.f32.mxu1 %vm5016_vm0, %v5017_v4  ;;  %v28_v6 = vld [vmem:[%s5668_s1 + $0x10] sm:$0xff]  ;;  %vm249_vm2 = vcmask 64512   ;;  %s5021_s11 = smov 16   ;;  %s5022_s12 = smov 8  }
   0x2   :  { %v266_v1 = vld [vmem:[%s5669_s2] sm:$0xff]  ;;  %35 = vxpose.xlu0.b32.start [1/4] (short) (narrow) %v26_v0, 8  ;;  %v4858_v5 = vpack.c.bf16 %v27_v2, %v26_v0  ;;  %v29_v7 = vld [vmem:[%s5668_s1 + $0x18] sm:$0xff]  ;;  %v4224_v8 = vld [vmem:[%s5669_s2 + $0x8] sm:$0xff]  ;;  %4515 = vmatprep.subr.mxu0 %v5017_v4  ;;  %s5023_s13 = smov 24   ;;  %vm4057_vm3 = vcmask 130112  }
   0x3   :  { %267 = vxpose.xlu1.b32.start.end [1/1] (short) (narrow) %v266_v1, 8  ;;  %v4861_v9 = vpack.c.bf16 %v29_v7, %v28_v6  ;;  %v30_v10 = vld [vmem:[%s5670_s0] sm:$0xff]  ;;  %v31_v11 = vld [vmem:[%s5670_s0 + $0x8] sm:$0xff]  ;;  %4517 = vmatprep.mubr.msk.f32.mxu0 %vm5016_vm0, %v5017_v4  ;;  %v32_v13 = vld [vmem:[%s5670_s0 + $0x10] sm:$0xff]  ;;  %vm4165_vm4 = vcmask 261312   ;;  %vm4111_vm5 = vcmask 195712  }
   0x4   :  { %v4852_v12 = vpack.c.bf16 %v31_v11, %v30_v10  ;;  %v33_v14 = vld [vmem:[%s5670_s0 + $0x18] sm:$0xff]  ;;  %v5109_v15 = vld [vmem:[%s5671_s4] sm:$0xff]  ;;  %v4233_v17 = vld [vmem:[%s5669_s2 + $0x10] sm:$0xff]  ;;  %s5024_s15 = smov 1e-30  }
   0x5   :  { %4516 = vmatpush3.msra.mxu0 %v5109_v15  ;;  %v4855_v16 = vpack.c.bf16 %v33_v14, %v32_v13  ;;  %v4241_v21 = vld [vmem:[%s5669_s2 + $0x18] sm:$0xff]  ;;  %v5143_v22 = vld [vmem:[%s5672_s3] sm:$0xff]  ;;  %v4228_v31 = vld [vmem:[%s5673_s5 + $0x28] sm:$0xff] }
   0x6   :  { %36 = vxpose.xlu0.b32.cont [2/4] (short) (narrow) %v27_v2, 8  ;;  %4853 = vmatpush3.bf16.msra.mxu1 %v4852_v12  ;;  %v4227_v30 = vld [vmem:[%s5673_s5 + $0x20] sm:$0xff]  ;;  %v4229_v33 = vld [vmem:[%s5673_s5 + $0x30] sm:$0xff]  ;;  %v4230_v34 = vld [vmem:[%s5673_s5 + $0x38] sm:$0xff] }
   0x7   :  { %451 = vxpose.xlu1.b32.start.end [1/1] (short) (narrow) %v4224_v8, 8  ;;  %4525 = vmatprep.subr.mxu0 %v5017_v4  ;;  %v4864_v32 = vpack.c.bf16 %v4228_v31, %v4227_v30  ;;  %v4867_v35 = vpack.c.bf16 %v4230_v34, %v4229_v33  ;;  %v445_v38 = vld [vmem:[%s5673_s5] sm:$0xff]  ;;  %v446_v39 = vld [vmem:[%s5673_s5 + $0x8] sm:$0xff]  ;;  %v447_v43 = vld [vmem:[%s5673_s5 + $0x10] sm:$0xff] }
   0x8   :  { %4854 = vmatprep.subr.bf16.mxu1 %v5015_v3  ;;  %v4870_v42 = vpack.c.bf16 %v446_v39, %v445_v38  ;;  %v448_v44 = vld [vmem:[%s5673_s5 + $0x18] sm:$0xff]  ;;  %v4236_v48 = vld [vmem:[%s5673_s5 + $0x40] sm:$0xff]  ;;  %v4237_v49 = vld [vmem:[%s5673_s5 + $0x48] sm:$0xff] }
   0x9   :  { %v4873_v47 = vpack.c.bf16 %v448_v44, %v447_v43  ;;  %v4876_v53 = vpack.c.bf16 %v4237_v49, %v4236_v48  ;;  %v4238_v54 = vld [vmem:[%s5673_s5 + $0x50] sm:$0xff]  ;;  %v4239_v55 = vld [vmem:[%s5673_s5 + $0x58] sm:$0xff]  ;;  %v4244_v57 = vld [vmem:[%s5673_s5 + $0x60] sm:$0xff] }
   0xa   :  { %37 = vxpose.xlu0.b32.cont [3/4] (short) (narrow) %v28_v6, 8  ;;  %4856 = vmatpush3.bf16.msra.mxu1 %v4855_v16  ;;  %v4879_v56 = vpack.c.bf16 %v4239_v55, %v4238_v54  ;;  %v4245_v58 = vld [vmem:[%s5673_s5 + $0x68] sm:$0xff]  ;;  %v4246_v61 = vld [vmem:[%s5673_s5 + $0x70] sm:$0xff]  ;;  %v4247_v62 = vld [vmem:[%s5673_s5 + $0x78] sm:$0xff] }
   0xb   :  { %782 = vxpose.xlu1.b32.start.end [1/1] (short) (narrow) %v4233_v17, 8  ;;  %4857 = vmatprep.subr.bf16.mxu1 %v5015_v3  ;;  %v4882_v59 = vpack.c.bf16 %v4245_v58, %v4244_v57  ;;  %v5249_v0 = vld [vmem:[%s5671_s4 + $0x8] sm:$0xff]  ;;  %v4885_v1 = vpack.c.bf16 %v4247_v62, %v4246_v61  ;;  %v4252_v6 = vld [vmem:[%s5673_s5 + $0x80] sm:$0xff]  ;;  %v4254_v10 = vld [vmem:[%s5673_s5 + $0x90] sm:$0xff] }
   0xc   :  { %v4255_v11 = vld [vmem:[%s5673_s5 + $0x98] sm:$0xff]  ;;  %v4259_v16 = vld [vmem:[%s5673_s5 + $0xa0] sm:$0xff]  ;;  %v4260_v17 = vld [vmem:[%s5673_s5 + $0xa8] sm:$0xff] }
   0xd   :  { %v4891_v13 = vpack.c.bf16 %v4255_v11, %v4254_v10  ;;  %v4266_v30 = vld [vmem:[%s5673_s5 + $0xc0] sm:$0xff]  ;;  %v4267_v31 = vld [vmem:[%s5673_s5 + $0xc8] sm:$0xff]  ;;  %v4268_v34 = vld [vmem:[%s5673_s5 + $0xd0] sm:$0xff] }
   0xe   :  { %38 = vxpose.xlu0.b32.end [4/4] (short) (narrow) %v29_v7, 8  ;;  %v4253_v7 = vld [vmem:[%s5673_s5 + $0x88] sm:$0xff]  ;;  %v5366_v48 = vld [vmem:[%s5671_s4 + $0x10] sm:$0xff]  ;;  %v4284_v58 = vld [vmem:[%s5673_s5 + $0x118] sm:$0xff] }
   0xf   :  { %1041 = vxpose.xlu1.b32.start.end [1/1] (short) (narrow) %v4241_v21, 8  ;;  %v4888_v8 = vpack.c.bf16 %v4253_v7, %v4252_v6  ;;  %v4282_v54 = vld [vmem:[%s5673_s5 + $0x108] sm:$0xff]  ;;  %v4283_v57 = vld [vmem:[%s5673_s5 + $0x110] sm:$0xff]  ;;  %v4291_v6 = vld [vmem:[%s5673_s5 + $0x138] sm:$0xff] }
  0x10   :  { %v4295_v11 = vld [vmem:[%s5673_s5 + $0x140] sm:$0xff] }
  0x82   :  { %v51_v18 = vpop.trf.xlu0 }
  0x83   :  { %v5118_v19 = vpop.trf.xlu1  ;;  %4502 = vmatmul.mubr.msk.f32.vlgmr.msra.gmra.mrb[0].mxu1 %vm67_vm1, %v51_v18  ;;  %v4894_v18 = vpack.c.bf16 %v4260_v17, %v4259_v16  ;;  %v4298_v16 = vld [vmem:[%s5673_s5 + $0x158] sm:$0xff] }
  0x84   :  { %4518 = vmatmul.mubr.msk.f32.vlgmr.msra.gmra.mrb[0].mxu0 %vm249_vm2, %v5118_v19  ;;  %4859 = vmatpush3.bf16.msra.mxu1 %v4858_v5 }
  0x85   :  { %4526 = vmatpush3.msra.mxu0 %v5109_v15  ;;  %4527 = vmatprep.mubr.msk.f32.mxu0 %vm5016_vm0, %v5017_v4 }
  0x86   :  { %4512 = vmatprep.mubr.msk.f32.mxu1 %vm5016_vm0, %v5017_v4  ;;  %4860 = vmatprep.subr.bf16.mxu1 %v5015_v3 }
  0x87   :  { %v5128_v20 = vpop.trf.xlu1  ;;  %4863 = vmatprep.subr.bf16.mxu0 %v5015_v3 }
  0x88   :  { %4528 = vmatmul.mubr.msk.f32.vlgmr.msra.gmra.mrb[2].mxu0 %vm249_vm2, %v5128_v20  ;;  %4862 = vmatpush3.bf16.msra.mxu1 %v4861_v9 }
  0x89   :  { %4543 = vmatprep.mubr.msk.f32.mxu0 %vm5016_vm0, %v5017_v4  ;;  %4520 = vmatprep.subr.mxu1 %v5017_v4 }
  0x8a   :  { %4865 = vmatpush3.bf16.msra.mxu0 %v4864_v32  ;;  %v4900_v32 = vpack.c.bf16 %v4267_v31, %v4266_v30  ;;  %v4305_v30 = vld [vmem:[%s5673_s5 + $0x178] sm:$0xff] }
  0x8b   :  { %v5157_v29 = vpop.trf.xlu1  ;;  %4866 = vmatprep.subr.bf16.mxu0 %v5015_v3 }
  0x8e   :  { %4868 = vmatpush3.bf16.msra.mxu0 %v4867_v35  ;;  %v4269_v35 = vld [vmem:[%s5673_s5 + $0xd8] sm:$0xff] }
  0x8f   :  { %4869 = vmatprep.subr.bf16.mxu0 %v5015_v3  ;;  %v5208_v52 = vpop.trf.xlu1  ;;  %v4903_v38 = vpack.c.bf16 %v4269_v35, %v4268_v34 }
 0x156   :  { %v137_v23 = vpop.f32.mrb[0].mxu1 }
 0x157   :  { %v368_v24 = vpop.f32.mrb[0].mxu0  ;;  %v4503_v25 = vpop.f32.mrb[1].mxu1  ;;  %4513 = vmatmul.mubr.msk.f32.vlgmr.msra.gmra.mrb[2].mxu1 %vm67_vm1, %v137_v23  ;;  %v4261_v23 = vld [vmem:[%s5673_s5 + $0xb0] sm:$0xff] }
 0x158   :  { %v4519_v26 = vpop.f32.mrb[1].mxu0  ;;  %4521 = vmatpush3.msra.mxu1 %v5143_v22  ;;  %4522 = vmatprep.mubr.msk.f32.mxu1 %vm5016_vm0, %v5017_v4 }
 0x159   :  { %4530 = vmatprep.subr.mxu1 %v5017_v4 }
 0x15b   :  { %v552_v27 = vpop.f32.mrb[2].mxu0  ;;  %4523 = vmatmul.mubr.msk.f32.vlgmr.msra.gmra.mrb[4].mxu1 %vm249_vm2, %v368_v24  ;;  %v4262_v24 = vld [vmem:[%s5673_s5 + $0xb8] sm:$0xff] }
 0x15c   :  { %v4529_v28 = vpop.f32.mrb[3].mxu0  ;;  %4531 = vmatpush3.msra.mxu1 %v5143_v22  ;;  %4532 = vmatprep.mubr.msk.f32.mxu1 %vm5016_vm0, %v5017_v4  ;;  %v4897_v26 = vpack.c.bf16 %v4262_v24, %v4261_v23  ;;  %v4302_v24 = vld [vmem:[%s5673_s5 + $0x160] sm:$0xff] }
 0x15d   :  { %4557 = vmatprep.subr.mxu1 %v5017_v4 }
 0x15f   :  { %4533 = vmatmul.mubr.msk.f32.vlgmr.msra.gmra.mrb[6].mxu1 %vm249_vm2, %v552_v27 }
 0x160   :  { %4558 = vmatpush3.msra.mxu1 %v5109_v15  ;;  %4559 = vmatprep.mubr.msk.f32.mxu1 %vm5016_vm0, %v5017_v4 }
 0x161   :  { %4562 = vmatprep.subr.mxu1 %v5017_v4 }
 0x163   :  { %4560 = vmatmul.mubr.msk.f32.vlgmr.msra.gmra.mrb[8].mxu1 %vm249_vm2, %v5157_v29 }
 0x164   :  { %4563 = vmatpush3.msra.mxu1 %v5143_v22  ;;  %4564 = vmatprep.mubr.msk.f32.mxu1 %vm5016_vm0, %v5017_v4 }
 0x165   :  { %4578 = vmatprep.subr.mxu1 %v5017_v4 }
 0x22a   :  { %v5182_v36 = vpop.f32.mrb[2].mxu1 }
 0x22b   :  { %v4514_v37 = vpop.f32.mrb[3].mxu1 }
 0x22e   :  { %v441_v40 = vpop.f32.mrb[4].mxu1 }
 0x22f   :  { %v4524_v41 = vpop.f32.mrb[5].mxu1 }
 0x230   :  { %v4273_v41 = vld [vmem:[%s5673_s5 + $0xe0] sm:$0xff] }
 0x232   :  { %v625_v45 = vpop.f32.mrb[6].mxu1 }
 0x233   :  { %v4534_v46 = vpop.f32.mrb[7].mxu1  ;;  %4544 = vmatmul.mubr.msk.f32.vlgmr.msra.gmra.mrb[4].mxu0 %vm67_vm1, %v625_v45  ;;  %v4275_v45 = vld [vmem:[%s5673_s5 + $0xf0] sm:$0xff] }
 0x234   :  { %4871 = vmatpush3.bf16.msra.mxu0 %v4870_v42  ;;  %4554 = vmatprep.mubr.msk.f32.mxu0 %vm5016_vm0, %v5017_v4  ;;  %v4274_v42 = vld [vmem:[%s5673_s5 + $0xe8] sm:$0xff]  ;;  %v4276_v46 = vld [vmem:[%s5673_s5 + $0xf8] sm:$0xff] }
 0x235   :  { %4872 = vmatprep.subr.bf16.mxu0 %v5015_v3  ;;  %v4906_v43 = vpack.c.bf16 %v4274_v42, %v4273_v41  ;;  %v4909_v49 = vpack.c.bf16 %v4276_v46, %v4275_v45  ;;  %v4313_v41 = vld [vmem:[%s5673_s5 + $0x198] sm:$0xff]  ;;  %v4317_v46 = vld [vmem:[%s5673_s5 + $0x1a0] sm:$0xff] }
 0x236   :  { %v883_v50 = vpop.f32.mrb[8].mxu1 }
 0x237   :  { %v4561_v51 = vpop.f32.mrb[9].mxu1  ;;  %4565 = vmatmul.mubr.msk.f32.vlgmr.msra.gmra.mrb[10].mxu1 %vm249_vm2, %v883_v50 }
 0x238   :  { %4579 = vmatpush3.msra.mxu1 %v5109_v15  ;;  %4874 = vmatpush3.bf16.msra.mxu0 %v4873_v47 }
 0x239   :  { %4580 = vmatprep.mubr.msk.f32.mxu1 %vm5016_vm0, %v5017_v4  ;;  %4875 = vmatprep.subr.bf16.mxu0 %v5015_v3 }
 0x23a   :  { %4583 = vmatprep.subr.mxu1 %v5017_v4 }
 0x23b   :  { %4555 = vmatmul.mubr.msk.f32.vlgmr.msra.gmra.mrb[4].mxu0 %vm67_vm1, %v441_v40  ;;  %4581 = vmatmul.mubr.msk.f32.vlgmr.msra.gmra.mrb[12].mxu1 %vm249_vm2, %v5208_v52 }
 0x23c   :  { %4877 = vmatpush3.bf16.msra.mxu0 %v4876_v53  ;;  %4575 = vmatprep.mubr.msk.f32.mxu0 %vm5016_vm0, %v5017_v4  ;;  %v4281_v53 = vld [vmem:[%s5673_s5 + $0x100] sm:$0xff] }
 0x23d   :  { %4878 = vmatprep.subr.bf16.mxu0 %v5015_v3  ;;  %4584 = vmatpush3.msra.mxu1 %v5143_v22  ;;  %v4912_v55 = vpack.c.bf16 %v4282_v54, %v4281_v53 }
 0x23e   :  { %4585 = vmatprep.mubr.msk.f32.mxu1 %vm5016_vm0, %v5017_v4  ;;  %4599 = vmatprep.subr.mxu1 %v5017_v4 }
 0x240   :  { %4880 = vmatpush3.bf16.msra.mxu0 %v4879_v56 }
 0x241   :  { %4881 = vmatprep.subr.bf16.mxu0 %v5015_v3 }
 0x30a   :  { %v956_v60 = vpop.f32.mrb[10].mxu1 }
 0x30b   :  { %v4566_v63 = vpop.f32.mrb[11].mxu1  ;;  %4576 = vmatmul.mubr.msk.f32.vlgmr.msra.gmra.mrb[4].mxu0 %vm67_vm1, %v956_v60  ;;  %v4915_v60 = vpack.c.bf16 %v4284_v58, %v4283_v57  ;;  %v4325_v57 = vld [vmem:[%s5673_s5 + $0x1c8] sm:$0xff] }
 0x30c   :  { %4883 = vmatpush3.bf16.msra.mxu0 %v4882_v59  ;;  %4596 = vmatprep.mubr.msk.f32.mxu0 %vm5016_vm0, %v5017_v4  ;;  %v4288_v63 = vld [vmem:[%s5673_s5 + $0x120] sm:$0xff] }
 0x30d   :  { %4884 = vmatprep.subr.bf16.mxu0 %v5015_v3 }
 0x30e   :  { %v1142_v2 = vpop.f32.mrb[12].mxu1 }
 0x30f   :  { %v4582_v5 = vpop.f32.mrb[13].mxu1  ;;  %4586 = vmatmul.mubr.msk.f32.vlgmr.msra.gmra.mrb[14].mxu1 %vm249_vm2, %v1142_v2 }
 0x310   :  { %4600 = vmatpush3.msra.mxu1 %v5249_v0  ;;  %4601 = vmatprep.mubr.msk.f32.mxu1 %vm5016_vm0, %v5017_v4  ;;  %v4290_v5 = vld [vmem:[%s5673_s5 + $0x130] sm:$0xff] }
 0x311   :  { %4886 = vmatpush3.bf16.msra.mxu0 %v4885_v1  ;;  %4604 = vmatprep.subr.mxu1 %v5017_v4 }
 0x312   :  { %4887 = vmatprep.subr.bf16.mxu0 %v5015_v3 }
 0x313   :  { %4602 = vmatmul.mubr.msk.f32.vlgmr.msra.gmra.mrb[16].mxu1 %vm249_vm2, %v5118_v19 }
 0x314   :  { %4605 = vmatpush3.msra.mxu1 %v5143_v22  ;;  %4606 = vmatprep.mubr.msk.f32.mxu1 %vm5016_vm0, %v5017_v4 }
 0x315   :  { %4620 = vmatprep.subr.mxu1 %v5017_v4 }
 0x3e2   :  { %v1215_v9 = vpop.f32.mrb[14].mxu1 }
 0x3e3   :  { %v4587_v12 = vpop.f32.mrb[15].mxu1  ;;  %4597 = vmatmul.mubr.msk.f32.vlgmr.msra.gmra.mrb[4].mxu0 %vm67_vm1, %v1215_v9 }
 0x3e4   :  { %4889 = vmatpush3.bf16.msra.mxu0 %v4888_v8  ;;  %4617 = vmatprep.mubr.msk.f32.mxu0 %vm5016_vm0, %v5017_v4  ;;  %v4921_v8 = vpack.c.bf16 %v4291_v6, %v4290_v5  ;;  %v4296_v12 = vld [vmem:[%s5673_s5 + $0x148] sm:$0xff]  ;;  %v4333_v6 = vld [vmem:[%s5673_s5 + $0x1f0] sm:$0xff] }
 0x3e5   :  { %4890 = vmatprep.subr.bf16.mxu0 %v5015_v3 }
 0x3e6   :  { %v1366_v14 = vpop.f32.mrb[16].mxu1 }
 0x3e7   :  { %v4603_v15 = vpop.f32.mrb[17].mxu1  ;;  %4607 = vmatmul.mubr.msk.f32.vlgmr.msra.gmra.mrb[18].mxu1 %vm249_vm2, %v1366_v14 }
 0x3e8   :  { %4621 = vmatpush3.msra.mxu1 %v5249_v0  ;;  %4622 = vmatprep.mubr.msk.f32.mxu1 %vm5016_vm0, %v5017_v4  ;;  %v4297_v15 = vld [vmem:[%s5673_s5 + $0x150] sm:$0xff] }
 0x3e9   :  { %4892 = vmatpush3.bf16.msra.mxu0 %v4891_v13  ;;  %4625 = vmatprep.subr.mxu1 %v5017_v4  ;;  %v4924_v13 = vpack.c.bf16 %v4296_v12, %v4295_v11 }
 0x3ea   :  { %4893 = vmatprep.subr.bf16.mxu0 %v5015_v3 }
 0x3eb   :  { %4623 = vmatmul.mubr.msk.f32.vlgmr.msra.gmra.mrb[20].mxu1 %vm249_vm2, %v5128_v20 }
 0x3ec   :  { %4626 = vmatpush3.msra.mxu1 %v5143_v22  ;;  %4627 = vmatprep.mubr.msk.f32.mxu1 %vm5016_vm0, %v5017_v4 }
 0x3ed   :  { %4641 = vmatprep.subr.mxu1 %v5017_v4 }
 0x4ba   :  { %v1439_v21 = vpop.f32.mrb[18].mxu1 }
 0x4bb   :  { %v4608_v25 = vpop.f32.mrb[19].mxu1  ;;  %4618 = vmatmul.mubr.msk.f32.vlgmr.msra.gmra.mrb[4].mxu0 %vm67_vm1, %v1439_v21 }
 0x4bc   :  { %4895 = vmatpush3.bf16.msra.mxu0 %v4894_v18  ;;  %4638 = vmatprep.mubr.msk.f32.mxu0 %vm5016_vm0, %v5017_v4  ;;  %v4927_v18 = vpack.c.bf16 %v4298_v16, %v4297_v15  ;;  %v4303_v25 = vld [vmem:[%s5673_s5 + $0x168] sm:$0xff] }
 0x4bd   :  { %4896 = vmatprep.subr.bf16.mxu0 %v5015_v3 }
 0x4be   :  { %v1588_v27 = vpop.f32.mrb[20].mxu1 }
 0x4bf   :  { %v4624_v28 = vpop.f32.mrb[21].mxu1  ;;  %4628 = vmatmul.mubr.msk.f32.vlgmr.msra.gmra.mrb[22].mxu1 %vm249_vm2, %v1588_v27 }
 0x4c0   :  { %4642 = vmatpush3.msra.mxu1 %v5249_v0  ;;  %4643 = vmatprep.mubr.msk.f32.mxu1 %vm5016_vm0, %v5017_v4  ;;  %v4304_v28 = vld [vmem:[%s5673_s5 + $0x170] sm:$0xff] }
 0x4c1   :  { %4898 = vmatpush3.bf16.msra.mxu0 %v4897_v26  ;;  %4646 = vmatprep.subr.mxu1 %v5017_v4  ;;  %v4930_v26 = vpack.c.bf16 %v4303_v25, %v4302_v24 }
 0x4c2   :  { %4899 = vmatprep.subr.bf16.mxu0 %v5015_v3 }
 0x4c3   :  { %4644 = vmatmul.mubr.msk.f32.vlgmr.msra.gmra.mrb[24].mxu1 %vm249_vm2, %v5157_v29 }
 0x4c4   :  { %4647 = vmatpush3.msra.mxu1 %v5143_v22  ;;  %4648 = vmatprep.mubr.msk.f32.mxu1 %vm5016_vm0, %v5017_v4 }
 0x4c5   :  { %4662 = vmatprep.subr.mxu1 %v5017_v4 }
 0x592   :  { %v1661_v33 = vpop.f32.mrb[22].mxu1 }
 0x593   :  { %v4629_v37 = vpop.f32.mrb[23].mxu1  ;;  %4639 = vmatmul.mubr.msk.f32.vlgmr.msra.gmra.mrb[4].mxu0 %vm67_vm1, %v1661_v33  ;;  %v4933_v33 = vpack.c.bf16 %v4305_v30, %v4304_v28 }
 0x594   :  { %4901 = vmatpush3.bf16.msra.mxu0 %v4900_v32  ;;  %4659 = vmatprep.mubr.msk.f32.mxu0 %vm5016_vm0, %v5017_v4  ;;  %v5483_v32 = vld [vmem:[%s5671_s4 + $0x18] sm:$0xff]  ;;  %v4310_v37 = vld [vmem:[%s5673_s5 + $0x180] sm:$0xff] }
 0x595   :  { %4902 = vmatprep.subr.bf16.mxu0 %v5015_v3 }
 0x596   :  { %v1810_v39 = vpop.f32.mrb[24].mxu1 }
 0x597   :  { %v4645_v40 = vpop.f32.mrb[25].mxu1  ;;  %4649 = vmatmul.mubr.msk.f32.vlgmr.msra.gmra.mrb[26].mxu1 %vm249_vm2, %v1810_v39 }
 0x598   :  { %4663 = vmatpush3.msra.mxu1 %v5249_v0  ;;  %4664 = vmatprep.mubr.msk.f32.mxu1 %vm5016_vm0, %v5017_v4  ;;  %v4289_v0 = vld [vmem:[%s5673_s5 + $0x128] sm:$0xff] }
 0x599   :  { %4904 = vmatpush3.bf16.msra.mxu0 %v4903_v38  ;;  %4667 = vmatprep.subr.mxu1 %v5017_v4  ;;  %v4918_v1 = vpack.c.bf16 %v4289_v0, %v4288_v63  ;;  %v4311_v38 = vld [vmem:[%s5673_s5 + $0x188] sm:$0xff] }
 0x59a   :  { %4905 = vmatprep.subr.bf16.mxu0 %v5015_v3  ;;  %v4936_v39 = vpack.c.bf16 %v4311_v38, %v4310_v37 }
 0x59b   :  { %4665 = vmatmul.mubr.msk.f32.vlgmr.msra.gmra.mrb[28].mxu1 %vm249_vm2, %v5208_v52 }
 0x59c   :  { %4668 = vmatpush3.msra.mxu1 %v5143_v22  ;;  %4669 = vmatprep.mubr.msk.f32.mxu1 %vm5016_vm0, %v5017_v4 }
 0x59d   :  { %4683 = vmatprep.subr.mxu1 %v5017_v4 }
 0x66a   :  { %v1883_v44 = vpop.f32.mrb[26].mxu1 }
 0x66b   :  { %v4650_v47 = vpop.f32.mrb[27].mxu1  ;;  %4660 = vmatmul.mubr.msk.f32.vlgmr.msra.gmra.mrb[4].mxu0 %vm67_vm1, %v1883_v44 }
 0x66c   :  { %4907 = vmatpush3.bf16.msra.mxu0 %v4906_v43  ;;  %4680 = vmatprep.mubr.msk.f32.mxu0 %vm5016_vm0, %v5017_v4  ;;  %v4318_v47 = vld [vmem:[%s5673_s5 + $0x1a8] sm:$0xff] }
 0x66d   :  { %4908 = vmatprep.subr.bf16.mxu0 %v5015_v3 }
 0x66e   :  { %v2032_v50 = vpop.f32.mrb[28].mxu1 }
 0x66f   :  { %v4666_v51 = vpop.f32.mrb[29].mxu1  ;;  %4670 = vmatmul.mubr.msk.f32.vlgmr.msra.gmra.mrb[30].mxu1 %vm249_vm2, %v2032_v50  ;;  %v4320_v50 = vld [vmem:[%s5673_s5 + $0x1b8] sm:$0xff] }
 0x670   :  { %4684 = vmatpush3.msra.mxu1 %v5366_v48  ;;  %4685 = vmatprep.mubr.msk.f32.mxu1 %vm5016_vm0, %v5017_v4 }
 0x671   :  { %4910 = vmatpush3.bf16.msra.mxu0 %v4909_v49  ;;  %4688 = vmatprep.subr.mxu1 %v5017_v4 }
 0x672   :  { %4911 = vmatprep.subr.bf16.mxu0 %v5015_v3 }
 0x673   :  { %4686 = vmatmul.mubr.msk.f32.vlgmr.msra.gmra.mrb[32].mxu1 %vm249_vm2, %v5118_v19 }
 0x674   :  { %4689 = vmatpush3.msra.mxu1 %v5143_v22  ;;  %4690 = vmatprep.mubr.msk.f32.mxu1 %vm5016_vm0, %v5017_v4 }
 0x675   :  { %4704 = vmatprep.subr.mxu1 %v5017_v4 }
 0x742   :  { %v2105_v56 = vpop.f32.mrb[30].mxu1 }
 0x743   :  { %v4671_v59 = vpop.f32.mrb[31].mxu1  ;;  %4681 = vmatmul.mubr.msk.f32.vlgmr.msra.gmra.mrb[4].mxu0 %vm67_vm1, %v2105_v56  ;;  %v4324_v56 = vld [vmem:[%s5673_s5 + $0x1c0] sm:$0xff] }
 0x744   :  { %4913 = vmatpush3.bf16.msra.mxu0 %v4912_v55  ;;  %4701 = vmatprep.mubr.msk.f32.mxu0 %vm5016_vm0, %v5017_v4  ;;  %v4948_v58 = vpack.c.bf16 %v4325_v57, %v4324_v56 }
 0x745   :  { %4914 = vmatprep.subr.bf16.mxu0 %v5015_v3 }
 0x746   :  { %v2256_v61 = vpop.f32.mrb[32].mxu1 }
 0x747   :  { %v4687_v62 = vpop.f32.mrb[33].mxu1  ;;  %4691 = vmatmul.mubr.msk.f32.vlgmr.msra.gmra.mrb[34].mxu1 %vm249_vm2, %v2256_v61 }
 0x748   :  { %4705 = vmatpush3.msra.mxu1 %v5366_v48  ;;  %4706 = vmatprep.mubr.msk.f32.mxu1 %vm5016_vm0, %v5017_v4 }
 0x749   :  { %4916 = vmatpush3.bf16.msra.mxu0 %v4915_v60  ;;  %4709 = vmatprep.subr.mxu1 %v5017_v4  ;;  %v4327_v60 = vld [vmem:[%s5673_s5 + $0x1d8] sm:$0xff] }
 0x74a   :  { %4917 = vmatprep.subr.bf16.mxu0 %v5015_v3 }
 0x74b   :  { %4707 = vmatmul.mubr.msk.f32.vlgmr.msra.gmra.mrb[36].mxu1 %vm249_vm2, %v5128_v20 }
 0x74c   :  { %4710 = vmatpush3.msra.mxu1 %v5143_v22  ;;  %4711 = vmatprep.mubr.msk.f32.mxu1 %vm5016_vm0, %v5017_v4 }
 0x74d   :  { %4725 = vmatprep.subr.mxu1 %v5017_v4 }
 0x81a   :  { %v2329_v2 = vpop.f32.mrb[34].mxu1 }
 0x81b   :  { %v4692_v7 = vpop.f32.mrb[35].mxu1  ;;  %4702 = vmatmul.mubr.msk.f32.vlgmr.msra.gmra.mrb[4].mxu0 %vm67_vm1, %v2329_v2  ;;  %v4332_v2 = vld [vmem:[%s5673_s5 + $0x1e8] sm:$0xff] }
 0x81c   :  { %4919 = vmatpush3.bf16.msra.mxu0 %v4918_v1  ;;  %4722 = vmatprep.mubr.msk.f32.mxu0 %vm5016_vm0, %v5017_v4  ;;  %v4331_v1 = vld [vmem:[%s5673_s5 + $0x1e0] sm:$0xff] }
 0x81d   :  { %4920 = vmatprep.subr.bf16.mxu0 %v5015_v3  ;;  %v4954_v5 = vpack.c.bf16 %v4332_v2, %v4331_v1 }
 0x81e   :  { %v2478_v9 = vpop.f32.mrb[36].mxu1 }
 0x81f   :  { %v4708_v10 = vpop.f32.mrb[37].mxu1  ;;  %4712 = vmatmul.mubr.msk.f32.vlgmr.msra.gmra.mrb[38].mxu1 %vm249_vm2, %v2478_v9 }
 0x820   :  { %4726 = vmatpush3.msra.mxu1 %v5366_v48  ;;  %4727 = vmatprep.mubr.msk.f32.mxu1 %vm5016_vm0, %v5017_v4 }
 0x821   :  { %4922 = vmatpush3.bf16.msra.mxu0 %v4921_v8  ;;  %4730 = vmatprep.subr.mxu1 %v5017_v4 }
 0x822   :  { %4923 = vmatprep.subr.bf16.mxu0 %v5015_v3 }
 0x823   :  { %4728 = vmatmul.mubr.msk.f32.vlgmr.msra.gmra.mrb[40].mxu1 %vm249_vm2, %v5157_v29 }
 0x824   :  { %4731 = vmatpush3.msra.mxu1 %v5143_v22  ;;  %4732 = vmatprep.mubr.msk.f32.mxu1 %vm5016_vm0, %v5017_v4 }
 0x825   :  { %4746 = vmatprep.subr.mxu1 %v5017_v4 }
 0x8f2   :  { %v2551_v14 = vpop.f32.mrb[38].mxu1 }
 0x8f3   :  { %v4713_v17 = vpop.f32.mrb[39].mxu1  ;;  %4723 = vmatmul.mubr.msk.f32.vlgmr.msra.gmra.mrb[4].mxu0 %vm67_vm1, %v2551_v14 }
 0x8f4   :  { %4925 = vmatpush3.bf16.msra.mxu0 %v4924_v13  ;;  %4743 = vmatprep.mubr.msk.f32.mxu0 %vm5016_vm0, %v5017_v4 }
 0x8f5   :  { %4926 = vmatprep.subr.bf16.mxu0 %v5015_v3 }
 0x8f6   :  { %v2700_v21 = vpop.f32.mrb[40].mxu1 }
 0x8f7   :  { %v4729_v23 = vpop.f32.mrb[41].mxu1  ;;  %4733 = vmatmul.mubr.msk.f32.vlgmr.msra.gmra.mrb[42].mxu1 %vm249_vm2, %v2700_v21 }
 0x8f8   :  { %4747 = vmatpush3.msra.mxu1 %v5366_v48  ;;  %4748 = vmatprep.mubr.msk.f32.mxu1 %vm5016_vm0, %v5017_v4  ;;  %v4942_v48 = vpack.c.bf16 %v4318_v47, %v4317_v46 }
 0x8f9   :  { %4928 = vmatpush3.bf16.msra.mxu0 %v4927_v18  ;;  %4751 = vmatprep.subr.mxu1 %v5017_v4 }
 0x8fa   :  { %4929 = vmatprep.subr.bf16.mxu0 %v5015_v3 }
 0x8fb   :  { %4749 = vmatmul.mubr.msk.f32.vlgmr.msra.gmra.mrb[44].mxu1 %vm249_vm2, %v5208_v52 }
 0x8fc   :  { %4752 = vmatpush3.msra.mxu1 %v5143_v22  ;;  %4753 = vmatprep.mubr.msk.f32.mxu1 %vm5016_vm0, %v5017_v4 }
 0x8fd   :  { %4767 = vmatprep.subr.mxu1 %v5017_v4 }
 0x9ca   :  { %v2773_v27 = vpop.f32.mrb[42].mxu1 }
 0x9cb   :  { %v4734_v31 = vpop.f32.mrb[43].mxu1  ;;  %4744 = vmatmul.mubr.msk.f32.vlgmr.msra.gmra.mrb[4].mxu0 %vm67_vm1, %v2773_v27 }
 0x9cc   :  { %4931 = vmatpush3.bf16.msra.mxu0 %v4930_v26  ;;  %4764 = vmatprep.mubr.msk.f32.mxu0 %vm5016_vm0, %v5017_v4 }
 0x9cd   :  { %4932 = vmatprep.subr.bf16.mxu0 %v5015_v3 }
 0x9ce   :  { %v2922_v34 = vpop.f32.mrb[44].mxu1 }
 0x9cf   :  { %v4750_v35 = vpop.f32.mrb[45].mxu1  ;;  %4754 = vmatmul.mubr.msk.f32.vlgmr.msra.gmra.mrb[46].mxu1 %vm249_vm2, %v2922_v34 }
 0x9d0   :  { %4768 = vmatpush3.msra.mxu1 %v5483_v32  ;;  %4769 = vmatprep.mubr.msk.f32.mxu1 %vm5016_vm0, %v5017_v4 }
 0x9d1   :  { %4934 = vmatpush3.bf16.msra.mxu0 %v4933_v33  ;;  %4772 = vmatprep.subr.mxu1 %v5017_v4 }
 0x9d2   :  { %4935 = vmatprep.subr.bf16.mxu0 %v5015_v3 }
 0x9d3   :  { %4770 = vmatmul.mubr.msk.f32.vlgmr.msra.gmra.mrb[48].mxu1 %vm249_vm2, %v5118_v19  ;;  %v4312_v19 = vld [vmem:[%s5673_s5 + $0x190] sm:$0xff] }
 0x9d4   :  { %4773 = vmatpush3.msra.mxu1 %v5143_v22  ;;  %4774 = vmatprep.mubr.msk.f32.mxu1 %vm5016_vm0, %v5017_v4  ;;  %v4939_v43 = vpack.c.bf16 %v4313_v41, %v4312_v19 }
 0x9d5   :  { %4788 = vmatprep.subr.mxu1 %v5017_v4 }
 0xaa2   :  { %v2995_v40 = vpop.f32.mrb[46].mxu1 }
 0xaa3   :  { %v4755_v42 = vpop.f32.mrb[47].mxu1  ;;  %4765 = vmatmul.mubr.msk.f32.vlgmr.msra.gmra.mrb[4].mxu0 %vm67_vm1, %v2995_v40 }
 0xaa4   :  { %4937 = vmatpush3.bf16.msra.mxu0 %v4936_v39  ;;  %4785 = vmatprep.mubr.msk.f32.mxu0 %vm5016_vm0, %v5017_v4 }
 0xaa5   :  { %4938 = vmatprep.subr.bf16.mxu0 %v5015_v3 }
 0xaa6   :  { %v3146_v44 = vpop.f32.mrb[48].mxu1 }
 0xaa7   :  { %v4771_v45 = vpop.f32.mrb[49].mxu1  ;;  %4775 = vmatmul.mubr.msk.f32.vlgmr.msra.gmra.mrb[50].mxu1 %vm249_vm2, %v3146_v44 }
 0xaa8   :  { %4789 = vmatpush3.msra.mxu1 %v5483_v32  ;;  %4790 = vmatprep.mubr.msk.f32.mxu1 %vm5016_vm0, %v5017_v4 }
 0xaa9   :  { %4940 = vmatpush3.bf16.msra.mxu0 %v4939_v43  ;;  %4793 = vmatprep.subr.mxu1 %v5017_v4 }
 0xaaa   :  { %4941 = vmatprep.subr.bf16.mxu0 %v5015_v3 }
 0xaab   :  { %4791 = vmatmul.mubr.msk.f32.vlgmr.msra.gmra.mrb[52].mxu1 %vm249_vm2, %v5128_v20  ;;  %v4319_v20 = vld [vmem:[%s5673_s5 + $0x1b0] sm:$0xff] }
 0xaac   :  { %4794 = vmatpush3.msra.mxu1 %v5143_v22  ;;  %4795 = vmatprep.mubr.msk.f32.mxu1 %vm5016_vm0, %v5017_v4  ;;  %v4945_v53 = vpack.c.bf16 %v4320_v50, %v4319_v20 }
 0xaad   :  { %4809 = vmatprep.subr.mxu1 %v5017_v4 }
 0xb7a   :  { %v3219_v49 = vpop.f32.mrb[50].mxu1 }
 0xb7b   :  { %v4776_v51 = vpop.f32.mrb[51].mxu1  ;;  %4786 = vmatmul.mubr.msk.f32.vlgmr.msra.gmra.mrb[4].mxu0 %vm67_vm1, %v3219_v49 }
 0xb7c   :  { %4943 = vmatpush3.bf16.msra.mxu0 %v4942_v48  ;;  %4806 = vmatprep.mubr.msk.f32.mxu0 %vm5016_vm0, %v5017_v4 }
 0xb7d   :  { %4944 = vmatprep.subr.bf16.mxu0 %v5015_v3 }
 0xb7e   :  { %v3368_v54 = vpop.f32.mrb[52].mxu1 }
 0xb7f   :  { %v4792_v55 = vpop.f32.mrb[53].mxu1  ;;  %4796 = vmatmul.mubr.msk.f32.vlgmr.msra.gmra.mrb[54].mxu1 %vm249_vm2, %v3368_v54 }
 0xb80   :  { %4810 = vmatpush3.msra.mxu1 %v5483_v32  ;;  %4811 = vmatprep.mubr.msk.f32.mxu1 %vm5016_vm0, %v5017_v4 }
 0xb81   :  { %4946 = vmatpush3.bf16.msra.mxu0 %v4945_v53  ;;  %4814 = vmatprep.subr.mxu1 %v5017_v4 }
 0xb82   :  { %4947 = vmatprep.subr.bf16.mxu0 %v5015_v3 }
 0xb83   :  { %4812 = vmatmul.mubr.msk.f32.vlgmr.msra.gmra.mrb[56].mxu1 %vm249_vm2, %v5157_v29  ;;  %v4326_v29 = vld [vmem:[%s5673_s5 + $0x1d0] sm:$0xff] }
 0xb84   :  { %4815 = vmatpush3.msra.mxu1 %v5143_v22  ;;  %4816 = vmatprep.mubr.msk.f32.mxu1 %vm5016_vm0, %v5017_v4  ;;  %v4951_v62 = vpack.c.bf16 %v4327_v60, %v4326_v29 }
 0xb85   :  { %4830 = vmatprep.subr.mxu1 %v5017_v4 }
 0xc52   :  { %v3441_v59 = vpop.f32.mrb[54].mxu1 }
 0xc53   :  { %v4797_v61 = vpop.f32.mrb[55].mxu1  ;;  %4807 = vmatmul.mubr.msk.f32.vlgmr.msra.gmra.mrb[4].mxu0 %vm67_vm1, %v3441_v59 }
 0xc54   :  { %4949 = vmatpush3.bf16.msra.mxu0 %v4948_v58  ;;  %4827 = vmatprep.mubr.msk.f32.mxu0 %vm5016_vm0, %v5017_v4 }
 0xc55   :  { %4950 = vmatprep.subr.bf16.mxu0 %v5015_v3 }
 0xc56   :  { %v3590_v63 = vpop.f32.mrb[56].mxu1 }
 0xc57   :  { %v4813_v0 = vpop.f32.mrb[57].mxu1  ;;  %4817 = vmatmul.mubr.msk.f32.vlgmr.msra.gmra.mrb[58].mxu1 %vm249_vm2, %v3590_v63 }
 0xc58   :  { %4831 = vmatpush3.msra.mxu1 %v5483_v32  ;;  %4832 = vmatprep.mubr.msk.f32.mxu1 %vm5016_vm0, %v5017_v4 }
 0xc59   :  { %4952 = vmatpush3.bf16.msra.mxu0 %v4951_v62  ;;  %4835 = vmatprep.subr.mxu1 %v5017_v4 }
 0xc5a   :  { %4953 = vmatprep.subr.bf16.mxu0 %v5015_v3 }
 0xc5b   :  { %4833 = vmatmul.mubr.msk.f32.vlgmr.msra.gmra.mrb[60].mxu1 %vm249_vm2, %v5208_v52 }
 0xc5c   :  { %4836 = vmatpush3.msra.mxu1 %v5143_v22  ;;  %4837 = vmatprep.mubr.msk.f32.mxu1 %vm5016_vm0, %v5017_v4  ;;  %v4334_v22 = vld [vmem:[%s5673_s5 + $0x1f8] sm:$0xff]  ;;  %s5018_s5 = smov 112  }
 0xc5d   :  { %v4957_v8 = vpack.c.bf16 %v4334_v22, %v4333_v6 }
 0xd2a   :  { %v3663_v52 = vpop.f32.mrb[58].mxu1 }
 0xd2b   :  { %v4818_v7 = vpop.f32.mrb[59].mxu1  ;;  %4828 = vmatmul.mubr.msk.f32.vlgmr.msra.gmra.mrb[4].mxu0 %vm67_vm1, %v3663_v52 }
 0xd2c   :  { %4955 = vmatpush3.bf16.msra.mxu0 %v4954_v5  ;;  %4848 = vmatprep.mubr.msk.f32.mxu0 %vm5016_vm0, %v5017_v4 }
 0xd2d   :  { %4956 = vmatprep.subr.bf16.mxu0 %v5015_v3 }
 0xd2e   :  { %v3812_v9 = vpop.f32.mrb[60].mxu1 }
 0xd2f   :  { %v4834_v10 = vpop.f32.mrb[61].mxu1  ;;  %4838 = vmatmul.mubr.msk.f32.vlgmr.msra.gmra.mrb[62].mxu1 %vm249_vm2, %v3812_v9 }
 0xd30   :  { %4958 = vmatpush3.bf16.msra.mxu0 %v4957_v8 }
 0xe02   :  { %v3885_v11 = vpop.f32.mrb[62].mxu1 }
 0xe03   :  { %v4839_v12 = vpop.f32.mrb[63].mxu1  ;;  %4849 = vmatmul.mubr.msk.f32.vlgmr.msra.gmra.mrb[4].mxu0 %vm67_vm1, %v3885_v11 }
 0xed6   :  { %v3963_v13 = vpop.f32.mrb[4].mxu0 }
 0xed7   :  { %4069 = vrot.lane.b32.xlu1 %v3963_v13, %s5018_s5  ;;  %4015 = vrot.lane.b32.xlu0 %v3963_v13, %s5019_s9  ;;  %v4850_v14 = vpop.f32.mrb[5].mxu0 }
 0xedb   :  { %4123 = vrot.lane.b32.xlu1 %v3963_v13, %s5020_s10 }
 0xf49   :  { %v4070_v3 = vpop.permute.xlu1 %4069  ;;  %v4016_v4 = vpop.permute.xlu0 %4015 }
 0xf4a   :  { %4072 = vxpose.xlu0.b32.start.end [1/1] (short) (narrow) %v4070_v3, 8  ;;  %4018 = vxpose.xlu1.b32.start.end [1/1] (short) (narrow) %v4016_v4, 8 }
 0xf4d   :  { %v4124_v15 = vpop.permute.xlu1 %4123 }
 0xf4e   :  { %4126 = vxpose.xlu0.b32.start.end [1/1] (short) (narrow) %v4124_v15, 8 }
 0xfca   :  { %v4088_v16 = vpop.trf.xlu0  ;;  %v4034_v17 = vpop.trf.xlu1 }
 0xfcb   :  { %4105 = vrot.lane.b32.xlu1 %v4088_v16, %s5021_s11  ;;  %4051 = vrot.lane.b32.xlu0 %v4034_v17, %s5022_s12 }
 0xfce   :  { %v4142_v18 = vpop.trf.xlu0 }
 0xfcf   :  { %4159 = vrot.lane.b32.xlu1 %v4142_v18, %s5023_s13 }
 0xfe9   :  { %3968 = vxpose.xlu0.b32.start.end [1/1] (short) (narrow) %v3963_v13, 8 }
 0xff8   :  { %214 = vxpose.xlu1.b32.start.end [1/1] (short) (narrow) %v5182_v36, 8 }
0x103d   :  { %v4106_v21 = vpop.permute.xlu1 %4105  ;;  %v4052_v23 = vpop.permute.xlu0 %4051 }
0x103e   :  { %v4054_v24 = vadd.f32 %v4052_v23, %v3963_v13  ;;  %v4108_v39 = vadd.f32 %v4106_v21, %v3963_v13 }
0x1040   :  { %v5603_v28 = vmul.f32 0.5, %v4054_v24  ;;  %v5616_v42 = vmul.f32 0.5, %v4108_v39 }
0x1041   :  { %v4160_v25 = vpop.permute.xlu1 %4159 }
0x1042   :  { %v4162_v30 = vadd.f32 %v4160_v25, %v3963_v13  ;;  %v4056_v35 = vand.u32 2147483647, %v5603_v28  ;;  %v4110_v46 = vand.u32 2147483647, %v5616_v42 }
0x1044   :  { %v5608_v33 = vmul.f32 0.5, %v4162_v30  ;;  %v4058_v37 = vsel %vm4057_vm3, %v4056_v35, -inf  ;;  %v4112_v47 = vsel %vm4111_vm5, %v4110_v46, -inf }
0x1046   :  { %v4164_v38 = vand.u32 2147483647, %v5608_v33 }
0x1048   :  { %v4166_v19 = vsel %vm4165_vm4, %v4164_v38, -inf }
0x1069   :  { %v3984_v26 = vpop.trf.xlu0 }
0x106a   :  { %v4000_v27 = vadd.f32 %v3984_v26, %v3963_v13 }
0x106c   :  { %v5605_v31 = vmul.f32 0.5, %v4000_v27 }
0x106e   :  { %v4002_v32 = vand.u32 2147483647, %v5605_v31 }
0x1070   :  { %v4003_v34 = vsel %vm249_vm2, %v4002_v32, -inf }
0x1071   :  { %4004 = vmax.xlane.f32.xlu1 %v4003_v34 }
0x1075   :  { %4059 = vmax.xlane.f32.xlu1 %v4058_v37 }
0x1078   :  { %v230_v40 = vpop.trf.xlu1 }
0x1079   :  { %v246_v41 = vadd.f32 %v230_v40, %v5182_v36  ;;  %4167 = vmax.xlane.f32.xlu1 %v4166_v19 }
0x107b   :  { %v5618_v43 = vmul.f32 0.5, %v246_v41 }
0x107d   :  { %v248_v44 = vand.u32 2147483647, %v5618_v43 }
0x107f   :  { %v250_v45 = vsel %vm249_vm2, %v248_v44, -inf }
0x1080   :  { %251 = vmax.xlane.f32.xlu0 %v250_v45 }
0x1084   :  { %4113 = vmax.xlane.f32.xlu0 %v4112_v47 }
0x10fe   :  { %v4005_v48 = vpop.xlane.xlu1 %4004 }
0x10ff   :  { %v4006_v20 = vrot.slane %v4005_v48, 4 }
0x1101   :  { %v4007_v51 = vmax.f32 %v4005_v48, %v4006_v20 }
0x1102   :  { %v4060_v49 = vpop.xlane.xlu1 %4059 }
0x1103   :  { %v4061_v36 = vrot.slane %v4060_v49, 4  ;;  %v4008_v55 = vrot.slane %v4007_v51, 2 }
0x1105   :  { %v4062_v54 = vmax.f32 %v4060_v49, %v4061_v36  ;;  %v4009_v62 = vmax.f32 %v4007_v51, %v4008_v55 }
0x1106   :  { %v4168_v50 = vpop.xlane.xlu1 %4167 }
0x1107   :  { %v4169_v53 = vrot.slane %v4168_v50, 4  ;;  %v4063_v58 = vrot.slane %v4062_v54, 2  ;;  %v4010_v6 = vrot.slane %v4009_v62, 1 }
0x1109   :  { %v4170_v56 = vmax.f32 %v4168_v50, %v4169_v53  ;;  %v4064_v1 = vmax.f32 %v4062_v54, %v4063_v58  ;;  %v4011_v11 = vmax.f32 %v4009_v62, %v4010_v6 }
0x110b   :  { %v4171_v60 = vrot.slane %v4170_v56, 2  ;;  %v4065_v8 = vrot.slane %v4064_v1, 1 }
0x110d   :  { %v252_v57 = vpop.xlane.xlu0 %251  ;;  %v4172_v22 = vmax.f32 %v4170_v56, %v4171_v60  ;;  %v4066_v13 = vmax.f32 %v4064_v1, %v4065_v8 }
0x110e   :  { %v253_v59 = vrot.slane %v252_v57, 4 }
0x110f   :  { %v4173_v12 = vrot.slane %v4172_v22, 1 }
0x1110   :  { %v254_v29 = vmax.f32 %v252_v57, %v253_v59 }
0x1111   :  { %v4114_v61 = vpop.xlane.xlu0 %4113  ;;  %v4174_v4 = vmax.f32 %v4172_v22, %v4173_v12 }
0x1112   :  { %v255_v63 = vrot.slane %v254_v29, 2  ;;  %v4115_v0 = vrot.slane %v4114_v61, 4 }
0x1114   :  { %v4116_v2 = vmax.f32 %v4114_v61, %v4115_v0  ;;  %v256_v5 = vmax.f32 %v254_v29, %v255_v63 }
0x1116   :  { %v4117_v52 = vrot.slane %v4116_v2, 2  ;;  %v257_v7 = vrot.slane %v256_v5, 1 }
0x1118   :  { %v258_v9 = vmax.f32 %v256_v5, %v257_v7  ;;  %v4118_v10 = vmax.f32 %v4116_v2, %v4117_v52 }
0x111a   :  { %4989 = vpush %v258_v9  ;;  %v4119_v14 = vrot.slane %v4118_v10, 1 }
0x111b   :  { %4991 = vpush %v4011_v11 }
0x111c   :  { %4993 = vpush %v4066_v13  ;;  %v4120_v3 = vmax.f32 %v4118_v10, %v4119_v14 }
0x111e   :  { %4995 = vpush %v4120_v3 }
0x111f   :  { %4997 = vpush %v4174_v4 }
0x114b   :  { %s4990_s14 = spop %4989 }
0x114c   :  { %s260_s16 = smax.f32 %s5024_s15, %s4990_s14  ;;  %s4992_s17 = spop %4991 }
0x114d   :  { %v261_v15 = vstv %s260_s16  ;;  %s4013_s18 = smax.f32 %s5024_s15, %s4992_s17  ;;  %s4994_s19 = spop %4993 }
0x114e   :  { %5011 = vrcp.f32 %v261_v15  ;;  %s4068_s20 = smax.f32 %s4994_s19, %s4013_s18 }
0x114f   :  { %s4996_s1 = spop %4995 }
0x1150   :  { %s4122_s21 = smax.f32 %s4996_s1, %s4068_s20  ;;  %s4998_s22 = spop %4997 }
0x1151   :  { %s4176_s23 = smax.f32 %s4998_s22, %s4122_s21 }
0x1152   :  { %v4177_v16 = vstv %s4176_s23 }
0x1153   :  { %5013 = vrcp.f32 %v4177_v16 }
0x1158   :  { %v5012_v17 = vpop.eup %5011 }
0x1159   :  { %v263_v18 = vmul.f32 %v5012_v17, %v5618_v43 }
0x115b   :  { %264 = vst.msk [vmem:[%s5674_s6] sm:$0xff] %vm249_vm2, %v263_v18 }
0x115d   :  { %v5014_v21 = vpop.eup %5013 }
0x115e   :  { %4999 = vpush %v5014_v21 }
0x118f   :  { %s5000_s26 = spop %4999 }
0x1190   :  { %v4180_v23 = vstv %s5000_s26 }
0x1191   :  { %v4181_v24 = vmul.f32 %v4180_v23, %v5605_v31  ;;  %v4184_v25 = vmul.f32 %v4180_v23, %v5603_v28  ;;  %v4192_v26 = vmul.f32 %v4180_v23, %v5616_v42  ;;  %v4200_v27 = vmul.f32 %v4180_v23, %v5608_v33 }
0x1193   :  { %4183 = vst.msk [vmem:[%s5675_s8] sm:$0xff] %vm249_vm2, %v4181_v24  ;;  %4194 = vrot.lane.b32.xlu1 %v4192_v26, %s5018_s5  ;;  %4186 = vrot.lane.b32.xlu0 %v4184_v25, %s5019_s9  ;;  %4182 = vst.msk [vmem:[%s5676_s7] sm:$0xff] %vm249_vm2, %v4181_v24 }
0x1194   :  { %4191 = vst.msk [vmem:[%s5675_s8] sm:$0xff] %vm4057_vm3, %v4184_v25 }
0x1195   :  { %4199 = vst.msk [vmem:[%s5675_s8] sm:$0xff] %vm4111_vm5, %v4192_v26 }
0x1196   :  { %4207 = vst.msk [vmem:[%s5675_s8] sm:$0xff] %vm4165_vm4, %v4200_v27 }
0x1197   :  { %4202 = vrot.lane.b32.xlu1 %v4200_v27, %s5020_s10 }
0x1205   :  { %v4195_v28 = vpop.permute.xlu1 %4194  ;;  %v4187_v30 = vpop.permute.xlu0 %4186 }
0x1206   :  { %4337 = vst.msk [vmem:[%s5676_s7 + $0x10] sm:$0xff] %vm249_vm2, %v4195_v28  ;;  %4336 = vst.msk [vmem:[%s5676_s7 + $0x8] sm:$0xff] %vm249_vm2, %v4187_v30 }
0x1209   :  { %v4203_v31 = vpop.permute.xlu1 %4202 }
0x120a   :  { %4338 = vst.msk [vmem:[%s5676_s7 + $0x18] sm:$0xff] %vm249_vm2, %v4203_v31 }

// kernel: ipeps_forward.23
= control target key start
LH: loop header
LB: loop body
LE: loop exit
PB: predicated region body
PF: predicated region fallthrough
CT: control target
= control target key end

     0   :  { %s7683_s0 = inlined_call_operand.vmem [shape: f32[8,8], index: 0, kind: input, shape index: {}]   ;;  %s7684_s1 = inlined_call_operand.vmem [shape: f32[4,8,8], index: 1, kind: input, shape index: {}]   ;;  %s7685_s2 = inlined_call_operand.vmem [shape: f32[8,32], index: 2, kind: input, shape index: {}]   ;;  %s7686_s3 = inlined_call_operand.vmem [shape: f32[16,32,128], index: 3, kind: input, shape index: {}]   ;;  %s7687_s4 = inlined_call_operand.vmem [shape: f32[16,32,128], index: 4, kind: input, shape index: {}]   ;;  %s7688_s5 = inlined_call_operand.vmem [shape: f32[4,4], index: 5, kind: input, shape index: {}]   ;;  %s7689_s6 = inlined_call_operand.hbm [shape: f32[1,1], index: 6, kind: output, shape index: {}]  }
   0x1   :  { %7692 = sst [smem:[#allocation11_spill]] %s7689_s6 }
   0x2   :  { %11 = vsyncpa [#allocation4], 0 }
   0x3   :  { %12 = vsyncpa [#allocation3], 0  ;;  %s29_s23 = sshll.u32 %s7688_s5, 4  ;;  %s30_s23 = int_to_ptr.vmem [resolvable:$true] %s29_s23 }
   0x4   :  { %s6738_s24 = scalar_lea.vmem %s30_s23, 64  ;;  %p6743_p1 = scmp.lt.s32.totalorder %s30_s23, %s30_s23 }
   0x5   :  { %p6739_p0 = scmp.ne.s32.totalorder %s30_s23, %s6738_s24  ;;  %p6744_p2 = scmp.lt.s32.totalorder %s6738_s24, %s6738_s24 }
   0x7   :  { %p6745_p3 = por %p6744_p2, %p6743_p1 }
   0x9   :  { %p6746_p4 = pnand %p6745_p3, %p6739_p0 }
   0xb   :  { %6749 = shalt.err (!%p6746_p4)
}
   0xc   :  { %s6776_s25 = smov [#allocation2]  }
   0xd   :  { %32 = dma.vmem_to_smem %s30_s23, 64, %s6776_s25, [#allocation4]  }
   0xe   :  { %6772 = dma.done.wait [#allocation4], 64  }
   0xf   :  { %6773 = vsyncadd [#allocation4], 4294967232 }
  0x10   :  { %36 = sfence }
  0x11   :  { %v38_v0 = vld [vmem:[%s7685_s2] sm:$0xff]  ;;  %v6777_v2 = vmov 0.0   ;;  %vm39_vm0 = vcmask 64512   ;;  %vm6778_vm1 = vmmov 0   ;;  %v6843_v4 = vld [vmem:[%s7684_s1 + $0x8] sm:$0xff]  ;;  %v6850_v5 = vld [vmem:[%s7684_s1 + $0x10] sm:$0xff] }
  0x12   :  { %v6828_v1 = vld [vmem:[%s7684_s1] sm:$0xff]  ;;  %5904 = vmatprep.subr.mxu0 %v6777_v2  ;;  %5909 = vmatprep.subr.mxu1 %v6777_v2  ;;  %v6863_v6 = vld [vmem:[%s7684_s1 + $0x18] sm:$0xff]  ;;  %v5476_v16 = vld [vmem:[%s7686_s3 + $0x28] sm:$0xff]  ;;  %v6779_v17 = vmov 0.0|0.0   ;;  %vm702_vm2 = vcmask 261120   ;;  %s6781_s24 = smov 96  }
  0x13   :  { %v37_v3 = vld [vmem:[%s7683_s0] sm:$0xff]  ;;  %5905 = vmatpush3.msra.mxu0 %v38_v0  ;;  %5906 = vmatprep.mubr.msk.f32.mxu0 %vm6778_vm1, %v6777_v2  ;;  %v5477_v21 = vld [vmem:[%s7686_s3 + $0x30] sm:$0xff]  ;;  %v5478_v22 = vld [vmem:[%s7686_s3 + $0x38] sm:$0xff]  ;;  %s6782_s25 = smov 32   ;;  %s5655_s17 = sld [smem:[#allocation2 + $0x1]]  ;;  %vm5446_vm3 = vcmask 0  }
  0x14   :  { %5910 = vmatpush3.msra.mxu1 %v6828_v1  ;;  %5911 = vmatprep.mubr.msk.f32.mxu1 %vm6778_vm1, %v6777_v2  ;;  %v5475_v15 = vld [vmem:[%s7686_s3 + $0x20] sm:$0xff]  ;;  %v6445_v23 = vpack.c.bf16 %v5478_v22, %v5477_v21  ;;  %v5482_v25 = vld [vmem:[%s7687_s4 + $0x28] sm:$0xff]  ;;  %v5483_v29 = vld [vmem:[%s7687_s4 + $0x30] sm:$0xff]  ;;  %s5186_s18 = sld [smem:[#allocation2]]  ;;  %s5657_s20 = sld [smem:[#allocation2 + $0x81]] }
  0x15   :  { %5907 = vmatmul.mubr.msk.f32.vlgmr.msra.gmra.mrb[0].mxu0 %vm39_vm0, %v37_v3  ;;  %5912 = vmatmul.mubr.msk.f32.vlgmr.msra.gmra.mrb[0].mxu1 %vm39_vm0, %v37_v3  ;;  %v6442_v18 = vpack.c.bf16 %v5476_v16, %v5475_v15  ;;  %v5481_v24 = vld [vmem:[%s7687_s4 + $0x20] sm:$0xff]  ;;  %v5484_v30 = vld [vmem:[%s7687_s4 + $0x38] sm:$0xff]  ;;  %v547_v35 = vld [vmem:[%s7686_s3 + $0x8] sm:$0xff]  ;;  %s5656_s19 = sld [smem:[#allocation2 + $0x80]]  ;;  %s5658_s21 = sld [smem:[#allocation2 + $0x2]] }
  0x16   :  { %5914 = vmatprep.subr.mxu0 %v6777_v2  ;;  %5916 = vmatprep.mubr.msk.f32.mxu0 %vm6778_vm1, %v6777_v2  ;;  %v6454_v28 = vpack.c.bf16 %v5482_v25, %v5481_v24  ;;  %v6457_v33 = vpack.c.bf16 %v5484_v30, %v5483_v29  ;;  %v546_v34 = vld [vmem:[%s7686_s3] sm:$0xff]  ;;  %v551_v37 = vld [vmem:[%s7687_s4 + $0x8] sm:$0xff]  ;;  %v548_v42 = vld [vmem:[%s7686_s3 + $0x10] sm:$0xff] }
  0x17   :  { %5915 = vmatpush3.msra.mxu0 %v6843_v4  ;;  %5919 = vmatprep.subr.mxu1 %v6777_v2  ;;  %v550_v36 = vld [vmem:[%s7687_s4] sm:$0xff]  ;;  %v6448_v40 = vpack.c.bf16 %v547_v35, %v546_v34  ;;  %v549_v43 = vld [vmem:[%s7686_s3 + $0x18] sm:$0xff]  ;;  %v552_v44 = vld [vmem:[%s7687_s4 + $0x10] sm:$0xff] }
  0x18   :  { %5920 = vmatpush3.msra.mxu1 %v6850_v5  ;;  %5921 = vmatprep.mubr.msk.f32.mxu1 %vm6778_vm1, %v6777_v2  ;;  %v6460_v41 = vpack.c.bf16 %v551_v37, %v550_v36  ;;  %v553_v45 = vld [vmem:[%s7687_s4 + $0x18] sm:$0xff]  ;;  %v6451_v48 = vpack.c.bf16 %v549_v43, %v548_v42  ;;  %v5489_v50 = vld [vmem:[%s7686_s3 + $0x40] sm:$0xff]  ;;  %v5490_v51 = vld [vmem:[%s7686_s3 + $0x48] sm:$0xff] }
  0x19   :  { %5917 = vmatmul.mubr.msk.f32.vlgmr.msra.gmra.mrb[2].mxu0 %vm39_vm0, %v37_v3  ;;  %5922 = vmatmul.mubr.msk.f32.vlgmr.msra.gmra.mrb[2].mxu1 %vm39_vm0, %v37_v3  ;;  %v6463_v49 = vpack.c.bf16 %v553_v45, %v552_v44  ;;  %v6466_v52 = vpack.c.bf16 %v5490_v51, %v5489_v50  ;;  %v5491_v53 = vld [vmem:[%s7686_s3 + $0x50] sm:$0xff]  ;;  %v5492_v54 = vld [vmem:[%s7686_s3 + $0x58] sm:$0xff]  ;;  %v5494_v56 = vld [vmem:[%s7687_s4 + $0x40] sm:$0xff] }
  0x1a   :  { %5924 = vmatprep.subr.mxu0 %v6777_v2  ;;  %5926 = vmatprep.mubr.msk.f32.mxu0 %vm6778_vm1, %v6777_v2  ;;  %v6469_v55 = vpack.c.bf16 %v5492_v54, %v5491_v53  ;;  %v5495_v57 = vld [vmem:[%s7687_s4 + $0x48] sm:$0xff]  ;;  %v5496_v59 = vld [vmem:[%s7687_s4 + $0x50] sm:$0xff]  ;;  %v5497_v60 = vld [vmem:[%s7687_s4 + $0x58] sm:$0xff] }
  0x1b   :  { %5925 = vmatpush3.msra.mxu0 %v6863_v6  ;;  %5929 = vmatprep.subr.mxu1 %v6777_v2  ;;  %v6472_v58 = vpack.c.bf16 %v5495_v57, %v5494_v56  ;;  %v6475_v63 = vpack.c.bf16 %v5497_v60, %v5496_v59  ;;  %v5506_v16 = vld [vmem:[%s7687_s4 + $0x60] sm:$0xff]  ;;  %v5508_v21 = vld [vmem:[%s7687_s4 + $0x70] sm:$0xff]  ;;  %v5509_v22 = vld [vmem:[%s7687_s4 + $0x78] sm:$0xff] }
  0x1c   :  { %5934 = vmatprep.subr.mxu0 %v6777_v2  ;;  %5931 = vmatprep.mubr.msk.f32.mxu1 %vm6778_vm1, %v6777_v2  ;;  %v6487_v25 = vpack.c.bf16 %v5509_v22, %v5508_v21  ;;  %v5514_v29 = vld [vmem:[%s7686_s3 + $0x88] sm:$0xff]  ;;  %v5518_v34 = vld [vmem:[%s7687_s4 + $0x80] sm:$0xff]  ;;  %v5520_v37 = vld [vmem:[%s7687_s4 + $0x90] sm:$0xff] }
  0x1d   :  { %5927 = vmatmul.mubr.msk.f32.vlgmr.msra.gmra.mrb[4].mxu0 %vm39_vm0, %v37_v3  ;;  %v5519_v35 = vld [vmem:[%s7687_s4 + $0x88] sm:$0xff]  ;;  %v5525_v44 = vld [vmem:[%s7686_s3 + $0xa0] sm:$0xff]  ;;  %v5532_v53 = vld [vmem:[%s7687_s4 + $0xb0] sm:$0xff] }
  0x1e   :  { %5936 = vmatprep.mubr.msk.f32.mxu0 %vm6778_vm1, %v6777_v2  ;;  %v6496_v36 = vpack.c.bf16 %v5519_v35, %v5518_v34  ;;  %v5526_v45 = vld [vmem:[%s7686_s3 + $0xa8] sm:$0xff]  ;;  %v5530_v50 = vld [vmem:[%s7687_s4 + $0xa0] sm:$0xff]  ;;  %v5533_v54 = vld [vmem:[%s7687_s4 + $0xb8] sm:$0xff] }
  0x1f   :  { %v5531_v51 = vld [vmem:[%s7687_s4 + $0xa8] sm:$0xff]  ;;  %v6511_v57 = vpack.c.bf16 %v5533_v54, %v5532_v53  ;;  %v5537_v60 = vld [vmem:[%s7686_s3 + $0xc0] sm:$0xff] }
  0x20   :  { %v5549_v22 = vld [vmem:[%s7686_s3 + $0xe0] sm:$0xff]  ;;  %v5574_v54 = vld [vmem:[%s7686_s3 + $0x128] sm:$0xff] }
  0x21   :  { %v5573_v53 = vld [vmem:[%s7686_s3 + $0x120] sm:$0xff] }
  0xe8   :  { %v6878_v7 = vpop.f32.mrb[0].mxu0  ;;  %v6880_v8 = vpop.f32.mrb[0].mxu1 }
  0xe9   :  { %v5908_v9 = vpop.f32.mrb[1].mxu0  ;;  %v5913_v10 = vpop.f32.mrb[1].mxu1  ;;  %5930 = vmatpush3.msra.mxu1 %v6880_v8  ;;  %5935 = vmatpush3.msra.mxu0 %v6878_v7 }
  0xea   :  { %5932 = vmatmul.mubr.msk.f32.vlgmr.msra.gmra.mrb[4].mxu1 %vm39_vm0, %v6828_v1  ;;  %5939 = vmatprep.subr.mxu1 %v6777_v2  ;;  %v5501_v9 = vld [vmem:[%s7686_s3 + $0x60] sm:$0xff]  ;;  %v5502_v10 = vld [vmem:[%s7686_s3 + $0x68] sm:$0xff] }
  0xeb   :  { %5941 = vmatprep.mubr.msk.f32.mxu1 %vm6778_vm1, %v6777_v2  ;;  %5944 = vmatprep.subr.mxu0 %v6777_v2 }
  0xec   :  { %v6890_v11 = vpop.f32.mrb[2].mxu0  ;;  %v6892_v12 = vpop.f32.mrb[2].mxu1 }
  0xed   :  { %v5918_v13 = vpop.f32.mrb[3].mxu0  ;;  %5940 = vmatpush3.msra.mxu1 %v6890_v11  ;;  %v5923_v14 = vpop.f32.mrb[3].mxu1 }
  0xee   :  { %5942 = vmatmul.mubr.msk.f32.vlgmr.msra.gmra.mrb[6].mxu1 %vm39_vm0, %v6828_v1  ;;  %6441 = vmatprep.subr.bf16.mxu1 %v6779_v17  ;;  %v6478_v13 = vpack.c.bf16 %v5502_v10, %v5501_v9  ;;  %v5503_v14 = vld [vmem:[%s7686_s3 + $0x70] sm:$0xff]  ;;  %v5542_v9 = vld [vmem:[%s7687_s4 + $0xc0] sm:$0xff]  ;;  %v5543_v10 = vld [vmem:[%s7687_s4 + $0xc8] sm:$0xff] }
  0xef   :  { %5957 = vmatprep.mubr.msk.f32.mxu1 %vm6778_vm1, %v6777_v2  ;;  %6443 = vmatpush3.bf16.msra.mxu1 %v6442_v18  ;;  %v5507_v18 = vld [vmem:[%s7687_s4 + $0x68] sm:$0xff] }
  0xf0   :  { %v6906_v19 = vpop.f32.mrb[4].mxu0  ;;  %6444 = vmatprep.subr.bf16.mxu1 %v6779_v17 }
  0xf1   :  { %v5928_v20 = vpop.f32.mrb[5].mxu0 }
  0xf2   :  { %v6484_v20 = vpack.c.bf16 %v5507_v18, %v5506_v16 }
  0xf3   :  { %6446 = vmatpush3.bf16.msra.mxu1 %v6445_v23 }
  0xf4   :  { %6447 = vmatprep.subr.bf16.mxu1 %v6779_v17 }
 0x1bd   :  { %v469_v26 = vpop.f32.mrb[4].mxu1 }
 0x1be   :  { %5937 = vmatmul.mubr.msk.f32.vlgmr.msra.gmra.mrb[6].mxu0 %vm39_vm0, %v469_v26  ;;  %v5933_v27 = vpop.f32.mrb[5].mxu1 }
 0x1bf   :  { %5945 = vmatpush3.msra.mxu0 %v6878_v7  ;;  %5946 = vmatprep.mubr.msk.f32.mxu0 %vm6778_vm1, %v6777_v2 }
 0x1c0   :  { %6453 = vmatprep.subr.bf16.mxu0 %v6779_v17 }
 0x1c1   :  { %v620_v31 = vpop.f32.mrb[6].mxu1 }
 0x1c2   :  { %5947 = vmatmul.mubr.msk.f32.vlgmr.msra.gmra.mrb[8].mxu0 %vm39_vm0, %v620_v31  ;;  %v5943_v32 = vpop.f32.mrb[7].mxu1  ;;  %v5515_v31 = vld [vmem:[%s7686_s3 + $0x90] sm:$0xff] }
 0x1c3   :  { %6455 = vmatpush3.bf16.msra.mxu0 %v6454_v28  ;;  %5979 = vmatprep.mubr.msk.f32.mxu0 %vm6778_vm1, %v6777_v2  ;;  %v5513_v28 = vld [vmem:[%s7686_s3 + $0x80] sm:$0xff]  ;;  %v5516_v32 = vld [vmem:[%s7686_s3 + $0x98] sm:$0xff] }
 0x1c4   :  { %6456 = vmatprep.subr.bf16.mxu0 %v6779_v17  ;;  %v6490_v30 = vpack.c.bf16 %v5514_v29, %v5513_v28  ;;  %v5555_v28 = vld [vmem:[%s7687_s4 + $0xe8] sm:$0xff] }
 0x1c7   :  { %6458 = vmatpush3.bf16.msra.mxu0 %v6457_v33  ;;  %v6493_v33 = vpack.c.bf16 %v5516_v32, %v5515_v31  ;;  %v5557_v31 = vld [vmem:[%s7687_s4 + $0xf8] sm:$0xff] }
 0x1c8   :  { %6459 = vmatprep.subr.bf16.mxu0 %v6779_v17 }
 0x291   :  { %v542_v38 = vpop.f32.mrb[6].mxu0 }
 0x292   :  { %v5938_v39 = vpop.f32.mrb[7].mxu0 }
 0x295   :  { %v693_v46 = vpop.f32.mrb[8].mxu0 }
 0x296   :  { %5958 = vmatmul.mubr.msk.f32.vlgmr.msra.gmra.mrb[8].mxu1 %vm702_vm2, %v693_v46  ;;  %5980 = vmatmul.mubr.msk.f32.vlgmr.msra.gmra.mrb[10].mxu0 %vm702_vm2, %v693_v46  ;;  %v5948_v47 = vpop.f32.mrb[9].mxu0  ;;  %v6502_v46 = vpack.c.bf16 %v5526_v45, %v5525_v44  ;;  %v5567_v44 = vld [vmem:[%s7687_s4 + $0x108] sm:$0xff] }
 0x297   :  { %6449 = vmatpush3.bf16.msra.mxu1 %v6448_v40  ;;  %6461 = vmatpush3.bf16.msra.mxu0 %v6460_v41  ;;  %v5527_v47 = vld [vmem:[%s7686_s3 + $0xb0] sm:$0xff] }
 0x298   :  { %6450 = vmatprep.subr.bf16.mxu1 %v6779_v17  ;;  %6462 = vmatprep.subr.bf16.mxu0 %v6779_v17 }
 0x299   :  { %5968 = vmatprep.mubr.msk.f32.mxu1 %vm6778_vm1, %v6777_v2  ;;  %5990 = vmatprep.mubr.msk.f32.mxu0 %vm6778_vm1, %v6777_v2 }
 0x29b   :  { %6452 = vmatpush3.bf16.msra.mxu1 %v6451_v48  ;;  %6464 = vmatpush3.bf16.msra.mxu0 %v6463_v49  ;;  %v5528_v48 = vld [vmem:[%s7686_s3 + $0xb8] sm:$0xff] }
 0x29c   :  { %5993 = vmatprep.subr.mxu1 %v6777_v2  ;;  %5998 = vmatprep.subr.mxu0 %v6777_v2  ;;  %v6505_v49 = vpack.c.bf16 %v5528_v48, %v5527_v47  ;;  %v5569_v47 = vld [vmem:[%s7687_s4 + $0x118] sm:$0xff] }
 0x29e   :  { %5969 = vmatmul.mubr.msk.f32.vlgmr.msra.gmra.mrb[8].mxu1 %vm702_vm2, %v542_v38  ;;  %5991 = vmatmul.mubr.msk.f32.vlgmr.msra.gmra.mrb[10].mxu0 %vm702_vm2, %v542_v38  ;;  %v5521_v38 = vld [vmem:[%s7687_s4 + $0x98] sm:$0xff] }
 0x29f   :  { %5994 = vmatpush3.msra.mxu1 %v6892_v12  ;;  %5999 = vmatpush3.msra.mxu0 %v6878_v7  ;;  %v6499_v41 = vpack.c.bf16 %v5521_v38, %v5520_v37  ;;  %v5561_v37 = vld [vmem:[%s7686_s3 + $0x100] sm:$0xff]  ;;  %v5562_v38 = vld [vmem:[%s7686_s3 + $0x108] sm:$0xff] }
 0x2a0   :  { %5995 = vmatprep.mubr.msk.f32.mxu1 %vm6778_vm1, %v6777_v2  ;;  %6000 = vmatprep.mubr.msk.f32.mxu0 %vm6778_vm1, %v6777_v2 }
 0x2a1   :  { %6465 = vmatprep.subr.bf16.mxu1 %v6779_v17  ;;  %6471 = vmatprep.subr.bf16.mxu0 %v6779_v17 }
 0x2a2   :  { %5996 = vmatmul.mubr.msk.f32.vlgmr.msra.gmra.mrb[10].mxu1 %vm39_vm0, %v6828_v1 }
 0x2a3   :  { %6011 = vmatprep.mubr.msk.f32.mxu1 %vm6778_vm1, %v6777_v2  ;;  %6467 = vmatpush3.bf16.msra.mxu1 %v6466_v52  ;;  %v6508_v52 = vpack.c.bf16 %v5531_v51, %v5530_v50 }
 0x2a4   :  { %6468 = vmatprep.subr.bf16.mxu1 %v6779_v17 }
 0x2a7   :  { %6470 = vmatpush3.bf16.msra.mxu1 %v6469_v55 }
 0x2a8   :  { %6025 = vmatprep.subr.mxu1 %v6777_v2 }
 0x375   :  { %v1060_v61 = vpop.f32.mrb[10].mxu1 }
 0x376   :  { %6001 = vmatmul.mubr.msk.f32.vlgmr.msra.gmra.mrb[12].mxu0 %vm39_vm0, %v1060_v61  ;;  %v5997_v62 = vpop.f32.mrb[11].mxu1  ;;  %v5538_v61 = vld [vmem:[%s7686_s3 + $0xc8] sm:$0xff] }
 0x377   :  { %6473 = vmatpush3.bf16.msra.mxu0 %v6472_v58  ;;  %6022 = vmatprep.mubr.msk.f32.mxu0 %vm6778_vm1, %v6777_v2  ;;  %v6514_v62 = vpack.c.bf16 %v5538_v61, %v5537_v60  ;;  %v5579_v60 = vld [vmem:[%s7687_s4 + $0x128] sm:$0xff] }
 0x378   :  { %6474 = vmatprep.subr.bf16.mxu0 %v6779_v17 }
 0x37b   :  { %6476 = vmatpush3.bf16.msra.mxu0 %v6475_v63  ;;  %v5539_v63 = vld [vmem:[%s7686_s3 + $0xd0] sm:$0xff] }
 0x37c   :  { %6030 = vmatprep.subr.mxu0 %v6777_v2 }
 0x449   :  { %v1133_v0 = vpop.f32.mrb[12].mxu0 }
 0x44a   :  { %6012 = vmatmul.mubr.msk.f32.vlgmr.msra.gmra.mrb[8].mxu1 %vm702_vm2, %v1133_v0  ;;  %6023 = vmatmul.mubr.msk.f32.vlgmr.msra.gmra.mrb[10].mxu0 %vm702_vm2, %v1133_v0  ;;  %v6002_v3 = vpop.f32.mrb[13].mxu0  ;;  %v5540_v0 = vld [vmem:[%s7686_s3 + $0xd8] sm:$0xff] }
 0x44b   :  { %6026 = vmatpush3.msra.mxu1 %v6906_v19  ;;  %6031 = vmatpush3.msra.mxu0 %v6878_v7  ;;  %v6517_v3 = vpack.c.bf16 %v5540_v0, %v5539_v63  ;;  %v5581_v63 = vld [vmem:[%s7687_s4 + $0x138] sm:$0xff] }
 0x44c   :  { %6027 = vmatprep.mubr.msk.f32.mxu1 %vm6778_vm1, %v6777_v2  ;;  %6032 = vmatprep.mubr.msk.f32.mxu0 %vm6778_vm1, %v6777_v2 }
 0x44d   :  { %6477 = vmatprep.subr.bf16.mxu1 %v6779_v17  ;;  %6483 = vmatprep.subr.bf16.mxu0 %v6779_v17 }
 0x44e   :  { %6028 = vmatmul.mubr.msk.f32.vlgmr.msra.gmra.mrb[12].mxu1 %vm39_vm0, %v6828_v1  ;;  %v5504_v1 = vld [vmem:[%s7686_s3 + $0x78] sm:$0xff] }
 0x44f   :  { %6043 = vmatprep.mubr.msk.f32.mxu1 %vm6778_vm1, %v6777_v2  ;;  %6479 = vmatpush3.bf16.msra.mxu1 %v6478_v13  ;;  %v6481_v15 = vpack.c.bf16 %v5504_v1, %v5503_v14  ;;  %v6520_v13 = vpack.c.bf16 %v5543_v10, %v5542_v9  ;;  %v5544_v14 = vld [vmem:[%s7687_s4 + $0xd0] sm:$0xff]  ;;  %v5545_v1 = vld [vmem:[%s7687_s4 + $0xd8] sm:$0xff] }
 0x450   :  { %6480 = vmatprep.subr.bf16.mxu1 %v6779_v17  ;;  %v6523_v18 = vpack.c.bf16 %v5545_v1, %v5544_v14  ;;  %v5585_v14 = vld [vmem:[%s7686_s3 + $0x140] sm:$0xff]  ;;  %v5586_v1 = vld [vmem:[%s7686_s3 + $0x148] sm:$0xff] }
 0x453   :  { %6482 = vmatpush3.bf16.msra.mxu1 %v6481_v15 }
 0x454   :  { %6057 = vmatprep.subr.mxu1 %v6777_v2 }
 0x521   :  { %v1358_v23 = vpop.f32.mrb[12].mxu1 }
 0x522   :  { %6033 = vmatmul.mubr.msk.f32.vlgmr.msra.gmra.mrb[14].mxu0 %vm39_vm0, %v1358_v23  ;;  %v6029_v24 = vpop.f32.mrb[13].mxu1  ;;  %v5550_v23 = vld [vmem:[%s7686_s3 + $0xe8] sm:$0xff] }
 0x523   :  { %6485 = vmatpush3.bf16.msra.mxu0 %v6484_v20  ;;  %6054 = vmatprep.mubr.msk.f32.mxu0 %vm6778_vm1, %v6777_v2  ;;  %v6526_v24 = vpack.c.bf16 %v5550_v23, %v5549_v22  ;;  %v5591_v22 = vld [vmem:[%s7687_s4 + $0x148] sm:$0xff] }
 0x524   :  { %6486 = vmatprep.subr.bf16.mxu0 %v6779_v17 }
 0x527   :  { %6488 = vmatpush3.bf16.msra.mxu0 %v6487_v25  ;;  %v5551_v25 = vld [vmem:[%s7686_s3 + $0xf0] sm:$0xff] }
 0x528   :  { %6062 = vmatprep.subr.mxu0 %v6777_v2 }
 0x5f5   :  { %v1431_v26 = vpop.f32.mrb[14].mxu0 }
 0x5f6   :  { %6044 = vmatmul.mubr.msk.f32.vlgmr.msra.gmra.mrb[8].mxu1 %vm702_vm2, %v1431_v26  ;;  %6055 = vmatmul.mubr.msk.f32.vlgmr.msra.gmra.mrb[10].mxu0 %vm702_vm2, %v1431_v26  ;;  %v6034_v27 = vpop.f32.mrb[15].mxu0 }
 0x5f7   :  { %6058 = vmatpush3.msra.mxu1 %v6880_v8  ;;  %6063 = vmatpush3.msra.mxu0 %v6878_v7  ;;  %v5554_v27 = vld [vmem:[%s7687_s4 + $0xe0] sm:$0xff] }
 0x5f8   :  { %6059 = vmatprep.mubr.msk.f32.mxu1 %vm6778_vm1, %v6777_v2  ;;  %6064 = vmatprep.mubr.msk.f32.mxu0 %vm6778_vm1, %v6777_v2  ;;  %v6532_v29 = vpack.c.bf16 %v5555_v28, %v5554_v27 }
 0x5f9   :  { %6489 = vmatprep.subr.bf16.mxu1 %v6779_v17  ;;  %6495 = vmatprep.subr.bf16.mxu0 %v6779_v17 }
 0x5fa   :  { %6060 = vmatmul.mubr.msk.f32.vlgmr.msra.gmra.mrb[14].mxu1 %vm39_vm0, %v6843_v4 }
 0x5fb   :  { %6075 = vmatprep.mubr.msk.f32.mxu1 %vm6778_vm1, %v6777_v2  ;;  %6491 = vmatpush3.bf16.msra.mxu1 %v6490_v30  ;;  %v5556_v30 = vld [vmem:[%s7687_s4 + $0xf0] sm:$0xff] }
 0x5fc   :  { %6492 = vmatprep.subr.bf16.mxu1 %v6779_v17  ;;  %v6535_v34 = vpack.c.bf16 %v5557_v31, %v5556_v30  ;;  %v5597_v30 = vld [vmem:[%s7686_s3 + $0x160] sm:$0xff]  ;;  %v5598_v31 = vld [vmem:[%s7686_s3 + $0x168] sm:$0xff] }
 0x5ff   :  { %6494 = vmatpush3.bf16.msra.mxu1 %v6493_v33 }
 0x600   :  { %6089 = vmatprep.subr.mxu1 %v6777_v2 }
 0x6cd   :  { %v1659_v39 = vpop.f32.mrb[14].mxu1 }
 0x6ce   :  { %6065 = vmatmul.mubr.msk.f32.vlgmr.msra.gmra.mrb[16].mxu0 %vm39_vm0, %v1659_v39  ;;  %v6061_v40 = vpop.f32.mrb[15].mxu1  ;;  %v6538_v39 = vpack.c.bf16 %v5562_v38, %v5561_v37  ;;  %v5604_v38 = vld [vmem:[%s7687_s4 + $0x170] sm:$0xff] }
 0x6cf   :  { %6497 = vmatpush3.bf16.msra.mxu0 %v6496_v36  ;;  %6086 = vmatprep.mubr.msk.f32.mxu0 %vm6778_vm1, %v6777_v2  ;;  %v5563_v40 = vld [vmem:[%s7686_s3 + $0x110] sm:$0xff] }
 0x6d0   :  { %6498 = vmatprep.subr.bf16.mxu0 %v6779_v17 }
 0x6d3   :  { %6500 = vmatpush3.bf16.msra.mxu0 %v6499_v41  ;;  %v5564_v41 = vld [vmem:[%s7686_s3 + $0x118] sm:$0xff] }
 0x6d4   :  { %6094 = vmatprep.subr.mxu0 %v6777_v2 }
 0x7a1   :  { %v1732_v42 = vpop.f32.mrb[16].mxu0 }
 0x7a2   :  { %6076 = vmatmul.mubr.msk.f32.vlgmr.msra.gmra.mrb[8].mxu1 %vm702_vm2, %v1732_v42  ;;  %6087 = vmatmul.mubr.msk.f32.vlgmr.msra.gmra.mrb[10].mxu0 %vm702_vm2, %v1732_v42  ;;  %v6066_v43 = vpop.f32.mrb[17].mxu0  ;;  %v6541_v42 = vpack.c.bf16 %v5564_v41, %v5563_v40 }
 0x7a3   :  { %6090 = vmatpush3.msra.mxu1 %v6890_v11  ;;  %6095 = vmatpush3.msra.mxu0 %v6878_v7  ;;  %v5566_v43 = vld [vmem:[%s7687_s4 + $0x100] sm:$0xff] }
 0x7a4   :  { %6091 = vmatprep.mubr.msk.f32.mxu1 %vm6778_vm1, %v6777_v2  ;;  %6096 = vmatprep.mubr.msk.f32.mxu0 %vm6778_vm1, %v6777_v2  ;;  %v6544_v45 = vpack.c.bf16 %v5567_v44, %v5566_v43 }
 0x7a5   :  { %6501 = vmatprep.subr.bf16.mxu1 %v6779_v17  ;;  %6507 = vmatprep.subr.bf16.mxu0 %v6779_v17 }
 0x7a6   :  { %6092 = vmatmul.mubr.msk.f32.vlgmr.msra.gmra.mrb[16].mxu1 %vm39_vm0, %v6843_v4 }
 0x7a7   :  { %6107 = vmatprep.mubr.msk.f32.mxu1 %vm6778_vm1, %v6777_v2  ;;  %6503 = vmatpush3.bf16.msra.mxu1 %v6502_v46  ;;  %v5568_v46 = vld [vmem:[%s7687_s4 + $0x110] sm:$0xff] }
 0x7a8   :  { %6504 = vmatprep.subr.bf16.mxu1 %v6779_v17  ;;  %v6547_v50 = vpack.c.bf16 %v5569_v47, %v5568_v46  ;;  %v5611_v47 = vld [vmem:[%s7686_s3 + $0x190] sm:$0xff] }
 0x7ab   :  { %6506 = vmatpush3.bf16.msra.mxu1 %v6505_v49 }
 0x7ac   :  { %6121 = vmatprep.subr.mxu1 %v6777_v2 }
 0x879   :  { %v1957_v55 = vpop.f32.mrb[16].mxu1 }
 0x87a   :  { %6097 = vmatmul.mubr.msk.f32.vlgmr.msra.gmra.mrb[18].mxu0 %vm39_vm0, %v1957_v55  ;;  %v6093_v56 = vpop.f32.mrb[17].mxu1  ;;  %v6550_v55 = vpack.c.bf16 %v5574_v54, %v5573_v53  ;;  %v5616_v53 = vld [vmem:[%s7687_s4 + $0x190] sm:$0xff]  ;;  %v5617_v54 = vld [vmem:[%s7687_s4 + $0x198] sm:$0xff] }
 0x87b   :  { %6509 = vmatpush3.bf16.msra.mxu0 %v6508_v52  ;;  %6118 = vmatprep.mubr.msk.f32.mxu0 %vm6778_vm1, %v6777_v2  ;;  %v5575_v56 = vld [vmem:[%s7686_s3 + $0x130] sm:$0xff] }
 0x87c   :  { %6510 = vmatprep.subr.bf16.mxu0 %v6779_v17 }
 0x87f   :  { %6512 = vmatpush3.bf16.msra.mxu0 %v6511_v57  ;;  %v5576_v57 = vld [vmem:[%s7686_s3 + $0x138] sm:$0xff] }
 0x880   :  { %6126 = vmatprep.subr.mxu0 %v6777_v2 }
 0x94d   :  { %v2030_v58 = vpop.f32.mrb[18].mxu0 }
 0x94e   :  { %6108 = vmatmul.mubr.msk.f32.vlgmr.msra.gmra.mrb[8].mxu1 %vm702_vm2, %v2030_v58  ;;  %6119 = vmatmul.mubr.msk.f32.vlgmr.msra.gmra.mrb[10].mxu0 %vm702_vm2, %v2030_v58  ;;  %v6098_v59 = vpop.f32.mrb[19].mxu0  ;;  %v6553_v58 = vpack.c.bf16 %v5576_v57, %v5575_v56  ;;  %v6595_v57 = vpack.c.bf16 %v5617_v54, %v5616_v53 }
 0x94f   :  { %6122 = vmatpush3.msra.mxu1 %v6892_v12  ;;  %6127 = vmatpush3.msra.mxu0 %v6878_v7  ;;  %v5578_v59 = vld [vmem:[%s7687_s4 + $0x120] sm:$0xff] }
 0x950   :  { %6123 = vmatprep.mubr.msk.f32.mxu1 %vm6778_vm1, %v6777_v2  ;;  %6128 = vmatprep.mubr.msk.f32.mxu0 %vm6778_vm1, %v6777_v2  ;;  %v6556_v61 = vpack.c.bf16 %v5579_v60, %v5578_v59  ;;  %v5622_v60 = vld [vmem:[%s7686_s3 + $0x1a8] sm:$0xff] }
 0x951   :  { %6513 = vmatprep.subr.bf16.mxu1 %v6779_v17  ;;  %6519 = vmatprep.subr.bf16.mxu0 %v6779_v17 }
 0x952   :  { %6124 = vmatmul.mubr.msk.f32.vlgmr.msra.gmra.mrb[18].mxu1 %vm39_vm0, %v6843_v4 }
 0x953   :  { %6139 = vmatprep.mubr.msk.f32.mxu1 %vm6778_vm1, %v6777_v2  ;;  %6515 = vmatpush3.bf16.msra.mxu1 %v6514_v62  ;;  %v5580_v62 = vld [vmem:[%s7687_s4 + $0x130] sm:$0xff] }
 0x954   :  { %6516 = vmatprep.subr.bf16.mxu1 %v6779_v17  ;;  %v6559_v9 = vpack.c.bf16 %v5581_v63, %v5580_v62  ;;  %v5623_v62 = vld [vmem:[%s7686_s3 + $0x1b0] sm:$0xff] }
 0x957   :  { %6518 = vmatpush3.bf16.msra.mxu1 %v6517_v3 }
 0x958   :  { %6153 = vmatprep.subr.mxu1 %v6777_v2 }
 0xa25   :  { %v2255_v15 = vpop.f32.mrb[18].mxu1 }
 0xa26   :  { %6129 = vmatmul.mubr.msk.f32.vlgmr.msra.gmra.mrb[20].mxu0 %vm39_vm0, %v2255_v15  ;;  %v6125_v16 = vpop.f32.mrb[19].mxu1  ;;  %v6562_v15 = vpack.c.bf16 %v5586_v1, %v5585_v14 }
 0xa27   :  { %6521 = vmatpush3.bf16.msra.mxu0 %v6520_v13  ;;  %6150 = vmatprep.mubr.msk.f32.mxu0 %vm6778_vm1, %v6777_v2  ;;  %v5587_v16 = vld [vmem:[%s7686_s3 + $0x150] sm:$0xff] }
 0xa28   :  { %6522 = vmatprep.subr.bf16.mxu0 %v6779_v17 }
 0xa2b   :  { %6524 = vmatpush3.bf16.msra.mxu0 %v6523_v18  ;;  %v5588_v18 = vld [vmem:[%s7686_s3 + $0x158] sm:$0xff] }
 0xa2c   :  { %6158 = vmatprep.subr.mxu0 %v6777_v2 }
 0xaf9   :  { %v2328_v20 = vpop.f32.mrb[20].mxu0 }
 0xafa   :  { %6140 = vmatmul.mubr.msk.f32.vlgmr.msra.gmra.mrb[8].mxu1 %vm702_vm2, %v2328_v20  ;;  %6151 = vmatmul.mubr.msk.f32.vlgmr.msra.gmra.mrb[10].mxu0 %vm702_vm2, %v2328_v20  ;;  %v6130_v21 = vpop.f32.mrb[21].mxu0  ;;  %v6565_v20 = vpack.c.bf16 %v5588_v18, %v5587_v16 }
 0xafb   :  { %6154 = vmatpush3.msra.mxu1 %v6906_v19  ;;  %6159 = vmatpush3.msra.mxu0 %v6878_v7  ;;  %v5590_v21 = vld [vmem:[%s7687_s4 + $0x140] sm:$0xff] }
 0xafc   :  { %6155 = vmatprep.mubr.msk.f32.mxu1 %vm6778_vm1, %v6777_v2  ;;  %6160 = vmatprep.mubr.msk.f32.mxu0 %vm6778_vm1, %v6777_v2  ;;  %v6568_v23 = vpack.c.bf16 %v5591_v22, %v5590_v21  ;;  %v5634_v21 = vld [vmem:[%s7686_s3 + $0x1c8] sm:$0xff] }
 0xafd   :  { %6525 = vmatprep.subr.bf16.mxu1 %v6779_v17  ;;  %6531 = vmatprep.subr.bf16.mxu0 %v6779_v17 }
 0xafe   :  { %6156 = vmatmul.mubr.msk.f32.vlgmr.msra.gmra.mrb[20].mxu1 %vm39_vm0, %v6843_v4  ;;  %v5552_v4 = vld [vmem:[%s7686_s3 + $0xf8] sm:$0xff] }
 0xaff   :  { %6171 = vmatprep.mubr.msk.f32.mxu1 %vm6778_vm1, %v6777_v2  ;;  %6527 = vmatpush3.bf16.msra.mxu1 %v6526_v24  ;;  %v6529_v26 = vpack.c.bf16 %v5552_v4, %v5551_v25  ;;  %v5592_v24 = vld [vmem:[%s7687_s4 + $0x150] sm:$0xff]  ;;  %v5593_v25 = vld [vmem:[%s7687_s4 + $0x158] sm:$0xff] }
 0xb00   :  { %6528 = vmatprep.subr.bf16.mxu1 %v6779_v17  ;;  %v6571_v27 = vpack.c.bf16 %v5593_v25, %v5592_v24  ;;  %v5636_v24 = vld [vmem:[%s7686_s3 + $0x1d8] sm:$0xff] }
 0xb03   :  { %6530 = vmatpush3.bf16.msra.mxu1 %v6529_v26 }
 0xb04   :  { %6185 = vmatprep.subr.mxu1 %v6777_v2 }
 0xbd1   :  { %v2553_v32 = vpop.f32.mrb[20].mxu1 }
 0xbd2   :  { %6161 = vmatmul.mubr.msk.f32.vlgmr.msra.gmra.mrb[22].mxu0 %vm39_vm0, %v2553_v32  ;;  %v6157_v33 = vpop.f32.mrb[21].mxu1  ;;  %v6574_v32 = vpack.c.bf16 %v5598_v31, %v5597_v30 }
 0xbd3   :  { %6533 = vmatpush3.bf16.msra.mxu0 %v6532_v29  ;;  %6182 = vmatprep.mubr.msk.f32.mxu0 %vm6778_vm1, %v6777_v2  ;;  %v5599_v33 = vld [vmem:[%s7686_s3 + $0x170] sm:$0xff] }
 0xbd4   :  { %6534 = vmatprep.subr.bf16.mxu0 %v6779_v17 }
 0xbd7   :  { %6536 = vmatpush3.bf16.msra.mxu0 %v6535_v34 }
 0xbd8   :  { %6190 = vmatprep.subr.mxu0 %v6777_v2 }
 0xca5   :  { %v2626_v35 = vpop.f32.mrb[22].mxu0 }
 0xca6   :  { %6172 = vmatmul.mubr.msk.f32.vlgmr.msra.gmra.mrb[8].mxu1 %vm702_vm2, %v2626_v35  ;;  %6183 = vmatmul.mubr.msk.f32.vlgmr.msra.gmra.mrb[10].mxu0 %vm702_vm2, %v2626_v35  ;;  %v6162_v36 = vpop.f32.mrb[23].mxu0  ;;  %v5602_v35 = vld [vmem:[%s7687_s4 + $0x160] sm:$0xff] }
 0xca7   :  { %6186 = vmatpush3.msra.mxu1 %v6880_v8  ;;  %6191 = vmatpush3.msra.mxu0 %v6878_v7  ;;  %v5603_v36 = vld [vmem:[%s7687_s4 + $0x168] sm:$0xff] }
 0xca8   :  { %6187 = vmatprep.mubr.msk.f32.mxu1 %vm6778_vm1, %v6777_v2  ;;  %6192 = vmatprep.mubr.msk.f32.mxu0 %vm6778_vm1, %v6777_v2  ;;  %v6580_v37 = vpack.c.bf16 %v5603_v36, %v5602_v35  ;;  %v5647_v35 = vld [vmem:[%s7686_s3 + $0x1f0] sm:$0xff]  ;;  %v5648_v36 = vld [vmem:[%s7686_s3 + $0x1f8] sm:$0xff] }
 0xca9   :  { %6537 = vmatprep.subr.bf16.mxu1 %v6779_v17  ;;  %6543 = vmatprep.subr.bf16.mxu0 %v6779_v17 }
 0xcaa   :  { %6188 = vmatmul.mubr.msk.f32.vlgmr.msra.gmra.mrb[22].mxu1 %vm39_vm0, %v6850_v5 }
 0xcab   :  { %6203 = vmatprep.mubr.msk.f32.mxu1 %vm6778_vm1, %v6777_v2  ;;  %6539 = vmatpush3.bf16.msra.mxu1 %v6538_v39  ;;  %v5605_v39 = vld [vmem:[%s7687_s4 + $0x178] sm:$0xff] }
 0xcac   :  { %6540 = vmatprep.subr.bf16.mxu1 %v6779_v17 }
 0xcaf   :  { %6542 = vmatpush3.bf16.msra.mxu1 %v6541_v42  ;;  %v6583_v42 = vpack.c.bf16 %v5605_v39, %v5604_v38  ;;  %v5650_v38 = vld [vmem:[%s7687_s4 + $0x1e0] sm:$0xff]  ;;  %v5651_v39 = vld [vmem:[%s7687_s4 + $0x1e8] sm:$0xff] }
 0xcb0   :  { %6217 = vmatprep.subr.mxu1 %v6777_v2 }
 0xd7d   :  { %v2854_v48 = vpop.f32.mrb[22].mxu1 }
 0xd7e   :  { %6193 = vmatmul.mubr.msk.f32.vlgmr.msra.gmra.mrb[24].mxu0 %vm39_vm0, %v2854_v48  ;;  %v6189_v49 = vpop.f32.mrb[23].mxu1  ;;  %v5612_v48 = vld [vmem:[%s7686_s3 + $0x198] sm:$0xff] }
 0xd7f   :  { %6545 = vmatpush3.bf16.msra.mxu0 %v6544_v45  ;;  %6214 = vmatprep.mubr.msk.f32.mxu0 %vm6778_vm1, %v6777_v2  ;;  %v5610_v45 = vld [vmem:[%s7686_s3 + $0x188] sm:$0xff]  ;;  %v6589_v49 = vpack.c.bf16 %v5612_v48, %v5611_v47 }
 0xd80   :  { %6546 = vmatprep.subr.bf16.mxu0 %v6779_v17 }
 0xd83   :  { %6548 = vmatpush3.bf16.msra.mxu0 %v6547_v50  ;;  %v5614_v50 = vld [vmem:[%s7687_s4 + $0x180] sm:$0xff] }
 0xd84   :  { %6222 = vmatprep.subr.mxu0 %v6777_v2 }
 0xe51   :  { %v2927_v51 = vpop.f32.mrb[24].mxu0 }
 0xe52   :  { %6204 = vmatmul.mubr.msk.f32.vlgmr.msra.gmra.mrb[8].mxu1 %vm702_vm2, %v2927_v51  ;;  %6215 = vmatmul.mubr.msk.f32.vlgmr.msra.gmra.mrb[10].mxu0 %vm702_vm2, %v2927_v51  ;;  %v6194_v52 = vpop.f32.mrb[25].mxu0  ;;  %v5615_v51 = vld [vmem:[%s7687_s4 + $0x188] sm:$0xff] }
 0xe53   :  { %6218 = vmatpush3.msra.mxu1 %v6890_v11  ;;  %6223 = vmatpush3.msra.mxu0 %v6878_v7  ;;  %v6592_v52 = vpack.c.bf16 %v5615_v51, %v5614_v50 }
 0xe54   :  { %6219 = vmatprep.mubr.msk.f32.mxu1 %vm6778_vm1, %v6777_v2  ;;  %6224 = vmatprep.mubr.msk.f32.mxu0 %vm6778_vm1, %v6777_v2 }
 0xe55   :  { %6549 = vmatprep.subr.bf16.mxu1 %v6779_v17  ;;  %6555 = vmatprep.subr.bf16.mxu0 %v6779_v17 }
 0xe56   :  { %6220 = vmatmul.mubr.msk.f32.vlgmr.msra.gmra.mrb[24].mxu1 %vm39_vm0, %v6850_v5 }
 0xe57   :  { %6235 = vmatprep.mubr.msk.f32.mxu1 %vm6778_vm1, %v6777_v2  ;;  %6551 = vmatpush3.bf16.msra.mxu1 %v6550_v55 }
 0xe58   :  { %6552 = vmatprep.subr.bf16.mxu1 %v6779_v17 }
 0xe5b   :  { %6554 = vmatpush3.bf16.msra.mxu1 %v6553_v58 }
 0xe5c   :  { %6249 = vmatprep.subr.mxu1 %v6777_v2 }
 0xf29   :  { %v3152_v0 = vpop.f32.mrb[24].mxu1 }
 0xf2a   :  { %6225 = vmatmul.mubr.msk.f32.vlgmr.msra.gmra.mrb[26].mxu0 %vm39_vm0, %v3152_v0  ;;  %v6221_v3 = vpop.f32.mrb[25].mxu1  ;;  %v5626_v0 = vld [vmem:[%s7687_s4 + $0x1a0] sm:$0xff] }
 0xf2b   :  { %6557 = vmatpush3.bf16.msra.mxu0 %v6556_v61  ;;  %6246 = vmatprep.mubr.msk.f32.mxu0 %vm6778_vm1, %v6777_v2  ;;  %v5627_v3 = vld [vmem:[%s7687_s4 + $0x1a8] sm:$0xff] }
 0xf2c   :  { %6558 = vmatprep.subr.bf16.mxu0 %v6779_v17 }
 0xf2f   :  { %6560 = vmatpush3.bf16.msra.mxu0 %v6559_v9  ;;  %v6604_v9 = vpack.c.bf16 %v5627_v3, %v5626_v0 }
 0xf30   :  { %6254 = vmatprep.subr.mxu0 %v6777_v2 }
 0xffd   :  { %v3225_v10 = vpop.f32.mrb[26].mxu0 }
 0xffe   :  { %6236 = vmatmul.mubr.msk.f32.vlgmr.msra.gmra.mrb[8].mxu1 %vm702_vm2, %v3225_v10  ;;  %6247 = vmatmul.mubr.msk.f32.vlgmr.msra.gmra.mrb[10].mxu0 %vm702_vm2, %v3225_v10  ;;  %v6226_v13 = vpop.f32.mrb[27].mxu0  ;;  %v5628_v10 = vld [vmem:[%s7687_s4 + $0x1b0] sm:$0xff] }
 0xfff   :  { %6250 = vmatpush3.msra.mxu1 %v6892_v12  ;;  %6255 = vmatpush3.msra.mxu0 %v6878_v7  ;;  %v5629_v13 = vld [vmem:[%s7687_s4 + $0x1b8] sm:$0xff] }
0x1000   :  { %6251 = vmatprep.mubr.msk.f32.mxu1 %vm6778_vm1, %v6777_v2  ;;  %6256 = vmatprep.mubr.msk.f32.mxu0 %vm6778_vm1, %v6777_v2 }
0x1001   :  { %6561 = vmatprep.subr.bf16.mxu1 %v6779_v17  ;;  %6567 = vmatprep.subr.bf16.mxu0 %v6779_v17 }
0x1002   :  { %6252 = vmatmul.mubr.msk.f32.vlgmr.msra.gmra.mrb[26].mxu1 %vm39_vm0, %v6850_v5 }
0x1003   :  { %6267 = vmatprep.mubr.msk.f32.mxu1 %vm6778_vm1, %v6777_v2  ;;  %6563 = vmatpush3.bf16.msra.mxu1 %v6562_v15  ;;  %v6607_v15 = vpack.c.bf16 %v5629_v13, %v5628_v10 }
0x1004   :  { %6564 = vmatprep.subr.bf16.mxu1 %v6779_v17 }
0x1007   :  { %6566 = vmatpush3.bf16.msra.mxu1 %v6565_v20  ;;  %v6737_v20 = vld [vmem:[%s7684_s1 + $0x18] sm:$0xff] }
0x1008   :  { %6281 = vmatprep.subr.mxu1 %v6777_v2 }
0x10d5   :  { %v3450_v4 = vpop.f32.mrb[26].mxu1 }
0x10d6   :  { %6257 = vmatmul.mubr.msk.f32.vlgmr.msra.gmra.mrb[28].mxu0 %vm39_vm0, %v3450_v4  ;;  %v6253_v26 = vpop.f32.mrb[27].mxu1  ;;  %v5638_v4 = vld [vmem:[%s7687_s4 + $0x1c0] sm:$0xff] }
0x10d7   :  { %6569 = vmatpush3.bf16.msra.mxu0 %v6568_v23  ;;  %6278 = vmatprep.mubr.msk.f32.mxu0 %vm6778_vm1, %v6777_v2  ;;  %v5635_v23 = vld [vmem:[%s7686_s3 + $0x1d0] sm:$0xff]  ;;  %v5639_v26 = vld [vmem:[%s7687_s4 + $0x1c8] sm:$0xff] }
0x10d8   :  { %6570 = vmatprep.subr.bf16.mxu0 %v6779_v17  ;;  %v6613_v25 = vpack.c.bf16 %v5636_v24, %v5635_v23 }
0x10db   :  { %6572 = vmatpush3.bf16.msra.mxu0 %v6571_v27  ;;  %v6616_v27 = vpack.c.bf16 %v5639_v26, %v5638_v4 }
0x10dc   :  { %6286 = vmatprep.subr.mxu0 %v6777_v2 }
0x11a9   :  { %v3523_v28 = vpop.f32.mrb[28].mxu0 }
0x11aa   :  { %6268 = vmatmul.mubr.msk.f32.vlgmr.msra.gmra.mrb[8].mxu1 %vm702_vm2, %v3523_v28  ;;  %6279 = vmatmul.mubr.msk.f32.vlgmr.msra.gmra.mrb[10].mxu0 %vm702_vm2, %v3523_v28  ;;  %v6258_v29 = vpop.f32.mrb[29].mxu0  ;;  %v5640_v28 = vld [vmem:[%s7687_s4 + $0x1d0] sm:$0xff] }
0x11ab   :  { %6282 = vmatpush3.msra.mxu1 %v6906_v19  ;;  %6287 = vmatpush3.msra.mxu0 %v6878_v7  ;;  %v5641_v29 = vld [vmem:[%s7687_s4 + $0x1d8] sm:$0xff] }
0x11ac   :  { %6283 = vmatprep.mubr.msk.f32.mxu1 %vm6778_vm1, %v6777_v2  ;;  %6288 = vmatprep.mubr.msk.f32.mxu0 %vm6778_vm1, %v6777_v2 }
0x11ad   :  { %6573 = vmatprep.subr.bf16.mxu1 %v6779_v17  ;;  %6579 = vmatprep.subr.bf16.mxu0 %v6779_v17 }
0x11ae   :  { %6284 = vmatmul.mubr.msk.f32.vlgmr.msra.gmra.mrb[28].mxu1 %vm39_vm0, %v6850_v5  ;;  %v5600_v5 = vld [vmem:[%s7686_s3 + $0x178] sm:$0xff] }
0x11af   :  { %6299 = vmatprep.mubr.msk.f32.mxu1 %vm6778_vm1, %v6777_v2  ;;  %6575 = vmatpush3.bf16.msra.mxu1 %v6574_v32  ;;  %v6577_v34 = vpack.c.bf16 %v5600_v5, %v5599_v33  ;;  %v6619_v32 = vpack.c.bf16 %v5641_v29, %v5640_v28 }
0x11b0   :  { %6576 = vmatprep.subr.bf16.mxu1 %v6779_v17 }
0x11b3   :  { %6578 = vmatpush3.bf16.msra.mxu1 %v6577_v34 }
0x11b4   :  { %6313 = vmatprep.subr.mxu1 %v6777_v2 }
0x1281   :  { %v3748_v40 = vpop.f32.mrb[28].mxu1 }
0x1282   :  { %6289 = vmatmul.mubr.msk.f32.vlgmr.msra.gmra.mrb[30].mxu0 %vm39_vm0, %v3748_v40  ;;  %v6285_v41 = vpop.f32.mrb[29].mxu1  ;;  %v6628_v40 = vpack.c.bf16 %v5651_v39, %v5650_v38 }
0x1283   :  { %6581 = vmatpush3.bf16.msra.mxu0 %v6580_v37  ;;  %6310 = vmatprep.mubr.msk.f32.mxu0 %vm6778_vm1, %v6777_v2  ;;  %v6625_v37 = vpack.c.bf16 %v5648_v36, %v5647_v35  ;;  %v5652_v41 = vld [vmem:[%s7687_s4 + $0x1f0] sm:$0xff] }
0x1284   :  { %6582 = vmatprep.subr.bf16.mxu0 %v6779_v17 }
0x1287   :  { %6584 = vmatpush3.bf16.msra.mxu0 %v6583_v42  ;;  %v5653_v42 = vld [vmem:[%s7687_s4 + $0x1f8] sm:$0xff]  ;;  %s6780_s4 = smov 64  }
0x1288   :  { %6318 = vmatprep.subr.mxu0 %v6777_v2 }
0x1355   :  { %v3821_v43 = vpop.f32.mrb[30].mxu0 }
0x1356   :  { %6300 = vmatmul.mubr.msk.f32.vlgmr.msra.gmra.mrb[8].mxu1 %vm702_vm2, %v3821_v43  ;;  %6311 = vmatmul.mubr.msk.f32.vlgmr.msra.gmra.mrb[10].mxu0 %vm702_vm2, %v3821_v43  ;;  %v6290_v44 = vpop.f32.mrb[31].mxu0 }
0x1357   :  { %6314 = vmatpush3.msra.mxu1 %v6880_v8  ;;  %6319 = vmatpush3.msra.mxu0 %v6878_v7  ;;  %v5609_v8 = vld [vmem:[%s7686_s3 + $0x180] sm:$0xff] }
0x1358   :  { %6315 = vmatprep.mubr.msk.f32.mxu1 %vm6778_vm1, %v6777_v2  ;;  %6320 = vmatprep.mubr.msk.f32.mxu0 %vm6778_vm1, %v6777_v2  ;;  %v6586_v46 = vpack.c.bf16 %v5610_v45, %v5609_v8  ;;  %v6631_v8 = vpack.c.bf16 %v5653_v42, %v5652_v41 }
0x1359   :  { %6585 = vmatprep.subr.bf16.mxu1 %v6779_v17  ;;  %6591 = vmatprep.subr.bf16.mxu0 %v6779_v17 }
0x135a   :  { %6316 = vmatmul.mubr.msk.f32.vlgmr.msra.gmra.mrb[30].mxu1 %vm39_vm0, %v6863_v6 }
0x135b   :  { %6331 = vmatprep.mubr.msk.f32.mxu1 %vm6778_vm1, %v6777_v2  ;;  %6587 = vmatpush3.bf16.msra.mxu1 %v6586_v46 }
0x135c   :  { %6588 = vmatprep.subr.bf16.mxu1 %v6779_v17 }
0x135f   :  { %6590 = vmatpush3.bf16.msra.mxu1 %v6589_v49 }
0x1360   :  { %6345 = vmatprep.subr.mxu1 %v6777_v2 }
0x142d   :  { %v4049_v55 = vpop.f32.mrb[30].mxu1 }
0x142e   :  { %6321 = vmatmul.mubr.msk.f32.vlgmr.msra.gmra.mrb[32].mxu0 %vm39_vm0, %v4049_v55  ;;  %v6317_v56 = vpop.f32.mrb[31].mxu1 }
0x142f   :  { %6593 = vmatpush3.bf16.msra.mxu0 %v6592_v52  ;;  %6342 = vmatprep.mubr.msk.f32.mxu0 %vm6778_vm1, %v6777_v2 }
0x1430   :  { %6594 = vmatprep.subr.bf16.mxu0 %v6779_v17 }
0x1433   :  { %6596 = vmatpush3.bf16.msra.mxu0 %v6595_v57 }
0x1434   :  { %6350 = vmatprep.subr.mxu0 %v6777_v2 }
0x1501   :  { %v4122_v58 = vpop.f32.mrb[32].mxu0 }
0x1502   :  { %6332 = vmatmul.mubr.msk.f32.vlgmr.msra.gmra.mrb[8].mxu1 %vm702_vm2, %v4122_v58  ;;  %6343 = vmatmul.mubr.msk.f32.vlgmr.msra.gmra.mrb[10].mxu0 %vm702_vm2, %v4122_v58  ;;  %v6322_v59 = vpop.f32.mrb[33].mxu0 }
0x1503   :  { %6346 = vmatpush3.msra.mxu1 %v6890_v11  ;;  %6351 = vmatpush3.msra.mxu0 %v6878_v7  ;;  %v5621_v11 = vld [vmem:[%s7686_s3 + $0x1a0] sm:$0xff] }
0x1504   :  { %6347 = vmatprep.mubr.msk.f32.mxu1 %vm6778_vm1, %v6777_v2  ;;  %6352 = vmatprep.mubr.msk.f32.mxu0 %vm6778_vm1, %v6777_v2  ;;  %v6598_v61 = vpack.c.bf16 %v5622_v60, %v5621_v11 }
0x1505   :  { %6597 = vmatprep.subr.bf16.mxu1 %v6779_v17  ;;  %6603 = vmatprep.subr.bf16.mxu0 %v6779_v17 }
0x1506   :  { %6348 = vmatmul.mubr.msk.f32.vlgmr.msra.gmra.mrb[32].mxu1 %vm39_vm0, %v6863_v6  ;;  %v5624_v6 = vld [vmem:[%s7686_s3 + $0x1b8] sm:$0xff] }
0x1507   :  { %6363 = vmatprep.mubr.msk.f32.mxu1 %vm6778_vm1, %v6777_v2  ;;  %6599 = vmatpush3.bf16.msra.mxu1 %v6598_v61  ;;  %v6601_v63 = vpack.c.bf16 %v5624_v6, %v5623_v62 }
0x1508   :  { %6600 = vmatprep.subr.bf16.mxu1 %v6779_v17 }
0x150b   :  { %6602 = vmatpush3.bf16.msra.mxu1 %v6601_v63 }
0x150c   :  { %6377 = vmatprep.subr.mxu1 %v6777_v2 }
0x15d9   :  { %v4347_v14 = vpop.f32.mrb[32].mxu1 }
0x15da   :  { %6353 = vmatmul.mubr.msk.f32.vlgmr.msra.gmra.mrb[34].mxu0 %vm39_vm0, %v4347_v14  ;;  %v6349_v1 = vpop.f32.mrb[33].mxu1 }
0x15db   :  { %6605 = vmatpush3.bf16.msra.mxu0 %v6604_v9  ;;  %6374 = vmatprep.mubr.msk.f32.mxu0 %vm6778_vm1, %v6777_v2 }
0x15dc   :  { %6606 = vmatprep.subr.bf16.mxu0 %v6779_v17 }
0x15df   :  { %6608 = vmatpush3.bf16.msra.mxu0 %v6607_v15 }
0x15e0   :  { %6382 = vmatprep.subr.mxu0 %v6777_v2 }
0x16ad   :  { %v4420_v16 = vpop.f32.mrb[34].mxu0 }
0x16ae   :  { %6364 = vmatmul.mubr.msk.f32.vlgmr.msra.gmra.mrb[8].mxu1 %vm702_vm2, %v4420_v16  ;;  %6375 = vmatmul.mubr.msk.f32.vlgmr.msra.gmra.mrb[10].mxu0 %vm702_vm2, %v4420_v16  ;;  %v6354_v18 = vpop.f32.mrb[35].mxu0 }
0x16af   :  { %6378 = vmatpush3.msra.mxu1 %v6892_v12  ;;  %6383 = vmatpush3.msra.mxu0 %v6878_v7  ;;  %v5633_v12 = vld [vmem:[%s7686_s3 + $0x1c0] sm:$0xff] }
0x16b0   :  { %6379 = vmatprep.mubr.msk.f32.mxu1 %vm6778_vm1, %v6777_v2  ;;  %6384 = vmatprep.mubr.msk.f32.mxu0 %vm6778_vm1, %v6777_v2  ;;  %v6610_v22 = vpack.c.bf16 %v5634_v21, %v5633_v12 }
0x16b1   :  { %6609 = vmatprep.subr.bf16.mxu1 %v6779_v17  ;;  %6615 = vmatprep.subr.bf16.mxu0 %v6779_v17 }
0x16b2   :  { %6380 = vmatmul.mubr.msk.f32.vlgmr.msra.gmra.mrb[34].mxu1 %vm39_vm0, %v6737_v20 }
0x16b3   :  { %6395 = vmatprep.mubr.msk.f32.mxu1 %vm6778_vm1, %v6777_v2  ;;  %6611 = vmatpush3.bf16.msra.mxu1 %v6610_v22 }
0x16b4   :  { %6612 = vmatprep.subr.bf16.mxu1 %v6779_v17 }
0x16b7   :  { %6614 = vmatpush3.bf16.msra.mxu1 %v6613_v25 }
0x16b8   :  { %6409 = vmatprep.subr.mxu1 %v6777_v2 }
0x1785   :  { %v4645_v30 = vpop.f32.mrb[34].mxu1 }
0x1786   :  { %6385 = vmatmul.mubr.msk.f32.vlgmr.msra.gmra.mrb[36].mxu0 %vm39_vm0, %v4645_v30  ;;  %v6381_v31 = vpop.f32.mrb[35].mxu1 }
0x1787   :  { %6617 = vmatpush3.bf16.msra.mxu0 %v6616_v27  ;;  %6406 = vmatprep.mubr.msk.f32.mxu0 %vm6778_vm1, %v6777_v2 }
0x1788   :  { %6618 = vmatprep.subr.bf16.mxu0 %v6779_v17 }
0x178b   :  { %6620 = vmatpush3.bf16.msra.mxu0 %v6619_v32 }
0x178c   :  { %6414 = vmatprep.subr.mxu0 %v6777_v2 }
0x1859   :  { %v4718_v33 = vpop.f32.mrb[36].mxu0 }
0x185a   :  { %6396 = vmatmul.mubr.msk.f32.vlgmr.msra.gmra.mrb[8].mxu1 %vm702_vm2, %v4718_v33  ;;  %6407 = vmatmul.mubr.msk.f32.vlgmr.msra.gmra.mrb[10].mxu0 %vm702_vm2, %v4718_v33  ;;  %v6386_v5 = vpop.f32.mrb[37].mxu0 }
0x185b   :  { %6410 = vmatpush3.msra.mxu1 %v6906_v19  ;;  %6415 = vmatpush3.msra.mxu0 %v6878_v7  ;;  %v5645_v19 = vld [vmem:[%s7686_s3 + $0x1e0] sm:$0xff]  ;;  %v5646_v7 = vld [vmem:[%s7686_s3 + $0x1e8] sm:$0xff] }
0x185c   :  { %6411 = vmatprep.mubr.msk.f32.mxu1 %vm6778_vm1, %v6777_v2  ;;  %6416 = vmatprep.mubr.msk.f32.mxu0 %vm6778_vm1, %v6777_v2  ;;  %v6622_v34 = vpack.c.bf16 %v5646_v7, %v5645_v19 }
0x185d   :  { %6621 = vmatprep.subr.bf16.mxu1 %v6779_v17  ;;  %6627 = vmatprep.subr.bf16.mxu0 %v6779_v17 }
0x185e   :  { %6412 = vmatmul.mubr.msk.f32.vlgmr.msra.gmra.mrb[36].mxu1 %vm39_vm0, %v6737_v20 }
0x185f   :  { %6427 = vmatprep.mubr.msk.f32.mxu1 %vm6778_vm1, %v6777_v2  ;;  %6623 = vmatpush3.bf16.msra.mxu1 %v6622_v34 }
0x1860   :  { %6624 = vmatprep.subr.bf16.mxu1 %v6779_v17 }
0x1863   :  { %6626 = vmatpush3.bf16.msra.mxu1 %v6625_v37 }
0x1931   :  { %v4943_v43 = vpop.f32.mrb[36].mxu1 }
0x1932   :  { %6417 = vmatmul.mubr.msk.f32.vlgmr.msra.gmra.mrb[38].mxu0 %vm39_vm0, %v4943_v43  ;;  %v6413_v44 = vpop.f32.mrb[37].mxu1 }
0x1933   :  { %6629 = vmatpush3.bf16.msra.mxu0 %v6628_v40  ;;  %6438 = vmatprep.mubr.msk.f32.mxu0 %vm6778_vm1, %v6777_v2 }
0x1934   :  { %6630 = vmatprep.subr.bf16.mxu0 %v6779_v17 }
0x1937   :  { %6632 = vmatpush3.bf16.msra.mxu0 %v6631_v8 }
0x1a05   :  { %v5016_v45 = vpop.f32.mrb[38].mxu0 }
0x1a06   :  { %6428 = vmatmul.mubr.msk.f32.vlgmr.msra.gmra.mrb[8].mxu1 %vm702_vm2, %v5016_v45  ;;  %6439 = vmatmul.mubr.msk.f32.vlgmr.msra.gmra.mrb[10].mxu0 %vm702_vm2, %v5016_v45  ;;  %v6418_v46 = vpop.f32.mrb[39].mxu0 }
0x1ad9   :  { %v5094_v47 = vpop.f32.mrb[8].mxu1  ;;  %v5170_v48 = vpop.f32.mrb[10].mxu0 }
0x1ada   :  { %v5175_v49 = vmul.f32 %v5170_v48, %v5094_v47  ;;  %v6429_v50 = vpop.f32.mrb[9].mxu1  ;;  %5208 = vrot.lane.b32.xlu1 %v5170_v48, %s6780_s4  ;;  %5191 = vrot.lane.b32.xlu0 %v5170_v48, %s6781_s24  ;;  %v6440_v51 = vpop.f32.mrb[11].mxu0 }
0x1adc   :  { %v5176_v2 = vsel %vm702_vm2, %v5175_v49, 0.0 }
0x1ade   :  { %5225 = vrot.lane.b32.xlu0 %v5170_v48, %s6782_s25 }
0x1ae2   :  { %5261 = vrot.lane.b32.xlu0 %v5175_v49, %s6781_s24 }
0x1ae6   :  { %5343 = vrot.lane.b32.xlu0 %v5175_v49, %s6780_s4 }
0x1b05   :  { %5177 = vadd.xlane.f32.xlu0 %v5176_v2 }
0x1b4c   :  { %v5192_v17 = vpop.permute.xlu0 %5191  ;;  %v5209_v53 = vpop.permute.xlu1 %5208 }
0x1b4d   :  { %v5194_v52 = vmul.f32 %v5192_v17, %v5094_v47  ;;  %v5211_v55 = vmul.f32 %v5209_v53, %v5094_v47 }
0x1b4f   :  { %5278 = vrot.lane.b32.xlu0 %v5194_v52, %s6781_s24  ;;  %v5195_v57 = vsel %vm702_vm2, %v5194_v52, 0.0  ;;  %v5212_v58 = vsel %vm702_vm2, %v5211_v55, 0.0 }
0x1b50   :  { %v5226_v54 = vpop.permute.xlu0 %5225 }
0x1b51   :  { %v5228_v56 = vmul.f32 %v5226_v54, %v5094_v47 }
0x1b53   :  { %5244 = vrot.lane.b32.xlu1 %v5228_v56, %s6781_s24  ;;  %5295 = vrot.lane.b32.xlu0 %v5211_v55, %s6781_s24  ;;  %v5229_v60 = vsel %vm702_vm2, %v5228_v56, 0.0 }
0x1b54   :  { %v5262_v59 = vpop.permute.xlu0 %5261 }
0x1b55   :  { %v5264_v11 = vsel %vm702_vm2, %v5262_v59, 0.0 }
0x1b57   :  { %5375 = vrot.lane.b32.xlu1 %v5194_v52, %s6782_s25  ;;  %5311 = vrot.lane.b32.xlu0 %v5211_v55, %s6780_s4 }
0x1b58   :  { %v5344_v61 = vpop.permute.xlu0 %5343 }
0x1b59   :  { %v5346_v62 = vsel %vm702_vm2, %v5344_v61, 0.0 }
0x1b5b   :  { %5327 = vrot.lane.b32.xlu0 %v5228_v56, %s6780_s4 }
0x1b5f   :  { %5359 = vrot.lane.b32.xlu0 %v5194_v52, %s6780_s4  ;;  %s5659_s4 = sld [smem:[#allocation2 + $0x3]] }
0x1b63   :  { %5392 = vrot.lane.b32.xlu0 %v5211_v55, %s6782_s25 }
0x1b67   :  { %5408 = vrot.lane.b32.xlu0 %v5228_v56, %s6782_s25 }
0x1b6b   :  { %5424 = vrot.lane.b32.xlu0 %v5175_v49, %s6782_s25 }
0x1b7b   :  { %5196 = vadd.xlane.f32.xlu1 %v5195_v57 }
0x1b7f   :  { %5213 = vadd.xlane.f32.xlu1 %v5212_v58 }
0x1b83   :  { %5265 = vadd.xlane.f32.xlu1 %v5264_v11 }
0x1b8a   :  { %5230 = vadd.xlane.f32.xlu0 %v5229_v60 }
0x1b8e   :  { %5347 = vadd.xlane.f32.xlu0 %v5346_v62 }
0x1b92   :  { %v5178_v6 = vpop.xlane.xlu0 %5177 }
0x1b93   :  { %v5179_v63 = vrot.slane %v5178_v6, 4 }
0x1b95   :  { %v5180_v0 = vadd.f32 %v5179_v63, %v5178_v6 }
0x1b97   :  { %v5181_v3 = vrot.slane %v5180_v0, 2 }
0x1b99   :  { %v5182_v9 = vadd.f32 %v5181_v3, %v5180_v0 }
0x1b9b   :  { %v5183_v10 = vrot.slane %v5182_v9, 1 }
0x1b9d   :  { %v5184_v13 = vadd.f32 %v5183_v10, %v5182_v9 }
0x1b9f   :  { %6693 = vpush %v5184_v13 }
0x1bc1   :  { %v5279_v14 = vpop.permute.xlu0 %5278 }
0x1bc2   :  { %v5281_v12 = vsel %vm702_vm2, %v5279_v14, 0.0 }
0x1bc5   :  { %v5245_v1 = vpop.permute.xlu1 %5244  ;;  %v5296_v15 = vpop.permute.xlu0 %5295 }
0x1bc6   :  { %v5247_v16 = vsel %vm702_vm2, %v5245_v1, 0.0  ;;  %v5298_v18 = vsel %vm702_vm2, %v5296_v15, 0.0 }
0x1bc7   :  { %5248 = vadd.xlane.f32.xlu0 %v5247_v16  ;;  %5299 = vadd.xlane.f32.xlu1 %v5298_v18 }
0x1bc9   :  { %v5312_v20 = vpop.permute.xlu0 %5311  ;;  %v5376_v4 = vpop.permute.xlu1 %5375 }
0x1bca   :  { %v5314_v22 = vsel %vm702_vm2, %v5312_v20, 0.0  ;;  %v5378_v27 = vsel %vm702_vm2, %v5376_v4, 0.0 }
0x1bcb   :  { %5282 = vadd.xlane.f32.xlu0 %v5281_v12 }
0x1bcd   :  { %v5328_v21 = vpop.permute.xlu0 %5327 }
0x1bce   :  { %v5330_v24 = vsel %vm702_vm2, %v5328_v21, 0.0 }
0x1bcf   :  { %5315 = vadd.xlane.f32.xlu0 %v5314_v22 }
0x1bd0   :  { %s7619_s26 = spop %6693 }
0x1bd1   :  { %v5360_v23 = vpop.permute.xlu0 %5359  ;;  %s5187_s23 = smul.f32 %s7619_s26, %s5186_s18 }
0x1bd2   :  { %v5362_v25 = vsel %vm702_vm2, %v5360_v23, 0.0 }
0x1bd3   :  { %5331 = vadd.xlane.f32.xlu0 %v5330_v24  ;;  %5363 = vadd.xlane.f32.xlu1 %v5362_v25 }
0x1bd5   :  { %v5393_v26 = vpop.permute.xlu0 %5392 }
0x1bd6   :  { %v5395_v28 = vsel %vm702_vm2, %v5393_v26, 0.0 }
0x1bd7   :  { %5379 = vadd.xlane.f32.xlu0 %v5378_v27  ;;  %5396 = vadd.xlane.f32.xlu1 %v5395_v28 }
0x1bd9   :  { %v5409_v29 = vpop.permute.xlu0 %5408 }
0x1bda   :  { %v5411_v30 = vsel %vm702_vm2, %v5409_v29, 0.0 }
0x1bdb   :  { %5412 = vadd.xlane.f32.xlu0 %v5411_v30 }
0x1bdd   :  { %v5425_v31 = vpop.permute.xlu0 %5424 }
0x1bde   :  { %v5427_v32 = vsel %vm702_vm2, %v5425_v31, 0.0 }
0x1bdf   :  { %5428 = vadd.xlane.f32.xlu1 %v5427_v32 }
0x1c08   :  { %v5197_v33 = vpop.xlane.xlu1 %5196 }
0x1c09   :  { %v5198_v5 = vrot.slane %v5197_v33, 4 }
0x1c0b   :  { %v5199_v19 = vadd.f32 %v5198_v5, %v5197_v33 }
0x1c0c   :  { %v5214_v7 = vpop.xlane.xlu1 %5213 }
0x1c0d   :  { %v5200_v34 = vrot.slane %v5199_v19, 2  ;;  %v5215_v35 = vrot.slane %v5214_v7, 4 }
0x1c0f   :  { %v5216_v36 = vadd.f32 %v5215_v35, %v5214_v7  ;;  %v5201_v37 = vadd.f32 %v5200_v34, %v5199_v19 }
0x1c10   :  { %v5266_v50 = vpop.xlane.xlu1 %5265 }
0x1c11   :  { %v5217_v38 = vrot.slane %v5216_v36, 2  ;;  %v5202_v39 = vrot.slane %v5201_v37, 1  ;;  %v5267_v51 = vrot.slane %v5266_v50, 4 }
0x1c13   :  { %v5203_v40 = vadd.f32 %v5202_v39, %v5201_v37  ;;  %v5218_v41 = vadd.f32 %v5217_v38, %v5216_v36  ;;  %v5268_v2 = vadd.f32 %v5267_v51, %v5266_v50 }
0x1c15   :  { %6695 = vpush %v5203_v40  ;;  %v5219_v42 = vrot.slane %v5218_v41, 1  ;;  %v5269_v52 = vrot.slane %v5268_v2, 2 }
0x1c17   :  { %v5231_v43 = vpop.xlane.xlu0 %5230  ;;  %v5220_v44 = vadd.f32 %v5219_v42, %v5218_v41  ;;  %v5270_v60 = vadd.f32 %v5269_v52, %v5268_v2 }
0x1c18   :  { %v5232_v8 = vrot.slane %v5231_v43, 4 }
0x1c19   :  { %6697 = vpush %v5220_v44  ;;  %v5271_v10 = vrot.slane %v5270_v60, 1 }
0x1c1a   :  { %v5233_v45 = vadd.f32 %v5232_v8, %v5231_v43 }
0x1c1b   :  { %v5348_v17 = vpop.xlane.xlu0 %5347  ;;  %v5272_v23 = vadd.f32 %v5271_v10, %v5270_v60 }
0x1c1c   :  { %v5234_v46 = vrot.slane %v5233_v45, 2  ;;  %v5349_v59 = vrot.slane %v5348_v17, 4 }
0x1c1e   :  { %v5235_v47 = vadd.f32 %v5234_v46, %v5233_v45  ;;  %v5350_v3 = vadd.f32 %v5349_v59, %v5348_v17 }
0x1c20   :  { %v5236_v48 = vrot.slane %v5235_v47, 1  ;;  %v5351_v12 = vrot.slane %v5350_v3, 2 }
0x1c22   :  { %v5237_v49 = vadd.f32 %v5236_v48, %v5235_v47  ;;  %v5352_v19 = vadd.f32 %v5351_v12, %v5350_v3 }
0x1c24   :  { %6699 = vpush %v5237_v49  ;;  %v5353_v44 = vrot.slane %v5352_v19, 1 }
0x1c26   :  { %v5354_v52 = vadd.f32 %v5353_v44, %v5352_v19 }
0x1c46   :  { %s7621_s27 = spop %6695 }
0x1c47   :  { %s5206_s22 = smul.f32 %s7621_s27, %s5655_s17  ;;  %s5662_s27 = sld [smem:[#allocation2 + $0x100]] }
0x1c48   :  { %s5663_s17 = sld [smem:[#allocation2 + $0x101]] }
0x1c49   :  { %s5207_s24 = sadd.f32 %s5206_s22, %s5187_s23 }
0x1c4a   :  { %s7623_s1 = spop %6697 }
0x1c4b   :  { %s5223_s3 = smul.f32 %s7623_s1, %s5656_s19 }
0x1c54   :  { %v5300_v53 = vpop.xlane.xlu1 %5299  ;;  %v5249_v54 = vpop.xlane.xlu0 %5248 }
0x1c55   :  { %v5301_v55 = vrot.slane %v5300_v53, 4  ;;  %v5250_v56 = vrot.slane %v5249_v54, 4  ;;  %s7625_s28 = spop %6699 }
0x1c56   :  { %s5242_s11 = sadd.f32 %s7625_s28, %s7619_s26  ;;  %s5240_s25 = smul.f32 %s7625_s28, %s5657_s20 }
0x1c57   :  { %v5302_v57 = vadd.f32 %v5301_v55, %v5300_v53  ;;  %v5251_v58 = vadd.f32 %v5250_v56, %v5249_v54  ;;  %s5664_s28 = sld [smem:[#allocation2 + $0x180]] }
0x1c58   :  { %v5283_v11 = vpop.xlane.xlu0 %5282 }
0x1c59   :  { %v5303_v61 = vrot.slane %v5302_v57, 2  ;;  %v5252_v62 = vrot.slane %v5251_v58, 2  ;;  %v5284_v6 = vrot.slane %v5283_v11, 4 }
0x1c5b   :  { %v5285_v63 = vadd.f32 %v5284_v6, %v5283_v11  ;;  %v5253_v0 = vadd.f32 %v5252_v62, %v5251_v58  ;;  %v5304_v13 = vadd.f32 %v5303_v61, %v5302_v57 }
0x1c5c   :  { %v5316_v9 = vpop.xlane.xlu0 %5315 }
0x1c5d   :  { %v5286_v14 = vrot.slane %v5285_v63, 2  ;;  %v5317_v1 = vrot.slane %v5316_v9, 4  ;;  %v5254_v15 = vrot.slane %v5253_v0, 1  ;;  %v5305_v24 = vrot.slane %v5304_v13, 1 }
0x1c5f   :  { %v5318_v16 = vadd.f32 %v5317_v1, %v5316_v9  ;;  %v5255_v18 = vadd.f32 %v5254_v15, %v5253_v0  ;;  %v5287_v20 = vadd.f32 %v5286_v14, %v5285_v63  ;;  %v5306_v5 = vadd.f32 %v5305_v24, %v5304_v13 }
0x1c60   :  { %v5364_v21 = vpop.xlane.xlu1 %5363  ;;  %v5332_v22 = vpop.xlane.xlu0 %5331 }
0x1c61   :  { %v5319_v25 = vrot.slane %v5318_v16, 2  ;;  %v5365_v4 = vrot.slane %v5364_v21, 4  ;;  %v5333_v26 = vrot.slane %v5332_v22, 4  ;;  %6701 = vpush %v5255_v18  ;;  %v5288_v27 = vrot.slane %v5287_v20, 1 }
0x1c62   :  { %6703 = vpush %v5272_v23 }
0x1c63   :  { %v5366_v28 = vadd.f32 %v5365_v4, %v5364_v21  ;;  %v5334_v29 = vadd.f32 %v5333_v26, %v5332_v22  ;;  %v5289_v30 = vadd.f32 %v5288_v27, %v5287_v20  ;;  %v5320_v31 = vadd.f32 %v5319_v25, %v5318_v16 }
0x1c64   :  { %v5397_v32 = vpop.xlane.xlu1 %5396  ;;  %v5380_v33 = vpop.xlane.xlu0 %5379 }
0x1c65   :  { %v5367_v7 = vrot.slane %v5366_v28, 2  ;;  %v5335_v34 = vrot.slane %v5334_v29, 2  ;;  %v5398_v35 = vrot.slane %v5397_v32, 4  ;;  %v5381_v36 = vrot.slane %v5380_v33, 4  ;;  %6705 = vpush %v5289_v30 }
0x1c66   :  { %6707 = vpush %v5306_v5  ;;  %v5321_v37 = vrot.slane %v5320_v31, 1 }
0x1c67   :  { %v5399_v38 = vadd.f32 %v5398_v35, %v5397_v32  ;;  %v5382_v39 = vadd.f32 %v5381_v36, %v5380_v33  ;;  %v5336_v40 = vadd.f32 %v5335_v34, %v5334_v29  ;;  %v5368_v41 = vadd.f32 %v5367_v7, %v5366_v28 }
0x1c68   :  { %v5413_v42 = vpop.xlane.xlu0 %5412  ;;  %v5322_v43 = vadd.f32 %v5321_v37, %v5320_v31 }
0x1c69   :  { %v5400_v8 = vrot.slane %v5399_v38, 2  ;;  %v5383_v45 = vrot.slane %v5382_v39, 2  ;;  %v5414_v46 = vrot.slane %v5413_v42, 4  ;;  %v5337_v47 = vrot.slane %v5336_v40, 1 }
0x1c6a   :  { %6709 = vpush %v5322_v43  ;;  %v5369_v48 = vrot.slane %v5368_v41, 1 }
0x1c6b   :  { %v5415_v49 = vadd.f32 %v5414_v46, %v5413_v42  ;;  %v5338_v50 = vadd.f32 %v5337_v47, %v5336_v40  ;;  %v5384_v51 = vadd.f32 %v5383_v45, %v5382_v39  ;;  %v5401_v2 = vadd.f32 %v5400_v8, %v5399_v38 }
0x1c6c   :  { %v5429_v17 = vpop.xlane.xlu1 %5428  ;;  %v5370_v53 = vadd.f32 %v5369_v48, %v5368_v41 }
0x1c6d   :  { %v5416_v54 = vrot.slane %v5415_v49, 2  ;;  %v5430_v55 = vrot.slane %v5429_v17, 4  ;;  %6711 = vpush %v5338_v50  ;;  %v5385_v56 = vrot.slane %v5384_v51, 1  ;;  %v5402_v57 = vrot.slane %v5401_v2, 1 }
0x1c6e   :  { %6713 = vpush %v5354_v52 }
0x1c6f   :  { %v5417_v58 = vadd.f32 %v5416_v54, %v5415_v49  ;;  %v5431_v59 = vadd.f32 %v5430_v55, %v5429_v17  ;;  %6715 = vpush %v5370_v53  ;;  %v5386_v11 = vadd.f32 %v5385_v56, %v5384_v51  ;;  %v5403_v60 = vadd.f32 %v5402_v57, %v5401_v2 }
0x1c71   :  { %v5432_v61 = vrot.slane %v5431_v59, 2  ;;  %6717 = vpush %v5386_v11  ;;  %v5418_v62 = vrot.slane %v5417_v58, 1 }
0x1c72   :  { %6719 = vpush %v5403_v60 }
0x1c73   :  { %v5433_v6 = vadd.f32 %v5432_v61, %v5431_v59  ;;  %v5419_v63 = vadd.f32 %v5418_v62, %v5417_v58 }
0x1c75   :  { %6721 = vpush %v5419_v63  ;;  %v5434_v0 = vrot.slane %v5433_v6, 1 }
0x1c77   :  { %v5435_v3 = vadd.f32 %v5434_v0, %v5433_v6 }
0x1c79   :  { %6723 = vpush %v5435_v3 }
0x1c92   :  { %s7627_s29 = spop %6701 }
0x1c93   :  { %s7629_s5 = spop %6703 }
0x1c96   :  { %s7631_s30 = spop %6705 }
0x1c97   :  { %s7633_s2 = spop %6707 }
0x1c9b   :  { %s7635_s7 = spop %6709 }
0x1c9c   :  { %s5325_s23 = smul.f32 %s7635_s7, %s5662_s27 }
0x1c9e   :  { %s7637_s0 = spop %6711 }
0x1c9f   :  { %s7639_s8 = spop %6713 }
0x1ca0   :  { %s7641_s9 = spop %6715 }
0x1ca2   :  { %s7643_s10 = spop %6717 }
0x1ca3   :  { %s7647_s12 = spop %6719  ;;  %s5391_s14 = sadd.f32 %s7643_s10, %s5242_s11 }
0x1ca4   :  { %7693 = sst [smem:[#allocation8_spill]] %s7647_s12  ;;  %s5660_s11 = sld [smem:[#allocation2 + $0x82]] }
0x1ca5   :  { %s5661_s12 = sld [smem:[#allocation2 + $0x83]]  ;;  %s7696_s22 = sld [smem:[#allocation8_spill]] }
0x1ca6   :  { %s7649_s13 = spop %6721 }
0x1ca7   :  { %7694 = sst [smem:[#allocation9_spill]] %s7649_s13  ;;  %s5275_s13 = smul.f32 %s7629_s5, %s5659_s4 }
0x1ca8   :  { %s5357_s5 = smul.f32 %s7639_s8, %s5664_s28  ;;  %s5666_s4 = sld [smem:[#allocation2 + $0x102]] }
0x1caa   :  { %s7652_s15 = spop %6723  ;;  %s5292_s1 = smul.f32 %s7631_s30, %s5660_s11 }
0x1cab   :  { %7695 = sst [smem:[#allocation10_spill]] %s7652_s15  ;;  %s5309_s19 = smul.f32 %s7633_s2, %s5661_s12 }
0x1cac   :  { %s5440_s16 = sadd.f32 %s7652_s15, %s5391_s14  ;;  %s5668_s11 = sld [smem:[#allocation2 + $0x182]] }
0x1cad   :  { %s5224_s14 = sadd.f32 %s5223_s3, %s5207_s24  ;;  %s5341_s3 = smul.f32 %s7637_s0, %s5663_s17 }
0x1cae   :  { %v5441_v9 = vstv %s5440_s16  ;;  %s5258_s16 = smul.f32 %s7627_s29, %s5658_s21  ;;  %s7697_s24 = sld [smem:[#allocation9_spill]] }
0x1caf   :  { %6735 = vrcp.f32 %v5441_v9  ;;  %s5241_s6 = sadd.f32 %s5240_s25, %s5224_s14  ;;  %s5665_s21 = sld [smem:[#allocation2 + $0x181]] }
0x1cb0   :  { %s5669_s2 = sld [smem:[#allocation2 + $0x183]]  ;;  %s6783_s17 = smov [#allocation5]  }
0x1cb1   :  { %s5259_s15 = sadd.f32 %s5258_s16, %s5241_s6  ;;  %s7698_s6 = sld [smem:[#allocation10_spill]] }
0x1cb3   :  { %s5276_s26 = sadd.f32 %s5275_s13, %s5259_s15  ;;  %s5667_s13 = sld [smem:[#allocation2 + $0x103]] }
0x1cb4   :  { %s5389_s15 = smul.f32 %s7643_s10, %s5666_s4 }
0x1cb5   :  { %s5293_s18 = sadd.f32 %s5292_s1, %s5276_s26  ;;  %s5373_s16 = smul.f32 %s7641_s9, %s5665_s21 }
0x1cb7   :  { %s5310_s20 = sadd.f32 %s5309_s19, %s5293_s18  ;;  %s5422_s18 = smul.f32 %s7697_s24, %s5668_s11 }
0x1cb8   :  { %s5438_s0 = smul.f32 %s7698_s6, %s5669_s2  ;;  %s5454_s19 = sshll.u32 %s6783_s17, 4  ;;  %s5455_s19 = int_to_ptr.vmem [resolvable:$true] %s5454_s19 }
0x1cb9   :  { %v6736_v10 = vpop.eup %6735  ;;  %s5326_s29 = sadd.f32 %s5325_s23, %s5310_s20  ;;  %s5406_s12 = smul.f32 %s7696_s22, %s5667_s13 }
0x1cba   :  { %6725 = vpush %v6736_v10  ;;  %s6750_s8 = scalar_lea.vmem %s5455_s19, 16  ;;  %s6754_s9 = scalar_lea.vmem %s5455_s19, 32 }
0x1cbb   :  { %s5342_s25 = sadd.f32 %s5341_s3, %s5326_s29  ;;  %p6751_p5 = scmp.ne.s32.totalorder %s5455_s19, %s6750_s8 }
0x1cbc   :  { %p6755_p6 = scmp.lt.s32.totalorder %s5455_s19, %s5455_s19  ;;  %p6756_p7 = scmp.lt.s32.totalorder %s6754_s9, %s6750_s8 }
0x1cbd   :  { %s5358_s14 = sadd.f32 %s5357_s5, %s5342_s25 }
0x1cbe   :  { %p6757_p8 = por %p6756_p7, %p6755_p6 }
0x1cbf   :  { %s5374_s30 = sadd.f32 %s5373_s16, %s5358_s14 }
0x1cc0   :  { %p6758_p9 = pnand %p6757_p8, %p6751_p5 }
0x1cc1   :  { %s5390_s26 = sadd.f32 %s5389_s15, %s5374_s30 }
0x1cc3   :  { %s5407_s1 = sadd.f32 %s5406_s12, %s5390_s26 }
0x1cc5   :  { %s5423_s7 = sadd.f32 %s5422_s18, %s5407_s1 }
0x1cc7   :  { %s5439_s27 = sadd.f32 %s5438_s0, %s5423_s7 }
0x1ceb   :  { %s6726_s20 = spop %6725 }
0x1cec   :  { %s5444_s23 = smul.f32 %s6726_s20, %s5439_s27 }
0x1cee   :  { %v5445_v13 = vstv %s5444_s23 }
0x1cef   :  { %5447 = vst.msk [vmem:[#allocation5] sm:$0x1] %vm5446_vm3, %v5445_v13 }
0x1cf0   :  { %6761 = shalt.err (!%p6758_p9)
}
0x1cf1   :  { %s7699_s22 = sld [smem:[#allocation11_spill]] }
0x1cf7   :  { %s6762_s3 = scalar_lea.hbm %s7699_s22, 16 }
0x1cf8   :  { %p6763_p10 = scmp.ne.s32.totalorder %s7699_s22, %s6762_s3  ;;  %p6766_p11 = scmp.lt.u32.totalorder %s6762_s3, %s7699_s22 }
0x1cfa   :  { %p6768_p12 = pnand %p6766_p11, %p6763_p10 }
0x1cfc   :  { %6771 = shalt.err (!%p6768_p12)
}
0x1cfd   :  { %5457 = dma.vmem_to_hbm [thread:$0]  %s5455_s19, 16, %s7699_s22, [#allocation3]  }
0x1cfe   :  { %6774 = dma.done.wait [#allocation3], 16  }
0x1cff   :  { %6775 = vsyncadd [#allocation3], 4294967280 }
0x1d00   :  { %5461 = vsyncpa [#allocation3], 1 }
0x1d01   :  { %5462 = vsyncpa [#allocation4], 1 }

</bundles_post_ra>
